<compile_context>
chip_gen: v7x
topology: tpu7x:2x2x1
jax: 0.10.0
libtpu: 0.0.40
codegen_flags: <defaults>
</compile_context>

<pallas_src>
import jax
import jax.numpy as jnp
from jax.experimental import pallas as pl
from jax.experimental.pallas import tpu as pltpu


def _vmem():
    return pl.BlockSpec(memory_space=pltpu.MemorySpace.VMEM)


# ----------------------------- Pallas kernels -----------------------------

def _conv_gemm_kernel(w_ref, cols_ref, b_ref, o_ref):
    # w: (O, C*k*k) bf16, cols: (C*k*k, OH*OW) bf16, b: (O, 1) f32.
    # Y = relu(W @ cols + b) is directly the NCHW feature map (channels x spatial).
    y = jnp.dot(w_ref[...], cols_ref[...], preferred_element_type=jnp.float32) + b_ref[...]
    o_ref[...] = jnp.maximum(y, 0.0).astype(o_ref.dtype)


def _tail_kernel(wemb_ref, gwih_ref, gwhh_ref, gbih_ref, gbhh_ref,
                 x_ref, hx_ref, cx_ref, temb_ref,
                 attnw_ref, attnb_ref, linw_ref, linb_ref,
                 lstmw_ref, lstmb_ref, headwh_ref, headwt_ref, headb_ref,
                 h_out_ref, c_out_ref, head_out_ref,
                 gi_ref):
    H = 256

    # ---- sentence GRU (PyTorch gate order r,z,n); input GEMM hoisted out of the loop ----
    gi_ref[...] = (jnp.dot(wemb_ref[...], gwih_ref[...],
                           preferred_element_type=jnp.float32) + gbih_ref[...])
    L = wemb_ref.shape[0]

    def gru_step(t, h):
        gi = gi_ref[pl.ds(t, 1), :]
        gh = jnp.dot(h, gwhh_ref[...], preferred_element_type=jnp.float32) + gbhh_ref[...]
        r = jax.nn.sigmoid(gi[:, 0:H] + gh[:, 0:H])
        z = jax.nn.sigmoid(gi[:, H:2 * H] + gh[:, H:2 * H])
        n = jnp.tanh(gi[:, 2 * H:3 * H] + r * gh[:, 2 * H:3 * H])
        return (1.0 - z) * n + z * h

    s_emb = jax.lax.fori_loop(0, L, gru_step, jnp.zeros((1, H), jnp.float32))

    # ---- gated attention: gate expansion (repeat over spatial) folded into weight at init ----
    gate = jax.nn.sigmoid(
        jnp.dot(s_emb.astype(attnw_ref.dtype), attnw_ref[...],
                preferred_element_type=jnp.float32) + attnb_ref[...])          # (1, C*P)
    z = x_ref[...].astype(jnp.float32) * gate                                   # (1, C*P)

    # ---- linear + relu ----
    feat = jnp.maximum(
        jnp.dot(z.astype(linw_ref.dtype), linw_ref[...],
                preferred_element_type=jnp.float32) + linb_ref[...], 0.0)       # (1, 256)

    # ---- LSTM cell: [x|h] @ [Wih; Whh] single GEMM; gate order i,f,g,o ----
    xh = jnp.concatenate([feat, hx_ref[...]], axis=1)                           # (1, 512)
    gates = (jnp.dot(xh.astype(lstmw_ref.dtype), lstmw_ref[...],
                     preferred_element_type=jnp.float32) + lstmb_ref[...])      # (1, 1024)
    i = jax.nn.sigmoid(gates[:, 0:H])
    f = jax.nn.sigmoid(gates[:, H:2 * H])
    g = jnp.tanh(gates[:, 2 * H:3 * H])
    o = jax.nn.sigmoid(gates[:, 3 * H:4 * H])
    c_new = f * cx_ref[...] + i * g
    h_new = o * jnp.tanh(c_new)
    h_out_ref[...] = h_new
    c_out_ref[...] = c_new

    # ---- actor/critic heads: weights split over [hx | time_emb], padded to 128 lanes ----
    head_out_ref[...] = (
        jnp.dot(h_new, headwh_ref[...], preferred_element_type=jnp.float32)
        + jnp.dot(temb_ref[...], headwt_ref[...], preferred_element_type=jnp.float32)
        + headb_ref[...])


# ----------------------------- wrappers -----------------------------

def conv2d_relu(x_chw, wmat, b_col, k, stride):
    """PyTorch-semantics Conv2d (valid, stride) + ReLU on a (C,H,W) map; Pallas GEMM."""
    C, Hh, Ww = x_chw.shape
    O = wmat.shape[0]
    OH = (Hh - k) // stride + 1
    OW = (Ww - k) // stride + 1
    # im2col: (1, C*k*k, OH, OW) with features in (C,kH,kW)-major order (== PyTorch weight
    # flatten), spatial row-major -> pure reshape, no transpose / relayout.
    patches = jax.lax.conv_general_dilated_patches(
        x_chw[None], (k, k), (stride, stride), 'VALID',
        dimension_numbers=('NCHW', 'OIHW', 'NCHW'))
    cols = patches.reshape(C * k * k, OH * OW)
    y = pl.pallas_call(
        _conv_gemm_kernel,
        out_shape=jax.ShapeDtypeStruct((O, OH * OW), jnp.bfloat16),
        in_specs=[_vmem(), _vmem(), _vmem()],
        out_specs=_vmem(),
    )(wmat, cols, b_col)
    return y.reshape(O, OH, OW)


def normalized_columns_init(key, shape, std):
    out = jax.random.normal(key, shape, jnp.float32)
    return out * std / jnp.sqrt(jnp.sum(out * out, axis=1, keepdims=True))


def init_params(key, *, vocab_size, max_ep_len, dim_x):
    keys = jax.random.split(key, 16)

    def w(k, shape, scale=0.05):
        return scale * jax.random.normal(k, shape, jnp.float32)

    P = dim_x * dim_x        # conv3 spatial positions
    C3 = 64                  # conv3 channels

    attn_w = w(keys[3], (256, 64))                     # GatedAttention.attn_linear
    attn_b = jnp.zeros((64,), jnp.float32)

    lstm_wih = w(keys[9], (256, 4 * 256))              # LSTMCell(256, 256)
    lstm_whh = w(keys[10], (256, 4 * 256))

    critic_w = normalized_columns_init(keys[11], (1, 256 + 32), 1.0)
    actor_w = normalized_columns_init(keys[12], (3, 256 + 32), 0.01)
    head_full = jnp.concatenate([critic_w, actor_w], axis=0).T        # (288, 4) = [critic|actor]
    head_pad = jnp.zeros((288, 128), jnp.float32).at[:, :4].set(head_full)

    return dict(
        # text path
        w_emb=w(keys[0], (vocab_size, 32)),            # WordEmbedding(vocab, 32)
        gru_wih=w(keys[1], (32, 3 * 256)),             # SentenceEmbedding GRU(32 -> 256)
        gru_whh=w(keys[2], (256, 3 * 256)),
        gru_bih=jnp.zeros((1, 3 * 256), jnp.float32),
        gru_bhh=jnp.zeros((1, 3 * 256), jnp.float32),
        # gated attention, gate expansion folded into weight/bias (lane-dense 1 x C*P gate)
        attn_w_exp=jnp.repeat(attn_w, P, axis=1).astype(jnp.bfloat16),   # (256, C3*P)
        attn_b_exp=jnp.repeat(attn_b, P).reshape(1, C3 * P),
        # conv stack, weights pre-flattened to GEMM form (O, C*k*k), bf16 for MXU / DMA bytes
        conv1_wm=w(keys[4], (128, 3, 8, 8)).reshape(128, 3 * 8 * 8).astype(jnp.bfloat16),
        conv1_b=jnp.zeros((128, 1), jnp.float32),
        conv2_wm=w(keys[5], (64, 128, 4, 4)).reshape(64, 128 * 4 * 4).astype(jnp.bfloat16),
        conv2_b=jnp.zeros((64, 1), jnp.float32),
        conv3_wm=w(keys[6], (64, 64, 4, 4)).reshape(64, 64 * 4 * 4).astype(jnp.bfloat16),
        conv3_b=jnp.zeros((64, 1), jnp.float32),
        # time embedding
        time_emb=w(keys[7], (max_ep_len + 1, 32)),     # Embedding(max_ep+1, 32)
        # Linear(64*dim_x*dim_x, 256): conv3 output is already channel-major flattened, so the
        # weight rows need no permutation.
        lin_w=w(keys[8], (C3 * P, 256)).astype(jnp.bfloat16),
        lin_b=jnp.zeros((1, 256), jnp.float32),
        # LSTM cell with stacked [Wih; Whh] weight; bias_ih/bias_hh are .fill_(0) in the model
        lstm_w=jnp.concatenate([lstm_wih, lstm_whh], axis=0).astype(jnp.bfloat16),  # (512, 1024)
        lstm_b=jnp.zeros((1, 4 * 256), jnp.float32),
        # actor/critic heads split over [hx | time_emb] and padded to 128 output lanes
        head_wh=head_pad[:256],                        # (256, 128)
        head_wt=head_pad[256:],                        # (32, 128)
        head_b=jnp.zeros((1, 128), jnp.float32),
    )


@jax.jit
def a3c_lstm_ga_forward(params, x, input_inst, tx, hx, cx):
    # ---- image path: conv1/2/3 + ReLU (Pallas GEMMs, bf16 operands, f32 accumulate) ----
    h = x[0].astype(jnp.bfloat16)                                        # (3, H, W); N == 1
    h = conv2d_relu(h, params['conv1_wm'], params['conv1_b'], 8, 4)
    h = conv2d_relu(h, params['conv2_wm'], params['conv2_b'], 4, 2)
    h = conv2d_relu(h, params['conv3_wm'], params['conv3_b'], 4, 2)      # (64, dim_x, dim_x)
    C3 = h.shape[0]
    P = h.shape[1] * h.shape[2]
    x_flat = h.reshape(1, C3 * P)      # channel-major flatten == PyTorch z.view(1, -1)

    # ---- embedding lookups (tiny gathers, XLA level) ----
    w_emb = jnp.take(params['w_emb'], input_inst[0].astype(jnp.int32), axis=0)   # (L, 32)
    time_emb = jnp.take(params['time_emb'], tx.astype(jnp.int32), axis=0).reshape(1, 32)

    # ---- fused tail: GRU -> gated attention -> linear -> LSTM -> heads (single launch) ----
    L = w_emb.shape[0]
    h_new, c_new, head = pl.pallas_call(
        _tail_kernel,
        out_shape=(jax.ShapeDtypeStruct((1, 256), jnp.float32),
                   jax.ShapeDtypeStruct((1, 256), jnp.float32),
                   jax.ShapeDtypeStruct((1, 128), jnp.float32)),
        in_specs=[_vmem() for _ in range(18)],
        out_specs=(_vmem(), _vmem(), _vmem()),
        scratch_shapes=[pltpu.VMEM((L, 3 * 256), jnp.float32)],
    )(w_emb, params['gru_wih'], params['gru_whh'], params['gru_bih'], params['gru_bhh'],
      x_flat, hx, cx, time_emb,
      params['attn_w_exp'], params['attn_b_exp'], params['lin_w'], params['lin_b'],
      params['lstm_w'], params['lstm_b'], params['head_wh'], params['head_wt'], params['head_b'])

    critic = head[:, 0:1]
    actor = head[:, 1:4]
    return critic, actor, (h_new, c_new)


if __name__ == "__main__":
    key = jax.random.PRNGKey(0)
    vocab_size = 64
    max_ep_len = 30
    seq_len = 8
    img_hw = 96          # 96x96 input -> conv stack gives a 64 x 4 x 4 feature map (dim_x = 4)
    dim_x = 4

    params = init_params(key, vocab_size=vocab_size, max_ep_len=max_ep_len, dim_x=dim_x)

    kx, ki = jax.random.split(jax.random.PRNGKey(0), 2)
    x = jax.random.uniform(kx, (1, 3, img_hw, img_hw), jnp.float32)
    input_inst = jax.random.randint(ki, (1, seq_len), 0, vocab_size, dtype=jnp.int32)
    tx = jnp.array([3], jnp.int32)
    hx = jnp.zeros((1, 256), jnp.float32)
    cx = jnp.zeros((1, 256), jnp.float32)

    critic, actor, (hx_n, cx_n) = a3c_lstm_ga_forward(params, x, input_inst, tx, hx, cx)
    jax.block_until_ready((critic, actor, hx_n, cx_n))
    att_img = None  # 'gated' branch never sets att_img
    assert critic.shape == (1, 1) and actor.shape == (1, 3)
    assert hx_n.shape == (1, 256) and cx_n.shape == (1, 256)
    print("KERNEL_OK")
</pallas_src>

<mosaic_0001>
module attributes {stable_mosaic.version = 11 : i64} {
  func.func @_conv_gemm_kernel(%arg0: memref<128x192xbf16, #tpu.memory_space<vmem>>, %arg1: memref<192x529xbf16, #tpu.memory_space<vmem>>, %arg2: memref<128x1xf32, #tpu.memory_space<vmem>>, %arg3: memref<128x529xbf16, #tpu.memory_space<vmem>>) attributes {dimension_semantics = [], scalar_prefetch = 0 : i64, scratch_operands = 0 : i64, tpu.core_type = #tpu.core_type<tc>} {
    %c0 = arith.constant 0 : index
    %c0_0 = arith.constant 0 : index
    %0 = vector.load %arg0[%c0, %c0_0] : memref<128x192xbf16, #tpu.memory_space<vmem>>, vector<128x192xbf16>
    %c0_1 = arith.constant 0 : index
    %c0_2 = arith.constant 0 : index
    %1 = vector.load %arg1[%c0_1, %c0_2] : memref<192x529xbf16, #tpu.memory_space<vmem>>, vector<192x529xbf16>
    %cst = arith.constant dense<0.000000e+00> : vector<128x529xf32>
    %2 = tpu.matmul %0, %1, %cst {dimension_numbers = #tpu.dot_dimension_numbers<[1], [0], [0], [1], [0, 0, 1, 1], [], []>} : vector<128x192xbf16>, vector<192x529xbf16>, vector<128x529xf32> -> vector<128x529xf32>
    %c0_3 = arith.constant 0 : index
    %c0_4 = arith.constant 0 : index
    %3 = vector.load %arg2[%c0_3, %c0_4] : memref<128x1xf32, #tpu.memory_space<vmem>>, vector<128x1xf32>
    %4 = vector.broadcast %3 : vector<128x1xf32> to vector<128x529xf32>
    %5 = arith.addf %2, %4 : vector<128x529xf32>
    %cst_5 = arith.constant 0.000000e+00 : f32
    %6 = vector.broadcast %cst_5 : f32 to vector<128x529xf32>
    %7 = arith.maximumf %5, %6 : vector<128x529xf32>
    %8 = arith.truncf %7 : vector<128x529xf32> to vector<128x529xbf16>
    %c0_6 = arith.constant 0 : index
    %c0_7 = arith.constant 0 : index
    %9 = vector.load %arg3[%c0_6, %c0_7] : memref<128x529xbf16, #tpu.memory_space<vmem>>, vector<128x529xbf16>
    tpu.vector_store %arg3[%c0_6, %c0_7], %8 {strides = array<i32>} : memref<128x529xbf16, #tpu.memory_space<vmem>>, vector<128x529xbf16>,
    return
  }
}

module attributes {stable_mosaic.version = 11 : i64} {
  func.func @_conv_gemm_kernel(%arg0: memref<64x2048xbf16, #tpu.memory_space<vmem>>, %arg1: memref<2048x100xbf16, #tpu.memory_space<vmem>>, %arg2: memref<64x1xf32, #tpu.memory_space<vmem>>, %arg3: memref<64x100xbf16, #tpu.memory_space<vmem>>) attributes {dimension_semantics = [], scalar_prefetch = 0 : i64, scratch_operands = 0 : i64, tpu.core_type = #tpu.core_type<tc>} {
    %c0 = arith.constant 0 : index
    %c0_0 = arith.constant 0 : index
    %0 = vector.load %arg0[%c0, %c0_0] : memref<64x2048xbf16, #tpu.memory_space<vmem>>, vector<64x2048xbf16>
    %c0_1 = arith.constant 0 : index
    %c0_2 = arith.constant 0 : index
    %1 = vector.load %arg1[%c0_1, %c0_2] : memref<2048x100xbf16, #tpu.memory_space<vmem>>, vector<2048x100xbf16>
    %cst = arith.constant dense<0.000000e+00> : vector<64x100xf32>
    %2 = tpu.matmul %0, %1, %cst {dimension_numbers = #tpu.dot_dimension_numbers<[1], [0], [0], [1], [0, 0, 1, 1], [], []>} : vector<64x2048xbf16>, vector<2048x100xbf16>, vector<64x100xf32> -> vector<64x100xf32>
    %c0_3 = arith.constant 0 : index
    %c0_4 = arith.constant 0 : index
    %3 = vector.load %arg2[%c0_3, %c0_4] : memref<64x1xf32, #tpu.memory_space<vmem>>, vector<64x1xf32>
    %4 = vector.broadcast %3 : vector<64x1xf32> to vector<64x100xf32>
    %5 = arith.addf %2, %4 : vector<64x100xf32>
    %cst_5 = arith.constant 0.000000e+00 : f32
    %6 = vector.broadcast %cst_5 : f32 to vector<64x100xf32>
    %7 = arith.maximumf %5, %6 : vector<64x100xf32>
    %8 = arith.truncf %7 : vector<64x100xf32> to vector<64x100xbf16>
    %c0_6 = arith.constant 0 : index
    %c0_7 = arith.constant 0 : index
    %9 = vector.load %arg3[%c0_6, %c0_7] : memref<64x100xbf16, #tpu.memory_space<vmem>>, vector<64x100xbf16>
    tpu.vector_store %arg3[%c0_6, %c0_7], %8 {strides = array<i32>} : memref<64x100xbf16, #tpu.memory_space<vmem>>, vector<64x100xbf16>,
    return
  }
}

module attributes {stable_mosaic.version = 11 : i64} {
  func.func @_conv_gemm_kernel(%arg0: memref<64x1024xbf16, #tpu.memory_space<vmem>>, %arg1: memref<1024x16xbf16, #tpu.memory_space<vmem>>, %arg2: memref<64x1xf32, #tpu.memory_space<vmem>>, %arg3: memref<64x16xbf16, #tpu.memory_space<vmem>>) attributes {dimension_semantics = [], scalar_prefetch = 0 : i64, scratch_operands = 0 : i64, tpu.core_type = #tpu.core_type<tc>} {
    %c0 = arith.constant 0 : index
    %c0_0 = arith.constant 0 : index
    %0 = vector.load %arg0[%c0, %c0_0] : memref<64x1024xbf16, #tpu.memory_space<vmem>>, vector<64x1024xbf16>
    %c0_1 = arith.constant 0 : index
    %c0_2 = arith.constant 0 : index
    %1 = vector.load %arg1[%c0_1, %c0_2] : memref<1024x16xbf16, #tpu.memory_space<vmem>>, vector<1024x16xbf16>
    %cst = arith.constant dense<0.000000e+00> : vector<64x16xf32>
    %2 = tpu.matmul %0, %1, %cst {dimension_numbers = #tpu.dot_dimension_numbers<[1], [0], [0], [1], [0, 0, 1, 1], [], []>} : vector<64x1024xbf16>, vector<1024x16xbf16>, vector<64x16xf32> -> vector<64x16xf32>
    %c0_3 = arith.constant 0 : index
    %c0_4 = arith.constant 0 : index
    %3 = vector.load %arg2[%c0_3, %c0_4] : memref<64x1xf32, #tpu.memory_space<vmem>>, vector<64x1xf32>
    %4 = vector.broadcast %3 : vector<64x1xf32> to vector<64x16xf32>
    %5 = arith.addf %2, %4 : vector<64x16xf32>
    %cst_5 = arith.constant 0.000000e+00 : f32
    %6 = vector.broadcast %cst_5 : f32 to vector<64x16xf32>
    %7 = arith.maximumf %5, %6 : vector<64x16xf32>
    %8 = arith.truncf %7 : vector<64x16xf32> to vector<64x16xbf16>
    %c0_6 = arith.constant 0 : index
    %c0_7 = arith.constant 0 : index
    %9 = vector.load %arg3[%c0_6, %c0_7] : memref<64x16xbf16, #tpu.memory_space<vmem>>, vector<64x16xbf16>
    tpu.vector_store %arg3[%c0_6, %c0_7], %8 {strides = array<i32>} : memref<64x16xbf16, #tpu.memory_space<vmem>>, vector<64x16xbf16>,
    return
  }
}

module attributes {stable_mosaic.version = 11 : i64} {
  func.func @_tail_kernel(%arg0: memref<8x32xf32, #tpu.memory_space<vmem>>, %arg1: memref<32x768xf32, #tpu.memory_space<vmem>>, %arg2: memref<256x768xf32, #tpu.memory_space<vmem>>, %arg3: memref<1x768xf32, #tpu.memory_space<vmem>>, %arg4: memref<1x768xf32, #tpu.memory_space<vmem>>, %arg5: memref<1x1024xbf16, #tpu.memory_space<vmem>>, %arg6: memref<1x256xf32, #tpu.memory_space<vmem>>, %arg7: memref<1x256xf32, #tpu.memory_space<vmem>>, %arg8: memref<1x32xf32, #tpu.memory_space<vmem>>, %arg9: memref<256x1024xbf16, #tpu.memory_space<vmem>>, %arg10: memref<1x1024xf32, #tpu.memory_space<vmem>>, %arg11: memref<1024x256xbf16, #tpu.memory_space<vmem>>, %arg12: memref<1x256xf32, #tpu.memory_space<vmem>>, %arg13: memref<512x1024xbf16, #tpu.memory_space<vmem>>, %arg14: memref<1x1024xf32, #tpu.memory_space<vmem>>, %arg15: memref<256x128xf32, #tpu.memory_space<vmem>>, %arg16: memref<32x128xf32, #tpu.memory_space<vmem>>, %arg17: memref<1x128xf32, #tpu.memory_space<vmem>>, %arg18: memref<1x256xf32, #tpu.memory_space<vmem>>, %arg19: memref<1x256xf32, #tpu.memory_space<vmem>>, %arg20: memref<1x128xf32, #tpu.memory_space<vmem>>, %arg21: memref<8x768xf32, #tpu.memory_space<vmem>>) attributes {dimension_semantics = [], scalar_prefetch = 0 : i64, scratch_operands = 1 : i64, tpu.core_type = #tpu.core_type<tc>} {
    %c0 = arith.constant 0 : index
    %c0_0 = arith.constant 0 : index
    %0 = vector.load %arg0[%c0, %c0_0] : memref<8x32xf32, #tpu.memory_space<vmem>>, vector<8x32xf32>
    %c0_1 = arith.constant 0 : index
    %c0_2 = arith.constant 0 : index
    %1 = vector.load %arg1[%c0_1, %c0_2] : memref<32x768xf32, #tpu.memory_space<vmem>>, vector<32x768xf32>
    %cst = arith.constant dense<0.000000e+00> : vector<8x768xf32>
    %2 = tpu.matmul %0, %1, %cst {dimension_numbers = #tpu.dot_dimension_numbers<[1], [0], [0], [1], [0, 0, 1, 1], [], []>} : vector<8x32xf32>, vector<32x768xf32>, vector<8x768xf32> -> vector<8x768xf32>
    %c0_3 = arith.constant 0 : index
    %c0_4 = arith.constant 0 : index
    %3 = vector.load %arg3[%c0_3, %c0_4] : memref<1x768xf32, #tpu.memory_space<vmem>>, vector<1x768xf32>
    %4 = vector.broadcast %3 : vector<1x768xf32> to vector<8x768xf32>
    %5 = arith.addf %2, %4 : vector<8x768xf32>
    %c0_5 = arith.constant 0 : index
    %c0_6 = arith.constant 0 : index
    %6 = vector.load %arg21[%c0_5, %c0_6] : memref<8x768xf32, #tpu.memory_space<vmem>>, vector<8x768xf32>
    tpu.vector_store %arg21[%c0_5, %c0_6], %5 {strides = array<i32>} : memref<8x768xf32, #tpu.memory_space<vmem>>, vector<8x768xf32>,
    %cst_7 = arith.constant 0.000000e+00 : f32
    %7 = vector.broadcast %cst_7 : f32 to vector<1x256xf32>
    %c0_i32 = arith.constant 0 : i32
    %c8_i32 = arith.constant 8 : i32
    %8 = arith.addi %c0_i32, %c8_i32 : i32
    %c1_i32 = arith.constant 1 : i32
    %9 = scf.for %arg22 = %c0_i32 to %8 step %c1_i32 iter_args(%arg23 = %7) -> (vector<1x256xf32>)  : i32 {
      %74 = arith.index_cast %arg22 : i32 to index
      %c0_51 = arith.constant 0 : index
      %75 = vector.load %arg21[%74, %c0_51] : memref<8x768xf32, #tpu.memory_space<vmem>>, vector<1x768xf32>
      %c0_52 = arith.constant 0 : index
      %c0_53 = arith.constant 0 : index
      %76 = vector.load %arg2[%c0_52, %c0_53] : memref<256x768xf32, #tpu.memory_space<vmem>>, vector<256x768xf32>
      %cst_54 = arith.constant dense<0.000000e+00> : vector<1x768xf32>
      %77 = tpu.matmul %arg23, %76, %cst_54 {dimension_numbers = #tpu.dot_dimension_numbers<[1], [0], [0], [1], [0, 0, 1, 1], [], []>} : vector<1x256xf32>, vector<256x768xf32>, vector<1x768xf32> -> vector<1x768xf32>
      %c0_55 = arith.constant 0 : index
      %c0_56 = arith.constant 0 : index
      %78 = vector.load %arg4[%c0_55, %c0_56] : memref<1x768xf32, #tpu.memory_space<vmem>>, vector<1x768xf32>
      %79 = arith.addf %77, %78 : vector<1x768xf32>
      %80 = vector.extract_strided_slice %75 {offsets = [0, 0], sizes = [1, 256], strides = [1, 1]} : vector<1x768xf32> to vector<1x256xf32>
      %81 = vector.extract_strided_slice %79 {offsets = [0, 0], sizes = [1, 256], strides = [1, 1]} : vector<1x768xf32> to vector<1x256xf32>
      %82 = arith.addf %80, %81 : vector<1x256xf32>
      %83 = arith.negf %82 : vector<1x256xf32>
      %84 = math.exp %83 : vector<1x256xf32>
      %cst_57 = arith.constant 1.000000e+00 : f32
      %85 = vector.broadcast %cst_57 : f32 to vector<1x256xf32>
      %86 = arith.addf %85, %84 : vector<1x256xf32>
      %87 = arith.divf %85, %86 : vector<1x256xf32>
      %88 = vector.extract_strided_slice %75 {offsets = [0, 256], sizes = [1, 256], strides = [1, 1]} : vector<1x768xf32> to vector<1x256xf32>
      %89 = vector.extract_strided_slice %79 {offsets = [0, 256], sizes = [1, 256], strides = [1, 1]} : vector<1x768xf32> to vector<1x256xf32>
      %90 = arith.addf %88, %89 : vector<1x256xf32>
      %91 = arith.negf %90 : vector<1x256xf32>
      %92 = math.exp %91 : vector<1x256xf32>
      %cst_58 = arith.constant 1.000000e+00 : f32
      %93 = vector.broadcast %cst_58 : f32 to vector<1x256xf32>
      %94 = arith.addf %93, %92 : vector<1x256xf32>
      %95 = arith.divf %93, %94 : vector<1x256xf32>
      %96 = vector.extract_strided_slice %75 {offsets = [0, 512], sizes = [1, 256], strides = [1, 1]} : vector<1x768xf32> to vector<1x256xf32>
      %97 = vector.extract_strided_slice %79 {offsets = [0, 512], sizes = [1, 256], strides = [1, 1]} : vector<1x768xf32> to vector<1x256xf32>
      %98 = arith.mulf %87, %97 : vector<1x256xf32>
      %99 = arith.addf %96, %98 : vector<1x256xf32>
      %100 = math.tanh %99 : vector<1x256xf32>
      %cst_59 = arith.constant 1.000000e+00 : f32
      %101 = vector.broadcast %cst_59 : f32 to vector<1x256xf32>
      %102 = arith.subf %101, %95 : vector<1x256xf32>
      %103 = arith.mulf %102, %100 : vector<1x256xf32>
      %104 = arith.mulf %95, %arg23 : vector<1x256xf32>
      %105 = arith.addf %103, %104 : vector<1x256xf32>
      scf.yield %105 : vector<1x256xf32>
    }
    %c8_i32_8 = arith.constant 8 : i32
    %10 = arith.truncf %9 : vector<1x256xf32> to vector<1x256xbf16>
    %c0_9 = arith.constant 0 : index
    %c0_10 = arith.constant 0 : index
    %11 = vector.load %arg9[%c0_9, %c0_10] : memref<256x1024xbf16, #tpu.memory_space<vmem>>, vector<256x1024xbf16>
    %cst_11 = arith.constant dense<0.000000e+00> : vector<1x1024xf32>
    %12 = tpu.matmul %10, %11, %cst_11 {dimension_numbers = #tpu.dot_dimension_numbers<[1], [0], [0], [1], [0, 0, 1, 1], [], []>} : vector<1x256xbf16>, vector<256x1024xbf16>, vector<1x1024xf32> -> vector<1x1024xf32>
    %c0_12 = arith.constant 0 : index
    %c0_13 = arith.constant 0 : index
    %13 = vector.load %arg10[%c0_12, %c0_13] : memref<1x1024xf32, #tpu.memory_space<vmem>>, vector<1x1024xf32>
    %14 = arith.addf %12, %13 : vector<1x1024xf32>
    %15 = arith.negf %14 : vector<1x1024xf32>
    %16 = math.exp %15 : vector<1x1024xf32>
    %cst_14 = arith.constant 1.000000e+00 : f32
    %17 = vector.broadcast %cst_14 : f32 to vector<1x1024xf32>
    %18 = arith.addf %17, %16 : vector<1x1024xf32>
    %19 = arith.divf %17, %18 : vector<1x1024xf32>
    %c0_15 = arith.constant 0 : index
    %c0_16 = arith.constant 0 : index
    %20 = vector.load %arg5[%c0_15, %c0_16] : memref<1x1024xbf16, #tpu.memory_space<vmem>>, vector<1x1024xbf16>
    %21 = arith.extf %20 : vector<1x1024xbf16> to vector<1x1024xf32>
    %22 = arith.mulf %21, %19 : vector<1x1024xf32>
    %23 = arith.truncf %22 : vector<1x1024xf32> to vector<1x1024xbf16>
    %c0_17 = arith.constant 0 : index
    %c0_18 = arith.constant 0 : index
    %24 = vector.load %arg11[%c0_17, %c0_18] : memref<1024x256xbf16, #tpu.memory_space<vmem>>, vector<1024x256xbf16>
    %cst_19 = arith.constant dense<0.000000e+00> : vector<1x256xf32>
    %25 = tpu.matmul %23, %24, %cst_19 {dimension_numbers = #tpu.dot_dimension_numbers<[1], [0], [0], [1], [0, 0, 1, 1], [], []>} : vector<1x1024xbf16>, vector<1024x256xbf16>, vector<1x256xf32> -> vector<1x256xf32>
    %c0_20 = arith.constant 0 : index
    %c0_21 = arith.constant 0 : index
    %26 = vector.load %arg12[%c0_20, %c0_21] : memref<1x256xf32, #tpu.memory_space<vmem>>, vector<1x256xf32>
    %27 = arith.addf %25, %26 : vector<1x256xf32>
    %cst_22 = arith.constant 0.000000e+00 : f32
    %28 = vector.broadcast %cst_22 : f32 to vector<1x256xf32>
    %29 = arith.maximumf %27, %28 : vector<1x256xf32>
    %c0_23 = arith.constant 0 : index
    %c0_24 = arith.constant 0 : index
    %30 = vector.load %arg6[%c0_23, %c0_24] : memref<1x256xf32, #tpu.memory_space<vmem>>, vector<1x256xf32>
    %31 = tpu.concatenate %29, %30 in 1 : vector<1x256xf32>, vector<1x256xf32> -> vector<1x512xf32>
    %32 = arith.truncf %31 : vector<1x512xf32> to vector<1x512xbf16>
    %c0_25 = arith.constant 0 : index
    %c0_26 = arith.constant 0 : index
    %33 = vector.load %arg13[%c0_25, %c0_26] : memref<512x1024xbf16, #tpu.memory_space<vmem>>, vector<512x1024xbf16>
    %cst_27 = arith.constant dense<0.000000e+00> : vector<1x1024xf32>
    %34 = tpu.matmul %32, %33, %cst_27 {dimension_numbers = #tpu.dot_dimension_numbers<[1], [0], [0], [1], [0, 0, 1, 1], [], []>} : vector<1x512xbf16>, vector<512x1024xbf16>, vector<1x1024xf32> -> vector<1x1024xf32>
    %c0_28 = arith.constant 0 : index
    %c0_29 = arith.constant 0 : index
    %35 = vector.load %arg14[%c0_28, %c0_29] : memref<1x1024xf32, #tpu.memory_space<vmem>>, vector<1x1024xf32>
    %36 = arith.addf %34, %35 : vector<1x1024xf32>
    %37 = vector.extract_strided_slice %36 {offsets = [0, 0], sizes = [1, 256], strides = [1, 1]} : vector<1x1024xf32> to vector<1x256xf32>
    %38 = arith.negf %37 : vector<1x256xf32>
    %39 = math.exp %38 : vector<1x256xf32>
    %cst_30 = arith.constant 1.000000e+00 : f32
    %40 = vector.broadcast %cst_30 : f32 to vector<1x256xf32>
    %41 = arith.addf %40, %39 : vector<1x256xf32>
    %42 = arith.divf %40, %41 : vector<1x256xf32>
    %43 = vector.extract_strided_slice %36 {offsets = [0, 256], sizes = [1, 256], strides = [1, 1]} : vector<1x1024xf32> to vector<1x256xf32>
    %44 = arith.negf %43 : vector<1x256xf32>
    %45 = math.exp %44 : vector<1x256xf32>
    %cst_31 = arith.constant 1.000000e+00 : f32
    %46 = vector.broadcast %cst_31 : f32 to vector<1x256xf32>
    %47 = arith.addf %46, %45 : vector<1x256xf32>
    %48 = arith.divf %46, %47 : vector<1x256xf32>
    %49 = vector.extract_strided_slice %36 {offsets = [0, 512], sizes = [1, 256], strides = [1, 1]} : vector<1x1024xf32> to vector<1x256xf32>
    %50 = math.tanh %49 : vector<1x256xf32>
    %51 = vector.extract_strided_slice %36 {offsets = [0, 768], sizes = [1, 256], strides = [1, 1]} : vector<1x1024xf32> to vector<1x256xf32>
    %52 = arith.negf %51 : vector<1x256xf32>
    %53 = math.exp %52 : vector<1x256xf32>
    %cst_32 = arith.constant 1.000000e+00 : f32
    %54 = vector.broadcast %cst_32 : f32 to vector<1x256xf32>
    %55 = arith.addf %54, %53 : vector<1x256xf32>
    %56 = arith.divf %54, %55 : vector<1x256xf32>
    %c0_33 = arith.constant 0 : index
    %c0_34 = arith.constant 0 : index
    %57 = vector.load %arg7[%c0_33, %c0_34] : memref<1x256xf32, #tpu.memory_space<vmem>>, vector<1x256xf32>
    %58 = arith.mulf %48, %57 : vector<1x256xf32>
    %59 = arith.mulf %42, %50 : vector<1x256xf32>
    %60 = arith.addf %58, %59 : vector<1x256xf32>
    %61 = math.tanh %60 : vector<1x256xf32>
    %62 = arith.mulf %56, %61 : vector<1x256xf32>
    %c0_35 = arith.constant 0 : index
    %c0_36 = arith.constant 0 : index
    %63 = vector.load %arg18[%c0_35, %c0_36] : memref<1x256xf32, #tpu.memory_space<vmem>>, vector<1x256xf32>
    tpu.vector_store %arg18[%c0_35, %c0_36], %62 {strides = array<i32>} : memref<1x256xf32, #tpu.memory_space<vmem>>, vector<1x256xf32>,
    %c0_37 = arith.constant 0 : index
    %c0_38 = arith.constant 0 : index
    %64 = vector.load %arg19[%c0_37, %c0_38] : memref<1x256xf32, #tpu.memory_space<vmem>>, vector<1x256xf32>
    tpu.vector_store %arg19[%c0_37, %c0_38], %60 {strides = array<i32>} : memref<1x256xf32, #tpu.memory_space<vmem>>, vector<1x256xf32>,
    %c0_39 = arith.constant 0 : index
    %c0_40 = arith.constant 0 : index
    %65 = vector.load %arg15[%c0_39, %c0_40] : memref<256x128xf32, #tpu.memory_space<vmem>>, vector<256x128xf32>
    %cst_41 = arith.constant dense<0.000000e+00> : vector<1x128xf32>
    %66 = tpu.matmul %62, %65, %cst_41 {dimension_numbers = #tpu.dot_dimension_numbers<[1], [0], [0], [1], [0, 0, 1, 1], [], []>} : vector<1x256xf32>, vector<256x128xf32>, vector<1x128xf32> -> vector<1x128xf32>
    %c0_42 = arith.constant 0 : index
    %c0_43 = arith.constant 0 : index
    %67 = vector.load %arg8[%c0_42, %c0_43] : memref<1x32xf32, #tpu.memory_space<vmem>>, vector<1x32xf32>
    %c0_44 = arith.constant 0 : index
    %c0_45 = arith.constant 0 : index
    %68 = vector.load %arg16[%c0_44, %c0_45] : memref<32x128xf32, #tpu.memory_space<vmem>>, vector<32x128xf32>
    %cst_46 = arith.constant dense<0.000000e+00> : vector<1x128xf32>
    %69 = tpu.matmul %67, %68, %cst_46 {dimension_numbers = #tpu.dot_dimension_numbers<[1], [0], [0], [1], [0, 0, 1, 1], [], []>} : vector<1x32xf32>, vector<32x128xf32>, vector<1x128xf32> -> vector<1x128xf32>
    %70 = arith.addf %66, %69 : vector<1x128xf32>
    %c0_47 = arith.constant 0 : index
    %c0_48 = arith.constant 0 : index
    %71 = vector.load %arg17[%c0_47, %c0_48] : memref<1x128xf32, #tpu.memory_space<vmem>>, vector<1x128xf32>
    %72 = arith.addf %70, %71 : vector<1x128xf32>
    %c0_49 = arith.constant 0 : index
    %c0_50 = arith.constant 0 : index
    %73 = vector.load %arg20[%c0_49, %c0_50] : memref<1x128xf32, #tpu.memory_space<vmem>>, vector<1x128xf32>
    tpu.vector_store %arg20[%c0_49, %c0_50], %72 {strides = array<i32>} : memref<1x128xf32, #tpu.memory_space<vmem>>, vector<1x128xf32>,
    return
  }
}

</mosaic_0001>

<bundles_post_ra>
// kernel: a3c_lstm_ga_forward.4
= control target key start
LH: loop header
LB: loop body
LE: loop exit
PB: predicated region body
PF: predicated region fallthrough
CT: control target
= control target key end

     0   :  { %v1651_v1 = vmov 0   ;;  %vm583_vm0 = vcmask 523264   ;;  %vm1269_vm1 = vcmask 134144   ;;  %s2325_s1 = inlined_call_operand.vmem [shape: bf16[192,529], index: 1, kind: input, shape index: {}]   ;;  %s2326_s0 = inlined_call_operand.vmem [shape: bf16[128,192], index: 0, kind: input, shape index: {}]   ;;  %s2327_s2 = inlined_call_operand.vmem [shape: f32[128,1], index: 2, kind: input, shape index: {}]   ;;  %s2328_s3 = inlined_call_operand.vmem [shape: bf16[128,529], index: 3, kind: output, shape index: {}]  }
   0x1   :  { %v1543_v0 = vld [vmem:[%s2325_s1 + $0x4] ss:$20 sps:$4 sm:$0xff]   ;;  %1541 = vset.pattern.permute.xlu0 %v1651_v1  ;;  %1542 = vset.pattern.permute.xlu1 %v1651_v1  ;;  %v1545_v2 = vld [vmem:[%s2325_s1 + $0xc] ss:$20 sps:$4 sm:$0xff]   ;;  %v1548_v4 = vld [vmem:[%s2325_s1 + $0x8] ss:$20 sps:$4 sm:$0xff]  }
   0x2   :  { %608 = vmatprep.subr.bf16.mxu0 %v1543_v0  ;;  %v1547_v3 = vld [vmem:[%s2325_s1] ss:$20 sps:$4 sm:$0xff]   ;;  %721 = vmatprep.subr.bf16.mxu1 %v1545_v2  ;;  %v1553_v7 = vld [vmem:[%s2325_s1 + $0x28] ss:$20 sps:$4 sm:$0xff]   ;;  %v1554_v8 = vld [vmem:[%s2325_s1 + $0x30] ss:$20 sps:$4 sm:$0xff]  }
   0x3   :  { %v1549_v5 = vld [vmem:[%s2325_s1 + $0x2c] ss:$20 sps:$4 sm:$0xff]   ;;  %609 = vmatpush1.bf16.msra.mxu0 %v1547_v3  ;;  %722 = vmatpush1.bf16.msra.mxu1 %v1548_v4  ;;  %v1551_v6 = vld [vmem:[%s2325_s1 + $0x34] ss:$20 sps:$4 sm:$0xff]   ;;  %v1557_v10 = vld [vmem:[%s2325_s1 + $0x5c] ss:$20 sps:$4 sm:$0xff]  }
   0x4   :  { %610 = vmatprep.subr.bf16.mxu0 %v1549_v5  ;;  %723 = vmatprep.subr.bf16.mxu1 %v1551_v6  ;;  %v1555_v9 = vld [vmem:[%s2325_s1 + $0x54] ss:$20 sps:$4 sm:$0xff]   ;;  %v1559_v11 = vld [vmem:[%s2325_s1 + $0x50] ss:$20 sps:$4 sm:$0xff]   ;;  %v1560_v12 = vld [vmem:[%s2325_s1 + $0x58] ss:$20 sps:$4 sm:$0xff]  }
   0x5   :  { %v1561_v13 = vld [vmem:[%s2325_s1 + $0x7c] ss:$20 sps:$4 sm:$0xff]   ;;  %v1563_v14 = vld [vmem:[%s2325_s1 + $0x84] ss:$20 sps:$4 sm:$0xff]   ;;  %v1566_v16 = vld [vmem:[%s2325_s1 + $0x80] ss:$20 sps:$4 sm:$0xff]  }
   0x6   :  { %v1565_v15 = vld [vmem:[%s2325_s1 + $0x78] ss:$20 sps:$4 sm:$0xff]   ;;  %v1571_v19 = vld [vmem:[%s2325_s1 + $0xa0] ss:$20 sps:$4 sm:$0xff]   ;;  %v1572_v20 = vld [vmem:[%s2325_s1 + $0xa8] ss:$20 sps:$4 sm:$0xff]  }
   0x7   :  { %611 = vmatpush1.bf16.msra.mxu0 %v1553_v7  ;;  %724 = vmatpush1.bf16.msra.mxu1 %v1554_v8  ;;  %v1567_v17 = vld [vmem:[%s2325_s1 + $0xa4] ss:$20 sps:$4 sm:$0xff]   ;;  %v1569_v18 = vld [vmem:[%s2325_s1 + $0xac] ss:$20 sps:$4 sm:$0xff]   ;;  %v1575_v22 = vld [vmem:[%s2325_s1 + $0xd4] ss:$20 sps:$4 sm:$0xff]  }
   0x8   :  { %612 = vmatprep.subr.bf16.mxu0 %v1555_v9  ;;  %725 = vmatprep.subr.bf16.mxu1 %v1557_v10  ;;  %v1573_v21 = vld [vmem:[%s2325_s1 + $0xcc] ss:$20 sps:$4 sm:$0xff]   ;;  %v1577_v23 = vld [vmem:[%s2325_s1 + $0xc8] ss:$20 sps:$4 sm:$0xff]   ;;  %v1578_v24 = vld [vmem:[%s2325_s1 + $0xd0] ss:$20 sps:$4 sm:$0xff]  }
   0x9   :  { %v1579_v25 = vld [vmem:[%s2325_s1 + $0xf4] ss:$20 sps:$4 sm:$0xff]   ;;  %v1581_v26 = vld [vmem:[%s2325_s1 + $0xfc] ss:$20 sps:$4 sm:$0xff]   ;;  %v1584_v28 = vld [vmem:[%s2325_s1 + $0xf8] ss:$20 sps:$4 sm:$0xff]  }
   0xa   :  { %v1583_v27 = vld [vmem:[%s2325_s1 + $0xf0] ss:$20 sps:$4 sm:$0xff]   ;;  %v1589_v31 = vld [vmem:[%s2325_s1 + $0x118] ss:$20 sps:$4 sm:$0xff]   ;;  %v1590_v32 = vld [vmem:[%s2325_s1 + $0x120] ss:$20 sps:$4 sm:$0xff]  }
   0xb   :  { %613 = vmatpush1.bf16.msra.mxu0 %v1559_v11  ;;  %726 = vmatpush1.bf16.msra.mxu1 %v1560_v12  ;;  %v1585_v29 = vld [vmem:[%s2325_s1 + $0x11c] ss:$20 sps:$4 sm:$0xff]   ;;  %v1587_v30 = vld [vmem:[%s2325_s1 + $0x124] ss:$20 sps:$4 sm:$0xff]   ;;  %v1593_v34 = vld [vmem:[%s2325_s1 + $0x14c] ss:$20 sps:$4 sm:$0xff]  }
   0xc   :  { %614 = vmatprep.subr.bf16.mxu0 %v1561_v13  ;;  %727 = vmatprep.subr.bf16.mxu1 %v1563_v14  ;;  %v1591_v33 = vld [vmem:[%s2325_s1 + $0x144] ss:$20 sps:$4 sm:$0xff]   ;;  %v1595_v35 = vld [vmem:[%s2325_s1 + $0x140] ss:$20 sps:$4 sm:$0xff]   ;;  %v1596_v36 = vld [vmem:[%s2325_s1 + $0x148] ss:$20 sps:$4 sm:$0xff]  }
   0xd   :  { %v1597_v37 = vld [vmem:[%s2325_s1 + $0x16c] ss:$20 sps:$4 sm:$0xff]   ;;  %v1599_v39 = vld [vmem:[%s2325_s1 + $0x174] ss:$20 sps:$4 sm:$0xff]   ;;  %v1602_v41 = vld [vmem:[%s2325_s1 + $0x170] ss:$20 sps:$4 sm:$0xff]  }
   0xe   :  { %v1788_v38 = vld [vmem:[%s2326_s0 + $0x4] ss:$8 sps:$4 sm:$0xff]   ;;  %v1601_v40 = vld [vmem:[%s2325_s1 + $0x168] ss:$20 sps:$4 sm:$0xff]   ;;  %v1614_v49 = vld [vmem:[%s2325_s1 + $0x1c0] ss:$20 sps:$4 sm:$0xff]  }
   0xf   :  { %615 = vmatpush1.bf16.msra.mxu0 %v1565_v15  ;;  %728 = vmatpush1.bf16.msra.mxu1 %v1566_v16  ;;  %v1603_v42 = vld [vmem:[%s2325_s1 + $0x194] ss:$20 sps:$4 sm:$0xff]   ;;  %v1605_v43 = vld [vmem:[%s2325_s1 + $0x19c] ss:$20 sps:$4 sm:$0xff]   ;;  %v1608_v45 = vld [vmem:[%s2325_s1 + $0x198] ss:$20 sps:$4 sm:$0xff]  }
  0x10   :  { %616 = vmatprep.subr.bf16.mxu0 %v1567_v17  ;;  %729 = vmatprep.subr.bf16.mxu1 %v1569_v18  ;;  %v1607_v44 = vld [vmem:[%s2325_s1 + $0x190] ss:$20 sps:$4 sm:$0xff]   ;;  %v1613_v48 = vld [vmem:[%s2325_s1 + $0x1b8] ss:$20 sps:$4 sm:$0xff]   ;;  %v1830_v50 = vld [vmem:[%s2326_s0] ss:$8 sps:$4 sm:$0xff]  }
  0x11   :  { %1396 = vmatprep.mubr.msk.bf16.mxu0 %vm583_vm0, %v1788_v38  ;;  %1404 = vmatprep.mubr.msk.bf16.mxu1 %vm583_vm0, %v1788_v38  ;;  %v1609_v46 = vld [vmem:[%s2325_s1 + $0x1bc] ss:$20 sps:$4 sm:$0xff]   ;;  %v1611_v47 = vld [vmem:[%s2325_s1 + $0x1c4] ss:$20 sps:$4 sm:$0xff]   ;;  %v1623_v57 = vld [vmem:[%s2325_s1 + $0x60] ss:$20 sps:$4 sm:$0xff]  }
  0x12   :  { %v1618_v51 = vld [vmem:[%s2325_s1 + $0x10] ss:$20 sps:$4 sm:$0xff]   ;;  %v1840_v52 = vld [vmem:[%s2326_s0 + $0x14] ss:$8 sps:$4 sm:$0xff]   ;;  %v1621_v53 = vld [vmem:[%s2325_s1 + $0x38] ss:$20 sps:$4 sm:$0xff]  }
  0x13   :  { %617 = vmatpush1.bf16.msra.mxu0 %v1571_v19  ;;  %730 = vmatpush1.bf16.msra.mxu1 %v1572_v20  ;;  %v103_v54 = vld [vmem:[%s2327_s2] sm:$0xff]  ;;  %v1859_v55 = vld [vmem:[%s2326_s0 + $0x10] ss:$8 sps:$4 sm:$0xff]   ;;  %v1627_v59 = vld [vmem:[%s2325_s1 + $0x88] ss:$20 sps:$4 sm:$0xff]  }
  0x14   :  { %618 = vmatprep.subr.bf16.mxu0 %v1573_v21  ;;  %731 = vmatprep.subr.bf16.mxu1 %v1575_v22  ;;  %v105_v56 = vld [vmem:[%s2327_s2 + $0x10] sm:$0xff]  ;;  %v1872_v58 = vld [vmem:[%s2326_s0 + $0x24] ss:$8 sps:$4 sm:$0xff]   ;;  %v106_v61 = vld [vmem:[%s2327_s2 + $0x18] sm:$0xff] }
  0x15   :  { %121 = vperm.xlu0 %1541, %v103_v54   ;;  %131 = vperm.xlu1 %1542, %v105_v56   ;;  %v104_v60 = vld [vmem:[%s2327_s2 + $0x8] sm:$0xff]  ;;  %v1899_v63 = vld [vmem:[%s2326_s0 + $0x34] ss:$8 sps:$4 sm:$0xff]   ;;  %v1630_v0 = vld [vmem:[%s2325_s1 + $0xb0] ss:$20 sps:$4 sm:$0xff]  }
  0x16   :  { %v1894_v62 = vld [vmem:[%s2326_s0 + $0x20] ss:$8 sps:$4 sm:$0xff]   ;;  %v1632_v4 = vld [vmem:[%s2325_s1 + $0xd8] ss:$20 sps:$4 sm:$0xff]   ;;  %v109_v8 = vld [vmem:[%s2327_s2 + $0x30] sm:$0xff] }
  0x17   :  { %619 = vmatpush1.bf16.msra.mxu0 %v1577_v23  ;;  %732 = vmatpush1.bf16.msra.mxu1 %v1578_v24  ;;  %v107_v2 = vld [vmem:[%s2327_s2 + $0x20] sm:$0xff]  ;;  %v108_v3 = vld [vmem:[%s2327_s2 + $0x28] sm:$0xff]  ;;  %v1926_v5 = vld [vmem:[%s2326_s0 + $0x30] ss:$8 sps:$4 sm:$0xff]  }
  0x18   :  { %620 = vmatprep.subr.bf16.mxu0 %v1579_v25  ;;  %733 = vmatprep.subr.bf16.mxu1 %v1581_v26  ;;  %v1931_v6 = vld [vmem:[%s2326_s0 + $0x44] ss:$8 sps:$4 sm:$0xff]   ;;  %v1636_v7 = vld [vmem:[%s2325_s1 + $0x100] ss:$20 sps:$4 sm:$0xff]   ;;  %v110_v9 = vld [vmem:[%s2327_s2 + $0x38] sm:$0xff] }
  0x19   :  { %126 = vperm.xlu0 %1541, %v104_v60   ;;  %136 = vperm.xlu1 %1542, %v106_v61   ;;  %v1639_v10 = vld [vmem:[%s2325_s1 + $0x128] ss:$20 sps:$4 sm:$0xff]   ;;  %v1641_v13 = vld [vmem:[%s2325_s1 + $0x150] ss:$20 sps:$4 sm:$0xff]   ;;  %v1645_v16 = vld [vmem:[%s2325_s1 + $0x178] ss:$20 sps:$4 sm:$0xff]  }
  0x1a   :  { %v1958_v11 = vld [vmem:[%s2326_s0 + $0x40] ss:$8 sps:$4 sm:$0xff]   ;;  %v1963_v12 = vld [vmem:[%s2326_s0 + $0x54] ss:$8 sps:$4 sm:$0xff]   ;;  %v1640_v17 = vld [vmem:[%s2326_s0 + $0x50] ss:$8 sps:$4 sm:$0xff]  }
  0x1b   :  { %621 = vmatpush1.bf16.msra.mxu0 %v1583_v27  ;;  %734 = vmatpush1.bf16.msra.mxu1 %v1584_v28  ;;  %v111_v14 = vld [vmem:[%s2327_s2 + $0x40] sm:$0xff]  ;;  %v112_v15 = vld [vmem:[%s2327_s2 + $0x48] sm:$0xff]  ;;  %v113_v20 = vld [vmem:[%s2327_s2 + $0x50] sm:$0xff] }
  0x1c   :  { %622 = vmatprep.subr.bf16.mxu0 %v1585_v29  ;;  %735 = vmatprep.subr.bf16.mxu1 %v1587_v30  ;;  %v1642_v18 = vld [vmem:[%s2326_s0 + $0x64] ss:$8 sps:$4 sm:$0xff]   ;;  %v1648_v19 = vld [vmem:[%s2325_s1 + $0x1a0] ss:$20 sps:$4 sm:$0xff]   ;;  %v114_v21 = vld [vmem:[%s2327_s2 + $0x58] sm:$0xff] }
  0x1d   :  { %141 = vperm.xlu0 %1541, %v107_v2   ;;  %146 = vperm.xlu1 %1542, %v108_v3   ;;  %v1650_v22 = vld [vmem:[%s2325_s1 + $0x1c8] ss:$20 sps:$4 sm:$0xff]   ;;  %v115_v25 = vld [vmem:[%s2327_s2 + $0x60] sm:$0xff]  ;;  %v117_v26 = vld [vmem:[%s2327_s2 + $0x70] sm:$0xff] }
  0x1e   :  { %v1644_v23 = vld [vmem:[%s2326_s0 + $0x60] ss:$8 sps:$4 sm:$0xff]   ;;  %v1646_v24 = vld [vmem:[%s2326_s0 + $0x74] ss:$8 sps:$4 sm:$0xff]   ;;  %v1649_v28 = vld [vmem:[%s2326_s0 + $0x70] ss:$8 sps:$4 sm:$0xff]  }
  0x1f   :  { %623 = vmatpush1.bf16.msra.mxu0 %v1589_v31  ;;  %736 = vmatpush1.bf16.msra.mxu1 %v1590_v32  ;;  %v118_v27 = vld [vmem:[%s2327_s2 + $0x78] sm:$0xff] }
  0x20   :  { %624 = vmatprep.subr.bf16.mxu0 %v1591_v33  ;;  %737 = vmatprep.subr.bf16.mxu1 %v1593_v34 }
  0x21   :  { %151 = vperm.xlu0 %1541, %v109_v8   ;;  %156 = vperm.xlu1 %1542, %v110_v9  }
  0x23   :  { %625 = vmatpush1.bf16.msra.mxu0 %v1595_v35  ;;  %738 = vmatpush1.bf16.msra.mxu1 %v1596_v36 }
  0x24   :  { %626 = vmatprep.subr.bf16.mxu0 %v1597_v37  ;;  %739 = vmatprep.subr.bf16.mxu1 %v1599_v39 }
  0x25   :  { %161 = vperm.xlu0 %1541, %v111_v14   ;;  %166 = vperm.xlu1 %1542, %v112_v15  }
  0x27   :  { %627 = vmatpush1.bf16.msra.mxu0 %v1601_v40  ;;  %740 = vmatpush1.bf16.msra.mxu1 %v1602_v41 }
  0x28   :  { %628 = vmatprep.subr.bf16.mxu0 %v1603_v42  ;;  %741 = vmatprep.subr.bf16.mxu1 %v1605_v43 }
  0x29   :  { %171 = vperm.xlu0 %1541, %v113_v20   ;;  %176 = vperm.xlu1 %1542, %v114_v21  }
  0x2b   :  { %629 = vmatpush1.bf16.msra.mxu0 %v1607_v44  ;;  %742 = vmatpush1.bf16.msra.mxu1 %v1608_v45 }
  0x2c   :  { %630 = vmatprep.subr.bf16.mxu0 %v1609_v46  ;;  %743 = vmatprep.subr.bf16.mxu1 %v1611_v47 }
  0x2d   :  { %181 = vperm.xlu0 %1541, %v115_v25  }
  0x2f   :  { %631 = vmatpush1.bf16.msra.mxu0 %v1613_v48  ;;  %744 = vmatpush1.bf16.msra.mxu1 %v1614_v49 }
  0x30   :  { %834 = vmatprep.subr.bf16.mxu0 %v1651_v1  ;;  %1516 = vmatprep.subr.bf16.mxu1 %v1651_v1 }
  0x31   :  { %191 = vperm.xlu0 %1541, %v117_v26  }
  0x32   :  { %641 = vmatmul.mubr.bf16.vlgmr.msra.gmra.mrb[0].mxu0 %v1830_v50  ;;  %754 = vmatmul.mubr.bf16.vlgmr.msra.gmra.mrb[0].mxu1 %v1830_v50 }
  0x33   :  { %835 = vmatpush1.bf16.msra.mxu0 %v1618_v51  ;;  %1528 = vmatpush1.bf16.msra.mxu1 %v1618_v51 }
  0x34   :  { %836 = vmatprep.subr.bf16.mxu0 %v1651_v1  ;;  %1517 = vmatprep.subr.bf16.mxu1 %v1651_v1 }
  0x35   :  { %1397 = vmatprep.mubr.msk.bf16.mxu0 %vm583_vm0, %v1840_v52  ;;  %1405 = vmatprep.mubr.msk.bf16.mxu1 %vm583_vm0, %v1840_v52 }
  0x37   :  { %837 = vmatpush1.bf16.msra.mxu0 %v1621_v53  ;;  %1529 = vmatpush1.bf16.msra.mxu1 %v1621_v53 }
  0x38   :  { %838 = vmatprep.subr.bf16.mxu0 %v1651_v1  ;;  %1518 = vmatprep.subr.bf16.mxu1 %v1651_v1 }
  0x3a   :  { %651 = vmatmul.mubr.bf16.gmra.mrb[4].mxu0 %v1859_v55  ;;  %764 = vmatmul.mubr.bf16.gmra.mrb[4].mxu1 %v1859_v55 }
  0x3b   :  { %839 = vmatpush1.bf16.msra.mxu0 %v1623_v57  ;;  %1530 = vmatpush1.bf16.msra.mxu1 %v1623_v57 }
  0x3c   :  { %1398 = vmatprep.mubr.msk.bf16.mxu0 %vm583_vm0, %v1872_v58  ;;  %1406 = vmatprep.mubr.msk.bf16.mxu1 %vm583_vm0, %v1872_v58 }
  0x3d   :  { %840 = vmatprep.subr.bf16.mxu0 %v1651_v1  ;;  %1519 = vmatprep.subr.bf16.mxu1 %v1651_v1 }
  0x3f   :  { %841 = vmatpush1.bf16.msra.mxu0 %v1627_v59  ;;  %1531 = vmatpush1.bf16.msra.mxu1 %v1627_v59 }
  0x40   :  { %842 = vmatprep.subr.bf16.mxu0 %v1651_v1  ;;  %1520 = vmatprep.subr.bf16.mxu1 %v1651_v1 }
  0x42   :  { %661 = vmatmul.mubr.bf16.gmra.mrb[8].mxu0 %v1894_v62  ;;  %774 = vmatmul.mubr.bf16.gmra.mrb[8].mxu1 %v1894_v62 }
  0x43   :  { %1399 = vmatprep.mubr.msk.bf16.mxu0 %vm583_vm0, %v1899_v63  ;;  %1407 = vmatprep.mubr.msk.bf16.mxu1 %vm583_vm0, %v1899_v63 }
  0x44   :  { %843 = vmatpush1.bf16.msra.mxu0 %v1630_v0  ;;  %1532 = vmatpush1.bf16.msra.mxu1 %v1630_v0 }
  0x45   :  { %844 = vmatprep.subr.bf16.mxu0 %v1651_v1  ;;  %1521 = vmatprep.subr.bf16.mxu1 %v1651_v1 }
  0x48   :  { %845 = vmatpush1.bf16.msra.mxu0 %v1632_v4  ;;  %1533 = vmatpush1.bf16.msra.mxu1 %v1632_v4 }
  0x49   :  { %846 = vmatprep.subr.bf16.mxu0 %v1651_v1  ;;  %1522 = vmatprep.subr.bf16.mxu1 %v1651_v1 }
  0x4a   :  { %671 = vmatmul.mubr.bf16.gmra.mrb[12].mxu0 %v1926_v5  ;;  %784 = vmatmul.mubr.bf16.gmra.mrb[12].mxu1 %v1926_v5 }
  0x4b   :  { %1400 = vmatprep.mubr.msk.bf16.mxu0 %vm583_vm0, %v1931_v6  ;;  %1408 = vmatprep.mubr.msk.bf16.mxu1 %vm583_vm0, %v1931_v6 }
  0x4c   :  { %847 = vmatpush1.bf16.msra.mxu0 %v1636_v7  ;;  %1534 = vmatpush1.bf16.msra.mxu1 %v1636_v7 }
  0x4d   :  { %848 = vmatprep.subr.bf16.mxu0 %v1651_v1  ;;  %1523 = vmatprep.subr.bf16.mxu1 %v1651_v1 }
  0x50   :  { %849 = vmatpush1.bf16.msra.mxu0 %v1639_v10  ;;  %1535 = vmatpush1.bf16.msra.mxu1 %v1639_v10 }
  0x51   :  { %850 = vmatprep.subr.bf16.mxu0 %v1651_v1  ;;  %1524 = vmatprep.subr.bf16.mxu1 %v1651_v1 }
  0x52   :  { %681 = vmatmul.mubr.bf16.gmra.mrb[16].mxu0 %v1958_v11  ;;  %794 = vmatmul.mubr.bf16.gmra.mrb[16].mxu1 %v1958_v11 }
  0x53   :  { %1401 = vmatprep.mubr.msk.bf16.mxu0 %vm583_vm0, %v1963_v12  ;;  %1409 = vmatprep.mubr.msk.bf16.mxu1 %vm583_vm0, %v1963_v12 }
  0x54   :  { %851 = vmatpush1.bf16.msra.mxu0 %v1641_v13  ;;  %1536 = vmatpush1.bf16.msra.mxu1 %v1641_v13 }
  0x55   :  { %852 = vmatprep.subr.bf16.mxu0 %v1651_v1  ;;  %1525 = vmatprep.subr.bf16.mxu1 %v1651_v1 }
  0x58   :  { %853 = vmatpush1.bf16.msra.mxu0 %v1645_v16  ;;  %1537 = vmatpush1.bf16.msra.mxu1 %v1645_v16 }
  0x59   :  { %854 = vmatprep.subr.bf16.mxu0 %v1651_v1  ;;  %1526 = vmatprep.subr.bf16.mxu1 %v1651_v1 }
  0x5a   :  { %691 = vmatmul.mubr.bf16.gmra.mrb[20].mxu0 %v1640_v17  ;;  %804 = vmatmul.mubr.bf16.gmra.mrb[20].mxu1 %v1640_v17 }
  0x5b   :  { %1402 = vmatprep.mubr.msk.bf16.mxu0 %vm583_vm0, %v1642_v18  ;;  %1410 = vmatprep.mubr.msk.bf16.mxu1 %vm583_vm0, %v1642_v18 }
  0x5c   :  { %855 = vmatpush1.bf16.msra.mxu0 %v1648_v19  ;;  %1538 = vmatpush1.bf16.msra.mxu1 %v1648_v19 }
  0x5d   :  { %856 = vmatprep.subr.bf16.mxu0 %v1651_v1  ;;  %1527 = vmatprep.subr.bf16.mxu1 %v1651_v1  ;;  %v116_v1 = vld [vmem:[%s2327_s2 + $0x68] sm:$0xff] }
  0x5e   :  { %186 = vperm.xlu1 %1542, %v116_v1  }
  0x60   :  { %857 = vmatpush1.bf16.msra.mxu0 %v1650_v22  ;;  %1539 = vmatpush1.bf16.msra.mxu1 %v1650_v22 }
  0x62   :  { %701 = vmatmul.mubr.bf16.gmra.mrb[24].mxu0 %v1644_v23  ;;  %814 = vmatmul.mubr.bf16.gmra.mrb[24].mxu1 %v1644_v23 }
  0x63   :  { %1403 = vmatprep.mubr.msk.bf16.mxu0 %vm583_vm0, %v1646_v24  ;;  %1411 = vmatprep.mubr.msk.bf16.mxu1 %vm583_vm0, %v1646_v24 }
  0x64   :  { %196 = vperm.xlu1 %1542, %v118_v27  }
  0x6a   :  { %711 = vmatmul.mubr.bf16.gmra.mrb[28].mxu0 %v1649_v28  ;;  %824 = vmatmul.mubr.bf16.gmra.mrb[28].mxu1 %v1649_v28 }
  0x6b   :  { %1412 = vmatprep.mubr.msk.bf16.mxu0 %vm583_vm0, %v1788_v38  ;;  %1416 = vmatprep.mubr.msk.bf16.mxu1 %vm583_vm0, %v1931_v6 }
  0x72   :  { %867 = vmatmul.mubr.bf16.vlgmr.msra.gmra.mrb[32].mxu0 %v1830_v50  ;;  %899 = vmatmul.mubr.bf16.vlgmr.msra.gmra.mrb[32].mxu1 %v1958_v11 }
  0x73   :  { %1413 = vmatprep.mubr.msk.bf16.mxu0 %vm583_vm0, %v1840_v52  ;;  %1417 = vmatprep.mubr.msk.bf16.mxu1 %vm583_vm0, %v1963_v12 }
  0x7a   :  { %875 = vmatmul.mubr.bf16.gmra.mrb[36].mxu0 %v1859_v55  ;;  %907 = vmatmul.mubr.bf16.gmra.mrb[36].mxu1 %v1640_v17 }
  0x7b   :  { %1414 = vmatprep.mubr.msk.bf16.mxu0 %vm583_vm0, %v1872_v58  ;;  %1418 = vmatprep.mubr.msk.bf16.mxu1 %vm583_vm0, %v1642_v18 }
  0x82   :  { %883 = vmatmul.mubr.bf16.gmra.mrb[40].mxu0 %v1894_v62  ;;  %915 = vmatmul.mubr.bf16.gmra.mrb[40].mxu1 %v1644_v23 }
  0x83   :  { %1415 = vmatprep.mubr.msk.bf16.mxu0 %vm583_vm0, %v1899_v63  ;;  %1419 = vmatprep.mubr.msk.bf16.mxu1 %vm583_vm0, %v1646_v24 }
  0x8a   :  { %891 = vmatmul.mubr.bf16.gmra.mrb[44].mxu0 %v1926_v5  ;;  %923 = vmatmul.mubr.bf16.gmra.mrb[44].mxu1 %v1649_v28 }
  0x94   :  { %v2053_v29 = vpop.permute.xlu0 %121  ;;  %v2057_v31 = vpop.permute.xlu1 %131 }
  0x98   :  { %v2055_v30 = vpop.permute.xlu0 %126  ;;  %v2067_v58 = vpop.permute.xlu1 %136 }
  0x9c   :  { %v2089_v24 = vpop.permute.xlu0 %141  ;;  %v2091_v25 = vpop.permute.xlu1 %146 }
 0x105   :  { %v642_v32 = vpop.f32.mrb[0].mxu0  ;;  %v755_v33 = vpop.f32.mrb[0].mxu1 }
 0x106   :  { %v643_v34 = vadd.f32 %v642_v32, %v2053_v29  ;;  %v756_v35 = vadd.f32 %v755_v33, %v2053_v29  ;;  %v644_v36 = vpop.f32.mrb[1].mxu0  ;;  %v757_v37 = vpop.f32.mrb[1].mxu1 }
 0x107   :  { %v645_v38 = vadd.f32 %v644_v36, %v2053_v29  ;;  %v758_v39 = vadd.f32 %v757_v37, %v2053_v29  ;;  %v646_v40 = vpop.f32.mrb[2].mxu0  ;;  %v759_v41 = vpop.f32.mrb[2].mxu1 }
 0x108   :  { %v931_v42 = vmax.f32 %v643_v34, 0.0  ;;  %v933_v43 = vmax.f32 %v756_v35, 0.0  ;;  %v647_v44 = vadd.f32 %v646_v40, %v2055_v30  ;;  %v760_v45 = vadd.f32 %v759_v41, %v2055_v30  ;;  %v648_v46 = vpop.f32.mrb[3].mxu0  ;;  %v761_v47 = vpop.f32.mrb[3].mxu1 }
 0x109   :  { %v932_v48 = vmax.f32 %v645_v38, 0.0  ;;  %v934_v49 = vmax.f32 %v758_v39, 0.0  ;;  %v649_v50 = vadd.f32 %v648_v46, %v2055_v30  ;;  %v762_v51 = vadd.f32 %v761_v47, %v2055_v30 }
 0x10a   :  { %v936_v52 = vmax.f32 %v647_v44, 0.0  ;;  %v938_v53 = vmax.f32 %v760_v45, 0.0 }
 0x10b   :  { %v1468_v54 = vpack.c.bf16 %v932_v48, %v931_v42  ;;  %v1469_v55 = vpack.c.bf16 %v934_v49, %v933_v43  ;;  %v937_v56 = vmax.f32 %v649_v50, 0.0  ;;  %v939_v57 = vmax.f32 %v762_v51, 0.0 }
 0x10d   :  { %1267 = vst [vmem:[%s2328_s3] sm:$0xff] %v1468_v54  ;;  %1268 = vst [vmem:[%s2328_s3 + $0x8] sm:$0xff] %v1469_v55  ;;  %v1471_v59 = vpack.c.bf16 %v937_v56, %v936_v52  ;;  %v1472_v60 = vpack.c.bf16 %v939_v57, %v938_v53  ;;  %v652_v61 = vpop.f32.mrb[4].mxu0  ;;  %v765_v62 = vpop.f32.mrb[4].mxu1 }
 0x10e   :  { %v653_v63 = vadd.f32 %v652_v61, %v2057_v31  ;;  %v766_v0 = vadd.f32 %v765_v62, %v2057_v31  ;;  %v654_v2 = vpop.f32.mrb[5].mxu0  ;;  %v767_v3 = vpop.f32.mrb[5].mxu1 }
 0x10f   :  { %1271 = vst [vmem:[%s2328_s3 + $0x14] sm:$0xff] %v1471_v59  ;;  %1272 = vst [vmem:[%s2328_s3 + $0x1c] sm:$0xff] %v1472_v60  ;;  %v655_v4 = vadd.f32 %v654_v2, %v2057_v31  ;;  %v768_v5 = vadd.f32 %v767_v3, %v2057_v31  ;;  %v656_v6 = vpop.f32.mrb[6].mxu0  ;;  %v769_v7 = vpop.f32.mrb[6].mxu1 }
 0x110   :  { %v941_v8 = vmax.f32 %v653_v63, 0.0  ;;  %v943_v9 = vmax.f32 %v766_v0, 0.0  ;;  %v657_v10 = vadd.f32 %v656_v6, %v2067_v58  ;;  %v770_v11 = vadd.f32 %v769_v7, %v2067_v58  ;;  %v658_v12 = vpop.f32.mrb[7].mxu0  ;;  %v771_v13 = vpop.f32.mrb[7].mxu1 }
 0x111   :  { %v942_v14 = vmax.f32 %v655_v4, 0.0  ;;  %v944_v15 = vmax.f32 %v768_v5, 0.0  ;;  %v659_v16 = vadd.f32 %v658_v12, %v2067_v58  ;;  %v772_v17 = vadd.f32 %v771_v13, %v2067_v58  ;;  %v2113_v56 = vpop.permute.xlu0 %151  ;;  %v2115_v57 = vpop.permute.xlu1 %156 }
 0x112   :  { %v946_v18 = vmax.f32 %v657_v10, 0.0  ;;  %v948_v19 = vmax.f32 %v770_v11, 0.0 }
 0x113   :  { %v1474_v20 = vpack.c.bf16 %v942_v14, %v941_v8  ;;  %v1475_v21 = vpack.c.bf16 %v944_v15, %v943_v9  ;;  %v947_v22 = vmax.f32 %v659_v16, 0.0  ;;  %v949_v23 = vmax.f32 %v772_v17, 0.0 }
 0x115   :  { %1274 = vst [vmem:[%s2328_s3 + $0x28] sm:$0xff] %v1474_v20  ;;  %1275 = vst [vmem:[%s2328_s3 + $0x30] sm:$0xff] %v1475_v21  ;;  %v1477_v1 = vpack.c.bf16 %v947_v22, %v946_v18  ;;  %v1478_v26 = vpack.c.bf16 %v949_v23, %v948_v19  ;;  %v662_v27 = vpop.f32.mrb[8].mxu0  ;;  %v775_v28 = vpop.f32.mrb[8].mxu1 }
 0x116   :  { %v663_v32 = vadd.f32 %v662_v27, %v2089_v24  ;;  %v664_v33 = vpop.f32.mrb[9].mxu0  ;;  %v776_v34 = vadd.f32 %v775_v28, %v2089_v24  ;;  %v777_v35 = vpop.f32.mrb[9].mxu1 }
 0x117   :  { %1277 = vst [vmem:[%s2328_s3 + $0x3c] sm:$0xff] %v1477_v1  ;;  %1278 = vst [vmem:[%s2328_s3 + $0x44] sm:$0xff] %v1478_v26  ;;  %v665_v36 = vadd.f32 %v664_v33, %v2089_v24  ;;  %v778_v37 = vadd.f32 %v777_v35, %v2089_v24  ;;  %v666_v38 = vpop.f32.mrb[10].mxu0  ;;  %v779_v39 = vpop.f32.mrb[10].mxu1 }
 0x118   :  { %v951_v40 = vmax.f32 %v663_v32, 0.0  ;;  %v953_v41 = vmax.f32 %v776_v34, 0.0  ;;  %v667_v42 = vadd.f32 %v666_v38, %v2091_v25  ;;  %v780_v43 = vadd.f32 %v779_v39, %v2091_v25  ;;  %v668_v44 = vpop.f32.mrb[11].mxu0  ;;  %v781_v45 = vpop.f32.mrb[11].mxu1 }
 0x119   :  { %v952_v46 = vmax.f32 %v665_v36, 0.0  ;;  %v954_v47 = vmax.f32 %v778_v37, 0.0  ;;  %v669_v48 = vadd.f32 %v668_v44, %v2091_v25  ;;  %v782_v49 = vadd.f32 %v781_v45, %v2091_v25  ;;  %v2137_v1 = vpop.permute.xlu0 %161  ;;  %v2139_v26 = vpop.permute.xlu1 %166 }
 0x11a   :  { %v956_v50 = vmax.f32 %v667_v42, 0.0  ;;  %v958_v51 = vmax.f32 %v780_v43, 0.0 }
 0x11b   :  { %v1480_v52 = vpack.c.bf16 %v952_v46, %v951_v40  ;;  %v1481_v53 = vpack.c.bf16 %v954_v47, %v953_v41  ;;  %v957_v54 = vmax.f32 %v669_v48, 0.0  ;;  %v959_v55 = vmax.f32 %v782_v49, 0.0 }
 0x11d   :  { %1280 = vst [vmem:[%s2328_s3 + $0x50] sm:$0xff] %v1480_v52  ;;  %1281 = vst [vmem:[%s2328_s3 + $0x58] sm:$0xff] %v1481_v53  ;;  %v1483_v59 = vpack.c.bf16 %v957_v54, %v956_v50  ;;  %v1484_v60 = vpack.c.bf16 %v959_v55, %v958_v51  ;;  %v672_v61 = vpop.f32.mrb[12].mxu0  ;;  %v785_v62 = vpop.f32.mrb[12].mxu1 }
 0x11e   :  { %v673_v63 = vadd.f32 %v672_v61, %v2113_v56  ;;  %v674_v0 = vpop.f32.mrb[13].mxu0  ;;  %v786_v2 = vadd.f32 %v785_v62, %v2113_v56  ;;  %v787_v3 = vpop.f32.mrb[13].mxu1 }
 0x11f   :  { %1283 = vst [vmem:[%s2328_s3 + $0x64] sm:$0xff] %v1483_v59  ;;  %1284 = vst [vmem:[%s2328_s3 + $0x6c] sm:$0xff] %v1484_v60  ;;  %v675_v4 = vadd.f32 %v674_v0, %v2113_v56  ;;  %v788_v5 = vadd.f32 %v787_v3, %v2113_v56  ;;  %v676_v6 = vpop.f32.mrb[14].mxu0  ;;  %v789_v7 = vpop.f32.mrb[14].mxu1 }
 0x120   :  { %v961_v8 = vmax.f32 %v673_v63, 0.0  ;;  %v963_v9 = vmax.f32 %v786_v2, 0.0  ;;  %v677_v10 = vadd.f32 %v676_v6, %v2115_v57  ;;  %v790_v11 = vadd.f32 %v789_v7, %v2115_v57  ;;  %v678_v12 = vpop.f32.mrb[15].mxu0  ;;  %v791_v13 = vpop.f32.mrb[15].mxu1 }
 0x121   :  { %v962_v14 = vmax.f32 %v675_v4, 0.0  ;;  %v964_v15 = vmax.f32 %v788_v5, 0.0  ;;  %v679_v16 = vadd.f32 %v678_v12, %v2115_v57  ;;  %v792_v17 = vadd.f32 %v791_v13, %v2115_v57  ;;  %v2161_v61 = vpop.permute.xlu0 %171  ;;  %v2163_v62 = vpop.permute.xlu1 %176 }
 0x122   :  { %v966_v18 = vmax.f32 %v677_v10, 0.0  ;;  %v968_v19 = vmax.f32 %v790_v11, 0.0 }
 0x123   :  { %v1486_v20 = vpack.c.bf16 %v962_v14, %v961_v8  ;;  %v1487_v21 = vpack.c.bf16 %v964_v15, %v963_v9  ;;  %v967_v22 = vmax.f32 %v679_v16, 0.0  ;;  %v969_v23 = vmax.f32 %v792_v17, 0.0 }
 0x125   :  { %1286 = vst [vmem:[%s2328_s3 + $0x78] sm:$0xff] %v1486_v20  ;;  %1287 = vst [vmem:[%s2328_s3 + $0x80] sm:$0xff] %v1487_v21  ;;  %v1489_v27 = vpack.c.bf16 %v967_v22, %v966_v18  ;;  %v1490_v28 = vpack.c.bf16 %v969_v23, %v968_v19  ;;  %v682_v32 = vpop.f32.mrb[16].mxu0  ;;  %v795_v33 = vpop.f32.mrb[16].mxu1 }
 0x126   :  { %v683_v34 = vadd.f32 %v682_v32, %v2137_v1  ;;  %v684_v35 = vpop.f32.mrb[17].mxu0  ;;  %v796_v36 = vadd.f32 %v795_v33, %v2137_v1  ;;  %v797_v37 = vpop.f32.mrb[17].mxu1 }
 0x127   :  { %1289 = vst [vmem:[%s2328_s3 + $0x8c] sm:$0xff] %v1489_v27  ;;  %1290 = vst [vmem:[%s2328_s3 + $0x94] sm:$0xff] %v1490_v28  ;;  %v685_v38 = vadd.f32 %v684_v35, %v2137_v1  ;;  %v798_v39 = vadd.f32 %v797_v37, %v2137_v1  ;;  %v686_v40 = vpop.f32.mrb[18].mxu0  ;;  %v799_v41 = vpop.f32.mrb[18].mxu1 }
 0x128   :  { %v971_v42 = vmax.f32 %v683_v34, 0.0  ;;  %v973_v43 = vmax.f32 %v796_v36, 0.0  ;;  %v687_v44 = vadd.f32 %v686_v40, %v2139_v26  ;;  %v800_v45 = vadd.f32 %v799_v41, %v2139_v26  ;;  %v688_v46 = vpop.f32.mrb[19].mxu0  ;;  %v801_v47 = vpop.f32.mrb[19].mxu1 }
 0x129   :  { %v972_v48 = vmax.f32 %v685_v38, 0.0  ;;  %v974_v49 = vmax.f32 %v798_v39, 0.0  ;;  %v689_v50 = vadd.f32 %v688_v46, %v2139_v26  ;;  %v802_v51 = vadd.f32 %v801_v47, %v2139_v26  ;;  %v2185_v34 = vpop.permute.xlu0 %181  ;;  %v2187_v35 = vpop.permute.xlu1 %186 }
 0x12a   :  { %v976_v52 = vmax.f32 %v687_v44, 0.0  ;;  %v978_v53 = vmax.f32 %v800_v45, 0.0 }
 0x12b   :  { %v1492_v54 = vpack.c.bf16 %v972_v48, %v971_v42  ;;  %v1493_v55 = vpack.c.bf16 %v974_v49, %v973_v43  ;;  %v977_v59 = vmax.f32 %v689_v50, 0.0  ;;  %v979_v60 = vmax.f32 %v802_v51, 0.0 }
 0x12d   :  { %1292 = vst [vmem:[%s2328_s3 + $0xa0] sm:$0xff] %v1492_v54  ;;  %1293 = vst [vmem:[%s2328_s3 + $0xa8] sm:$0xff] %v1493_v55  ;;  %v1495_v63 = vpack.c.bf16 %v977_v59, %v976_v52  ;;  %v1496_v0 = vpack.c.bf16 %v979_v60, %v978_v53  ;;  %v692_v2 = vpop.f32.mrb[20].mxu0  ;;  %v805_v3 = vpop.f32.mrb[20].mxu1 }
 0x12e   :  { %v693_v4 = vadd.f32 %v692_v2, %v2161_v61  ;;  %v694_v5 = vpop.f32.mrb[21].mxu0  ;;  %v806_v6 = vadd.f32 %v805_v3, %v2161_v61  ;;  %v807_v7 = vpop.f32.mrb[21].mxu1 }
 0x12f   :  { %1295 = vst [vmem:[%s2328_s3 + $0xb4] sm:$0xff] %v1495_v63  ;;  %1296 = vst [vmem:[%s2328_s3 + $0xbc] sm:$0xff] %v1496_v0  ;;  %v695_v8 = vadd.f32 %v694_v5, %v2161_v61  ;;  %v808_v9 = vadd.f32 %v807_v7, %v2161_v61  ;;  %v696_v10 = vpop.f32.mrb[22].mxu0  ;;  %v809_v11 = vpop.f32.mrb[22].mxu1 }
 0x130   :  { %v981_v12 = vmax.f32 %v693_v4, 0.0  ;;  %v983_v13 = vmax.f32 %v806_v6, 0.0  ;;  %v697_v14 = vadd.f32 %v696_v10, %v2163_v62  ;;  %v810_v15 = vadd.f32 %v809_v11, %v2163_v62  ;;  %v698_v16 = vpop.f32.mrb[23].mxu0  ;;  %v811_v17 = vpop.f32.mrb[23].mxu1 }
 0x131   :  { %v982_v18 = vmax.f32 %v695_v8, 0.0  ;;  %v984_v19 = vmax.f32 %v808_v9, 0.0  ;;  %v699_v20 = vadd.f32 %v698_v16, %v2163_v62  ;;  %v812_v21 = vadd.f32 %v811_v17, %v2163_v62  ;;  %v2209_v6 = vpop.permute.xlu0 %191  ;;  %v2211_v7 = vpop.permute.xlu1 %196 }
 0x132   :  { %v986_v22 = vmax.f32 %v697_v14, 0.0  ;;  %v988_v23 = vmax.f32 %v810_v15, 0.0 }
 0x133   :  { %v1498_v27 = vpack.c.bf16 %v982_v18, %v981_v12  ;;  %v1499_v28 = vpack.c.bf16 %v984_v19, %v983_v13  ;;  %v987_v32 = vmax.f32 %v699_v20, 0.0  ;;  %v989_v33 = vmax.f32 %v812_v21, 0.0 }
 0x135   :  { %1298 = vst [vmem:[%s2328_s3 + $0xc8] sm:$0xff] %v1498_v27  ;;  %1299 = vst [vmem:[%s2328_s3 + $0xd0] sm:$0xff] %v1499_v28  ;;  %v1501_v36 = vpack.c.bf16 %v987_v32, %v986_v22  ;;  %v1502_v37 = vpack.c.bf16 %v989_v33, %v988_v23  ;;  %v702_v38 = vpop.f32.mrb[24].mxu0  ;;  %v815_v39 = vpop.f32.mrb[24].mxu1 }
 0x136   :  { %v703_v40 = vadd.f32 %v702_v38, %v2185_v34  ;;  %v704_v41 = vpop.f32.mrb[25].mxu0  ;;  %v816_v42 = vadd.f32 %v815_v39, %v2185_v34  ;;  %v817_v43 = vpop.f32.mrb[25].mxu1 }
 0x137   :  { %1301 = vst [vmem:[%s2328_s3 + $0xdc] sm:$0xff] %v1501_v36  ;;  %1302 = vst [vmem:[%s2328_s3 + $0xe4] sm:$0xff] %v1502_v37  ;;  %v705_v44 = vadd.f32 %v704_v41, %v2185_v34  ;;  %v818_v45 = vadd.f32 %v817_v43, %v2185_v34  ;;  %v706_v46 = vpop.f32.mrb[26].mxu0  ;;  %v819_v47 = vpop.f32.mrb[26].mxu1 }
 0x138   :  { %v991_v48 = vmax.f32 %v703_v40, 0.0  ;;  %v993_v49 = vmax.f32 %v816_v42, 0.0  ;;  %v707_v50 = vadd.f32 %v706_v46, %v2187_v35  ;;  %v820_v51 = vadd.f32 %v819_v47, %v2187_v35  ;;  %v708_v52 = vpop.f32.mrb[27].mxu0  ;;  %v821_v53 = vpop.f32.mrb[27].mxu1 }
 0x139   :  { %v992_v54 = vmax.f32 %v705_v44, 0.0  ;;  %v994_v55 = vmax.f32 %v818_v45, 0.0  ;;  %v709_v59 = vadd.f32 %v708_v52, %v2187_v35  ;;  %v822_v60 = vadd.f32 %v821_v53, %v2187_v35 }
 0x13a   :  { %v996_v63 = vmax.f32 %v707_v50, 0.0  ;;  %v998_v0 = vmax.f32 %v820_v51, 0.0 }
 0x13b   :  { %v1504_v2 = vpack.c.bf16 %v992_v54, %v991_v48  ;;  %v1505_v3 = vpack.c.bf16 %v994_v55, %v993_v49  ;;  %v997_v4 = vmax.f32 %v709_v59, 0.0  ;;  %v999_v5 = vmax.f32 %v822_v60, 0.0 }
 0x13d   :  { %1304 = vst [vmem:[%s2328_s3 + $0xf0] sm:$0xff] %v1504_v2  ;;  %1305 = vst [vmem:[%s2328_s3 + $0xf8] sm:$0xff] %v1505_v3  ;;  %v1507_v8 = vpack.c.bf16 %v997_v4, %v996_v63  ;;  %v1508_v9 = vpack.c.bf16 %v999_v5, %v998_v0  ;;  %v712_v10 = vpop.f32.mrb[28].mxu0  ;;  %v825_v11 = vpop.f32.mrb[28].mxu1 }
 0x13e   :  { %v713_v12 = vadd.f32 %v712_v10, %v2209_v6  ;;  %v714_v13 = vpop.f32.mrb[29].mxu0  ;;  %v826_v14 = vadd.f32 %v825_v11, %v2209_v6  ;;  %v827_v15 = vpop.f32.mrb[29].mxu1 }
 0x13f   :  { %1307 = vst [vmem:[%s2328_s3 + $0x104] sm:$0xff] %v1507_v8  ;;  %1308 = vst [vmem:[%s2328_s3 + $0x10c] sm:$0xff] %v1508_v9  ;;  %v715_v16 = vadd.f32 %v714_v13, %v2209_v6  ;;  %v828_v17 = vadd.f32 %v827_v15, %v2209_v6  ;;  %v716_v18 = vpop.f32.mrb[30].mxu0  ;;  %v829_v19 = vpop.f32.mrb[30].mxu1 }
 0x140   :  { %v1001_v20 = vmax.f32 %v713_v12, 0.0  ;;  %v1003_v21 = vmax.f32 %v826_v14, 0.0  ;;  %v717_v22 = vadd.f32 %v716_v18, %v2211_v7  ;;  %v830_v23 = vadd.f32 %v829_v19, %v2211_v7  ;;  %v718_v27 = vpop.f32.mrb[31].mxu0  ;;  %v831_v28 = vpop.f32.mrb[31].mxu1 }
 0x141   :  { %v1002_v32 = vmax.f32 %v715_v16, 0.0  ;;  %v1004_v33 = vmax.f32 %v828_v17, 0.0  ;;  %v719_v36 = vadd.f32 %v718_v27, %v2211_v7  ;;  %v832_v37 = vadd.f32 %v831_v28, %v2211_v7 }
 0x142   :  { %v1006_v38 = vmax.f32 %v717_v22, 0.0  ;;  %v1008_v39 = vmax.f32 %v830_v23, 0.0 }
 0x143   :  { %v1510_v40 = vpack.c.bf16 %v1002_v32, %v1001_v20  ;;  %v1511_v41 = vpack.c.bf16 %v1004_v33, %v1003_v21  ;;  %v1007_v42 = vmax.f32 %v719_v36, 0.0  ;;  %v1009_v43 = vmax.f32 %v832_v37, 0.0 }
 0x145   :  { %1310 = vst [vmem:[%s2328_s3 + $0x118] sm:$0xff] %v1510_v40  ;;  %1311 = vst [vmem:[%s2328_s3 + $0x120] sm:$0xff] %v1511_v41  ;;  %v1513_v44 = vpack.c.bf16 %v1007_v42, %v1006_v38  ;;  %v1514_v45 = vpack.c.bf16 %v1009_v43, %v1008_v39  ;;  %v868_v46 = vpop.f32.mrb[32].mxu0  ;;  %v900_v47 = vpop.f32.mrb[32].mxu1 }
 0x146   :  { %v869_v48 = vadd.f32 %v868_v46, %v2053_v29  ;;  %v901_v49 = vadd.f32 %v900_v47, %v2137_v1  ;;  %v870_v50 = vpop.f32.mrb[33].mxu0  ;;  %v902_v51 = vpop.f32.mrb[33].mxu1 }
 0x147   :  { %1313 = vst [vmem:[%s2328_s3 + $0x12c] sm:$0xff] %v1513_v44  ;;  %1314 = vst [vmem:[%s2328_s3 + $0x134] sm:$0xff] %v1514_v45  ;;  %v871_v52 = vpop.f32.mrb[34].mxu0  ;;  %v903_v53 = vpop.f32.mrb[34].mxu1 }
 0x148   :  { %v935_v54 = vmax.f32 %v869_v48, 0.0  ;;  %v975_v55 = vmax.f32 %v901_v49, 0.0  ;;  %v872_v59 = vadd.f32 %v871_v52, %v2055_v30  ;;  %v904_v29 = vadd.f32 %v903_v53, %v2139_v26  ;;  %v873_v60 = vpop.f32.mrb[35].mxu0  ;;  %v905_v1 = vpop.f32.mrb[35].mxu1 }
 0x14a   :  { %v1470_v63 = vpack.c.bf16 %v935_v54, %v935_v54  ;;  %v1494_v0 = vpack.c.bf16 %v975_v55, %v975_v55  ;;  %v940_v2 = vmax.f32 %v872_v59, 0.0  ;;  %v980_v3 = vmax.f32 %v904_v29, 0.0 }
 0x14c   :  { %1270 = vst.msk [vmem:[%s2328_s3 + $0x10] sm:$0xf] %vm1269_vm1, %v1470_v63  ;;  %1294 = vst.msk [vmem:[%s2328_s3 + $0xb0] sm:$0xf] %vm1269_vm1, %v1494_v0  ;;  %v1473_v30 = vpack.c.bf16 %v940_v2, %v940_v2  ;;  %v1497_v4 = vpack.c.bf16 %v980_v3, %v980_v3 }
 0x14d   :  { %v876_v26 = vpop.f32.mrb[36].mxu0  ;;  %v908_v5 = vpop.f32.mrb[36].mxu1 }
 0x14e   :  { %1273 = vst.msk [vmem:[%s2328_s3 + $0x24] sm:$0xf] %vm1269_vm1, %v1473_v30  ;;  %1297 = vst.msk [vmem:[%s2328_s3 + $0xc4] sm:$0xf] %vm1269_vm1, %v1497_v4  ;;  %v877_v8 = vadd.f32 %v876_v26, %v2057_v31  ;;  %v909_v9 = vadd.f32 %v908_v5, %v2161_v61  ;;  %v878_v10 = vpop.f32.mrb[37].mxu0  ;;  %v910_v11 = vpop.f32.mrb[37].mxu1 }
 0x14f   :  { %v879_v12 = vpop.f32.mrb[38].mxu0  ;;  %v911_v13 = vpop.f32.mrb[38].mxu1 }
 0x150   :  { %v945_v14 = vmax.f32 %v877_v8, 0.0  ;;  %v985_v15 = vmax.f32 %v909_v9, 0.0  ;;  %v880_v16 = vadd.f32 %v879_v12, %v2067_v58  ;;  %v912_v17 = vadd.f32 %v911_v13, %v2163_v62  ;;  %v881_v18 = vpop.f32.mrb[39].mxu0  ;;  %v913_v19 = vpop.f32.mrb[39].mxu1 }
 0x152   :  { %v1476_v20 = vpack.c.bf16 %v945_v14, %v945_v14  ;;  %v1500_v21 = vpack.c.bf16 %v985_v15, %v985_v15  ;;  %v950_v22 = vmax.f32 %v880_v16, 0.0  ;;  %v990_v23 = vmax.f32 %v912_v17, 0.0 }
 0x154   :  { %1276 = vst.msk [vmem:[%s2328_s3 + $0x38] sm:$0xf] %vm1269_vm1, %v1476_v20  ;;  %1300 = vst.msk [vmem:[%s2328_s3 + $0xd8] sm:$0xf] %vm1269_vm1, %v1500_v21  ;;  %v1479_v31 = vpack.c.bf16 %v950_v22, %v950_v22  ;;  %v1503_v58 = vpack.c.bf16 %v990_v23, %v990_v23 }
 0x155   :  { %v884_v61 = vpop.f32.mrb[40].mxu0  ;;  %v916_v62 = vpop.f32.mrb[40].mxu1 }
 0x156   :  { %1279 = vst.msk [vmem:[%s2328_s3 + $0x4c] sm:$0xf] %vm1269_vm1, %v1479_v31  ;;  %1303 = vst.msk [vmem:[%s2328_s3 + $0xec] sm:$0xf] %vm1269_vm1, %v1503_v58  ;;  %v885_v27 = vadd.f32 %v884_v61, %v2089_v24  ;;  %v917_v28 = vadd.f32 %v916_v62, %v2185_v34  ;;  %v886_v32 = vpop.f32.mrb[41].mxu0  ;;  %v918_v33 = vpop.f32.mrb[41].mxu1 }
 0x157   :  { %v887_v36 = vpop.f32.mrb[42].mxu0  ;;  %v919_v37 = vpop.f32.mrb[42].mxu1 }
 0x158   :  { %v955_v38 = vmax.f32 %v885_v27, 0.0  ;;  %v995_v39 = vmax.f32 %v917_v28, 0.0  ;;  %v888_v40 = vadd.f32 %v887_v36, %v2091_v25  ;;  %v920_v41 = vadd.f32 %v919_v37, %v2187_v35  ;;  %v889_v42 = vpop.f32.mrb[43].mxu0  ;;  %v921_v43 = vpop.f32.mrb[43].mxu1 }
 0x15a   :  { %v1482_v44 = vpack.c.bf16 %v955_v38, %v955_v38  ;;  %v1506_v45 = vpack.c.bf16 %v995_v39, %v995_v39  ;;  %v960_v46 = vmax.f32 %v888_v40, 0.0  ;;  %v1000_v47 = vmax.f32 %v920_v41, 0.0 }
 0x15c   :  { %1282 = vst.msk [vmem:[%s2328_s3 + $0x60] sm:$0xf] %vm1269_vm1, %v1482_v44  ;;  %1306 = vst.msk [vmem:[%s2328_s3 + $0x100] sm:$0xf] %vm1269_vm1, %v1506_v45  ;;  %v1485_v24 = vpack.c.bf16 %v960_v46, %v960_v46  ;;  %v1509_v25 = vpack.c.bf16 %v1000_v47, %v1000_v47 }
 0x15d   :  { %v892_v34 = vpop.f32.mrb[44].mxu0  ;;  %v924_v35 = vpop.f32.mrb[44].mxu1 }
 0x15e   :  { %1285 = vst.msk [vmem:[%s2328_s3 + $0x74] sm:$0xf] %vm1269_vm1, %v1485_v24  ;;  %1309 = vst.msk [vmem:[%s2328_s3 + $0x114] sm:$0xf] %vm1269_vm1, %v1509_v25  ;;  %v893_v48 = vadd.f32 %v892_v34, %v2113_v56  ;;  %v925_v49 = vadd.f32 %v924_v35, %v2209_v6  ;;  %v894_v50 = vpop.f32.mrb[45].mxu0  ;;  %v926_v51 = vpop.f32.mrb[45].mxu1 }
 0x15f   :  { %v895_v52 = vpop.f32.mrb[46].mxu0  ;;  %v927_v53 = vpop.f32.mrb[46].mxu1 }
 0x160   :  { %v965_v54 = vmax.f32 %v893_v48, 0.0  ;;  %v1005_v55 = vmax.f32 %v925_v49, 0.0  ;;  %v896_v59 = vadd.f32 %v895_v52, %v2115_v57  ;;  %v928_v29 = vadd.f32 %v927_v53, %v2211_v7  ;;  %v897_v60 = vpop.f32.mrb[47].mxu0  ;;  %v929_v1 = vpop.f32.mrb[47].mxu1 }
 0x162   :  { %v1488_v63 = vpack.c.bf16 %v965_v54, %v965_v54  ;;  %v1512_v0 = vpack.c.bf16 %v1005_v55, %v1005_v55  ;;  %v970_v2 = vmax.f32 %v896_v59, 0.0  ;;  %v1010_v3 = vmax.f32 %v928_v29, 0.0 }
 0x164   :  { %1288 = vst.msk [vmem:[%s2328_s3 + $0x88] sm:$0xf] %vm1269_vm1, %v1488_v63  ;;  %1312 = vst.msk [vmem:[%s2328_s3 + $0x128] sm:$0xf] %vm1269_vm1, %v1512_v0  ;;  %v1491_v56 = vpack.c.bf16 %v970_v2, %v970_v2  ;;  %v1515_v57 = vpack.c.bf16 %v1010_v3, %v1010_v3 }
 0x166   :  { %1291 = vst.msk [vmem:[%s2328_s3 + $0x9c] sm:$0xf] %vm1269_vm1, %v1491_v56  ;;  %1315 = vst.msk [vmem:[%s2328_s3 + $0x13c] sm:$0xf] %vm1269_vm1, %v1515_v57 }

// kernel: a3c_lstm_ga_forward.5
= control target key start
LH: loop header
LB: loop body
LE: loop exit
PB: predicated region body
PF: predicated region fallthrough
CT: control target
= control target key end

     0   :  { %v2703_v6 = vmov 0   ;;  %vm2031_vm0 = vcmask 814080   ;;  %s3389_s1 = inlined_call_operand.vmem [shape: bf16[2048,100], index: 1, kind: input, shape index: {}]   ;;  %s3390_s0 = inlined_call_operand.vmem [shape: bf16[64,2048], index: 0, kind: input, shape index: {}]   ;;  %s3391_s2 = inlined_call_operand.vmem [shape: f32[64,1], index: 2, kind: input, shape index: {}]   ;;  %s3392_s3 = inlined_call_operand.vmem [shape: bf16[64,100], index: 3, kind: output, shape index: {}]  }
   0x1   :  { %v2575_v0 = vld [vmem:[%s3389_s1 + $0x40] sm:$0xff]   ;;  %v2579_v4 = vld [vmem:[%s3389_s1 + $0x48] sm:$0xff]   ;;  %2573 = vset.pattern.permute.xlu0 %v2703_v6  ;;  %2574 = vset.pattern.permute.xlu1 %v2703_v6  ;;  %v2583_v9 = vld [vmem:[%s3389_s1 + $0x50] sm:$0xff]  }
   0x2   :  { %v2576_v1 = vld [vmem:[%s3389_s1 + $0xc0] sm:$0xff]   ;;  %2252 = vmatprep.subr.bf16.mxu0 %v2575_v0  ;;  %v2580_v5 = vld [vmem:[%s3389_s1 + $0xc8] sm:$0xff]   ;;  %v2584_v10 = vld [vmem:[%s3389_s1 + $0xd0] sm:$0xff]  }
   0x3   :  { %v2577_v2 = vld [vmem:[%s3389_s1] sm:$0xff]   ;;  %2292 = vmatprep.subr.bf16.mxu1 %v2576_v1  ;;  %v2581_v7 = vld [vmem:[%s3389_s1 + $0x8] sm:$0xff]   ;;  %v2585_v11 = vld [vmem:[%s3389_s1 + $0x10] sm:$0xff]  }
   0x4   :  { %v2578_v3 = vld [vmem:[%s3389_s1 + $0x80] sm:$0xff]   ;;  %2253 = vmatpush3.bf16.msra.mxu0 %v2577_v2  ;;  %v2582_v8 = vld [vmem:[%s3389_s1 + $0x88] sm:$0xff]   ;;  %v2586_v12 = vld [vmem:[%s3389_s1 + $0x90] sm:$0xff]  }
   0x5   :  { %2293 = vmatpush3.bf16.msra.mxu1 %v2578_v3  ;;  %2254 = vmatprep.subr.bf16.mxu0 %v2579_v4  ;;  %v2587_v13 = vld [vmem:[%s3389_s1 + $0x58] sm:$0xff]   ;;  %v2591_v17 = vld [vmem:[%s3389_s1 + $0x60] sm:$0xff]   ;;  %v2595_v21 = vld [vmem:[%s3389_s1 + $0x68] sm:$0xff]  }
   0x6   :  { %2294 = vmatprep.subr.bf16.mxu1 %v2580_v5  ;;  %v2588_v14 = vld [vmem:[%s3389_s1 + $0xd8] sm:$0xff]   ;;  %v2592_v18 = vld [vmem:[%s3389_s1 + $0xe0] sm:$0xff]   ;;  %v2596_v22 = vld [vmem:[%s3389_s1 + $0xe8] sm:$0xff]  }
   0x7   :  { %v2589_v15 = vld [vmem:[%s3389_s1 + $0x18] sm:$0xff]   ;;  %v2593_v19 = vld [vmem:[%s3389_s1 + $0x20] sm:$0xff]   ;;  %v2597_v23 = vld [vmem:[%s3389_s1 + $0x28] sm:$0xff]  }
   0x8   :  { %2255 = vmatpush3.bf16.msra.mxu0 %v2581_v7  ;;  %v2590_v16 = vld [vmem:[%s3389_s1 + $0x98] sm:$0xff]   ;;  %v2594_v20 = vld [vmem:[%s3389_s1 + $0xa0] sm:$0xff]   ;;  %v2598_v24 = vld [vmem:[%s3389_s1 + $0xa8] sm:$0xff]  }
   0x9   :  { %2295 = vmatpush3.bf16.msra.mxu1 %v2582_v8  ;;  %2256 = vmatprep.subr.bf16.mxu0 %v2583_v9  ;;  %v2599_v25 = vld [vmem:[%s3389_s1 + $0x70] sm:$0xff]   ;;  %v2603_v29 = vld [vmem:[%s3389_s1 + $0x78] sm:$0xff]   ;;  %v15_v33 = vld [vmem:[%s3390_s0] sm:$0xff] }
   0xa   :  { %2296 = vmatprep.subr.bf16.mxu1 %v2584_v10  ;;  %v2600_v26 = vld [vmem:[%s3389_s1 + $0xf0] sm:$0xff]   ;;  %v2604_v30 = vld [vmem:[%s3389_s1 + $0xf8] sm:$0xff]   ;;  %v23_v34 = vld [vmem:[%s3390_s0 + $0x40] sm:$0xff] }
   0xb   :  { %v2601_v27 = vld [vmem:[%s3389_s1 + $0x30] sm:$0xff]   ;;  %v2605_v31 = vld [vmem:[%s3389_s1 + $0x38] sm:$0xff]   ;;  %v16_v35 = vld [vmem:[%s3390_s0 + $0x8] sm:$0xff]  ;;  %v2044_v36 = vcombine.low %v15_v33, %v23_v34  ;;  %v2045_v37 = vcombine.high %v15_v33, %v23_v34 }
   0xc   :  { %2257 = vmatpush3.bf16.msra.mxu0 %v2585_v11  ;;  %v2602_v28 = vld [vmem:[%s3389_s1 + $0xb0] sm:$0xff]   ;;  %v2606_v32 = vld [vmem:[%s3389_s1 + $0xb8] sm:$0xff]   ;;  %v24_v38 = vld [vmem:[%s3390_s0 + $0x48] sm:$0xff] }
   0xd   :  { %2297 = vmatpush3.bf16.msra.mxu1 %v2586_v12  ;;  %2258 = vmatprep.subr.bf16.mxu0 %v2587_v13  ;;  %v2046_v39 = vcombine.low %v16_v35, %v24_v38  ;;  %v2047_v40 = vcombine.high %v16_v35, %v24_v38  ;;  %v2607_v41 = vld [vmem:[%s3389_s1 + $0x140] sm:$0xff]   ;;  %v2611_v45 = vld [vmem:[%s3389_s1 + $0x148] sm:$0xff]   ;;  %v2615_v57 = vld [vmem:[%s3389_s1 + $0x150] sm:$0xff]  }
   0xe   :  { %2298 = vmatprep.subr.bf16.mxu1 %v2588_v14  ;;  %1503 = vmatprep.mubr.bf16.mxu0 %v2045_v37  ;;  %v2608_v42 = vld [vmem:[%s3389_s1 + $0x1c0] sm:$0xff]   ;;  %v2612_v46 = vld [vmem:[%s3389_s1 + $0x1c8] sm:$0xff]   ;;  %v2616_v58 = vld [vmem:[%s3389_s1 + $0x1d0] sm:$0xff]  }
   0xf   :  { %1568 = vmatprep.mubr.bf16.mxu1 %v2047_v40  ;;  %v2609_v43 = vld [vmem:[%s3389_s1 + $0x100] sm:$0xff]   ;;  %v2613_v47 = vld [vmem:[%s3389_s1 + $0x108] sm:$0xff]   ;;  %v2617_v59 = vld [vmem:[%s3389_s1 + $0x110] sm:$0xff]  }
  0x10   :  { %2259 = vmatpush3.bf16.msra.mxu0 %v2589_v15  ;;  %v2610_v44 = vld [vmem:[%s3389_s1 + $0x180] sm:$0xff]   ;;  %v2614_v48 = vld [vmem:[%s3389_s1 + $0x188] sm:$0xff]   ;;  %v2618_v60 = vld [vmem:[%s3389_s1 + $0x190] sm:$0xff]  }
  0x11   :  { %2299 = vmatpush3.bf16.msra.mxu1 %v2590_v16  ;;  %2260 = vmatprep.subr.bf16.mxu0 %v2591_v17  ;;  %v31_v49 = vld [vmem:[%s3390_s0 + $0x80] sm:$0xff]  ;;  %v32_v52 = vld [vmem:[%s3390_s0 + $0x88] sm:$0xff]  ;;  %v2619_v61 = vld [vmem:[%s3389_s1 + $0x158] sm:$0xff]  }
  0x12   :  { %2300 = vmatprep.subr.bf16.mxu1 %v2592_v18  ;;  %v39_v50 = vld [vmem:[%s3390_s0 + $0xc0] sm:$0xff]  ;;  %v40_v53 = vld [vmem:[%s3390_s0 + $0xc8] sm:$0xff]  ;;  %v2620_v62 = vld [vmem:[%s3389_s1 + $0x1d8] sm:$0xff]  }
  0x13   :  { %v2061_v51 = vcombine.high %v31_v49, %v39_v50  ;;  %v2060_v54 = vcombine.low %v31_v49, %v39_v50  ;;  %v2063_v55 = vcombine.high %v32_v52, %v40_v53  ;;  %v2062_v56 = vcombine.low %v32_v52, %v40_v53  ;;  %v2621_v63 = vld [vmem:[%s3389_s1 + $0x118] sm:$0xff]   ;;  %v47_v1 = vld [vmem:[%s3390_s0 + $0x100] sm:$0xff]  ;;  %v48_v3 = vld [vmem:[%s3390_s0 + $0x108] sm:$0xff] }
  0x14   :  { %2261 = vmatpush3.bf16.msra.mxu0 %v2593_v19  ;;  %v2622_v0 = vld [vmem:[%s3389_s1 + $0x198] sm:$0xff]   ;;  %v55_v2 = vld [vmem:[%s3390_s0 + $0x140] sm:$0xff]  ;;  %v56_v4 = vld [vmem:[%s3390_s0 + $0x148] sm:$0xff] }
  0x15   :  { %2301 = vmatpush3.bf16.msra.mxu1 %v2594_v20  ;;  %2262 = vmatprep.subr.bf16.mxu0 %v2595_v21  ;;  %v2077_v5 = vcombine.high %v47_v1, %v55_v2  ;;  %v2079_v6 = vcombine.high %v48_v3, %v56_v4  ;;  %v2076_v7 = vcombine.low %v47_v1, %v55_v2  ;;  %v2623_v9 = vld [vmem:[%s3389_s1 + $0x160] sm:$0xff]   ;;  %v2627_v13 = vld [vmem:[%s3389_s1 + $0x168] sm:$0xff]   ;;  %v17_v33 = vld [vmem:[%s3390_s0 + $0x10] sm:$0xff] }
  0x16   :  { %2302 = vmatprep.subr.bf16.mxu1 %v2596_v22  ;;  %v2078_v8 = vcombine.low %v48_v3, %v56_v4  ;;  %v2624_v10 = vld [vmem:[%s3389_s1 + $0x1e0] sm:$0xff]   ;;  %v2628_v14 = vld [vmem:[%s3389_s1 + $0x1e8] sm:$0xff]   ;;  %v25_v34 = vld [vmem:[%s3390_s0 + $0x50] sm:$0xff] }
  0x17   :  { %v2625_v11 = vld [vmem:[%s3389_s1 + $0x120] sm:$0xff]   ;;  %v2629_v15 = vld [vmem:[%s3389_s1 + $0x128] sm:$0xff]   ;;  %v2048_v35 = vcombine.low %v17_v33, %v25_v34  ;;  %v18_v37 = vld [vmem:[%s3390_s0 + $0x18] sm:$0xff] }
  0x18   :  { %2263 = vmatpush3.bf16.msra.mxu0 %v2597_v23  ;;  %v2626_v12 = vld [vmem:[%s3389_s1 + $0x1a0] sm:$0xff]   ;;  %v2630_v16 = vld [vmem:[%s3389_s1 + $0x1a8] sm:$0xff]   ;;  %v26_v38 = vld [vmem:[%s3390_s0 + $0x58] sm:$0xff] }
  0x19   :  { %2303 = vmatpush3.bf16.msra.mxu1 %v2598_v24  ;;  %2264 = vmatprep.subr.bf16.mxu0 %v2599_v25  ;;  %v63_v17 = vld [vmem:[%s3390_s0 + $0x180] sm:$0xff]  ;;  %v64_v19 = vld [vmem:[%s3390_s0 + $0x188] sm:$0xff]  ;;  %v2631_v25 = vld [vmem:[%s3389_s1 + $0x170] sm:$0xff]   ;;  %v2051_v40 = vcombine.high %v18_v37, %v26_v38 }
  0x1a   :  { %2304 = vmatprep.subr.bf16.mxu1 %v2600_v26  ;;  %v71_v18 = vld [vmem:[%s3390_s0 + $0x1c0] sm:$0xff]  ;;  %v72_v21 = vld [vmem:[%s3390_s0 + $0x1c8] sm:$0xff]  ;;  %v2632_v26 = vld [vmem:[%s3389_s1 + $0x1f0] sm:$0xff]  }
  0x1b   :  { %v2093_v20 = vcombine.high %v63_v17, %v71_v18  ;;  %v2092_v22 = vcombine.low %v63_v17, %v71_v18  ;;  %v2095_v23 = vcombine.high %v64_v19, %v72_v21  ;;  %v2094_v24 = vcombine.low %v64_v19, %v72_v21  ;;  %v33_v49 = vld [vmem:[%s3390_s0 + $0x90] sm:$0xff]  ;;  %v42_v52 = vld [vmem:[%s3390_s0 + $0xd8] sm:$0xff] }
  0x1c   :  { %2265 = vmatpush3.bf16.msra.mxu0 %v2601_v27  ;;  %v2633_v27 = vld [vmem:[%s3389_s1 + $0x130] sm:$0xff]   ;;  %v50_v3 = vld [vmem:[%s3390_s0 + $0x118] sm:$0xff] }
  0x1d   :  { %2305 = vmatpush3.bf16.msra.mxu1 %v2602_v28  ;;  %2266 = vmatprep.subr.bf16.mxu0 %v2603_v29  ;;  %v2634_v28 = vld [vmem:[%s3389_s1 + $0x1b0] sm:$0xff]   ;;  %v2635_v29 = vld [vmem:[%s3389_s1 + $0x178] sm:$0xff]  }
  0x1e   :  { %2306 = vmatprep.subr.bf16.mxu1 %v2604_v30  ;;  %v2636_v30 = vld [vmem:[%s3389_s1 + $0x1f8] sm:$0xff]   ;;  %v41_v50 = vld [vmem:[%s3390_s0 + $0xd0] sm:$0xff] }
  0x1f   :  { %v2065_v53 = vcombine.high %v33_v49, %v41_v50  ;;  %v49_v1 = vld [vmem:[%s3390_s0 + $0x110] sm:$0xff]  ;;  %v74_v21 = vld [vmem:[%s3390_s0 + $0x1d8] sm:$0xff] }
  0x20   :  { %2267 = vmatpush3.bf16.msra.mxu0 %v2605_v31  ;;  %v2637_v31 = vld [vmem:[%s3389_s1 + $0x138] sm:$0xff]   ;;  %v57_v2 = vld [vmem:[%s3390_s0 + $0x150] sm:$0xff] }
  0x21   :  { %2307 = vmatpush3.bf16.msra.mxu1 %v2606_v32  ;;  %2332 = vmatprep.subr.bf16.mxu0 %v2607_v41  ;;  %v2638_v32 = vld [vmem:[%s3389_s1 + $0x1b8] sm:$0xff]   ;;  %v2639_v41 = vld [vmem:[%s3389_s1 + $0x240] sm:$0xff]   ;;  %v2081_v4 = vcombine.high %v49_v1, %v57_v2  ;;  %v65_v17 = vld [vmem:[%s3390_s0 + $0x190] sm:$0xff] }
  0x22   :  { %2372 = vmatprep.subr.bf16.mxu1 %v2608_v42  ;;  %v2640_v42 = vld [vmem:[%s3389_s1 + $0x2c0] sm:$0xff]   ;;  %v73_v18 = vld [vmem:[%s3390_s0 + $0x1d0] sm:$0xff] }
  0x23   :  { %1504 = vmatmul.mubr.bf16.vlgmr.msra.gmra.mrb[0].mxu0 %v2044_v36  ;;  %v2049_v36 = vcombine.high %v17_v33, %v25_v34  ;;  %v2097_v19 = vcombine.high %v65_v17, %v73_v18  ;;  %v19_v33 = vld [vmem:[%s3390_s0 + $0x20] sm:$0xff] }
  0x24   :  { %1569 = vmatmul.mubr.bf16.vlgmr.msra.gmra.mrb[0].mxu1 %v2046_v39  ;;  %2333 = vmatpush3.bf16.msra.mxu0 %v2609_v43  ;;  %v2050_v39 = vcombine.low %v18_v37, %v26_v38  ;;  %v2641_v43 = vld [vmem:[%s3389_s1 + $0x200] sm:$0xff]  }
  0x25   :  { %2373 = vmatpush3.bf16.msra.mxu1 %v2610_v44  ;;  %2334 = vmatprep.subr.bf16.mxu0 %v2611_v45  ;;  %v2642_v44 = vld [vmem:[%s3389_s1 + $0x280] sm:$0xff]   ;;  %v2643_v45 = vld [vmem:[%s3389_s1 + $0x248] sm:$0xff]  }
  0x26   :  { %2374 = vmatprep.subr.bf16.mxu1 %v2612_v46  ;;  %1511 = vmatprep.mubr.bf16.mxu0 %v2061_v51  ;;  %v2644_v46 = vld [vmem:[%s3389_s1 + $0x2c8] sm:$0xff]   ;;  %v34_v51 = vld [vmem:[%s3390_s0 + $0x98] sm:$0xff]  ;;  %v27_v34 = vld [vmem:[%s3390_s0 + $0x60] sm:$0xff] }
  0x27   :  { %1576 = vmatprep.mubr.bf16.mxu1 %v2063_v55  ;;  %v2064_v55 = vcombine.low %v33_v49, %v41_v50  ;;  %v2052_v37 = vcombine.low %v19_v33, %v27_v34  ;;  %v2053_v38 = vcombine.high %v19_v33, %v27_v34  ;;  %v35_v49 = vld [vmem:[%s3390_s0 + $0xa0] sm:$0xff]  ;;  %v337_v33 = vld [vmem:[%s3391_s2 + $0x10] sm:$0xff]  ;;  %v2701_v34 = vld [vmem:[%s3389_s1 + $0x338] sm:$0xff]  }
  0x28   :  { %2335 = vmatpush3.bf16.msra.mxu0 %v2613_v47  ;;  %v2645_v47 = vld [vmem:[%s3389_s1 + $0x208] sm:$0xff]   ;;  %v43_v50 = vld [vmem:[%s3390_s0 + $0xe0] sm:$0xff]  ;;  %355 = vperm.xlu1 %2574, %v337_v33  }
  0x29   :  { %2375 = vmatpush3.bf16.msra.mxu1 %v2614_v48  ;;  %2336 = vmatprep.subr.bf16.mxu0 %v2615_v57  ;;  %v2646_v48 = vld [vmem:[%s3389_s1 + $0x288] sm:$0xff]   ;;  %v2647_v57 = vld [vmem:[%s3389_s1 + $0x250] sm:$0xff]  }
  0x2a   :  { %2376 = vmatprep.subr.bf16.mxu1 %v2616_v58  ;;  %v2648_v58 = vld [vmem:[%s3389_s1 + $0x2d0] sm:$0xff]  }
  0x2b   :  { %1512 = vmatmul.mubr.bf16.gmra.mrb[4].mxu0 %v2060_v54  ;;  %v2067_v54 = vcombine.high %v34_v51, %v42_v52 }
  0x2c   :  { %1577 = vmatmul.mubr.bf16.gmra.mrb[4].mxu1 %v2062_v56  ;;  %2337 = vmatpush3.bf16.msra.mxu0 %v2617_v59  ;;  %v2066_v56 = vcombine.low %v34_v51, %v42_v52  ;;  %v2649_v59 = vld [vmem:[%s3389_s1 + $0x210] sm:$0xff]   ;;  %v36_v51 = vld [vmem:[%s3390_s0 + $0xa8] sm:$0xff]  ;;  %v2069_v52 = vcombine.high %v35_v49, %v43_v50 }
  0x2d   :  { %2377 = vmatpush3.bf16.msra.mxu1 %v2618_v60  ;;  %2338 = vmatprep.subr.bf16.mxu0 %v2619_v61  ;;  %v2650_v60 = vld [vmem:[%s3389_s1 + $0x290] sm:$0xff]   ;;  %v2651_v61 = vld [vmem:[%s3389_s1 + $0x258] sm:$0xff]  }
  0x2e   :  { %2378 = vmatprep.subr.bf16.mxu1 %v2620_v62  ;;  %1519 = vmatprep.mubr.bf16.mxu0 %v2077_v5  ;;  %v2652_v62 = vld [vmem:[%s3389_s1 + $0x2d8] sm:$0xff]  }
  0x2f   :  { %1584 = vmatprep.mubr.bf16.mxu1 %v2079_v6  ;;  %v58_v5 = vld [vmem:[%s3390_s0 + $0x158] sm:$0xff]  ;;  %v2080_v6 = vcombine.low %v49_v1, %v57_v2  ;;  %v51_v1 = vld [vmem:[%s3390_s0 + $0x120] sm:$0xff] }
  0x30   :  { %2339 = vmatpush3.bf16.msra.mxu0 %v2621_v63  ;;  %v2653_v63 = vld [vmem:[%s3389_s1 + $0x218] sm:$0xff]   ;;  %v59_v2 = vld [vmem:[%s3390_s0 + $0x160] sm:$0xff] }
  0x31   :  { %2379 = vmatpush3.bf16.msra.mxu1 %v2622_v0  ;;  %2340 = vmatprep.subr.bf16.mxu0 %v2623_v9  ;;  %v2654_v0 = vld [vmem:[%s3389_s1 + $0x298] sm:$0xff]   ;;  %v2655_v9 = vld [vmem:[%s3389_s1 + $0x260] sm:$0xff]  }
  0x32   :  { %2380 = vmatprep.subr.bf16.mxu1 %v2624_v10  ;;  %v2656_v10 = vld [vmem:[%s3389_s1 + $0x2e0] sm:$0xff]  }
  0x33   :  { %1520 = vmatmul.mubr.bf16.gmra.mrb[8].mxu0 %v2076_v7  ;;  %v2083_v7 = vcombine.high %v50_v3, %v58_v5 }
  0x34   :  { %1585 = vmatmul.mubr.bf16.gmra.mrb[8].mxu1 %v2078_v8  ;;  %2341 = vmatpush3.bf16.msra.mxu0 %v2625_v11  ;;  %v2082_v8 = vcombine.low %v50_v3, %v58_v5  ;;  %v2657_v11 = vld [vmem:[%s3389_s1 + $0x220] sm:$0xff]   ;;  %v2085_v3 = vcombine.high %v51_v1, %v59_v2  ;;  %v60_v5 = vld [vmem:[%s3390_s0 + $0x168] sm:$0xff] }
  0x35   :  { %2381 = vmatpush3.bf16.msra.mxu1 %v2626_v12  ;;  %2342 = vmatprep.subr.bf16.mxu0 %v2627_v13  ;;  %v2658_v12 = vld [vmem:[%s3389_s1 + $0x2a0] sm:$0xff]   ;;  %v2659_v13 = vld [vmem:[%s3389_s1 + $0x268] sm:$0xff]  }
  0x36   :  { %2382 = vmatprep.subr.bf16.mxu1 %v2628_v14  ;;  %1527 = vmatprep.mubr.bf16.mxu0 %v2093_v20  ;;  %v2660_v14 = vld [vmem:[%s3389_s1 + $0x2e8] sm:$0xff]   ;;  %v66_v20 = vld [vmem:[%s3390_s0 + $0x198] sm:$0xff] }
  0x37   :  { %1592 = vmatprep.mubr.bf16.mxu1 %v2095_v23  ;;  %v2099_v23 = vcombine.high %v66_v20, %v74_v21 }
  0x38   :  { %2343 = vmatpush3.bf16.msra.mxu0 %v2629_v15  ;;  %v2661_v15 = vld [vmem:[%s3389_s1 + $0x228] sm:$0xff]  }
  0x39   :  { %2383 = vmatpush3.bf16.msra.mxu1 %v2630_v16  ;;  %2344 = vmatprep.subr.bf16.mxu0 %v2631_v25  ;;  %v2662_v16 = vld [vmem:[%s3389_s1 + $0x2a8] sm:$0xff]   ;;  %v2663_v25 = vld [vmem:[%s3389_s1 + $0x270] sm:$0xff]  }
  0x3a   :  { %2384 = vmatprep.subr.bf16.mxu1 %v2632_v26  ;;  %v2664_v26 = vld [vmem:[%s3389_s1 + $0x2f0] sm:$0xff]  }
  0x3b   :  { %1528 = vmatmul.mubr.bf16.gmra.mrb[12].mxu0 %v2092_v22  ;;  %v2096_v22 = vcombine.low %v65_v17, %v73_v18  ;;  %v2694_v17 = vld [vmem:[%s3389_s1 + $0x3a8] sm:$0xff]   ;;  %v67_v18 = vld [vmem:[%s3390_s0 + $0x1a0] sm:$0xff] }
  0x3c   :  { %1593 = vmatmul.mubr.bf16.gmra.mrb[12].mxu1 %v2094_v24  ;;  %2345 = vmatpush3.bf16.msra.mxu0 %v2633_v27  ;;  %v2098_v24 = vcombine.low %v66_v20, %v74_v21  ;;  %v2665_v27 = vld [vmem:[%s3389_s1 + $0x230] sm:$0xff]   ;;  %v68_v20 = vld [vmem:[%s3390_s0 + $0x1a8] sm:$0xff] }
  0x3d   :  { %2385 = vmatpush3.bf16.msra.mxu1 %v2634_v28  ;;  %2346 = vmatprep.subr.bf16.mxu0 %v2635_v29  ;;  %v2666_v28 = vld [vmem:[%s3389_s1 + $0x2b0] sm:$0xff]   ;;  %v2667_v29 = vld [vmem:[%s3389_s1 + $0x278] sm:$0xff]  }
  0x3e   :  { %2386 = vmatprep.subr.bf16.mxu1 %v2636_v30  ;;  %1633 = vmatprep.mubr.bf16.mxu0 %v2049_v36  ;;  %v2668_v30 = vld [vmem:[%s3389_s1 + $0x2f8] sm:$0xff]   ;;  %v28_v36 = vld [vmem:[%s3390_s0 + $0x68] sm:$0xff] }
  0x3f   :  { %1698 = vmatprep.mubr.bf16.mxu1 %v2051_v40 }
  0x40   :  { %2347 = vmatpush3.bf16.msra.mxu0 %v2637_v31  ;;  %v2669_v31 = vld [vmem:[%s3389_s1 + $0x238] sm:$0xff]  }
  0x41   :  { %2387 = vmatpush3.bf16.msra.mxu1 %v2638_v32  ;;  %2412 = vmatprep.subr.bf16.mxu0 %v2639_v41  ;;  %v2670_v32 = vld [vmem:[%s3389_s1 + $0x2b8] sm:$0xff]   ;;  %v2671_v41 = vld [vmem:[%s3389_s1 + $0x340] sm:$0xff]  }
  0x42   :  { %2452 = vmatprep.subr.bf16.mxu1 %v2640_v42  ;;  %v2672_v42 = vld [vmem:[%s3389_s1 + $0x3c0] sm:$0xff]  }
  0x43   :  { %1634 = vmatmul.mubr.bf16.vlgmr.msra.gmra.mrb[16].mxu0 %v2048_v35  ;;  %v20_v35 = vld [vmem:[%s3390_s0 + $0x28] sm:$0xff] }
  0x44   :  { %1699 = vmatmul.mubr.bf16.vlgmr.msra.gmra.mrb[16].mxu1 %v2050_v39  ;;  %2413 = vmatpush3.bf16.msra.mxu0 %v2641_v43  ;;  %v2054_v39 = vcombine.low %v20_v35, %v28_v36  ;;  %v2055_v40 = vcombine.high %v20_v35, %v28_v36  ;;  %v2673_v43 = vld [vmem:[%s3389_s1 + $0x300] sm:$0xff]   ;;  %v2702_v35 = vld [vmem:[%s3389_s1 + $0x3b8] sm:$0xff]   ;;  %v21_v36 = vld [vmem:[%s3390_s0 + $0x30] sm:$0xff] }
  0x45   :  { %2453 = vmatpush3.bf16.msra.mxu1 %v2642_v44  ;;  %2414 = vmatprep.subr.bf16.mxu0 %v2643_v45  ;;  %v2674_v44 = vld [vmem:[%s3389_s1 + $0x380] sm:$0xff]   ;;  %v2675_v45 = vld [vmem:[%s3389_s1 + $0x348] sm:$0xff]  }
  0x46   :  { %2454 = vmatprep.subr.bf16.mxu1 %v2644_v46  ;;  %1641 = vmatprep.mubr.bf16.mxu0 %v2065_v53  ;;  %v2676_v46 = vld [vmem:[%s3389_s1 + $0x3c8] sm:$0xff]  }
  0x47   :  { %1706 = vmatprep.mubr.bf16.mxu1 %v2067_v54  ;;  %v44_v53 = vld [vmem:[%s3390_s0 + $0xe8] sm:$0xff]  ;;  %v2068_v54 = vcombine.low %v35_v49, %v43_v50  ;;  %v46_v50 = vld [vmem:[%s3390_s0 + $0xf8] sm:$0xff] }
  0x48   :  { %2415 = vmatpush3.bf16.msra.mxu0 %v2645_v47  ;;  %v2677_v47 = vld [vmem:[%s3389_s1 + $0x308] sm:$0xff]  }
  0x49   :  { %2455 = vmatpush3.bf16.msra.mxu1 %v2646_v48  ;;  %2416 = vmatprep.subr.bf16.mxu0 %v2647_v57  ;;  %v2678_v48 = vld [vmem:[%s3389_s1 + $0x388] sm:$0xff]   ;;  %v2679_v57 = vld [vmem:[%s3389_s1 + $0x350] sm:$0xff]  }
  0x4a   :  { %2456 = vmatprep.subr.bf16.mxu1 %v2648_v58  ;;  %v2680_v58 = vld [vmem:[%s3389_s1 + $0x3d0] sm:$0xff]  }
  0x4b   :  { %1642 = vmatmul.mubr.bf16.gmra.mrb[20].mxu0 %v2064_v55  ;;  %v2071_v55 = vcombine.high %v36_v51, %v44_v53 }
  0x4c   :  { %1707 = vmatmul.mubr.bf16.gmra.mrb[20].mxu1 %v2066_v56  ;;  %2417 = vmatpush3.bf16.msra.mxu0 %v2649_v59  ;;  %v2070_v56 = vcombine.low %v36_v51, %v44_v53  ;;  %v2681_v59 = vld [vmem:[%s3389_s1 + $0x310] sm:$0xff]   ;;  %v340_v51 = vld [vmem:[%s3391_s2 + $0x28] sm:$0xff] }
  0x4d   :  { %2457 = vmatpush3.bf16.msra.mxu1 %v2650_v60  ;;  %2418 = vmatprep.subr.bf16.mxu0 %v2651_v61  ;;  %v2682_v60 = vld [vmem:[%s3389_s1 + $0x390] sm:$0xff]   ;;  %v2683_v61 = vld [vmem:[%s3389_s1 + $0x358] sm:$0xff]  }
  0x4e   :  { %2458 = vmatprep.subr.bf16.mxu1 %v2652_v62  ;;  %1649 = vmatprep.mubr.bf16.mxu0 %v2081_v4  ;;  %v2684_v62 = vld [vmem:[%s3389_s1 + $0x3d8] sm:$0xff]   ;;  %v52_v4 = vld [vmem:[%s3390_s0 + $0x128] sm:$0xff]  ;;  %v341_v53 = vld [vmem:[%s3391_s2 + $0x30] sm:$0xff] }
  0x4f   :  { %1714 = vmatprep.mubr.bf16.mxu1 %v2083_v7  ;;  %v2087_v7 = vcombine.high %v52_v4, %v60_v5 }
  0x50   :  { %2419 = vmatpush3.bf16.msra.mxu0 %v2653_v63  ;;  %v2685_v63 = vld [vmem:[%s3389_s1 + $0x318] sm:$0xff]  }
  0x51   :  { %2459 = vmatpush3.bf16.msra.mxu1 %v2654_v0  ;;  %2420 = vmatprep.subr.bf16.mxu0 %v2655_v9  ;;  %v2686_v0 = vld [vmem:[%s3389_s1 + $0x398] sm:$0xff]   ;;  %v2687_v9 = vld [vmem:[%s3389_s1 + $0x360] sm:$0xff]  }
  0x52   :  { %2460 = vmatprep.subr.bf16.mxu1 %v2656_v10  ;;  %v2688_v10 = vld [vmem:[%s3389_s1 + $0x3e0] sm:$0xff]  }
  0x53   :  { %1650 = vmatmul.mubr.bf16.gmra.mrb[24].mxu0 %v2080_v6  ;;  %v2084_v6 = vcombine.low %v51_v1, %v59_v2  ;;  %v70_v1 = vld [vmem:[%s3390_s0 + $0x1b8] sm:$0xff] }
  0x54   :  { %1715 = vmatmul.mubr.bf16.gmra.mrb[24].mxu1 %v2082_v8  ;;  %2421 = vmatpush3.bf16.msra.mxu0 %v2657_v11  ;;  %v2086_v8 = vcombine.low %v52_v4, %v60_v5  ;;  %v2689_v11 = vld [vmem:[%s3389_s1 + $0x320] sm:$0xff]   ;;  %v78_v2 = vld [vmem:[%s3390_s0 + $0x1f8] sm:$0xff] }
  0x55   :  { %2461 = vmatpush3.bf16.msra.mxu1 %v2658_v12  ;;  %2422 = vmatprep.subr.bf16.mxu0 %v2659_v13  ;;  %v2690_v12 = vld [vmem:[%s3389_s1 + $0x3a0] sm:$0xff]   ;;  %v2691_v13 = vld [vmem:[%s3389_s1 + $0x368] sm:$0xff]  }
  0x56   :  { %2462 = vmatprep.subr.bf16.mxu1 %v2660_v14  ;;  %1657 = vmatprep.mubr.bf16.mxu0 %v2097_v19  ;;  %v2692_v14 = vld [vmem:[%s3389_s1 + $0x3e8] sm:$0xff]   ;;  %v75_v19 = vld [vmem:[%s3390_s0 + $0x1e0] sm:$0xff] }
  0x57   :  { %1722 = vmatprep.mubr.bf16.mxu1 %v2099_v23  ;;  %v2101_v21 = vcombine.high %v67_v18, %v75_v19  ;;  %v2100_v23 = vcombine.low %v67_v18, %v75_v19 }
  0x58   :  { %2423 = vmatpush3.bf16.msra.mxu0 %v2661_v15  ;;  %v335_v15 = vld [vmem:[%s3391_s2] sm:$0xff] }
  0x59   :  { %2463 = vmatpush3.bf16.msra.mxu1 %v2662_v16  ;;  %2424 = vmatprep.subr.bf16.mxu0 %v2663_v25  ;;  %v2693_v16 = vld [vmem:[%s3389_s1 + $0x328] sm:$0xff]  }
  0x5a   :  { %2464 = vmatprep.subr.bf16.mxu1 %v2664_v26  ;;  %345 = vperm.xlu0 %2573, %v335_v15   ;;  %v2695_v26 = vld [vmem:[%s3389_s1 + $0x370] sm:$0xff]  }
  0x5b   :  { %1658 = vmatmul.mubr.bf16.gmra.mrb[28].mxu0 %v2096_v22  ;;  %v76_v22 = vld [vmem:[%s3390_s0 + $0x1e8] sm:$0xff] }
  0x5c   :  { %1723 = vmatmul.mubr.bf16.gmra.mrb[28].mxu1 %v2098_v24  ;;  %2425 = vmatpush3.bf16.msra.mxu0 %v2665_v27  ;;  %v2103_v24 = vcombine.high %v68_v20, %v76_v22  ;;  %v2102_v25 = vcombine.low %v68_v20, %v76_v22  ;;  %v2696_v27 = vld [vmem:[%s3389_s1 + $0x3f0] sm:$0xff]  }
  0x5d   :  { %2465 = vmatpush3.bf16.msra.mxu1 %v2666_v28  ;;  %2426 = vmatprep.subr.bf16.mxu0 %v2667_v29  ;;  %v336_v28 = vld [vmem:[%s3391_s2 + $0x8] sm:$0xff]  ;;  %v2697_v29 = vld [vmem:[%s3389_s1 + $0x330] sm:$0xff]  }
  0x5e   :  { %2466 = vmatprep.subr.bf16.mxu1 %v2668_v30  ;;  %1763 = vmatprep.mubr.bf16.mxu0 %v2053_v38  ;;  %v2698_v30 = vld [vmem:[%s3389_s1 + $0x3b0] sm:$0xff]   ;;  %v22_v38 = vld [vmem:[%s3390_s0 + $0x38] sm:$0xff] }
  0x5f   :  { %1828 = vmatprep.mubr.bf16.mxu1 %v2055_v40  ;;  %350 = vperm.xlu0 %2573, %v336_v28  }
  0x60   :  { %2427 = vmatpush3.bf16.msra.mxu0 %v2669_v31  ;;  %v2699_v31 = vld [vmem:[%s3389_s1 + $0x378] sm:$0xff]  }
  0x61   :  { %2467 = vmatpush3.bf16.msra.mxu1 %v2670_v32  ;;  %2492 = vmatprep.subr.bf16.mxu0 %v2671_v41  ;;  %v2700_v32 = vld [vmem:[%s3389_s1 + $0x3f8] sm:$0xff]  }
  0x62   :  { %2532 = vmatprep.subr.bf16.mxu1 %v2672_v42  ;;  %v30_v41 = vld [vmem:[%s3390_s0 + $0x78] sm:$0xff] }
  0x63   :  { %1764 = vmatmul.mubr.bf16.vlgmr.msra.gmra.mrb[32].mxu0 %v2052_v37  ;;  %v29_v37 = vld [vmem:[%s3390_s0 + $0x70] sm:$0xff]  ;;  %v338_v42 = vld [vmem:[%s3391_s2 + $0x18] sm:$0xff] }
  0x64   :  { %1829 = vmatmul.mubr.bf16.vlgmr.msra.gmra.mrb[32].mxu1 %v2054_v39  ;;  %2493 = vmatpush3.bf16.msra.mxu0 %v2673_v43  ;;  %v2056_v39 = vcombine.low %v21_v36, %v29_v37  ;;  %v2057_v40 = vcombine.high %v21_v36, %v29_v37  ;;  %v339_v43 = vld [vmem:[%s3391_s2 + $0x20] sm:$0xff] }
  0x65   :  { %2533 = vmatpush3.bf16.msra.mxu1 %v2674_v44  ;;  %2494 = vmatprep.subr.bf16.mxu0 %v2675_v45  ;;  %v2058_v44 = vcombine.low %v22_v38, %v30_v41  ;;  %v2059_v45 = vcombine.high %v22_v38, %v30_v41 }
  0x66   :  { %2534 = vmatprep.subr.bf16.mxu1 %v2676_v46  ;;  %1771 = vmatprep.mubr.bf16.mxu0 %v2069_v52  ;;  %v37_v46 = vld [vmem:[%s3390_s0 + $0xb0] sm:$0xff] }
  0x67   :  { %1836 = vmatprep.mubr.bf16.mxu1 %v2071_v55  ;;  %360 = vperm.xlu1 %2574, %v338_v42   ;;  %v61_v55 = vld [vmem:[%s3390_s0 + $0x170] sm:$0xff] }
  0x68   :  { %2495 = vmatpush3.bf16.msra.mxu0 %v2677_v47  ;;  %365 = vperm.xlu0 %2573, %v339_v43   ;;  %v45_v47 = vld [vmem:[%s3390_s0 + $0xf0] sm:$0xff] }
  0x69   :  { %2535 = vmatpush3.bf16.msra.mxu1 %v2678_v48  ;;  %2496 = vmatprep.subr.bf16.mxu0 %v2679_v57  ;;  %v38_v48 = vld [vmem:[%s3390_s0 + $0xb8] sm:$0xff]  ;;  %v2073_v49 = vcombine.high %v37_v46, %v45_v47 }
  0x6a   :  { %2536 = vmatprep.subr.bf16.mxu1 %v2680_v58  ;;  %v2075_v52 = vcombine.high %v38_v48, %v46_v50  ;;  %v62_v57 = vld [vmem:[%s3390_s0 + $0x178] sm:$0xff] }
  0x6b   :  { %1772 = vmatmul.mubr.bf16.gmra.mrb[36].mxu0 %v2068_v54  ;;  %370 = vperm.xlu1 %2574, %v340_v51   ;;  %v53_v54 = vld [vmem:[%s3390_s0 + $0x130] sm:$0xff]  ;;  %v342_v58 = vld [vmem:[%s3391_s2 + $0x38] sm:$0xff] }
  0x6c   :  { %1837 = vmatmul.mubr.bf16.gmra.mrb[36].mxu1 %v2070_v56  ;;  %2497 = vmatpush3.bf16.msra.mxu0 %v2681_v59  ;;  %v54_v56 = vld [vmem:[%s3390_s0 + $0x138] sm:$0xff]  ;;  %v2072_v59 = vcombine.low %v37_v46, %v45_v47 }
  0x6d   :  { %2537 = vmatpush3.bf16.msra.mxu1 %v2682_v60  ;;  %2498 = vmatprep.subr.bf16.mxu0 %v2683_v61  ;;  %v2074_v60 = vcombine.low %v38_v48, %v46_v50  ;;  %v2089_v61 = vcombine.high %v53_v54, %v61_v55  ;;  %v2090_v4 = vcombine.low %v54_v56, %v62_v57 }
  0x6e   :  { %2538 = vmatprep.subr.bf16.mxu1 %v2684_v62  ;;  %1779 = vmatprep.mubr.bf16.mxu0 %v2085_v3  ;;  %v2091_v62 = vcombine.high %v54_v56, %v62_v57  ;;  %v2088_v3 = vcombine.low %v53_v54, %v61_v55 }
  0x6f   :  { %1844 = vmatprep.mubr.bf16.mxu1 %v2087_v7  ;;  %375 = vperm.xlu0 %2573, %v341_v53  }
  0x70   :  { %2499 = vmatpush3.bf16.msra.mxu0 %v2685_v63  ;;  %380 = vperm.xlu1 %2574, %v342_v58   ;;  %v69_v63 = vld [vmem:[%s3390_s0 + $0x1b0] sm:$0xff] }
  0x71   :  { %2539 = vmatpush3.bf16.msra.mxu1 %v2686_v0  ;;  %2500 = vmatprep.subr.bf16.mxu0 %v2687_v9  ;;  %v77_v0 = vld [vmem:[%s3390_s0 + $0x1f0] sm:$0xff] }
  0x72   :  { %2540 = vmatprep.subr.bf16.mxu1 %v2688_v10  ;;  %v2105_v5 = vcombine.high %v69_v63, %v77_v0  ;;  %v2104_v7 = vcombine.low %v69_v63, %v77_v0 }
  0x73   :  { %1780 = vmatmul.mubr.bf16.gmra.mrb[40].mxu0 %v2084_v6  ;;  %v2107_v6 = vcombine.high %v70_v1, %v78_v2 }
  0x74   :  { %1845 = vmatmul.mubr.bf16.gmra.mrb[40].mxu1 %v2086_v8  ;;  %2501 = vmatpush3.bf16.msra.mxu0 %v2689_v11  ;;  %v2106_v8 = vcombine.low %v70_v1, %v78_v2 }
  0x75   :  { %2541 = vmatpush3.bf16.msra.mxu1 %v2690_v12  ;;  %2502 = vmatprep.subr.bf16.mxu0 %v2691_v13 }
  0x76   :  { %2542 = vmatprep.subr.bf16.mxu1 %v2692_v14  ;;  %1787 = vmatprep.mubr.bf16.mxu0 %v2101_v21 }
  0x77   :  { %1852 = vmatprep.mubr.bf16.mxu1 %v2103_v24 }
  0x78   :  { %2503 = vmatpush3.bf16.msra.mxu0 %v2693_v16 }
  0x79   :  { %2543 = vmatpush3.bf16.msra.mxu1 %v2694_v17  ;;  %2504 = vmatprep.subr.bf16.mxu0 %v2695_v26 }
  0x7a   :  { %2544 = vmatprep.subr.bf16.mxu1 %v2696_v27 }
  0x7b   :  { %1788 = vmatmul.mubr.bf16.gmra.mrb[44].mxu0 %v2100_v23 }
  0x7c   :  { %1853 = vmatmul.mubr.bf16.gmra.mrb[44].mxu1 %v2102_v25  ;;  %2505 = vmatpush3.bf16.msra.mxu0 %v2697_v29 }
  0x7d   :  { %2545 = vmatpush3.bf16.msra.mxu1 %v2698_v30  ;;  %2506 = vmatprep.subr.bf16.mxu0 %v2699_v31 }
  0x7e   :  { %2546 = vmatprep.subr.bf16.mxu1 %v2700_v32  ;;  %1893 = vmatprep.mubr.bf16.mxu0 %v2057_v40 }
  0x7f   :  { %1958 = vmatprep.mubr.bf16.mxu1 %v2059_v45 }
  0x80   :  { %2507 = vmatpush3.bf16.msra.mxu0 %v2701_v34 }
  0x81   :  { %2547 = vmatpush3.bf16.msra.mxu1 %v2702_v35 }
  0x83   :  { %1894 = vmatmul.mubr.bf16.vlgmr.msra.gmra.mrb[48].mxu0 %v2056_v39 }
  0x84   :  { %1959 = vmatmul.mubr.bf16.vlgmr.msra.gmra.mrb[48].mxu1 %v2058_v44  ;;  %1901 = vmatprep.mubr.bf16.mxu0 %v2073_v49 }
  0x85   :  { %1966 = vmatprep.mubr.bf16.mxu1 %v2075_v52 }
  0x8b   :  { %1902 = vmatmul.mubr.bf16.gmra.mrb[52].mxu0 %v2072_v59 }
  0x8c   :  { %1967 = vmatmul.mubr.bf16.gmra.mrb[52].mxu1 %v2074_v60  ;;  %1909 = vmatprep.mubr.bf16.mxu0 %v2089_v61 }
  0x8d   :  { %1974 = vmatprep.mubr.bf16.mxu1 %v2091_v62 }
  0x93   :  { %1910 = vmatmul.mubr.bf16.gmra.mrb[56].mxu0 %v2088_v3 }
  0x94   :  { %1975 = vmatmul.mubr.bf16.gmra.mrb[56].mxu1 %v2090_v4  ;;  %1917 = vmatprep.mubr.bf16.mxu0 %v2105_v5 }
  0x95   :  { %1982 = vmatprep.mubr.bf16.mxu1 %v2107_v6 }
  0x9b   :  { %1918 = vmatmul.mubr.bf16.gmra.mrb[60].mxu0 %v2104_v7 }
  0x9c   :  { %1983 = vmatmul.mubr.bf16.gmra.mrb[60].mxu1 %v2106_v8 }
  0xa7   :  { %v356_v47 = vpop.permute.xlu1 %355 }
  0xd9   :  { %v346_v30 = vpop.permute.xlu0 %345 }
  0xde   :  { %v351_v40 = vpop.permute.xlu0 %350 }
  0xe6   :  { %v361_v54 = vpop.permute.xlu1 %360 }
  0xe7   :  { %v366_v55 = vpop.permute.xlu0 %365 }
  0xea   :  { %v371_v2 = vpop.permute.xlu1 %370 }
  0xee   :  { %v376_v6 = vpop.permute.xlu0 %375 }
  0xf6   :  { %v2268_v9 = vpop.f32.mrb[0].mxu0 }
  0xf7   :  { %v2308_v10 = vpop.f32.mrb[0].mxu1  ;;  %v2269_v11 = vpop.f32.mrb[1].mxu0 }
  0xf8   :  { %v2270_v12 = vadd.f32 %v2269_v11, %v2268_v9  ;;  %v2309_v13 = vpop.f32.mrb[1].mxu1  ;;  %v2271_v14 = vpop.f32.mrb[2].mxu0 }
  0xf9   :  { %v2310_v15 = vadd.f32 %v2309_v13, %v2308_v10  ;;  %v2311_v16 = vpop.f32.mrb[2].mxu1  ;;  %v2272_v17 = vpop.f32.mrb[3].mxu0 }
  0xfa   :  { %v2273_v18 = vadd.f32 %v2272_v17, %v2271_v14  ;;  %v2312_v19 = vpop.f32.mrb[3].mxu1  ;;  %v1506_v33 = vadd.f32 %v2270_v12, %v346_v30  ;;  %v381_v14 = vpop.permute.xlu1 %380 }
  0xfb   :  { %v2313_v20 = vadd.f32 %v2312_v19, %v2311_v16 }
  0xfc   :  { %v1571_v35 = vadd.f32 %v2310_v15, %v1506_v33  ;;  %v1509_v44 = vadd.f32 %v2273_v18, %v351_v40 }
  0xfe   :  { %v2274_v21 = vpop.f32.mrb[4].mxu0  ;;  %v1574_v50 = vadd.f32 %v2313_v20, %v1509_v44 }
  0xff   :  { %v2314_v22 = vpop.f32.mrb[4].mxu1  ;;  %v2275_v23 = vpop.f32.mrb[5].mxu0 }
 0x100   :  { %v2276_v24 = vadd.f32 %v2275_v23, %v2274_v21  ;;  %v2315_v25 = vpop.f32.mrb[5].mxu1  ;;  %v2277_v26 = vpop.f32.mrb[6].mxu0 }
 0x101   :  { %v2316_v27 = vadd.f32 %v2315_v25, %v2314_v22  ;;  %v2317_v28 = vpop.f32.mrb[6].mxu1  ;;  %v2278_v29 = vpop.f32.mrb[7].mxu0 }
 0x102   :  { %v2279_v31 = vadd.f32 %v2278_v29, %v2277_v26  ;;  %v2318_v32 = vpop.f32.mrb[7].mxu1  ;;  %v1514_v51 = vadd.f32 %v2276_v24, %v356_v47 }
 0x103   :  { %v2319_v34 = vadd.f32 %v2318_v32, %v2317_v28 }
 0x104   :  { %v1579_v53 = vadd.f32 %v2316_v27, %v1514_v51  ;;  %v1517_v56 = vadd.f32 %v2279_v31, %v361_v54 }
 0x106   :  { %v2280_v36 = vpop.f32.mrb[8].mxu0  ;;  %v1582_v61 = vadd.f32 %v2319_v34, %v1517_v56 }
 0x107   :  { %v2320_v37 = vpop.f32.mrb[8].mxu1  ;;  %v2281_v38 = vpop.f32.mrb[9].mxu0 }
 0x108   :  { %v2321_v39 = vpop.f32.mrb[9].mxu1  ;;  %v2282_v41 = vadd.f32 %v2281_v38, %v2280_v36  ;;  %v2283_v43 = vpop.f32.mrb[10].mxu0 }
 0x109   :  { %v2322_v42 = vadd.f32 %v2321_v39, %v2320_v37  ;;  %v2323_v45 = vpop.f32.mrb[10].mxu1  ;;  %v2284_v46 = vpop.f32.mrb[11].mxu0 }
 0x10a   :  { %v2285_v48 = vadd.f32 %v2284_v46, %v2283_v43  ;;  %v2324_v49 = vpop.f32.mrb[11].mxu1  ;;  %v1522_v57 = vadd.f32 %v2282_v41, %v366_v55 }
 0x10b   :  { %v2325_v52 = vadd.f32 %v2324_v49, %v2323_v45 }
 0x10c   :  { %v1587_v62 = vadd.f32 %v2322_v42, %v1522_v57  ;;  %v1525_v5 = vadd.f32 %v2285_v48, %v371_v2 }
 0x10e   :  { %v2286_v58 = vpop.f32.mrb[12].mxu0  ;;  %v1590_v11 = vadd.f32 %v2325_v52, %v1525_v5 }
 0x10f   :  { %v2326_v59 = vpop.f32.mrb[12].mxu1  ;;  %v2287_v60 = vpop.f32.mrb[13].mxu0 }
 0x110   :  { %v2288_v63 = vadd.f32 %v2287_v60, %v2286_v58  ;;  %v2327_v0 = vpop.f32.mrb[13].mxu1  ;;  %v2289_v1 = vpop.f32.mrb[14].mxu0 }
 0x111   :  { %v2328_v3 = vadd.f32 %v2327_v0, %v2326_v59  ;;  %v2329_v4 = vpop.f32.mrb[14].mxu1  ;;  %v2290_v7 = vpop.f32.mrb[15].mxu0 }
 0x112   :  { %v1530_v8 = vadd.f32 %v2288_v63, %v376_v6  ;;  %v2291_v9 = vadd.f32 %v2290_v7, %v2289_v1  ;;  %v2330_v10 = vpop.f32.mrb[15].mxu1 }
 0x113   :  { %v2331_v12 = vadd.f32 %v2330_v10, %v2329_v4 }
 0x114   :  { %v1595_v13 = vadd.f32 %v2328_v3, %v1530_v8  ;;  %v1533_v15 = vadd.f32 %v2291_v9, %v381_v14 }
 0x116   :  { %v2348_v16 = vpop.f32.mrb[16].mxu0  ;;  %v1598_v17 = vadd.f32 %v2331_v12, %v1533_v15 }
 0x117   :  { %v2388_v18 = vpop.f32.mrb[16].mxu1  ;;  %v2349_v19 = vpop.f32.mrb[17].mxu0 }
 0x118   :  { %v2350_v20 = vadd.f32 %v2349_v19, %v2348_v16  ;;  %v2389_v21 = vpop.f32.mrb[17].mxu1  ;;  %v2351_v22 = vpop.f32.mrb[18].mxu0 }
 0x119   :  { %v2390_v23 = vadd.f32 %v2389_v21, %v2388_v18  ;;  %v2391_v24 = vpop.f32.mrb[18].mxu1  ;;  %v2352_v25 = vpop.f32.mrb[19].mxu0 }
 0x11a   :  { %v1636_v26 = vadd.f32 %v2350_v20, %v1571_v35  ;;  %v2353_v27 = vadd.f32 %v2352_v25, %v2351_v22  ;;  %v2392_v28 = vpop.f32.mrb[19].mxu1 }
 0x11b   :  { %v2393_v29 = vadd.f32 %v2392_v28, %v2391_v24 }
 0x11c   :  { %v1701_v30 = vadd.f32 %v2390_v23, %v1636_v26  ;;  %v1639_v31 = vadd.f32 %v2353_v27, %v1574_v50 }
 0x11e   :  { %v3324_v32 = vadd.f32 %v2393_v29, %v1639_v31  ;;  %v2354_v33 = vpop.f32.mrb[20].mxu0 }
 0x11f   :  { %v2394_v34 = vpop.f32.mrb[20].mxu1  ;;  %v2355_v36 = vpop.f32.mrb[21].mxu0 }
 0x120   :  { %v2395_v37 = vpop.f32.mrb[21].mxu1  ;;  %v2356_v38 = vadd.f32 %v2355_v36, %v2354_v33  ;;  %v2357_v40 = vpop.f32.mrb[22].mxu0 }
 0x121   :  { %v2396_v39 = vadd.f32 %v2395_v37, %v2394_v34  ;;  %v2397_v41 = vpop.f32.mrb[22].mxu1  ;;  %v2358_v42 = vpop.f32.mrb[23].mxu0 }
 0x122   :  { %v2398_v43 = vpop.f32.mrb[23].mxu1  ;;  %v1644_v44 = vadd.f32 %v2356_v38, %v1579_v53  ;;  %v2359_v45 = vadd.f32 %v2358_v42, %v2357_v40 }
 0x123   :  { %v2399_v35 = vadd.f32 %v2398_v43, %v2397_v41 }
 0x124   :  { %v1709_v46 = vadd.f32 %v2396_v39, %v1644_v44  ;;  %v1647_v47 = vadd.f32 %v2359_v45, %v1582_v61 }
 0x126   :  { %v3326_v48 = vadd.f32 %v2399_v35, %v1647_v47  ;;  %v2360_v49 = vpop.f32.mrb[24].mxu0 }
 0x127   :  { %v2400_v50 = vpop.f32.mrb[24].mxu1  ;;  %v2361_v51 = vpop.f32.mrb[25].mxu0 }
 0x128   :  { %v2362_v52 = vadd.f32 %v2361_v51, %v2360_v49  ;;  %v2401_v54 = vpop.f32.mrb[25].mxu1  ;;  %v2363_v55 = vpop.f32.mrb[26].mxu0 }
 0x129   :  { %v2402_v56 = vadd.f32 %v2401_v54, %v2400_v50  ;;  %v2403_v57 = vpop.f32.mrb[26].mxu1  ;;  %v2364_v58 = vpop.f32.mrb[27].mxu0 }
 0x12a   :  { %v1652_v59 = vadd.f32 %v2362_v52, %v1587_v62  ;;  %v2365_v60 = vadd.f32 %v2364_v58, %v2363_v55  ;;  %v2404_v63 = vpop.f32.mrb[27].mxu1 }
 0x12b   :  { %v2405_v0 = vadd.f32 %v2404_v63, %v2403_v57 }
 0x12c   :  { %v1717_v53 = vadd.f32 %v2402_v56, %v1652_v59  ;;  %v1655_v1 = vadd.f32 %v2365_v60, %v1590_v11 }
 0x12e   :  { %v3328_v2 = vadd.f32 %v2405_v0, %v1655_v1  ;;  %v2366_v61 = vpop.f32.mrb[28].mxu0 }
 0x12f   :  { %v2406_v3 = vpop.f32.mrb[28].mxu1  ;;  %v2367_v4 = vpop.f32.mrb[29].mxu0 }
 0x130   :  { %v2368_v5 = vadd.f32 %v2367_v4, %v2366_v61  ;;  %v2407_v6 = vpop.f32.mrb[29].mxu1  ;;  %v2369_v7 = vpop.f32.mrb[30].mxu0 }
 0x131   :  { %v2408_v8 = vadd.f32 %v2407_v6, %v2406_v3  ;;  %v2409_v9 = vpop.f32.mrb[30].mxu1  ;;  %v2370_v10 = vpop.f32.mrb[31].mxu0 }
 0x132   :  { %v1660_v12 = vadd.f32 %v2368_v5, %v1595_v13  ;;  %v2371_v14 = vadd.f32 %v2370_v10, %v2369_v7  ;;  %v2410_v15 = vpop.f32.mrb[31].mxu1 }
 0x133   :  { %v2411_v62 = vadd.f32 %v2410_v15, %v2409_v9 }
 0x134   :  { %v1725_v16 = vadd.f32 %v2408_v8, %v1660_v12  ;;  %v1663_v18 = vadd.f32 %v2371_v14, %v1598_v17 }
 0x136   :  { %v3330_v19 = vadd.f32 %v2411_v62, %v1663_v18  ;;  %v2428_v11 = vpop.f32.mrb[32].mxu0 }
 0x137   :  { %v2468_v20 = vpop.f32.mrb[32].mxu1  ;;  %v2429_v21 = vpop.f32.mrb[33].mxu0 }
 0x138   :  { %v2469_v22 = vpop.f32.mrb[33].mxu1  ;;  %v2430_v23 = vadd.f32 %v2429_v21, %v2428_v11  ;;  %v2431_v25 = vpop.f32.mrb[34].mxu0 }
 0x139   :  { %v2470_v24 = vadd.f32 %v2469_v22, %v2468_v20  ;;  %v2471_v26 = vpop.f32.mrb[34].mxu1  ;;  %v2432_v27 = vpop.f32.mrb[35].mxu0 }
 0x13a   :  { %v2472_v28 = vpop.f32.mrb[35].mxu1  ;;  %v1766_v29 = vadd.f32 %v2430_v23, %v1701_v30  ;;  %v2433_v31 = vadd.f32 %v2432_v27, %v2431_v25 }
 0x13b   :  { %v2473_v13 = vadd.f32 %v2472_v28, %v2471_v26 }
 0x13c   :  { %v1831_v33 = vadd.f32 %v2470_v24, %v1766_v29  ;;  %v1769_v34 = vadd.f32 %v2433_v31, %v3324_v32 }
 0x13e   :  { %v3333_v36 = vadd.f32 %v2473_v13, %v1769_v34  ;;  %v2434_v17 = vpop.f32.mrb[36].mxu0 }
 0x13f   :  { %v2474_v37 = vpop.f32.mrb[36].mxu1  ;;  %v2435_v38 = vpop.f32.mrb[37].mxu0 }
 0x140   :  { %v2436_v39 = vadd.f32 %v2435_v38, %v2434_v17  ;;  %v2475_v40 = vpop.f32.mrb[37].mxu1  ;;  %v2437_v41 = vpop.f32.mrb[38].mxu0 }
 0x141   :  { %v2476_v42 = vadd.f32 %v2475_v40, %v2474_v37  ;;  %v2477_v43 = vpop.f32.mrb[38].mxu1  ;;  %v2438_v44 = vpop.f32.mrb[39].mxu0 }
 0x142   :  { %v1774_v45 = vadd.f32 %v2436_v39, %v1709_v46  ;;  %v2439_v35 = vadd.f32 %v2438_v44, %v2437_v41  ;;  %v2478_v47 = vpop.f32.mrb[39].mxu1 }
 0x143   :  { %v2479_v30 = vadd.f32 %v2478_v47, %v2477_v43 }
 0x144   :  { %v3335_v49 = vadd.f32 %v2476_v42, %v1774_v45  ;;  %v1777_v50 = vadd.f32 %v2439_v35, %v3326_v48 }
 0x146   :  { %v3338_v32 = vadd.f32 %v2479_v30, %v1777_v50  ;;  %v2440_v51 = vpop.f32.mrb[40].mxu0 }
 0x147   :  { %v2480_v52 = vpop.f32.mrb[40].mxu1  ;;  %v2441_v54 = vpop.f32.mrb[41].mxu0 }
 0x148   :  { %v2442_v55 = vadd.f32 %v2441_v54, %v2440_v51  ;;  %v2481_v56 = vpop.f32.mrb[41].mxu1  ;;  %v2443_v57 = vpop.f32.mrb[42].mxu0 }
 0x149   :  { %v2482_v58 = vadd.f32 %v2481_v56, %v2480_v52  ;;  %v2483_v59 = vpop.f32.mrb[42].mxu1  ;;  %v2444_v60 = vpop.f32.mrb[43].mxu0 }
 0x14a   :  { %v1782_v63 = vadd.f32 %v2442_v55, %v1717_v53  ;;  %v2445_v46 = vadd.f32 %v2444_v60, %v2443_v57  ;;  %v2484_v0 = vpop.f32.mrb[43].mxu1 }
 0x14b   :  { %v2485_v1 = vadd.f32 %v2484_v0, %v2483_v59 }
 0x14c   :  { %v3340_v61 = vadd.f32 %v2482_v58, %v1782_v63  ;;  %v1785_v3 = vadd.f32 %v2445_v46, %v3328_v2 }
 0x14e   :  { %v3343_v48 = vadd.f32 %v2485_v1, %v1785_v3  ;;  %v2446_v4 = vpop.f32.mrb[44].mxu0 }
 0x14f   :  { %v2486_v5 = vpop.f32.mrb[44].mxu1  ;;  %v2447_v6 = vpop.f32.mrb[45].mxu0 }
 0x150   :  { %v2448_v7 = vadd.f32 %v2447_v6, %v2446_v4  ;;  %v2487_v8 = vpop.f32.mrb[45].mxu1  ;;  %v2449_v9 = vpop.f32.mrb[46].mxu0 }
 0x151   :  { %v2488_v10 = vadd.f32 %v2487_v8, %v2486_v5  ;;  %v2489_v12 = vpop.f32.mrb[46].mxu1  ;;  %v2450_v14 = vpop.f32.mrb[47].mxu0 }
 0x152   :  { %v1790_v15 = vadd.f32 %v2448_v7, %v1725_v16  ;;  %v2451_v53 = vadd.f32 %v2450_v14, %v2449_v9  ;;  %v2490_v62 = vpop.f32.mrb[47].mxu1 }
 0x153   :  { %v2491_v18 = vadd.f32 %v2490_v62, %v2489_v12 }
 0x154   :  { %v3345_v11 = vadd.f32 %v2488_v10, %v1790_v15  ;;  %v1793_v20 = vadd.f32 %v2451_v53, %v3330_v19 }
 0x156   :  { %v3348_v2 = vadd.f32 %v2491_v18, %v1793_v20  ;;  %v2508_v21 = vpop.f32.mrb[48].mxu0 }
 0x157   :  { %v2548_v22 = vpop.f32.mrb[48].mxu1  ;;  %v2509_v23 = vpop.f32.mrb[49].mxu0 }
 0x158   :  { %v2510_v24 = vadd.f32 %v2509_v23, %v2508_v21  ;;  %v2549_v25 = vpop.f32.mrb[49].mxu1  ;;  %v2511_v26 = vpop.f32.mrb[50].mxu0 }
 0x159   :  { %v2550_v27 = vadd.f32 %v2549_v25, %v2548_v22  ;;  %v2551_v28 = vpop.f32.mrb[50].mxu1  ;;  %v2512_v29 = vpop.f32.mrb[51].mxu0 }
 0x15a   :  { %v1896_v31 = vadd.f32 %v2510_v24, %v1831_v33  ;;  %v2513_v16 = vadd.f32 %v2512_v29, %v2511_v26  ;;  %v2552_v13 = vpop.f32.mrb[51].mxu1 }
 0x15b   :  { %v2553_v34 = vadd.f32 %v2552_v13, %v2551_v28 }
 0x15c   :  { %v1961_v17 = vadd.f32 %v2550_v27, %v1896_v31  ;;  %v1899_v37 = vadd.f32 %v2513_v16, %v3333_v36 }
 0x15e   :  { %v1991_v38 = vmax.f32 %v1961_v17, 0.0  ;;  %v1964_v19 = vadd.f32 %v2553_v34, %v1899_v37  ;;  %v2514_v39 = vpop.f32.mrb[52].mxu0 }
 0x15f   :  { %v2554_v40 = vpop.f32.mrb[52].mxu1  ;;  %v2515_v41 = vpop.f32.mrb[53].mxu0 }
 0x160   :  { %v2244_v42 = vpack.c.bf16 %v1991_v38, %v1991_v38  ;;  %v1992_v43 = vmax.f32 %v1964_v19, 0.0  ;;  %v2516_v44 = vadd.f32 %v2515_v41, %v2514_v39  ;;  %v2555_v45 = vpop.f32.mrb[53].mxu1  ;;  %v2517_v35 = vpop.f32.mrb[54].mxu0 }
 0x161   :  { %v2556_v47 = vadd.f32 %v2555_v45, %v2554_v40  ;;  %v2557_v30 = vpop.f32.mrb[54].mxu1  ;;  %v2518_v33 = vpop.f32.mrb[55].mxu0 }
 0x162   :  { %2032 = vst.msk [vmem:[%s3392_s3] sm:$0xf] %vm2031_vm0, %v2244_v42  ;;  %v2245_v36 = vpack.c.bf16 %v1992_v43, %v1992_v43  ;;  %v1904_v50 = vadd.f32 %v2516_v44, %v3335_v49  ;;  %v2519_v51 = vadd.f32 %v2518_v33, %v2517_v35  ;;  %v2558_v52 = vpop.f32.mrb[55].mxu1 }
 0x163   :  { %v2559_v54 = vadd.f32 %v2558_v52, %v2557_v30 }
 0x164   :  { %2033 = vst.msk [vmem:[%s3392_s3 + $0x4] sm:$0xf] %vm2031_vm0, %v2245_v36  ;;  %v1969_v55 = vadd.f32 %v2556_v47, %v1904_v50  ;;  %v1907_v56 = vadd.f32 %v2519_v51, %v3338_v32 }
 0x166   :  { %v1993_v57 = vmax.f32 %v1969_v55, 0.0  ;;  %v1972_v58 = vadd.f32 %v2559_v54, %v1907_v56  ;;  %v2520_v59 = vpop.f32.mrb[56].mxu0 }
 0x167   :  { %v2560_v60 = vpop.f32.mrb[56].mxu1  ;;  %v2521_v63 = vpop.f32.mrb[57].mxu0 }
 0x168   :  { %v2246_v46 = vpack.c.bf16 %v1993_v57, %v1993_v57  ;;  %v1994_v0 = vmax.f32 %v1972_v58, 0.0  ;;  %v2522_v1 = vadd.f32 %v2521_v63, %v2520_v59  ;;  %v2561_v49 = vpop.f32.mrb[57].mxu1  ;;  %v2523_v3 = vpop.f32.mrb[58].mxu0 }
 0x169   :  { %v2562_v4 = vadd.f32 %v2561_v49, %v2560_v60  ;;  %v2563_v5 = vpop.f32.mrb[58].mxu1  ;;  %v2524_v6 = vpop.f32.mrb[59].mxu0 }
 0x16a   :  { %2034 = vst.msk [vmem:[%s3392_s3 + $0x8] sm:$0xf] %vm2031_vm0, %v2246_v46  ;;  %v2247_v7 = vpack.c.bf16 %v1994_v0, %v1994_v0  ;;  %v1912_v32 = vadd.f32 %v2522_v1, %v3340_v61  ;;  %v2525_v8 = vadd.f32 %v2524_v6, %v2523_v3  ;;  %v2564_v9 = vpop.f32.mrb[59].mxu1 }
 0x16b   :  { %v2565_v10 = vadd.f32 %v2564_v9, %v2563_v5 }
 0x16c   :  { %2035 = vst.msk [vmem:[%s3392_s3 + $0xc] sm:$0xf] %vm2031_vm0, %v2247_v7  ;;  %v1977_v12 = vadd.f32 %v2562_v4, %v1912_v32  ;;  %v1915_v14 = vadd.f32 %v2525_v8, %v3343_v48 }
 0x16e   :  { %v1995_v15 = vmax.f32 %v1977_v12, 0.0  ;;  %v1980_v53 = vadd.f32 %v2565_v10, %v1915_v14  ;;  %v2526_v62 = vpop.f32.mrb[60].mxu0 }
 0x16f   :  { %v2566_v18 = vpop.f32.mrb[60].mxu1  ;;  %v2527_v20 = vpop.f32.mrb[61].mxu0 }
 0x170   :  { %v2248_v21 = vpack.c.bf16 %v1995_v15, %v1995_v15  ;;  %v1996_v22 = vmax.f32 %v1980_v53, 0.0  ;;  %v2528_v23 = vadd.f32 %v2527_v20, %v2526_v62  ;;  %v2567_v61 = vpop.f32.mrb[61].mxu1  ;;  %v2529_v24 = vpop.f32.mrb[62].mxu0 }
 0x171   :  { %v2568_v25 = vadd.f32 %v2567_v61, %v2566_v18  ;;  %v2569_v26 = vpop.f32.mrb[62].mxu1  ;;  %v2530_v27 = vpop.f32.mrb[63].mxu0 }
 0x172   :  { %2036 = vst.msk [vmem:[%s3392_s3 + $0x10] sm:$0xf] %vm2031_vm0, %v2248_v21  ;;  %v2249_v28 = vpack.c.bf16 %v1996_v22, %v1996_v22  ;;  %v1920_v48 = vadd.f32 %v2528_v23, %v3345_v11  ;;  %v2531_v29 = vadd.f32 %v2530_v27, %v2529_v24  ;;  %v2570_v31 = vpop.f32.mrb[63].mxu1 }
 0x173   :  { %v2571_v16 = vadd.f32 %v2570_v31, %v2569_v26 }
 0x174   :  { %2037 = vst.msk [vmem:[%s3392_s3 + $0x14] sm:$0xf] %vm2031_vm0, %v2249_v28  ;;  %v1985_v13 = vadd.f32 %v2568_v25, %v1920_v48  ;;  %v1923_v34 = vadd.f32 %v2531_v29, %v3348_v2 }
 0x176   :  { %v1997_v17 = vmax.f32 %v1985_v13, 0.0  ;;  %v1988_v37 = vadd.f32 %v2571_v16, %v1923_v34 }
 0x178   :  { %v2250_v38 = vpack.c.bf16 %v1997_v17, %v1997_v17  ;;  %v1998_v19 = vmax.f32 %v1988_v37, 0.0 }
 0x17a   :  { %2038 = vst.msk [vmem:[%s3392_s3 + $0x18] sm:$0xf] %vm2031_vm0, %v2250_v38  ;;  %v2251_v11 = vpack.c.bf16 %v1998_v19, %v1998_v19 }
 0x17c   :  { %2039 = vst.msk [vmem:[%s3392_s3 + $0x1c] sm:$0xf] %vm2031_vm0, %v2251_v11 }

// kernel: a3c_lstm_ga_forward.6
= control target key start
LH: loop header
LB: loop body
LE: loop exit
PB: predicated region body
PF: predicated region fallthrough
CT: control target
= control target key end

     0   :  { %v1419_v1 = vmov 0   ;;  %vm1067_vm0 = vcmask 125952   ;;  %s1808_s1 = inlined_call_operand.vmem [shape: bf16[1024,16], index: 1, kind: input, shape index: {}]   ;;  %s1809_s0 = inlined_call_operand.vmem [shape: bf16[64,1024], index: 0, kind: input, shape index: {}]   ;;  %s1810_s2 = inlined_call_operand.vmem [shape: f32[64,1], index: 2, kind: input, shape index: {}]   ;;  %s1811_s3 = inlined_call_operand.vmem [shape: bf16[64,16], index: 3, kind: output, shape index: {}]  }
   0x1   :  { %v1355_v0 = vld [vmem:[%s1808_s1 + $0x40] sm:$0xff]   ;;  %1353 = vset.pattern.permute.xlu0 %v1419_v1  ;;  %1354 = vset.pattern.permute.xlu1 %v1419_v1  ;;  %v1359_v5 = vld [vmem:[%s1808_s1 + $0x48] sm:$0xff]   ;;  %v1363_v9 = vld [vmem:[%s1808_s1 + $0x50] sm:$0xff]  }
   0x2   :  { %v1356_v2 = vld [vmem:[%s1808_s1 + $0xc0] sm:$0xff]   ;;  %1192 = vmatprep.subr.bf16.mxu0 %v1355_v0  ;;  %v1360_v6 = vld [vmem:[%s1808_s1 + $0xc8] sm:$0xff]   ;;  %v1364_v10 = vld [vmem:[%s1808_s1 + $0xd0] sm:$0xff]  }
   0x3   :  { %v1357_v3 = vld [vmem:[%s1808_s1] sm:$0xff]   ;;  %1232 = vmatprep.subr.bf16.mxu1 %v1356_v2  ;;  %v1361_v7 = vld [vmem:[%s1808_s1 + $0x8] sm:$0xff]   ;;  %v1365_v11 = vld [vmem:[%s1808_s1 + $0x10] sm:$0xff]  }
   0x4   :  { %v1358_v4 = vld [vmem:[%s1808_s1 + $0x80] sm:$0xff]   ;;  %1193 = vmatpush3.bf16.msra.mxu0 %v1357_v3  ;;  %v1362_v8 = vld [vmem:[%s1808_s1 + $0x88] sm:$0xff]   ;;  %v1366_v12 = vld [vmem:[%s1808_s1 + $0x90] sm:$0xff]  }
   0x5   :  { %1233 = vmatpush3.bf16.msra.mxu1 %v1358_v4  ;;  %1194 = vmatprep.subr.bf16.mxu0 %v1359_v5  ;;  %v1367_v13 = vld [vmem:[%s1808_s1 + $0x58] sm:$0xff]   ;;  %v1371_v17 = vld [vmem:[%s1808_s1 + $0x60] sm:$0xff]   ;;  %v1375_v21 = vld [vmem:[%s1808_s1 + $0x68] sm:$0xff]  }
   0x6   :  { %1234 = vmatprep.subr.bf16.mxu1 %v1360_v6  ;;  %v1368_v14 = vld [vmem:[%s1808_s1 + $0xd8] sm:$0xff]   ;;  %v1372_v18 = vld [vmem:[%s1808_s1 + $0xe0] sm:$0xff]   ;;  %v1376_v22 = vld [vmem:[%s1808_s1 + $0xe8] sm:$0xff]  }
   0x7   :  { %v1369_v15 = vld [vmem:[%s1808_s1 + $0x18] sm:$0xff]   ;;  %v1373_v19 = vld [vmem:[%s1808_s1 + $0x20] sm:$0xff]   ;;  %v1377_v23 = vld [vmem:[%s1808_s1 + $0x28] sm:$0xff]  }
   0x8   :  { %1195 = vmatpush3.bf16.msra.mxu0 %v1361_v7  ;;  %v1370_v16 = vld [vmem:[%s1808_s1 + $0x98] sm:$0xff]   ;;  %v1374_v20 = vld [vmem:[%s1808_s1 + $0xa0] sm:$0xff]   ;;  %v1378_v24 = vld [vmem:[%s1808_s1 + $0xa8] sm:$0xff]  }
   0x9   :  { %1235 = vmatpush3.bf16.msra.mxu1 %v1362_v8  ;;  %1196 = vmatprep.subr.bf16.mxu0 %v1363_v9  ;;  %v1379_v25 = vld [vmem:[%s1808_s1 + $0x70] sm:$0xff]   ;;  %v1383_v29 = vld [vmem:[%s1808_s1 + $0x78] sm:$0xff]   ;;  %v15_v33 = vld [vmem:[%s1809_s0] sm:$0xff] }
   0xa   :  { %1236 = vmatprep.subr.bf16.mxu1 %v1364_v10  ;;  %v1380_v26 = vld [vmem:[%s1808_s1 + $0xf0] sm:$0xff]   ;;  %v1384_v30 = vld [vmem:[%s1808_s1 + $0xf8] sm:$0xff]   ;;  %v19_v34 = vld [vmem:[%s1809_s0 + $0x20] sm:$0xff] }
   0xb   :  { %v1381_v27 = vld [vmem:[%s1808_s1 + $0x30] sm:$0xff]   ;;  %v1385_v31 = vld [vmem:[%s1808_s1 + $0x38] sm:$0xff]   ;;  %v16_v35 = vld [vmem:[%s1809_s0 + $0x8] sm:$0xff]  ;;  %v1080_v36 = vcombine.low %v15_v33, %v19_v34  ;;  %v1081_v37 = vcombine.high %v15_v33, %v19_v34 }
   0xc   :  { %1197 = vmatpush3.bf16.msra.mxu0 %v1365_v11  ;;  %v1382_v28 = vld [vmem:[%s1808_s1 + $0xb0] sm:$0xff]   ;;  %v1386_v32 = vld [vmem:[%s1808_s1 + $0xb8] sm:$0xff]   ;;  %v20_v38 = vld [vmem:[%s1809_s0 + $0x28] sm:$0xff] }
   0xd   :  { %1237 = vmatpush3.bf16.msra.mxu1 %v1366_v12  ;;  %1198 = vmatprep.subr.bf16.mxu0 %v1367_v13  ;;  %v1082_v39 = vcombine.low %v16_v35, %v20_v38  ;;  %v1083_v40 = vcombine.high %v16_v35, %v20_v38  ;;  %v1387_v41 = vld [vmem:[%s1808_s1 + $0x140] sm:$0xff]   ;;  %v1391_v45 = vld [vmem:[%s1808_s1 + $0x148] sm:$0xff]   ;;  %v1395_v57 = vld [vmem:[%s1808_s1 + $0x150] sm:$0xff]  }
   0xe   :  { %1238 = vmatprep.subr.bf16.mxu1 %v1368_v14  ;;  %799 = vmatprep.mubr.bf16.mxu0 %v1081_v37  ;;  %v1388_v42 = vld [vmem:[%s1808_s1 + $0x1c0] sm:$0xff]   ;;  %v1392_v46 = vld [vmem:[%s1808_s1 + $0x1c8] sm:$0xff]   ;;  %v1396_v58 = vld [vmem:[%s1808_s1 + $0x1d0] sm:$0xff]  }
   0xf   :  { %864 = vmatprep.mubr.bf16.mxu1 %v1083_v40  ;;  %v1389_v43 = vld [vmem:[%s1808_s1 + $0x100] sm:$0xff]   ;;  %v1393_v47 = vld [vmem:[%s1808_s1 + $0x108] sm:$0xff]   ;;  %v1397_v59 = vld [vmem:[%s1808_s1 + $0x110] sm:$0xff]  }
  0x10   :  { %1199 = vmatpush3.bf16.msra.mxu0 %v1369_v15  ;;  %v1390_v44 = vld [vmem:[%s1808_s1 + $0x180] sm:$0xff]   ;;  %v1394_v48 = vld [vmem:[%s1808_s1 + $0x188] sm:$0xff]   ;;  %v1398_v60 = vld [vmem:[%s1808_s1 + $0x190] sm:$0xff]  }
  0x11   :  { %1239 = vmatpush3.bf16.msra.mxu1 %v1370_v16  ;;  %1200 = vmatprep.subr.bf16.mxu0 %v1371_v17  ;;  %v23_v49 = vld [vmem:[%s1809_s0 + $0x40] sm:$0xff]  ;;  %v24_v52 = vld [vmem:[%s1809_s0 + $0x48] sm:$0xff]  ;;  %v1399_v61 = vld [vmem:[%s1808_s1 + $0x158] sm:$0xff]  }
  0x12   :  { %1240 = vmatprep.subr.bf16.mxu1 %v1372_v18  ;;  %v27_v50 = vld [vmem:[%s1809_s0 + $0x60] sm:$0xff]  ;;  %v28_v53 = vld [vmem:[%s1809_s0 + $0x68] sm:$0xff]  ;;  %v1400_v62 = vld [vmem:[%s1808_s1 + $0x1d8] sm:$0xff]  }
  0x13   :  { %v1089_v51 = vcombine.high %v23_v49, %v27_v50  ;;  %v1088_v54 = vcombine.low %v23_v49, %v27_v50  ;;  %v1091_v55 = vcombine.high %v24_v52, %v28_v53  ;;  %v1090_v56 = vcombine.low %v24_v52, %v28_v53  ;;  %v1401_v63 = vld [vmem:[%s1808_s1 + $0x118] sm:$0xff]   ;;  %v31_v1 = vld [vmem:[%s1809_s0 + $0x80] sm:$0xff]  ;;  %v32_v3 = vld [vmem:[%s1809_s0 + $0x88] sm:$0xff] }
  0x14   :  { %1201 = vmatpush3.bf16.msra.mxu0 %v1373_v19  ;;  %v1402_v0 = vld [vmem:[%s1808_s1 + $0x198] sm:$0xff]   ;;  %v35_v2 = vld [vmem:[%s1809_s0 + $0xa0] sm:$0xff]  ;;  %v36_v4 = vld [vmem:[%s1809_s0 + $0xa8] sm:$0xff] }
  0x15   :  { %1241 = vmatpush3.bf16.msra.mxu1 %v1374_v20  ;;  %1202 = vmatprep.subr.bf16.mxu0 %v1375_v21  ;;  %v1097_v5 = vcombine.high %v31_v1, %v35_v2  ;;  %v1099_v6 = vcombine.high %v32_v3, %v36_v4  ;;  %v1096_v7 = vcombine.low %v31_v1, %v35_v2  ;;  %v1403_v9 = vld [vmem:[%s1808_s1 + $0x160] sm:$0xff]   ;;  %v1407_v13 = vld [vmem:[%s1808_s1 + $0x168] sm:$0xff]   ;;  %v17_v33 = vld [vmem:[%s1809_s0 + $0x10] sm:$0xff] }
  0x16   :  { %1242 = vmatprep.subr.bf16.mxu1 %v1376_v22  ;;  %v1098_v8 = vcombine.low %v32_v3, %v36_v4  ;;  %v1404_v10 = vld [vmem:[%s1808_s1 + $0x1e0] sm:$0xff]   ;;  %v1408_v14 = vld [vmem:[%s1808_s1 + $0x1e8] sm:$0xff]   ;;  %v21_v34 = vld [vmem:[%s1809_s0 + $0x30] sm:$0xff] }
  0x17   :  { %v1405_v11 = vld [vmem:[%s1808_s1 + $0x120] sm:$0xff]   ;;  %v1409_v15 = vld [vmem:[%s1808_s1 + $0x128] sm:$0xff]   ;;  %v1084_v35 = vcombine.low %v17_v33, %v21_v34  ;;  %v18_v37 = vld [vmem:[%s1809_s0 + $0x18] sm:$0xff] }
  0x18   :  { %1203 = vmatpush3.bf16.msra.mxu0 %v1377_v23  ;;  %v1406_v12 = vld [vmem:[%s1808_s1 + $0x1a0] sm:$0xff]   ;;  %v1410_v16 = vld [vmem:[%s1808_s1 + $0x1a8] sm:$0xff]   ;;  %v22_v38 = vld [vmem:[%s1809_s0 + $0x38] sm:$0xff] }
  0x19   :  { %1243 = vmatpush3.bf16.msra.mxu1 %v1378_v24  ;;  %1204 = vmatprep.subr.bf16.mxu0 %v1379_v25  ;;  %v39_v17 = vld [vmem:[%s1809_s0 + $0xc0] sm:$0xff]  ;;  %v40_v19 = vld [vmem:[%s1809_s0 + $0xc8] sm:$0xff]  ;;  %v1411_v25 = vld [vmem:[%s1808_s1 + $0x170] sm:$0xff]   ;;  %v1086_v40 = vcombine.low %v18_v37, %v22_v38 }
  0x1a   :  { %1244 = vmatprep.subr.bf16.mxu1 %v1380_v26  ;;  %v43_v18 = vld [vmem:[%s1809_s0 + $0xe0] sm:$0xff]  ;;  %v44_v21 = vld [vmem:[%s1809_s0 + $0xe8] sm:$0xff]  ;;  %v1412_v26 = vld [vmem:[%s1808_s1 + $0x1f0] sm:$0xff]  }
  0x1b   :  { %v1105_v20 = vcombine.high %v39_v17, %v43_v18  ;;  %v1104_v22 = vcombine.low %v39_v17, %v43_v18  ;;  %v1107_v23 = vcombine.high %v40_v19, %v44_v21  ;;  %v1106_v24 = vcombine.low %v40_v19, %v44_v21  ;;  %v37_v49 = vld [vmem:[%s1809_s0 + $0xb0] sm:$0xff]  ;;  %v38_v52 = vld [vmem:[%s1809_s0 + $0xb8] sm:$0xff]  ;;  %v176_v53 = vld [vmem:[%s1810_s2 + $0x8] sm:$0xff] }
  0x1c   :  { %1205 = vmatpush3.bf16.msra.mxu0 %v1381_v27  ;;  %v1413_v27 = vld [vmem:[%s1808_s1 + $0x130] sm:$0xff]   ;;  %v182_v3 = vld [vmem:[%s1810_s2 + $0x38] sm:$0xff] }
  0x1d   :  { %1245 = vmatpush3.bf16.msra.mxu1 %v1382_v28  ;;  %1206 = vmatprep.subr.bf16.mxu0 %v1383_v29  ;;  %v1414_v28 = vld [vmem:[%s1808_s1 + $0x1b0] sm:$0xff]   ;;  %v1415_v29 = vld [vmem:[%s1808_s1 + $0x178] sm:$0xff]  }
  0x1e   :  { %1246 = vmatprep.subr.bf16.mxu1 %v1384_v30  ;;  %v1416_v30 = vld [vmem:[%s1808_s1 + $0x1f8] sm:$0xff]   ;;  %v177_v50 = vld [vmem:[%s1810_s2 + $0x10] sm:$0xff] }
  0x1f   :  { %195 = vperm.xlu1 %1354, %v177_v50   ;;  %v181_v1 = vld [vmem:[%s1810_s2 + $0x30] sm:$0xff] }
  0x20   :  { %1207 = vmatpush3.bf16.msra.mxu0 %v1385_v31  ;;  %v1417_v31 = vld [vmem:[%s1808_s1 + $0x138] sm:$0xff]  }
  0x21   :  { %1247 = vmatpush3.bf16.msra.mxu1 %v1386_v32  ;;  %1272 = vmatprep.subr.bf16.mxu0 %v1387_v41  ;;  %v1418_v32 = vld [vmem:[%s1808_s1 + $0x1b8] sm:$0xff]   ;;  %v1087_v41 = vcombine.high %v18_v37, %v22_v38 }
  0x22   :  { %1312 = vmatprep.subr.bf16.mxu1 %v1388_v42  ;;  %v29_v42 = vld [vmem:[%s1809_s0 + $0x70] sm:$0xff] }
  0x23   :  { %800 = vmatmul.mubr.bf16.vlgmr.msra.gmra.mrb[0].mxu0 %v1080_v36  ;;  %v1085_v36 = vcombine.high %v17_v33, %v21_v34 }
  0x24   :  { %865 = vmatmul.mubr.bf16.vlgmr.msra.gmra.mrb[0].mxu1 %v1082_v39  ;;  %1273 = vmatpush3.bf16.msra.mxu0 %v1389_v43  ;;  %v25_v39 = vld [vmem:[%s1809_s0 + $0x50] sm:$0xff]  ;;  %v26_v43 = vld [vmem:[%s1809_s0 + $0x58] sm:$0xff] }
  0x25   :  { %1313 = vmatpush3.bf16.msra.mxu1 %v1390_v44  ;;  %1274 = vmatprep.subr.bf16.mxu0 %v1391_v45  ;;  %v30_v44 = vld [vmem:[%s1809_s0 + $0x78] sm:$0xff]  ;;  %v1093_v45 = vcombine.high %v25_v39, %v29_v42 }
  0x26   :  { %1314 = vmatprep.subr.bf16.mxu1 %v1392_v46  ;;  %807 = vmatprep.mubr.bf16.mxu0 %v1089_v51  ;;  %v1095_v46 = vcombine.high %v26_v43, %v30_v44  ;;  %v34_v51 = vld [vmem:[%s1809_s0 + $0x98] sm:$0xff] }
  0x27   :  { %872 = vmatprep.mubr.bf16.mxu1 %v1091_v55  ;;  %v178_v55 = vld [vmem:[%s1810_s2 + $0x18] sm:$0xff]  ;;  %v1102_v4 = vcombine.low %v34_v51, %v38_v52 }
  0x28   :  { %1275 = vmatpush3.bf16.msra.mxu0 %v1393_v47  ;;  %v175_v47 = vld [vmem:[%s1810_s2] sm:$0xff]  ;;  %200 = vperm.xlu1 %1354, %v178_v55  }
  0x29   :  { %1315 = vmatpush3.bf16.msra.mxu1 %v1394_v48  ;;  %1276 = vmatprep.subr.bf16.mxu0 %v1395_v57  ;;  %v33_v48 = vld [vmem:[%s1809_s0 + $0x90] sm:$0xff] }
  0x2a   :  { %1316 = vmatprep.subr.bf16.mxu1 %v1396_v58  ;;  %185 = vperm.xlu0 %1353, %v175_v47   ;;  %v1101_v57 = vcombine.high %v33_v48, %v37_v49  ;;  %v1103_v58 = vcombine.high %v34_v51, %v38_v52  ;;  %v1100_v2 = vcombine.low %v33_v48, %v37_v49 }
  0x2b   :  { %808 = vmatmul.mubr.bf16.gmra.mrb[4].mxu0 %v1088_v54  ;;  %v1092_v54 = vcombine.low %v25_v39, %v29_v42 }
  0x2c   :  { %873 = vmatmul.mubr.bf16.gmra.mrb[4].mxu1 %v1090_v56  ;;  %1277 = vmatpush3.bf16.msra.mxu0 %v1397_v59  ;;  %v1094_v56 = vcombine.low %v26_v43, %v30_v44  ;;  %v179_v59 = vld [vmem:[%s1810_s2 + $0x20] sm:$0xff] }
  0x2d   :  { %1317 = vmatpush3.bf16.msra.mxu1 %v1398_v60  ;;  %1278 = vmatprep.subr.bf16.mxu0 %v1399_v61  ;;  %v180_v60 = vld [vmem:[%s1810_s2 + $0x28] sm:$0xff]  ;;  %v41_v61 = vld [vmem:[%s1809_s0 + $0xd0] sm:$0xff] }
  0x2e   :  { %1318 = vmatprep.subr.bf16.mxu1 %v1400_v62  ;;  %815 = vmatprep.mubr.bf16.mxu0 %v1097_v5  ;;  %v45_v62 = vld [vmem:[%s1809_s0 + $0xf0] sm:$0xff] }
  0x2f   :  { %880 = vmatprep.mubr.bf16.mxu1 %v1099_v6  ;;  %190 = vperm.xlu0 %1353, %v176_v53   ;;  %v1109_v5 = vcombine.high %v41_v61, %v45_v62 }
  0x30   :  { %1279 = vmatpush3.bf16.msra.mxu0 %v1401_v63  ;;  %v42_v63 = vld [vmem:[%s1809_s0 + $0xd8] sm:$0xff]  ;;  %210 = vperm.xlu1 %1354, %v180_v60  }
  0x31   :  { %1319 = vmatpush3.bf16.msra.mxu1 %v1402_v0  ;;  %1280 = vmatprep.subr.bf16.mxu0 %v1403_v9  ;;  %v46_v0 = vld [vmem:[%s1809_s0 + $0xf8] sm:$0xff] }
  0x32   :  { %1320 = vmatprep.subr.bf16.mxu1 %v1404_v10  ;;  %v1111_v6 = vcombine.high %v42_v63, %v46_v0 }
  0x33   :  { %816 = vmatmul.mubr.bf16.gmra.mrb[8].mxu0 %v1096_v7  ;;  %205 = vperm.xlu0 %1353, %v179_v59   ;;  %v1108_v7 = vcombine.low %v41_v61, %v45_v62 }
  0x34   :  { %881 = vmatmul.mubr.bf16.gmra.mrb[8].mxu1 %v1098_v8  ;;  %1281 = vmatpush3.bf16.msra.mxu0 %v1405_v11  ;;  %v1110_v8 = vcombine.low %v42_v63, %v46_v0 }
  0x35   :  { %1321 = vmatpush3.bf16.msra.mxu1 %v1406_v12  ;;  %1282 = vmatprep.subr.bf16.mxu0 %v1407_v13 }
  0x36   :  { %1322 = vmatprep.subr.bf16.mxu1 %v1408_v14  ;;  %823 = vmatprep.mubr.bf16.mxu0 %v1105_v20 }
  0x37   :  { %888 = vmatprep.mubr.bf16.mxu1 %v1107_v23  ;;  %215 = vperm.xlu0 %1353, %v181_v1  }
  0x38   :  { %1283 = vmatpush3.bf16.msra.mxu0 %v1409_v15  ;;  %220 = vperm.xlu1 %1354, %v182_v3  }
  0x39   :  { %1323 = vmatpush3.bf16.msra.mxu1 %v1410_v16  ;;  %1284 = vmatprep.subr.bf16.mxu0 %v1411_v25 }
  0x3a   :  { %1324 = vmatprep.subr.bf16.mxu1 %v1412_v26 }
  0x3b   :  { %824 = vmatmul.mubr.bf16.gmra.mrb[12].mxu0 %v1104_v22 }
  0x3c   :  { %889 = vmatmul.mubr.bf16.gmra.mrb[12].mxu1 %v1106_v24  ;;  %1285 = vmatpush3.bf16.msra.mxu0 %v1413_v27 }
  0x3d   :  { %1325 = vmatpush3.bf16.msra.mxu1 %v1414_v28  ;;  %1286 = vmatprep.subr.bf16.mxu0 %v1415_v29 }
  0x3e   :  { %1326 = vmatprep.subr.bf16.mxu1 %v1416_v30  ;;  %929 = vmatprep.mubr.bf16.mxu0 %v1085_v36 }
  0x3f   :  { %994 = vmatprep.mubr.bf16.mxu1 %v1087_v41 }
  0x40   :  { %1287 = vmatpush3.bf16.msra.mxu0 %v1417_v31 }
  0x41   :  { %1327 = vmatpush3.bf16.msra.mxu1 %v1418_v32 }
  0x43   :  { %930 = vmatmul.mubr.bf16.vlgmr.msra.gmra.mrb[16].mxu0 %v1084_v35 }
  0x44   :  { %995 = vmatmul.mubr.bf16.vlgmr.msra.gmra.mrb[16].mxu1 %v1086_v40  ;;  %937 = vmatprep.mubr.bf16.mxu0 %v1093_v45 }
  0x45   :  { %1002 = vmatprep.mubr.bf16.mxu1 %v1095_v46 }
  0x4b   :  { %938 = vmatmul.mubr.bf16.gmra.mrb[20].mxu0 %v1092_v54 }
  0x4c   :  { %1003 = vmatmul.mubr.bf16.gmra.mrb[20].mxu1 %v1094_v56  ;;  %945 = vmatprep.mubr.bf16.mxu0 %v1101_v57 }
  0x4d   :  { %1010 = vmatprep.mubr.bf16.mxu1 %v1103_v58 }
  0x53   :  { %946 = vmatmul.mubr.bf16.gmra.mrb[24].mxu0 %v1100_v2 }
  0x54   :  { %1011 = vmatmul.mubr.bf16.gmra.mrb[24].mxu1 %v1102_v4  ;;  %953 = vmatprep.mubr.bf16.mxu0 %v1109_v5 }
  0x55   :  { %1018 = vmatprep.mubr.bf16.mxu1 %v1111_v6 }
  0x5b   :  { %954 = vmatmul.mubr.bf16.gmra.mrb[28].mxu0 %v1108_v7 }
  0x5c   :  { %1019 = vmatmul.mubr.bf16.gmra.mrb[28].mxu1 %v1110_v8 }
  0x9e   :  { %v196_v10 = vpop.permute.xlu1 %195 }
  0xa7   :  { %v201_v29 = vpop.permute.xlu1 %200 }
  0xa9   :  { %v186_v9 = vpop.permute.xlu0 %185 }
  0xae   :  { %v191_v12 = vpop.permute.xlu0 %190 }
  0xaf   :  { %v211_v46 = vpop.permute.xlu1 %210 }
  0xb2   :  { %v206_v45 = vpop.permute.xlu0 %205 }
  0xb6   :  { %v216_v63 = vpop.permute.xlu0 %215 }
  0xb7   :  { %v221_v1 = vpop.permute.xlu1 %220 }
  0xf6   :  { %v1208_v11 = vpop.f32.mrb[0].mxu0 }
  0xf7   :  { %v1248_v13 = vpop.f32.mrb[0].mxu1  ;;  %v1209_v14 = vpop.f32.mrb[1].mxu0 }
  0xf8   :  { %v1210_v15 = vadd.f32 %v1209_v14, %v1208_v11  ;;  %v1249_v16 = vpop.f32.mrb[1].mxu1  ;;  %v1211_v17 = vpop.f32.mrb[2].mxu0 }
  0xf9   :  { %v1250_v18 = vadd.f32 %v1249_v16, %v1248_v13  ;;  %v1251_v19 = vpop.f32.mrb[2].mxu1  ;;  %v1212_v20 = vpop.f32.mrb[3].mxu0 }
  0xfa   :  { %v802_v21 = vadd.f32 %v1210_v15, %v186_v9  ;;  %v1213_v22 = vadd.f32 %v1212_v20, %v1211_v17  ;;  %v1252_v23 = vpop.f32.mrb[3].mxu1 }
  0xfb   :  { %v1253_v24 = vadd.f32 %v1252_v23, %v1251_v19 }
  0xfc   :  { %v1752_v25 = vadd.f32 %v1250_v18, %v802_v21  ;;  %v805_v26 = vadd.f32 %v1213_v22, %v191_v12 }
  0xfe   :  { %v1754_v27 = vadd.f32 %v1253_v24, %v805_v26  ;;  %v1214_v28 = vpop.f32.mrb[4].mxu0 }
  0xff   :  { %v1254_v30 = vpop.f32.mrb[4].mxu1  ;;  %v1215_v31 = vpop.f32.mrb[5].mxu0 }
 0x100   :  { %v1216_v32 = vadd.f32 %v1215_v31, %v1214_v28  ;;  %v1255_v33 = vpop.f32.mrb[5].mxu1  ;;  %v1217_v34 = vpop.f32.mrb[6].mxu0 }
 0x101   :  { %v1256_v35 = vadd.f32 %v1255_v33, %v1254_v30  ;;  %v1257_v36 = vpop.f32.mrb[6].mxu1  ;;  %v1218_v37 = vpop.f32.mrb[7].mxu0 }
 0x102   :  { %v810_v38 = vadd.f32 %v1216_v32, %v196_v10  ;;  %v1219_v39 = vadd.f32 %v1218_v37, %v1217_v34  ;;  %v1258_v40 = vpop.f32.mrb[7].mxu1 }
 0x103   :  { %v1259_v41 = vadd.f32 %v1258_v40, %v1257_v36 }
 0x104   :  { %v1756_v42 = vadd.f32 %v1256_v35, %v810_v38  ;;  %v813_v43 = vadd.f32 %v1219_v39, %v201_v29 }
 0x106   :  { %v1758_v44 = vadd.f32 %v1259_v41, %v813_v43  ;;  %v1220_v47 = vpop.f32.mrb[8].mxu0 }
 0x107   :  { %v1260_v48 = vpop.f32.mrb[8].mxu1  ;;  %v1221_v49 = vpop.f32.mrb[9].mxu0 }
 0x108   :  { %v1261_v50 = vpop.f32.mrb[9].mxu1  ;;  %v1222_v51 = vadd.f32 %v1221_v49, %v1220_v47  ;;  %v1223_v53 = vpop.f32.mrb[10].mxu0 }
 0x109   :  { %v1262_v52 = vadd.f32 %v1261_v50, %v1260_v48  ;;  %v1263_v54 = vpop.f32.mrb[10].mxu1  ;;  %v1224_v55 = vpop.f32.mrb[11].mxu0 }
 0x10a   :  { %v1264_v56 = vpop.f32.mrb[11].mxu1  ;;  %v818_v57 = vadd.f32 %v1222_v51, %v206_v45  ;;  %v1225_v58 = vadd.f32 %v1224_v55, %v1223_v53 }
 0x10b   :  { %v1265_v59 = vadd.f32 %v1264_v56, %v1263_v54 }
 0x10c   :  { %v1760_v60 = vadd.f32 %v1262_v52, %v818_v57  ;;  %v821_v61 = vadd.f32 %v1225_v58, %v211_v46 }
 0x10e   :  { %v1762_v62 = vadd.f32 %v1265_v59, %v821_v61  ;;  %v1226_v0 = vpop.f32.mrb[12].mxu0 }
 0x10f   :  { %v1266_v2 = vpop.f32.mrb[12].mxu1  ;;  %v1227_v3 = vpop.f32.mrb[13].mxu0 }
 0x110   :  { %v1228_v4 = vadd.f32 %v1227_v3, %v1226_v0  ;;  %v1267_v5 = vpop.f32.mrb[13].mxu1  ;;  %v1229_v6 = vpop.f32.mrb[14].mxu0 }
 0x111   :  { %v1268_v7 = vadd.f32 %v1267_v5, %v1266_v2  ;;  %v1269_v8 = vpop.f32.mrb[14].mxu1  ;;  %v1230_v9 = vpop.f32.mrb[15].mxu0 }
 0x112   :  { %v826_v10 = vadd.f32 %v1228_v4, %v216_v63  ;;  %v1231_v11 = vadd.f32 %v1230_v9, %v1229_v6  ;;  %v1270_v12 = vpop.f32.mrb[15].mxu1 }
 0x113   :  { %v1271_v13 = vadd.f32 %v1270_v12, %v1269_v8 }
 0x114   :  { %v1764_v14 = vadd.f32 %v1268_v7, %v826_v10  ;;  %v829_v15 = vadd.f32 %v1231_v11, %v221_v1 }
 0x116   :  { %v1766_v16 = vadd.f32 %v1271_v13, %v829_v15  ;;  %v1288_v17 = vpop.f32.mrb[16].mxu0 }
 0x117   :  { %v1328_v18 = vpop.f32.mrb[16].mxu1  ;;  %v1289_v19 = vpop.f32.mrb[17].mxu0 }
 0x118   :  { %v1290_v20 = vadd.f32 %v1289_v19, %v1288_v17  ;;  %v1329_v21 = vpop.f32.mrb[17].mxu1  ;;  %v1291_v22 = vpop.f32.mrb[18].mxu0 }
 0x119   :  { %v1330_v23 = vadd.f32 %v1329_v21, %v1328_v18  ;;  %v1331_v24 = vpop.f32.mrb[18].mxu1  ;;  %v1292_v26 = vpop.f32.mrb[19].mxu0 }
 0x11a   :  { %v932_v28 = vadd.f32 %v1290_v20, %v1752_v25  ;;  %v1293_v29 = vadd.f32 %v1292_v26, %v1291_v22  ;;  %v1332_v30 = vpop.f32.mrb[19].mxu1 }
 0x11b   :  { %v1333_v31 = vadd.f32 %v1332_v30, %v1331_v24 }
 0x11c   :  { %v997_v32 = vadd.f32 %v1330_v23, %v932_v28  ;;  %v935_v33 = vadd.f32 %v1293_v29, %v1754_v27 }
 0x11e   :  { %v1027_v34 = vmax.f32 %v997_v32, 0.0  ;;  %v1000_v35 = vadd.f32 %v1333_v31, %v935_v33  ;;  %v1294_v36 = vpop.f32.mrb[20].mxu0 }
 0x11f   :  { %v1334_v37 = vpop.f32.mrb[20].mxu1  ;;  %v1295_v38 = vpop.f32.mrb[21].mxu0 }
 0x120   :  { %v1184_v39 = vpack.c.bf16 %v1027_v34, %v1027_v34  ;;  %v1028_v40 = vmax.f32 %v1000_v35, 0.0  ;;  %v1296_v41 = vadd.f32 %v1295_v38, %v1294_v36  ;;  %v1335_v43 = vpop.f32.mrb[21].mxu1  ;;  %v1297_v45 = vpop.f32.mrb[22].mxu0 }
 0x121   :  { %v1336_v46 = vadd.f32 %v1335_v43, %v1334_v37  ;;  %v1337_v47 = vpop.f32.mrb[22].mxu1  ;;  %v1298_v25 = vpop.f32.mrb[23].mxu0 }
 0x122   :  { %1068 = vst.msk [vmem:[%s1811_s3] sm:$0xf] %vm1067_vm0, %v1184_v39  ;;  %v1185_v27 = vpack.c.bf16 %v1028_v40, %v1028_v40  ;;  %v940_v48 = vadd.f32 %v1296_v41, %v1756_v42  ;;  %v1299_v49 = vadd.f32 %v1298_v25, %v1297_v45  ;;  %v1338_v50 = vpop.f32.mrb[23].mxu1 }
 0x123   :  { %v1339_v51 = vadd.f32 %v1338_v50, %v1337_v47 }
 0x124   :  { %1069 = vst.msk [vmem:[%s1811_s3 + $0x4] sm:$0xf] %vm1067_vm0, %v1185_v27  ;;  %v1005_v52 = vadd.f32 %v1336_v46, %v940_v48  ;;  %v943_v53 = vadd.f32 %v1299_v49, %v1758_v44 }
 0x126   :  { %v1029_v54 = vmax.f32 %v1005_v52, 0.0  ;;  %v1008_v55 = vadd.f32 %v1339_v51, %v943_v53  ;;  %v1300_v56 = vpop.f32.mrb[24].mxu0 }
 0x127   :  { %v1340_v57 = vpop.f32.mrb[24].mxu1  ;;  %v1301_v58 = vpop.f32.mrb[25].mxu0 }
 0x128   :  { %v1186_v59 = vpack.c.bf16 %v1029_v54, %v1029_v54  ;;  %v1030_v61 = vmax.f32 %v1008_v55, 0.0  ;;  %v1302_v63 = vadd.f32 %v1301_v58, %v1300_v56  ;;  %v1341_v42 = vpop.f32.mrb[25].mxu1  ;;  %v1303_v0 = vpop.f32.mrb[26].mxu0 }
 0x129   :  { %v1342_v1 = vadd.f32 %v1341_v42, %v1340_v57  ;;  %v1343_v2 = vpop.f32.mrb[26].mxu1  ;;  %v1304_v3 = vpop.f32.mrb[27].mxu0 }
 0x12a   :  { %1070 = vst.msk [vmem:[%s1811_s3 + $0x8] sm:$0xf] %vm1067_vm0, %v1186_v59  ;;  %v1187_v4 = vpack.c.bf16 %v1030_v61, %v1030_v61  ;;  %v948_v44 = vadd.f32 %v1302_v63, %v1760_v60  ;;  %v1305_v5 = vadd.f32 %v1304_v3, %v1303_v0  ;;  %v1344_v6 = vpop.f32.mrb[27].mxu1 }
 0x12b   :  { %v1345_v7 = vadd.f32 %v1344_v6, %v1343_v2 }
 0x12c   :  { %1071 = vst.msk [vmem:[%s1811_s3 + $0xc] sm:$0xf] %vm1067_vm0, %v1187_v4  ;;  %v1013_v8 = vadd.f32 %v1342_v1, %v948_v44  ;;  %v951_v9 = vadd.f32 %v1305_v5, %v1762_v62 }
 0x12e   :  { %v1031_v10 = vmax.f32 %v1013_v8, 0.0  ;;  %v1016_v11 = vadd.f32 %v1345_v7, %v951_v9  ;;  %v1306_v12 = vpop.f32.mrb[28].mxu0 }
 0x12f   :  { %v1346_v13 = vpop.f32.mrb[28].mxu1  ;;  %v1307_v15 = vpop.f32.mrb[29].mxu0 }
 0x130   :  { %v1188_v17 = vpack.c.bf16 %v1031_v10, %v1031_v10  ;;  %v1032_v18 = vmax.f32 %v1016_v11, 0.0  ;;  %v1308_v19 = vadd.f32 %v1307_v15, %v1306_v12  ;;  %v1347_v60 = vpop.f32.mrb[29].mxu1  ;;  %v1309_v20 = vpop.f32.mrb[30].mxu0 }
 0x131   :  { %v1348_v21 = vadd.f32 %v1347_v60, %v1346_v13  ;;  %v1349_v22 = vpop.f32.mrb[30].mxu1  ;;  %v1310_v23 = vpop.f32.mrb[31].mxu0 }
 0x132   :  { %1072 = vst.msk [vmem:[%s1811_s3 + $0x10] sm:$0xf] %vm1067_vm0, %v1188_v17  ;;  %v1189_v24 = vpack.c.bf16 %v1032_v18, %v1032_v18  ;;  %v956_v62 = vadd.f32 %v1308_v19, %v1764_v14  ;;  %v1311_v26 = vadd.f32 %v1310_v23, %v1309_v20  ;;  %v1350_v28 = vpop.f32.mrb[31].mxu1 }
 0x133   :  { %v1351_v29 = vadd.f32 %v1350_v28, %v1349_v22 }
 0x134   :  { %1073 = vst.msk [vmem:[%s1811_s3 + $0x14] sm:$0xf] %vm1067_vm0, %v1189_v24  ;;  %v1021_v30 = vadd.f32 %v1348_v21, %v956_v62  ;;  %v959_v31 = vadd.f32 %v1311_v26, %v1766_v16 }
 0x136   :  { %v1033_v32 = vmax.f32 %v1021_v30, 0.0  ;;  %v1024_v33 = vadd.f32 %v1351_v29, %v959_v31 }
 0x138   :  { %v1190_v34 = vpack.c.bf16 %v1033_v32, %v1033_v32  ;;  %v1034_v35 = vmax.f32 %v1024_v33, 0.0 }
 0x13a   :  { %1074 = vst.msk [vmem:[%s1811_s3 + $0x18] sm:$0xf] %vm1067_vm0, %v1190_v34  ;;  %v1191_v14 = vpack.c.bf16 %v1034_v35, %v1034_v35 }
 0x13c   :  { %1075 = vst.msk [vmem:[%s1811_s3 + $0x1c] sm:$0xf] %vm1067_vm0, %v1191_v14 }

// kernel: a3c_lstm_ga_forward.7
= control target key start
LH: loop header
LB: loop body
LE: loop exit
PB: predicated region body
PF: predicated region fallthrough
CT: control target
= control target key end

     0   :  { %s9140_s0 = inlined_call_operand.vmem [shape: f32[8,32], index: 0, kind: input, shape index: {}]   ;;  %s9141_s1 = inlined_call_operand.vmem [shape: f32[32,768], index: 1, kind: input, shape index: {}]   ;;  %s9142_s2 = inlined_call_operand.vmem [shape: f32[256,768], index: 2, kind: input, shape index: {}]   ;;  %s9143_s3 = inlined_call_operand.vmem [shape: f32[1,768], index: 3, kind: input, shape index: {}]   ;;  %s9144_s4 = inlined_call_operand.vmem [shape: f32[1,768], index: 4, kind: input, shape index: {}]   ;;  %s9145_s5 = inlined_call_operand.vmem [shape: bf16[1,1024], index: 5, kind: input, shape index: {}]   ;;  %s9146_s6 = inlined_call_operand.vmem [shape: f32[1,256], index: 6, kind: input, shape index: {}]   ;;  %s9147_s7 = inlined_call_operand.vmem [shape: f32[1,256], index: 7, kind: input, shape index: {}]   ;;  %s9148_s8 = inlined_call_operand.vmem [shape: f32[1,32], index: 8, kind: input, shape index: {}]   ;;  %s9149_s9 = inlined_call_operand.vmem [shape: bf16[256,1024], index: 9, kind: input, shape index: {}]   ;;  %s9150_s10 = inlined_call_operand.vmem [shape: f32[1,1024], index: 10, kind: input, shape index: {}]   ;;  %s9151_s11 = inlined_call_operand.vmem [shape: bf16[1024,256], index: 11, kind: input, shape index: {}]   ;;  %s9152_s12 = inlined_call_operand.vmem [shape: f32[1,256], index: 12, kind: input, shape index: {}]   ;;  %s9153_s13 = inlined_call_operand.vmem [shape: bf16[512,1024], index: 13, kind: input, shape index: {}]   ;;  %s9154_s14 = inlined_call_operand.vmem [shape: f32[1,1024], index: 14, kind: input, shape index: {}]   ;;  %s9155_s15 = inlined_call_operand.vmem [shape: f32[256,128], index: 15, kind: input, shape index: {}]   ;;  %s9156_s16 = inlined_call_operand.vmem [shape: f32[32,128], index: 16, kind: input, shape index: {}]   ;;  %s9157_s17 = inlined_call_operand.vmem [shape: f32[1,128], index: 17, kind: input, shape index: {}]   ;;  %s9158_s18 = inlined_call_operand.hbm [shape: f32[1,256], index: 18, kind: output, shape index: {0}]   ;;  %s9159_s19 = inlined_call_operand.hbm [shape: f32[1,256], index: 19, kind: output, shape index: {1}]   ;;  %s9160_s20 = inlined_call_operand.vmem [shape: f32[1,128], index: 20, kind: output, shape index: {2}]  }
   0x1   :  { %9163 = sst [smem:[#allocation9_spill]] %s9140_s0 }
   0x2   :  { %9164 = sst [smem:[#allocation10_spill]] %s9141_s1 }
   0x3   :  { %9165 = sst [smem:[#allocation11_spill]] %s9142_s2 }
   0x4   :  { %9166 = sst [smem:[#allocation12_spill]] %s9143_s3 }
   0x5   :  { %9167 = sst [smem:[#allocation13_spill]] %s9144_s4 }
   0x6   :  { %26 = vsyncpa [#allocation4], 0 }
   0x7   :  { %27 = vsyncpa [#allocation6], 0  ;;  %s9168_s23 = sld [smem:[#allocation10_spill]]  ;;  %v6449_v6 = vmov 0.0   ;;  %s9169_s25 = sld [smem:[#allocation9_spill]]  ;;  %vm121_vm0 = vcmask 261120   ;;  %v91_v38 = vlaneseq }
   0x8   :  { %189 = vmatprep.mubr.f32.mxu0 %v6449_v6  ;;  %260 = vmatprep.mubr.f32.mxu1 %v6449_v6  ;;  %s9170_s29 = sld [smem:[#allocation12_spill]]  ;;  %s6674_s30 = smov 0  }
   0x9   :  { %v6643_v39 = vshrl.u32 %v91_v38, 7 }
   0xb   :  { %v6646_v40 = vsub.s32 0, %v6643_v39  ;;  %v6652_v42 = vsub.s32 1, %v6643_v39  ;;  %v6655_v43 = vsub.s32 2, %v6643_v39  ;;  %v6659_v45 = vsub.s32 3, %v6643_v39 }
   0xc   :  { %v6665_v52 = vsub.s32 4, %v6643_v39  ;;  %v6668_v54 = vsub.s32 5, %v6643_v39 }
   0xd   :  { %v66_v0 = vld [vmem:[%s9168_s23 + $0x8] sm:$0xff]  ;;  %v72_v1 = vld [vmem:[%s9168_s23 + $0x38] sm:$0xff]  ;;  %v65_v3 = vld [vmem:[%s9168_s23] sm:$0xff] }
   0xe   :  { %v5804_v2 = vpack.c.bf16 %v72_v1, %v66_v0  ;;  %v71_v4 = vld [vmem:[%s9168_s23 + $0x30] sm:$0xff]  ;;  %v78_v5 = vld [vmem:[%s9168_s23 + $0x68] sm:$0xff]  ;;  %v84_v8 = vld [vmem:[%s9168_s23 + $0x98] sm:$0xff]  ;;  %v6672_v1 = vmov 0.0  }
   0xf   :  { %v5806_v7 = vpack.c.bf16 %v71_v4, %v65_v3  ;;  %v77_v9 = vld [vmem:[%s9168_s23 + $0x60] sm:$0xff]  ;;  %v83_v10 = vld [vmem:[%s9168_s23 + $0x90] sm:$0xff]  ;;  %v5808_v11 = vpack.c.bf16 %v84_v8, %v78_v5  ;;  %v68_v12 = vld [vmem:[%s9168_s23 + $0x18] sm:$0xff] }
  0x10   :  { %5805 = vmatprep.subr.bf16.mxu0 %v5804_v2  ;;  %v74_v13 = vld [vmem:[%s9168_s23 + $0x48] sm:$0xff]  ;;  %v5810_v14 = vpack.c.bf16 %v83_v10, %v77_v9  ;;  %v67_v16 = vld [vmem:[%s9168_s23 + $0x10] sm:$0xff]  ;;  %v73_v17 = vld [vmem:[%s9168_s23 + $0x40] sm:$0xff] }
  0x11   :  { %5807 = vmatpush1.bf16.msra.mxu0 %v5806_v7  ;;  %v5812_v15 = vpack.c.bf16 %v74_v13, %v68_v12  ;;  %v70_v18 = vld [vmem:[%s9168_s23 + $0x28] sm:$0xff]  ;;  %v5814_v19 = vpack.c.bf16 %v73_v17, %v67_v16  ;;  %v76_v20 = vld [vmem:[%s9168_s23 + $0x58] sm:$0xff]  ;;  %v69_v21 = vld [vmem:[%s9168_s23 + $0x20] sm:$0xff] }
  0x12   :  { %5809 = vmatprep.subr.bf16.mxu0 %v5808_v11  ;;  %v75_v22 = vld [vmem:[%s9168_s23 + $0x50] sm:$0xff]  ;;  %v5820_v23 = vpack.c.bf16 %v76_v20, %v70_v18  ;;  %v80_v24 = vld [vmem:[%s9168_s23 + $0x78] sm:$0xff]  ;;  %v86_v25 = vld [vmem:[%s9168_s23 + $0xa8] sm:$0xff] }
  0x13   :  { %5813 = vmatprep.subr.bf16.mxu1 %v5812_v15  ;;  %v79_v26 = vld [vmem:[%s9168_s23 + $0x70] sm:$0xff]  ;;  %v5816_v27 = vpack.c.bf16 %v86_v25, %v80_v24  ;;  %v85_v28 = vld [vmem:[%s9168_s23 + $0xa0] sm:$0xff]  ;;  %v82_v29 = vld [vmem:[%s9168_s23 + $0x88] sm:$0xff]  ;;  %v5822_v32 = vpack.c.bf16 %v75_v22, %v69_v21 }
  0x14   :  { %5815 = vmatpush1.bf16.msra.mxu1 %v5814_v19  ;;  %v88_v30 = vld [vmem:[%s9168_s23 + $0xb8] sm:$0xff]  ;;  %v64_v31 = vld [vmem:[%s9169_s25] sm:$0xff]  ;;  %v5818_v33 = vpack.c.bf16 %v85_v28, %v79_v26  ;;  %v87_v36 = vld [vmem:[%s9168_s23 + $0xb0] sm:$0xff] }
  0x15   :  { %5811 = vmatpush1.bf16.msra.mxu0 %v5810_v14  ;;  %5817 = vmatprep.subr.bf16.mxu1 %v5816_v27  ;;  %v5824_v34 = vpack.c.bf16 %v88_v30, %v82_v29  ;;  %v81_v35 = vld [vmem:[%s9168_s23 + $0x80] sm:$0xff] }
  0x16   :  { %5821 = vmatprep.subr.bf16.mxu0 %v5820_v23  ;;  %v5826_v37 = vpack.c.bf16 %v87_v36, %v81_v35  ;;  %v89_v41 = vld [vmem:[%s9170_s29] sm:$0x3f] }
  0x17   :  { %v94_v44 = vrot.slane %v89_v41, %v6646_v40  ;;  %v98_v46 = vrot.slane %v89_v41, %v6652_v42  ;;  %v102_v48 = vrot.slane %v89_v41, %v6655_v43  ;;  %v106_v51 = vrot.slane %v89_v41, %v6659_v45 }
  0x18   :  { %5220 = vmatmul.mubr.msk.f32.vlgmr.msra.gmra.mrb[0].mxu0 %vm121_vm0, %v64_v31  ;;  %5819 = vmatpush1.bf16.msra.mxu1 %v5818_v33  ;;  %v110_v59 = vrot.slane %v89_v41, %v6665_v52  ;;  %v114_v60 = vrot.slane %v89_v41, %v6668_v54 }
  0x19   :  { %5823 = vmatpush1.bf16.msra.mxu0 %v5822_v32  ;;  %331 = vmatprep.mubr.f32.mxu0 %v6449_v6 }
  0x1a   :  { %5825 = vmatprep.subr.bf16.mxu0 %v5824_v34 }
  0x1b   :  { %5221 = vmatmul.mubr.msk.f32.vlgmr.msra.gmra.mrb[0].mxu1 %vm121_vm0, %v64_v31 }
  0x1d   :  { %5827 = vmatpush1.bf16.msra.mxu0 %v5826_v37 }
  0x20   :  { %5222 = vmatmul.mubr.msk.f32.vlgmr.msra.gmra.mrb[2].mxu0 %vm121_vm0, %v64_v31 }
  0xeb   :  { %v191_v47 = vpop.f32.mrb[0].mxu0 }
  0xec   :  { %v192_v49 = vadd.f32 %v191_v47, %v94_v44  ;;  %v193_v50 = vpop.f32.mrb[1].mxu0 }
  0xed   :  { %v194_v53 = vadd.f32 %v193_v50, %v98_v46 }
  0xee   :  { %338 = vst [vmem:[#allocation2] sm:$0xff] %v192_v49  ;;  %v262_v55 = vpop.f32.mrb[0].mxu1 }
  0xef   :  { %339 = vst [vmem:[#allocation2 + $0x8] sm:$0xff] %v194_v53  ;;  %v263_v56 = vadd.f32 %v262_v55, %v102_v48  ;;  %v264_v57 = vpop.f32.mrb[1].mxu1 }
  0xf0   :  { %v265_v58 = vadd.f32 %v264_v57, %v106_v51 }
  0xf1   :  { %340 = vst [vmem:[#allocation2 + $0x10] sm:$0xff] %v263_v56 }
  0xf2   :  { %341 = vst [vmem:[#allocation2 + $0x18] sm:$0xff] %v265_v58 }
  0xf3   :  { %v333_v61 = vpop.f32.mrb[2].mxu0 }
  0xf4   :  { %v334_v62 = vadd.f32 %v333_v61, %v110_v59  ;;  %v335_v63 = vpop.f32.mrb[3].mxu0 }
  0xf5   :  { %v336_v0 = vadd.f32 %v335_v63, %v114_v60 }
  0xf6   :  { %342 = vst [vmem:[#allocation2 + $0x20] sm:$0xff] %v334_v62 }
  0xf7   :  { %343 = vst [vmem:[#allocation2 + $0x28] sm:$0xff] %v336_v0 }
  0xf8 LB: > { %s9171_s1 = sld [smem:[#allocation11_spill]]  ;;  %v6711_v15 = vrot.slane %v6443_v1, %v6652_v42  ;;  %s9172_s28 = sld [smem:[#allocation13_spill]]  ;;  %s6447_s30 = sphi %s6674_s30, %s349_s30   ;;  %v6443_v1 = vphi %v6672_v1, %v9174_v1  }
  0xf9   : > { %s351_s23 = sshra.s32 %s6447_s30, 3  ;;  %s354_s29 = sand.u32 7, %s6447_s30 }
  0xfa   : > { %661 = vmatprep.mubr.f32.mxu0 %v6711_v15  ;;  %732 = vmatprep.mubr.f32.mxu1 %v6711_v15  ;;  %s5223_s4 = smul.u32 48, %s351_s23  ;;  %s349_s30 = sadd.s32 1, %s6447_s30  }
  0xfb   : > { %p346_p0 = scmp.ge.s32.totalorder %s349_s30, 8  }
  0xfc   : > { %s357_s0 = sadd.s32 %s5223_s4, %s354_s29  ;;  %vm6453_vm1 = vmmov (%p346_p0), 0   ;;  %vm9094_vm2 = vcmp.lt.s32.totalorder (%p346_p0), %v91_v38, 256 }
  0xfd   : > { %s358_s21 = scalar_lea.vmem [#allocation2], %s357_s0 }
  0xfe   : > { %v363_v2 = vld [vmem:[%s9171_s1 + $0x8] sm:$0xff]  ;;  %v369_v3 = vld [vmem:[%s9171_s1 + $0x38] sm:$0xff]  ;;  %v362_v4 = vld [vmem:[%s9171_s1] sm:$0xff] }
  0xff   : > { %v5828_v5 = vpack.c.bf16 %v369_v3, %v363_v2  ;;  %v368_v7 = vld [vmem:[%s9171_s1 + $0x30] sm:$0xff]  ;;  %v375_v8 = vld [vmem:[%s9171_s1 + $0x68] sm:$0xff]  ;;  %v381_v9 = vld [vmem:[%s9171_s1 + $0x98] sm:$0xff] }
 0x100   : > { %v5830_v10 = vpack.c.bf16 %v368_v7, %v362_v4  ;;  %v5832_v11 = vpack.c.bf16 %v381_v9, %v375_v8  ;;  %v374_v12 = vld [vmem:[%s9171_s1 + $0x60] sm:$0xff]  ;;  %v380_v13 = vld [vmem:[%s9171_s1 + $0x90] sm:$0xff]  ;;  %v387_v14 = vld [vmem:[%s9171_s1 + $0xc8] sm:$0xff] }
 0x101   : > { %5829 = vmatprep.subr.bf16.mxu0 %v5828_v5  ;;  %v393_v16 = vld [vmem:[%s9171_s1 + $0xf8] sm:$0xff]  ;;  %v5834_v17 = vpack.c.bf16 %v380_v13, %v374_v12  ;;  %v386_v19 = vld [vmem:[%s9171_s1 + $0xc0] sm:$0xff]  ;;  %v392_v20 = vld [vmem:[%s9171_s1 + $0xf0] sm:$0xff] }
 0x102   : > { %5831 = vmatpush1.bf16.msra.mxu0 %v5830_v10  ;;  %v5836_v18 = vpack.c.bf16 %v393_v16, %v387_v14  ;;  %v399_v21 = vld [vmem:[%s9171_s1 + $0x128] sm:$0xff]  ;;  %v405_v22 = vld [vmem:[%s9171_s1 + $0x158] sm:$0xff]  ;;  %v5838_v23 = vpack.c.bf16 %v392_v20, %v386_v19  ;;  %v398_v25 = vld [vmem:[%s9171_s1 + $0x120] sm:$0xff] }
 0x103   : > { %5833 = vmatprep.subr.bf16.mxu0 %v5832_v11  ;;  %v5840_v24 = vpack.c.bf16 %v405_v22, %v399_v21  ;;  %v404_v26 = vld [vmem:[%s9171_s1 + $0x150] sm:$0xff]  ;;  %v411_v27 = vld [vmem:[%s9171_s1 + $0x188] sm:$0xff]  ;;  %v417_v28 = vld [vmem:[%s9171_s1 + $0x1b8] sm:$0xff] }
 0x104   : > { %v5842_v29 = vpack.c.bf16 %v404_v26, %v398_v25  ;;  %v5844_v30 = vpack.c.bf16 %v417_v28, %v411_v27  ;;  %v410_v31 = vld [vmem:[%s9171_s1 + $0x180] sm:$0xff]  ;;  %v416_v32 = vld [vmem:[%s9171_s1 + $0x1b0] sm:$0xff]  ;;  %v423_v33 = vld [vmem:[%s9171_s1 + $0x1e8] sm:$0xff] }
 0x105   : > { %v429_v34 = vld [vmem:[%s9171_s1 + $0x218] sm:$0xff]  ;;  %v5846_v35 = vpack.c.bf16 %v416_v32, %v410_v31  ;;  %v422_v36 = vld [vmem:[%s9171_s1 + $0x1e0] sm:$0xff]  ;;  %v428_v44 = vld [vmem:[%s9171_s1 + $0x210] sm:$0xff] }
 0x106   : > { %5835 = vmatpush1.bf16.msra.mxu0 %v5834_v17  ;;  %v365_v37 = vld [vmem:[%s9171_s1 + $0x18] sm:$0xff]  ;;  %v5848_v41 = vpack.c.bf16 %v429_v34, %v423_v33  ;;  %v435_v46 = vld [vmem:[%s9171_s1 + $0x248] sm:$0xff]  ;;  %v364_v50 = vld [vmem:[%s9171_s1 + $0x10] sm:$0xff]  ;;  %v5850_v57 = vpack.c.bf16 %v428_v44, %v422_v36 }
 0x107   : > { %5837 = vmatprep.subr.bf16.mxu0 %v5836_v18  ;;  %v371_v47 = vld [vmem:[%s9171_s1 + $0x48] sm:$0xff]  ;;  %v441_v48 = vld [vmem:[%s9171_s1 + $0x278] sm:$0xff]  ;;  %v370_v51 = vld [vmem:[%s9171_s1 + $0x40] sm:$0xff] }
 0x108   : > { %v5892_v49 = vpack.c.bf16 %v371_v47, %v365_v37  ;;  %v5894_v53 = vpack.c.bf16 %v370_v51, %v364_v50  ;;  %v377_v55 = vld [vmem:[%s9171_s1 + $0x78] sm:$0xff]  ;;  %v383_v56 = vld [vmem:[%s9171_s1 + $0xa8] sm:$0xff]  ;;  %v434_v58 = vld [vmem:[%s9171_s1 + $0x240] sm:$0xff]  ;;  %v5852_v61 = vpack.c.bf16 %v441_v48, %v435_v46 }
 0x109   : > { %v5896_v59 = vpack.c.bf16 %v383_v56, %v377_v55  ;;  %v376_v60 = vld [vmem:[%s9171_s1 + $0x70] sm:$0xff]  ;;  %v447_v63 = vld [vmem:[%s9171_s1 + $0x2a8] sm:$0xff]  ;;  %v382_v0 = vld [vmem:[%s9171_s1 + $0xa0] sm:$0xff] }
 0x10a   : > { %5839 = vmatpush1.bf16.msra.mxu0 %v5838_v23  ;;  %5893 = vmatprep.subr.bf16.mxu1 %v5892_v49  ;;  %v440_v62 = vld [vmem:[%s9171_s1 + $0x270] sm:$0xff]  ;;  %v453_v2 = vld [vmem:[%s9171_s1 + $0x2d8] sm:$0xff]  ;;  %v5898_v3 = vpack.c.bf16 %v382_v0, %v376_v60  ;;  %v395_v5 = vld [vmem:[%s9171_s1 + $0x108] sm:$0xff] }
 0x10b   : > { %5841 = vmatprep.subr.bf16.mxu0 %v5840_v24  ;;  %5895 = vmatpush1.bf16.msra.mxu1 %v5894_v53  ;;  %v389_v4 = vld [vmem:[%s9171_s1 + $0xd8] sm:$0xff]  ;;  %v388_v8 = vld [vmem:[%s9171_s1 + $0xd0] sm:$0xff]  ;;  %v394_v9 = vld [vmem:[%s9171_s1 + $0x100] sm:$0xff]  ;;  %v5854_v10 = vpack.c.bf16 %v440_v62, %v434_v58  ;;  %v5856_v13 = vpack.c.bf16 %v453_v2, %v447_v63 }
 0x10c   : > { %5897 = vmatprep.subr.bf16.mxu1 %v5896_v59  ;;  %v5900_v7 = vpack.c.bf16 %v395_v5, %v389_v4  ;;  %v446_v11 = vld [vmem:[%s9171_s1 + $0x2a0] sm:$0xff]  ;;  %v401_v12 = vld [vmem:[%s9171_s1 + $0x138] sm:$0xff]  ;;  %v452_v14 = vld [vmem:[%s9171_s1 + $0x2d0] sm:$0xff]  ;;  %v5902_v17 = vpack.c.bf16 %v394_v9, %v388_v8 }
 0x10d   : > { %v459_v16 = vld [vmem:[%s9171_s1 + $0x308] sm:$0xff]  ;;  %v465_v19 = vld [vmem:[%s9171_s1 + $0x338] sm:$0xff]  ;;  %v400_v21 = vld [vmem:[%s9171_s1 + $0x130] sm:$0xff]  ;;  %v5858_v25 = vpack.c.bf16 %v452_v14, %v446_v11 }
 0x10e   : > { %5843 = vmatpush1.bf16.msra.mxu0 %v5842_v29  ;;  %v407_v18 = vld [vmem:[%s9171_s1 + $0x168] sm:$0xff]  ;;  %v406_v22 = vld [vmem:[%s9171_s1 + $0x160] sm:$0xff]  ;;  %v413_v23 = vld [vmem:[%s9171_s1 + $0x198] sm:$0xff]  ;;  %v5860_v26 = vpack.c.bf16 %v465_v19, %v459_v16 }
 0x10f   : > { %5845 = vmatprep.subr.bf16.mxu0 %v5844_v30  ;;  %5899 = vmatpush1.bf16.msra.mxu1 %v5898_v3  ;;  %v5904_v20 = vpack.c.bf16 %v407_v18, %v401_v12  ;;  %v419_v24 = vld [vmem:[%s9171_s1 + $0x1c8] sm:$0xff]  ;;  %v458_v27 = vld [vmem:[%s9171_s1 + $0x300] sm:$0xff]  ;;  %v464_v28 = vld [vmem:[%s9171_s1 + $0x330] sm:$0xff]  ;;  %v5906_v30 = vpack.c.bf16 %v406_v22, %v400_v21 }
 0x110   : > { %5901 = vmatprep.subr.bf16.mxu1 %v5900_v7  ;;  %v471_v29 = vld [vmem:[%s9171_s1 + $0x368] sm:$0xff]  ;;  %v477_v31 = vld [vmem:[%s9171_s1 + $0x398] sm:$0xff]  ;;  %v5908_v32 = vpack.c.bf16 %v419_v24, %v413_v23  ;;  %v412_v33 = vld [vmem:[%s9171_s1 + $0x190] sm:$0xff]  ;;  %v5862_v37 = vpack.c.bf16 %v464_v28, %v458_v27 }
 0x111   : > { %v418_v34 = vld [vmem:[%s9171_s1 + $0x1c0] sm:$0xff]  ;;  %v431_v36 = vld [vmem:[%s9171_s1 + $0x228] sm:$0xff]  ;;  %v476_v46 = vld [vmem:[%s9171_s1 + $0x390] sm:$0xff] }
 0x112   : > { %5847 = vmatpush1.bf16.msra.mxu0 %v5846_v35  ;;  %v425_v35 = vld [vmem:[%s9171_s1 + $0x1f8] sm:$0xff]  ;;  %v470_v44 = vld [vmem:[%s9171_s1 + $0x360] sm:$0xff]  ;;  %v483_v47 = vld [vmem:[%s9171_s1 + $0x3c8] sm:$0xff]  ;;  %v5910_v48 = vpack.c.bf16 %v418_v34, %v412_v33 }
 0x113   : > { %5849 = vmatprep.subr.bf16.mxu0 %v5848_v41  ;;  %5903 = vmatpush1.bf16.msra.mxu1 %v5902_v17  ;;  %v5864_v41 = vpack.c.bf16 %v477_v31, %v471_v29  ;;  %v489_v49 = vld [vmem:[%s9171_s1 + $0x3f8] sm:$0xff]  ;;  %v5912_v50 = vpack.c.bf16 %v431_v36, %v425_v35  ;;  %v424_v51 = vld [vmem:[%s9171_s1 + $0x1f0] sm:$0xff]  ;;  %v430_v53 = vld [vmem:[%s9171_s1 + $0x220] sm:$0xff] }
 0x114   : > { %5905 = vmatprep.subr.bf16.mxu1 %v5904_v20  ;;  %v437_v55 = vld [vmem:[%s9171_s1 + $0x258] sm:$0xff]  ;;  %v443_v56 = vld [vmem:[%s9171_s1 + $0x288] sm:$0xff]  ;;  %v5868_v58 = vpack.c.bf16 %v489_v49, %v483_v47  ;;  %v482_v59 = vld [vmem:[%s9171_s1 + $0x3c0] sm:$0xff]  ;;  %v5914_v62 = vpack.c.bf16 %v430_v53, %v424_v51 }
 0x115   : > { %v488_v60 = vld [vmem:[%s9171_s1 + $0x3f0] sm:$0xff]  ;;  %v501_v63 = vld [vmem:[%s9171_s1 + $0x458] sm:$0xff]  ;;  %v5916_v0 = vpack.c.bf16 %v443_v56, %v437_v55  ;;  %v442_v3 = vld [vmem:[%s9171_s1 + $0x280] sm:$0xff] }
 0x116   : > { %5851 = vmatpush1.bf16.msra.mxu0 %v5850_v57  ;;  %v5866_v57 = vpack.c.bf16 %v476_v46, %v470_v44  ;;  %v436_v2 = vld [vmem:[%s9171_s1 + $0x250] sm:$0xff]  ;;  %v449_v4 = vld [vmem:[%s9171_s1 + $0x2b8] sm:$0xff]  ;;  %v455_v5 = vld [vmem:[%s9171_s1 + $0x2e8] sm:$0xff]  ;;  %v5870_v7 = vpack.c.bf16 %v488_v60, %v482_v59 }
 0x117   : > { %5853 = vmatprep.subr.bf16.mxu0 %v5852_v61  ;;  %5907 = vmatpush1.bf16.msra.mxu1 %v5906_v30  ;;  %v495_v61 = vld [vmem:[%s9171_s1 + $0x428] sm:$0xff]  ;;  %v494_v9 = vld [vmem:[%s9171_s1 + $0x420] sm:$0xff]  ;;  %v5918_v12 = vpack.c.bf16 %v442_v3, %v436_v2  ;;  %v5920_v14 = vpack.c.bf16 %v455_v5, %v449_v4  ;;  %v448_v16 = vld [vmem:[%s9171_s1 + $0x2b0] sm:$0xff] }
 0x118   : > { %5909 = vmatprep.subr.bf16.mxu1 %v5908_v32  ;;  %v5872_v8 = vpack.c.bf16 %v501_v63, %v495_v61  ;;  %v507_v11 = vld [vmem:[%s9171_s1 + $0x488] sm:$0xff]  ;;  %v454_v17 = vld [vmem:[%s9171_s1 + $0x2e0] sm:$0xff]  ;;  %v461_v18 = vld [vmem:[%s9171_s1 + $0x318] sm:$0xff] }
 0x119   : > { %v467_v19 = vld [vmem:[%s9171_s1 + $0x348] sm:$0xff]  ;;  %v506_v22 = vld [vmem:[%s9171_s1 + $0x480] sm:$0xff]  ;;  %v512_v23 = vld [vmem:[%s9171_s1 + $0x4b0] sm:$0xff] }
 0x11a   : > { %5855 = vmatpush1.bf16.msra.mxu0 %v5854_v10  ;;  %v500_v10 = vld [vmem:[%s9171_s1 + $0x450] sm:$0xff]  ;;  %v519_v24 = vld [vmem:[%s9171_s1 + $0x4e8] sm:$0xff]  ;;  %v5924_v27 = vpack.c.bf16 %v467_v19, %v461_v18  ;;  %v466_v29 = vld [vmem:[%s9171_s1 + $0x340] sm:$0xff]  ;;  %v5878_v32 = vpack.c.bf16 %v512_v23, %v506_v22 }
 0x11b   : > { %5857 = vmatprep.subr.bf16.mxu0 %v5856_v13  ;;  %5911 = vmatpush1.bf16.msra.mxu1 %v5910_v48  ;;  %v513_v13 = vld [vmem:[%s9171_s1 + $0x4b8] sm:$0xff]  ;;  %v5874_v20 = vpack.c.bf16 %v500_v10, %v494_v9  ;;  %v460_v28 = vld [vmem:[%s9171_s1 + $0x310] sm:$0xff]  ;;  %v479_v31 = vld [vmem:[%s9171_s1 + $0x3a8] sm:$0xff] }
 0x11c   : > { %5913 = vmatprep.subr.bf16.mxu1 %v5912_v50  ;;  %v5876_v21 = vpack.c.bf16 %v513_v13, %v507_v11  ;;  %v473_v30 = vld [vmem:[%s9171_s1 + $0x378] sm:$0xff]  ;;  %v518_v34 = vld [vmem:[%s9171_s1 + $0x4e0] sm:$0xff]  ;;  %v524_v35 = vld [vmem:[%s9171_s1 + $0x510] sm:$0xff] }
 0x11d   : > { %v531_v36 = vld [vmem:[%s9171_s1 + $0x548] sm:$0xff]  ;;  %v5928_v44 = vpack.c.bf16 %v479_v31, %v473_v30  ;;  %v472_v46 = vld [vmem:[%s9171_s1 + $0x370] sm:$0xff]  ;;  %v478_v47 = vld [vmem:[%s9171_s1 + $0x3a0] sm:$0xff]  ;;  %v5882_v50 = vpack.c.bf16 %v524_v35, %v518_v34 }
 0x11e   : > { %5859 = vmatpush1.bf16.msra.mxu0 %v5858_v25  ;;  %v5922_v25 = vpack.c.bf16 %v454_v17, %v448_v16  ;;  %v485_v48 = vld [vmem:[%s9171_s1 + $0x3d8] sm:$0xff]  ;;  %v491_v49 = vld [vmem:[%s9171_s1 + $0x408] sm:$0xff]  ;;  %v530_v53 = vld [vmem:[%s9171_s1 + $0x540] sm:$0xff] }
 0x11f   : > { %5861 = vmatprep.subr.bf16.mxu0 %v5860_v26  ;;  %5915 = vmatpush1.bf16.msra.mxu1 %v5914_v62  ;;  %v525_v26 = vld [vmem:[%s9171_s1 + $0x518] sm:$0xff]  ;;  %v536_v55 = vld [vmem:[%s9171_s1 + $0x570] sm:$0xff]  ;;  %v543_v56 = vld [vmem:[%s9171_s1 + $0x5a8] sm:$0xff]  ;;  %v5932_v59 = vpack.c.bf16 %v491_v49, %v485_v48 }
 0x120   : > { %5917 = vmatprep.subr.bf16.mxu1 %v5916_v0  ;;  %v5880_v33 = vpack.c.bf16 %v525_v26, %v519_v24  ;;  %v484_v60 = vld [vmem:[%s9171_s1 + $0x3d0] sm:$0xff]  ;;  %v490_v61 = vld [vmem:[%s9171_s1 + $0x400] sm:$0xff]  ;;  %v497_v62 = vld [vmem:[%s9171_s1 + $0x438] sm:$0xff]  ;;  %v5886_v0 = vpack.c.bf16 %v536_v55, %v530_v53 }
 0x121   : > { %v503_v63 = vld [vmem:[%s9171_s1 + $0x468] sm:$0xff]  ;;  %v542_v3 = vld [vmem:[%s9171_s1 + $0x5a0] sm:$0xff]  ;;  %v548_v4 = vld [vmem:[%s9171_s1 + $0x5d0] sm:$0xff] }
 0x122   : > { %5863 = vmatpush1.bf16.msra.mxu0 %v5862_v37  ;;  %v5926_v37 = vpack.c.bf16 %v466_v29, %v460_v28  ;;  %v367_v5 = vld [vmem:[%s9171_s1 + $0x28] sm:$0xff]  ;;  %v5936_v9 = vpack.c.bf16 %v503_v63, %v497_v62  ;;  %v496_v10 = vld [vmem:[%s9171_s1 + $0x430] sm:$0xff]  ;;  %v502_v11 = vld [vmem:[%s9171_s1 + $0x460] sm:$0xff] }
 0x123   : > { %5865 = vmatprep.subr.bf16.mxu0 %v5864_v41  ;;  %5919 = vmatpush1.bf16.msra.mxu1 %v5918_v12  ;;  %v537_v41 = vld [vmem:[%s9171_s1 + $0x578] sm:$0xff]  ;;  %v515_v13 = vld [vmem:[%s9171_s1 + $0x4c8] sm:$0xff]  ;;  %v366_v17 = vld [vmem:[%s9171_s1 + $0x20] sm:$0xff] }
 0x124   : > { %5921 = vmatprep.subr.bf16.mxu1 %v5920_v14  ;;  %v5884_v51 = vpack.c.bf16 %v537_v41, %v531_v36  ;;  %v509_v12 = vld [vmem:[%s9171_s1 + $0x498] sm:$0xff]  ;;  %v5890_v14 = vpack.c.bf16 %v548_v4, %v542_v3  ;;  %v372_v18 = vld [vmem:[%s9171_s1 + $0x50] sm:$0xff]  ;;  %v379_v19 = vld [vmem:[%s9171_s1 + $0x88] sm:$0xff] }
 0x125   : > { %v5940_v22 = vpack.c.bf16 %v515_v13, %v509_v12  ;;  %v508_v23 = vld [vmem:[%s9171_s1 + $0x490] sm:$0xff]  ;;  %v514_v24 = vld [vmem:[%s9171_s1 + $0x4c0] sm:$0xff]  ;;  %v521_v26 = vld [vmem:[%s9171_s1 + $0x4f8] sm:$0xff]  ;;  %v5958_v28 = vpack.c.bf16 %v372_v18, %v366_v17 }
 0x126   : > { %5867 = vmatpush1.bf16.msra.mxu0 %v5866_v57  ;;  %v5930_v57 = vpack.c.bf16 %v478_v47, %v472_v46  ;;  %v378_v30 = vld [vmem:[%s9171_s1 + $0x80] sm:$0xff]  ;;  %v384_v31 = vld [vmem:[%s9171_s1 + $0xb0] sm:$0xff]  ;;  %v397_v34 = vld [vmem:[%s9171_s1 + $0x118] sm:$0xff] }
 0x127   : > { %5869 = vmatprep.subr.bf16.mxu0 %v5868_v58  ;;  %5923 = vmatpush1.bf16.msra.mxu1 %v5922_v25  ;;  %v549_v58 = vld [vmem:[%s9171_s1 + $0x5d8] sm:$0xff]  ;;  %v7056_v25 = vrot.slane %v6443_v1, %v6646_v40  ;;  %v520_v36 = vld [vmem:[%s9171_s1 + $0x4f0] sm:$0xff]  ;;  %v5962_v46 = vpack.c.bf16 %v384_v31, %v378_v30  ;;  %v390_v48 = vld [vmem:[%s9171_s1 + $0xe0] sm:$0xff] }
 0x128   : > { %5925 = vmatprep.subr.bf16.mxu1 %v5924_v27  ;;  %v5888_v2 = vpack.c.bf16 %v549_v58, %v543_v56  ;;  %v527_v27 = vld [vmem:[%s9171_s1 + $0x528] sm:$0xff]  ;;  %v533_v41 = vld [vmem:[%s9171_s1 + $0x558] sm:$0xff]  ;;  %v396_v49 = vld [vmem:[%s9171_s1 + $0x110] sm:$0xff] }
 0x129   : > { %v5944_v35 = vpack.c.bf16 %v527_v27, %v521_v26  ;;  %v532_v55 = vld [vmem:[%s9171_s1 + $0x550] sm:$0xff]  ;;  %v538_v56 = vld [vmem:[%s9171_s1 + $0x580] sm:$0xff]  ;;  %v551_v58 = vld [vmem:[%s9171_s1 + $0x5e8] sm:$0xff] }
 0x12a   : > { %5871 = vmatpush1.bf16.msra.mxu0 %v5870_v7  ;;  %v5934_v7 = vpack.c.bf16 %v490_v61, %v484_v60  ;;  %v402_v61 = vld [vmem:[%s9171_s1 + $0x140] sm:$0xff]  ;;  %v408_v62 = vld [vmem:[%s9171_s1 + $0x170] sm:$0xff]  ;;  %v415_v63 = vld [vmem:[%s9171_s1 + $0x1a8] sm:$0xff] }
 0x12b   : > { %5873 = vmatprep.subr.bf16.mxu0 %v5872_v8  ;;  %5927 = vmatpush1.bf16.msra.mxu1 %v5926_v37  ;;  %v373_v8 = vld [vmem:[%s9171_s1 + $0x58] sm:$0xff]  ;;  %v526_v37 = vld [vmem:[%s9171_s1 + $0x520] sm:$0xff]  ;;  %v544_v4 = vld [vmem:[%s9171_s1 + $0x5b0] sm:$0xff] }
 0x12c   : > { %5929 = vmatprep.subr.bf16.mxu1 %v5928_v44  ;;  %v5956_v16 = vpack.c.bf16 %v373_v8, %v367_v5  ;;  %v539_v44 = vld [vmem:[%s9171_s1 + $0x588] sm:$0xff]  ;;  %v550_v5 = vld [vmem:[%s9171_s1 + $0x5e0] sm:$0xff]  ;;  %v433_v13 = vld [vmem:[%s9171_s1 + $0x238] sm:$0xff] }
 0x12d   : > { %v5948_v53 = vpack.c.bf16 %v539_v44, %v533_v41  ;;  %v427_v12 = vld [vmem:[%s9171_s1 + $0x208] sm:$0xff]  ;;  %v426_v17 = vld [vmem:[%s9171_s1 + $0x200] sm:$0xff]  ;;  %v432_v18 = vld [vmem:[%s9171_s1 + $0x230] sm:$0xff] }
 0x12e   : > { %5875 = vmatpush1.bf16.msra.mxu0 %v5874_v20  ;;  %v5938_v20 = vpack.c.bf16 %v502_v11, %v496_v10  ;;  %v420_v10 = vld [vmem:[%s9171_s1 + $0x1d0] sm:$0xff]  ;;  %v5954_v11 = vpack.c.bf16 %v550_v5, %v544_v4  ;;  %v451_v26 = vld [vmem:[%s9171_s1 + $0x2c8] sm:$0xff]  ;;  %v457_v27 = vld [vmem:[%s9171_s1 + $0x2f8] sm:$0xff] }
 0x12f   : > { %5877 = vmatprep.subr.bf16.mxu0 %v5876_v21  ;;  %5931 = vmatpush1.bf16.msra.mxu1 %v5930_v57  ;;  %v385_v21 = vld [vmem:[%s9171_s1 + $0xb8] sm:$0xff]  ;;  %v450_v30 = vld [vmem:[%s9171_s1 + $0x2c0] sm:$0xff]  ;;  %v456_v31 = vld [vmem:[%s9171_s1 + $0x2f0] sm:$0xff] }
 0x130   : > { %5933 = vmatprep.subr.bf16.mxu1 %v5932_v59  ;;  %v5960_v29 = vpack.c.bf16 %v385_v21, %v379_v19  ;;  %v545_v57 = vld [vmem:[%s9171_s1 + $0x5b8] sm:$0xff]  ;;  %v5966_v59 = vpack.c.bf16 %v396_v49, %v390_v48  ;;  %v439_v19 = vld [vmem:[%s9171_s1 + $0x268] sm:$0xff]  ;;  %v5978_v21 = vpack.c.bf16 %v432_v18, %v426_v17  ;;  %v474_v48 = vld [vmem:[%s9171_s1 + $0x380] sm:$0xff] }
 0x131   : > { %v5952_v3 = vpack.c.bf16 %v551_v58, %v545_v57  ;;  %v475_v41 = vld [vmem:[%s9171_s1 + $0x388] sm:$0xff]  ;;  %v481_v44 = vld [vmem:[%s9171_s1 + $0x3b8] sm:$0xff]  ;;  %v480_v49 = vld [vmem:[%s9171_s1 + $0x3b0] sm:$0xff] }
 0x132   : > { %5879 = vmatpush1.bf16.msra.mxu0 %v5878_v32  ;;  %v391_v32 = vld [vmem:[%s9171_s1 + $0xe8] sm:$0xff]  ;;  %v505_v58 = vld [vmem:[%s9171_s1 + $0x478] sm:$0xff]  ;;  %v510_v4 = vld [vmem:[%s9171_s1 + $0x4a0] sm:$0xff] }
 0x133   : > { %5881 = vmatprep.subr.bf16.mxu0 %v5880_v33  ;;  %5935 = vmatpush1.bf16.msra.mxu1 %v5934_v7  ;;  %v5942_v33 = vpack.c.bf16 %v514_v24, %v508_v23  ;;  %v5964_v47 = vpack.c.bf16 %v397_v34, %v391_v32  ;;  %v5970_v7 = vpack.c.bf16 %v408_v62, %v402_v61  ;;  %v438_v23 = vld [vmem:[%s9171_s1 + $0x260] sm:$0xff]  ;;  %v444_v24 = vld [vmem:[%s9171_s1 + $0x290] sm:$0xff]  ;;  %v463_v32 = vld [vmem:[%s9171_s1 + $0x328] sm:$0xff] }
 0x134   : > { %5937 = vmatprep.subr.bf16.mxu1 %v5936_v9  ;;  %v414_v9 = vld [vmem:[%s9171_s1 + $0x1a0] sm:$0xff]  ;;  %v5986_v34 = vpack.c.bf16 %v456_v31, %v450_v30  ;;  %v499_v57 = vld [vmem:[%s9171_s1 + $0x448] sm:$0xff]  ;;  %v504_v62 = vld [vmem:[%s9171_s1 + $0x470] sm:$0xff] }
 0x135   : > { %v498_v61 = vld [vmem:[%s9171_s1 + $0x440] sm:$0xff]  ;;  %v516_v5 = vld [vmem:[%s9171_s1 + $0x4d0] sm:$0xff] }
 0x136   : > { %5883 = vmatpush1.bf16.msra.mxu0 %v5882_v50  ;;  %v403_v50 = vld [vmem:[%s9171_s1 + $0x148] sm:$0xff]  ;;  %v534_v18 = vld [vmem:[%s9171_s1 + $0x560] sm:$0xff] }
 0x137   : > { %5885 = vmatprep.subr.bf16.mxu0 %v5884_v51  ;;  %5939 = vmatpush1.bf16.msra.mxu1 %v5938_v20  ;;  %v5946_v51 = vpack.c.bf16 %v526_v37, %v520_v36  ;;  %v445_v20 = vld [vmem:[%s9171_s1 + $0x298] sm:$0xff]  ;;  %v462_v36 = vld [vmem:[%s9171_s1 + $0x320] sm:$0xff]  ;;  %v468_v37 = vld [vmem:[%s9171_s1 + $0x350] sm:$0xff] }
 0x138   : > { %5941 = vmatprep.subr.bf16.mxu1 %v5940_v22  ;;  %v5980_v22 = vpack.c.bf16 %v445_v20, %v439_v19  ;;  %v540_v19 = vld [vmem:[%s9171_s1 + $0x590] sm:$0xff]  ;;  %v547_v20 = vld [vmem:[%s9171_s1 + $0x5c8] sm:$0xff] }
 0x13a   : > { %5887 = vmatpush1.bf16.msra.mxu0 %v5886_v0  ;;  %v5950_v0 = vpack.c.bf16 %v538_v56, %v532_v55  ;;  %v486_v55 = vld [vmem:[%s9171_s1 + $0x3e0] sm:$0xff]  ;;  %v492_v56 = vld [vmem:[%s9171_s1 + $0x410] sm:$0xff] }
 0x13b   : > { %5889 = vmatprep.subr.bf16.mxu0 %v5888_v2  ;;  %5943 = vmatpush1.bf16.msra.mxu1 %v5942_v33  ;;  %v421_v2 = vld [vmem:[%s9171_s1 + $0x1d8] sm:$0xff] }
 0x13c   : > { %5945 = vmatprep.subr.bf16.mxu1 %v5944_v35  ;;  %v5972_v8 = vpack.c.bf16 %v421_v2, %v415_v63  ;;  %v469_v33 = vld [vmem:[%s9171_s1 + $0x358] sm:$0xff]  ;;  %v511_v63 = vld [vmem:[%s9171_s1 + $0x4a8] sm:$0xff]  ;;  %v6002_v2 = vpack.c.bf16 %v504_v62, %v498_v61 }
 0x13d   : > { %v5988_v35 = vpack.c.bf16 %v469_v33, %v463_v32 }
 0x13e   : > { %5891 = vmatpush1.bf16.msra.mxu0 %v5890_v14  ;;  %v5974_v14 = vpack.c.bf16 %v420_v10, %v414_v9  ;;  %v6006_v9 = vpack.c.bf16 %v516_v5, %v510_v4 }
 0x13f   : > { %5957 = vmatprep.subr.bf16.mxu0 %v5956_v16  ;;  %5947 = vmatpush1.bf16.msra.mxu1 %v5946_v51  ;;  %v5976_v16 = vpack.c.bf16 %v433_v13, %v427_v12  ;;  %v493_v51 = vld [vmem:[%s9171_s1 + $0x418] sm:$0xff]  ;;  %v528_v12 = vld [vmem:[%s9171_s1 + $0x530] sm:$0xff]  ;;  %v535_v13 = vld [vmem:[%s9171_s1 + $0x568] sm:$0xff] }
 0x140   : > { %5949 = vmatprep.subr.bf16.mxu1 %v5948_v53 }
 0x141   : > { %662 = vmatmul.mubr.f32.vlgmr.msra.gmra.mrb[0].mxu0 %v7056_v25 }
 0x142   : > { %5959 = vmatpush1.bf16.msra.mxu0 %v5958_v28  ;;  %803 = vmatprep.mubr.f32.mxu0 %v6711_v15  ;;  %v409_v15 = vld [vmem:[%s9171_s1 + $0x178] sm:$0xff]  ;;  %v5982_v28 = vpack.c.bf16 %v444_v24, %v438_v23  ;;  %v546_v24 = vld [vmem:[%s9171_s1 + $0x5c0] sm:$0xff] }
 0x143   : > { %5961 = vmatprep.subr.bf16.mxu0 %v5960_v29  ;;  %v5968_v60 = vpack.c.bf16 %v409_v15, %v403_v50  ;;  %5951 = vmatpush1.bf16.msra.mxu1 %v5950_v0  ;;  %v5984_v29 = vpack.c.bf16 %v457_v27, %v451_v26  ;;  %v487_v50 = vld [vmem:[%s9171_s1 + $0x3e8] sm:$0xff]  ;;  %v5994_v15 = vpack.c.bf16 %v480_v49, %v474_v48  ;;  %v517_v0 = vld [vmem:[%s9171_s1 + $0x4d8] sm:$0xff]  ;;  %v552_v26 = vld [vmem:[%s9171_s1 + $0x5f0] sm:$0xff] }
 0x144   : > { %5953 = vmatprep.subr.bf16.mxu1 %v5952_v3  ;;  %v5996_v53 = vpack.c.bf16 %v493_v51, %v487_v50  ;;  %v6004_v3 = vpack.c.bf16 %v517_v0, %v511_v63  ;;  %v6018_v27 = vpack.c.bf16 %v552_v26, %v546_v24 }
 0x146   : > { %5963 = vmatpush1.bf16.msra.mxu0 %v5962_v46  ;;  %v5990_v46 = vpack.c.bf16 %v468_v37, %v462_v36 }
 0x147   : > { %5965 = vmatprep.subr.bf16.mxu0 %v5964_v47  ;;  %5955 = vmatpush1.bf16.msra.mxu1 %v5954_v11  ;;  %v5992_v47 = vpack.c.bf16 %v481_v44, %v475_v41  ;;  %v522_v11 = vld [vmem:[%s9171_s1 + $0x500] sm:$0xff] }
 0x14a   : > { %5967 = vmatpush1.bf16.msra.mxu0 %v5966_v59  ;;  %733 = vmatmul.mubr.f32.vlgmr.msra.gmra.mrb[0].mxu1 %v7056_v25  ;;  %v5998_v59 = vpack.c.bf16 %v492_v56, %v486_v55  ;;  %v360_v55 = vld [vmem:[%s358_s21] ss:$8 sm:$0x30] }
 0x14b   : > { %5969 = vmatprep.subr.bf16.mxu0 %v5968_v60  ;;  %v6000_v60 = vpack.c.bf16 %v505_v58, %v499_v57 }
 0x14e   : > { %5971 = vmatpush1.bf16.msra.mxu0 %v5970_v7  ;;  %v523_v7 = vld [vmem:[%s9171_s1 + $0x508] sm:$0xff] }
 0x14f   : > { %5973 = vmatprep.subr.bf16.mxu0 %v5972_v8  ;;  %v529_v8 = vld [vmem:[%s9171_s1 + $0x538] sm:$0xff] }
 0x150   : > { %v6008_v10 = vpack.c.bf16 %v529_v8, %v523_v7 }
 0x152   : > { %5975 = vmatpush1.bf16.msra.mxu0 %v5974_v14  ;;  %v541_v14 = vld [vmem:[%s9171_s1 + $0x598] sm:$0xff] }
 0x153   : > { %5977 = vmatprep.subr.bf16.mxu0 %v5976_v16  ;;  %v6010_v16 = vpack.c.bf16 %v528_v12, %v522_v11  ;;  %v6012_v17 = vpack.c.bf16 %v541_v14, %v535_v13 }
 0x156   : > { %5979 = vmatpush1.bf16.msra.mxu0 %v5978_v21  ;;  %v553_v21 = vld [vmem:[%s9171_s1 + $0x5f8] sm:$0xff] }
 0x157   : > { %5981 = vmatprep.subr.bf16.mxu0 %v5980_v22  ;;  %v6014_v22 = vpack.c.bf16 %v540_v19, %v534_v18  ;;  %v6016_v23 = vpack.c.bf16 %v553_v21, %v547_v20 }
 0x15a   : > { %5983 = vmatpush1.bf16.msra.mxu0 %v5982_v28  ;;  %v554_v28 = vld [vmem:[%s9172_s28] sm:$0x3f] }
 0x15b   : > { %5985 = vmatprep.subr.bf16.mxu0 %v5984_v29  ;;  %v570_v29 = vrot.slane %v554_v28, %v6646_v40  ;;  %v574_v30 = vrot.slane %v554_v28, %v6652_v42  ;;  %v578_v36 = vrot.slane %v554_v28, %v6655_v43  ;;  %v582_v37 = vrot.slane %v554_v28, %v6659_v45 }
 0x15c   : > { %v586_v4 = vrot.slane %v554_v28, %v6665_v52  ;;  %v590_v5 = vrot.slane %v554_v28, %v6668_v54  ;;  %v903_v28 = vld [vmem:[%s9149_s9] sm:$0xff] (%p346_p0) }
 0x15e   : > { %5987 = vmatpush1.bf16.msra.mxu0 %v5986_v34 }
 0x15f   : > { %5989 = vmatprep.subr.bf16.mxu0 %v5988_v35 }
 0x162   : > { %5991 = vmatpush1.bf16.msra.mxu0 %v5990_v46 }
 0x163   : > { %5993 = vmatprep.subr.bf16.mxu0 %v5992_v47 }
 0x166   : > { %5995 = vmatpush1.bf16.msra.mxu0 %v5994_v15 }
 0x167   : > { %5997 = vmatprep.subr.bf16.mxu0 %v5996_v53  ;;  %v359_v53 = vld [vmem:[%s358_s21] ss:$8 sm:$0xf] }
 0x168   : > { %v361_v56 = vor.u32 %v360_v55, %v359_v53 }
 0x16a   : > { %5999 = vmatpush1.bf16.msra.mxu0 %v5998_v59  ;;  %v836_v61 = vrot.slane %v361_v56, 2 }
 0x16b   : > { %6001 = vmatprep.subr.bf16.mxu0 %v6000_v60 }
 0x16e   : > { %6003 = vmatpush1.bf16.msra.mxu0 %v6002_v2 }
 0x16f   : > { %6005 = vmatprep.subr.bf16.mxu0 %v6004_v3 }
 0x172   : > { %6007 = vmatpush1.bf16.msra.mxu0 %v6006_v9 }
 0x173   : > { %6009 = vmatprep.subr.bf16.mxu0 %v6008_v10 }
 0x176   : > { %6011 = vmatpush1.bf16.msra.mxu0 %v6010_v16 }
 0x177   : > { %6013 = vmatprep.subr.bf16.mxu0 %v6012_v17  ;;  %v882_v17 = vrot.slane %v361_v56, 4 }
 0x17a   : > { %6015 = vmatpush1.bf16.msra.mxu0 %v6014_v22 }
 0x17b   : > { %6017 = vmatprep.subr.bf16.mxu0 %v6016_v23 }
 0x17e   : > { %6019 = vmatpush1.bf16.msra.mxu0 %v6018_v27 }
 0x181   : > { %804 = vmatmul.mubr.f32.vlgmr.msra.gmra.mrb[2].mxu0 %v7056_v25  ;;  %v6450_v25 = vmov 1966171168  }
 0x182   : > { %v814_v44 = vunpack.c.l.s4 %v6450_v25  ;;  %v912_v25 = vld [vmem:[%s9149_s9 + $0x48] sm:$0xff] (%p346_p0) }
 0x184   : > { %v815_v50 = vunpack.c.0.s8 %v814_v44  ;;  %v916_v44 = vld [vmem:[%s9149_s9 + $0x68] sm:$0xff] (%p346_p0) }
 0x185   :  { %v5236_v55 = vcombine.low (%p346_p0), %v912_v25, %v916_v44 }
 0x186   : > { %v7282_v51 = vsub.s32 %v815_v50, %v6643_v39  ;;  %v924_v50 = vld [vmem:[%s9149_s9 + $0xa8] sm:$0xff] (%p346_p0) }
 0x214   : > { %v663_v31 = vpop.f32.mrb[0].mxu0 }
 0x215   : > { %v664_v32 = vadd.f32 %v663_v31, %v570_v29  ;;  %v665_v33 = vpop.f32.mrb[1].mxu0  ;;  %v907_v29 = vld [vmem:[%s9149_s9 + $0x20] sm:$0xff] (%p346_p0) }
 0x216   : > { %v666_v34 = vadd.f32 %v665_v33, %v574_v30  ;;  %v5227_v31 = vcombine.high (%p346_p0), %v903_v28, %v907_v29  ;;  %v5226_v33 = vcombine.low (%p346_p0), %v903_v28, %v907_v29 }
 0x218   : > { %v812_v35 = vcombine.low %v664_v32, %v666_v34  ;;  %v908_v32 = vld [vmem:[%s9149_s9 + $0x28] sm:$0xff] (%p346_p0)  ;;  %v911_v34 = vld [vmem:[%s9149_s9 + $0x40] sm:$0xff] (%p346_p0)  ;;  %1713 = vmatprep.subr.bf16.mxu0 (%p346_p0), %v5227_v31 }
 0x219   :  { %1714 = vmatpush1.bf16.msra.mxu0 (%p346_p0), %v5226_v33  ;;  %v963_v31 = vld [vmem:[%s9149_s9 + $0x1e0] sm:$0xff] (%p346_p0)  ;;  %v964_v33 = vld [vmem:[%s9149_s9 + $0x1e8] sm:$0xff] (%p346_p0) }
 0x21a   : > { %v819_v15 = vrot.slane %v812_v35, %v7282_v51  ;;  %v915_v35 = vld [vmem:[%s9149_s9 + $0x60] sm:$0xff] (%p346_p0) }
 0x21b   :  { %v5234_v53 = vcombine.low (%p346_p0), %v911_v34, %v915_v35 }
 0x21c   : > { %v826_v57 = vrot.slane %v819_v15, %v7282_v51 }
 0x21d   : > { %v734_v41 = vpop.f32.mrb[0].mxu1 }
 0x21e   : > { %v735_v46 = vadd.f32 %v734_v41, %v578_v36  ;;  %v736_v47 = vpop.f32.mrb[1].mxu1  ;;  %v828_v58 = vadd.f32 %v826_v57, %v361_v56  ;;  %v5235_v41 = vcombine.high (%p346_p0), %v911_v34, %v915_v35 }
 0x21f   : > { %v737_v48 = vadd.f32 %v736_v47, %v582_v37  ;;  %v5237_v47 = vcombine.high (%p346_p0), %v912_v25, %v916_v44  ;;  %v971_v25 = vld [vmem:[%s9149_s9 + $0x220] sm:$0xff] (%p346_p0)  ;;  %v968_v44 = vld [vmem:[%s9149_s9 + $0x208] sm:$0xff] (%p346_p0) }
 0x220   : > { %v5224_v60 = vmul.f32 -1.442695, %v828_v58  ;;  %1715 = vmatprep.subr.bf16.mxu0 (%p346_p0), %v5235_v41  ;;  %v927_v58 = vld [vmem:[%s9149_s9 + $0xc0] sm:$0xff] (%p346_p0) }
 0x221   : > { %v840_v49 = vcombine.low %v735_v46, %v737_v48  ;;  %v919_v46 = vld [vmem:[%s9149_s9 + $0x80] sm:$0xff] (%p346_p0)  ;;  %1716 = vmatpush1.bf16.msra.mxu0 (%p346_p0), %v5234_v53 }
 0x222   : > { %6119 = vpow2.f32 %v5224_v60  ;;  %v923_v48 = vld [vmem:[%s9149_s9 + $0xa0] sm:$0xff] (%p346_p0)  ;;  %v928_v60 = vld [vmem:[%s9149_s9 + $0xc8] sm:$0xff] (%p346_p0) }
 0x223   : > { %v847_v59 = vrot.slane %v840_v49, %v7282_v51  ;;  %v920_v49 = vld [vmem:[%s9149_s9 + $0x88] sm:$0xff] (%p346_p0)  ;;  %v5243_v56 = vcombine.high (%p346_p0), %v919_v46, %v923_v48  ;;  %v967_v41 = vld [vmem:[%s9149_s9 + $0x200] sm:$0xff] (%p346_p0) }
 0x224   :  { %v5245_v57 = vcombine.high (%p346_p0), %v920_v49, %v924_v50  ;;  %v975_v53 = vld [vmem:[%s9149_s9 + $0x240] sm:$0xff] (%p346_p0) }
 0x225   : > { %v854_v62 = vrot.slane %v847_v59, %v7282_v51  ;;  %v931_v59 = vld [vmem:[%s9149_s9 + $0xe0] sm:$0xff] (%p346_p0)  ;;  %1717 = vmatprep.subr.bf16.mxu0 (%p346_p0), %v5243_v56  ;;  %v976_v56 = vld [vmem:[%s9149_s9 + $0x248] sm:$0xff] (%p346_p0) }
 0x227   : > { %v856_v63 = vadd.f32 %v854_v62, %v836_v61  ;;  %v932_v61 = vld [vmem:[%s9149_s9 + $0xe8] sm:$0xff] (%p346_p0)  ;;  %v5242_v62 = vcombine.low (%p346_p0), %v919_v46, %v923_v48 }
 0x228   :  { %v972_v46 = vld [vmem:[%s9149_s9 + $0x228] sm:$0xff] (%p346_p0) }
 0x229   : > { %v5225_v0 = vmul.f32 -1.442695, %v856_v63  ;;  %v5244_v63 = vcombine.low (%p346_p0), %v920_v49, %v924_v50  ;;  %1718 = vmatpush1.bf16.msra.mxu0 (%p346_p0), %v5242_v62  ;;  %v5291_v49 = vcombine.high (%p346_p0), %v967_v41, %v971_v25  ;;  %v5293_v50 = vcombine.high (%p346_p0), %v968_v44, %v972_v46  ;;  %v983_v62 = vld [vmem:[%s9149_s9 + $0x280] sm:$0xff] (%p346_p0) }
 0x22b   : > { %6121 = vpow2.f32 %v5225_v0  ;;  %v5251_v0 = vcombine.high (%p346_p0), %v927_v58, %v931_v59 }
 0x22c   : > { %v6120_v2 = vpop.eup %6119 }
 0x22d   : > { %v832_v3 = vadd.f32 1.0, %v6120_v2  ;;  %v5253_v2 = vcombine.high (%p346_p0), %v928_v60, %v932_v61  ;;  %1719 = vmatprep.subr.bf16.mxu0 (%p346_p0), %v5251_v0  ;;  %v984_v0 = vld [vmem:[%s9149_s9 + $0x288] sm:$0xff] (%p346_p0) }
 0x22f   : > { %6123 = vrcp.f32 %v832_v3  ;;  %v935_v3 = vld [vmem:[%s9149_s9 + $0x100] sm:$0xff] (%p346_p0) }
 0x235   : > { %v6122_v8 = vpop.eup %6121 }
 0x236   : > { %v860_v12 = vadd.f32 1.0, %v6122_v8  ;;  %v5250_v8 = vcombine.low (%p346_p0), %v927_v58, %v931_v59  ;;  %v5290_v58 = vcombine.low (%p346_p0), %v967_v41, %v971_v25  ;;  %v5292_v59 = vcombine.low (%p346_p0), %v968_v44, %v972_v46  ;;  %v1023_v25 = vld [vmem:[%s9149_s9 + $0x3c0] sm:$0xff] (%p346_p0) }
 0x237   :  { %v1027_v44 = vld [vmem:[%s9149_s9 + $0x3e0] sm:$0xff] (%p346_p0) }
 0x238   : > { %6125 = vrcp.f32 %v860_v12  ;;  %v943_v12 = vld [vmem:[%s9149_s9 + $0x140] sm:$0xff] (%p346_p0)  ;;  %1720 = vmatpush1.bf16.msra.mxu0 (%p346_p0), %v5250_v8 }
 0x239   : > { %v6124_v18 = vpop.eup %6123  ;;  %v991_v8 = vld [vmem:[%s9149_s9 + $0x2c0] sm:$0xff] (%p346_p0) }
 0x242   : > { %v6126_v21 = vpop.eup %6125 }
 0x243   : > { %v886_v22 = vsub.f32 1.0, %v6126_v21  ;;  %v888_v24 = vmul.f32 %v6443_v1, %v6126_v21  ;;  %v951_v21 = vld [vmem:[%s9149_s9 + $0x180] sm:$0xff] (%p346_p0) }
 0x254   : > { %v805_v7 = vpop.f32.mrb[2].mxu0 }
 0x255   : > { %v806_v9 = vadd.f32 %v805_v7, %v586_v4  ;;  %v807_v10 = vpop.f32.mrb[3].mxu0  ;;  %v939_v4 = vld [vmem:[%s9149_s9 + $0x120] sm:$0xff] (%p346_p0)  ;;  %v940_v7 = vld [vmem:[%s9149_s9 + $0x128] sm:$0xff] (%p346_p0) }
 0x256   : > { %v808_v11 = vadd.f32 %v807_v10, %v590_v5  ;;  %v936_v5 = vld [vmem:[%s9149_s9 + $0x108] sm:$0xff] (%p346_p0)  ;;  %v5259_v10 = vcombine.high (%p346_p0), %v935_v3, %v939_v4 }
 0x258   : > { %v865_v13 = vcombine.low %v806_v9, %v808_v11  ;;  %v5252_v9 = vcombine.low (%p346_p0), %v928_v60, %v932_v61  ;;  %v5261_v11 = vcombine.high (%p346_p0), %v936_v5, %v940_v7  ;;  %1721 = vmatprep.subr.bf16.mxu0 (%p346_p0), %v5259_v10  ;;  %v992_v10 = vld [vmem:[%s9149_s9 + $0x2c8] sm:$0xff] (%p346_p0) }
 0x25a   : > { %v872_v14 = vrot.slane %v865_v13, %v7282_v51  ;;  %v947_v13 = vld [vmem:[%s9149_s9 + $0x160] sm:$0xff] (%p346_p0) }
 0x25c   : > { %v879_v16 = vrot.slane %v872_v14, %v7282_v51  ;;  %v944_v14 = vld [vmem:[%s9149_s9 + $0x148] sm:$0xff] (%p346_p0) }
 0x25e   : > { %v881_v19 = vmul.f32 %v6124_v18, %v879_v16  ;;  %v948_v16 = vld [vmem:[%s9149_s9 + $0x168] sm:$0xff] (%p346_p0)  ;;  %v5260_v18 = vcombine.low (%p346_p0), %v936_v5, %v940_v7 }
 0x25f   :  { %v5268_v28 = vcombine.low (%p346_p0), %v944_v14, %v948_v16 }
 0x260   : > { %v884_v20 = vadd.f32 %v882_v17, %v881_v19  ;;  %v5258_v17 = vcombine.low (%p346_p0), %v935_v3, %v939_v4  ;;  %v5267_v19 = vcombine.high (%p346_p0), %v943_v12, %v947_v13 }
 0x262   : > { %6127 = vtanh.f32 %v884_v20  ;;  %v5269_v20 = vcombine.high (%p346_p0), %v944_v14, %v948_v16  ;;  %1722 = vmatpush1.bf16.msra.mxu0 (%p346_p0), %v5258_v17  ;;  %v999_v17 = vld [vmem:[%s9149_s9 + $0x300] sm:$0xff] (%p346_p0) }
 0x263   :  { %1723 = vmatprep.subr.bf16.mxu0 (%p346_p0), %v5267_v19  ;;  %v1000_v19 = vld [vmem:[%s9149_s9 + $0x308] sm:$0xff] (%p346_p0) }
 0x26c   : > { %v6128_v23 = vpop.eup %6127  ;;  %348 = sbr.rel (!%p346_p0) target bundleno = 248 (0xf8), region = 116 }
 0x26d   : > { %v887_v26 = vmul.f32 %v6128_v23, %v886_v22  ;;  %v955_v22 = vld [vmem:[%s9149_s9 + $0x1a0] sm:$0xff] (%p346_p0)  ;;  %v952_v23 = vld [vmem:[%s9149_s9 + $0x188] sm:$0xff] (%p346_p0) }
 0x26e   :  { %v5275_v29 = vcombine.high (%p346_p0), %v951_v21, %v955_v22  ;;  %v5274_v34 = vcombine.low (%p346_p0), %v951_v21, %v955_v22 }
 0x26f   : > { %v7293_v1 = vadd.f32 %v888_v24, %v887_v26   ;;  %v956_v24 = vld [vmem:[%s9149_s9 + $0x1a8] sm:$0xff] (%p346_p0)  ;;  %v5266_v26 = vcombine.low (%p346_p0), %v943_v12, %v947_v13 }
 0x270   :  { %v5276_v35 = vcombine.low (%p346_p0), %v952_v23, %v956_v24 }
 0x271   : > { %v9173_v27 = vmov %v7293_v1  ;;  %1724 = vmatpush1.bf16.msra.mxu0 (%p346_p0), %v5266_v26  ;;  %v1007_v26 = vld [vmem:[%s9149_s9 + $0x340] sm:$0xff] (%p346_p0) }
 0x272   : > { %v9174_v1 = vmov %v9173_v27  ;;  %v898_v30 = vrot.slane (%p346_p0), %v9173_v27, %v6652_v42  ;;  %1725 = vmatprep.subr.bf16.mxu0 (%p346_p0), %v5275_v29  ;;  %v1008_v29 = vld [vmem:[%s9149_s9 + $0x348] sm:$0xff] (%p346_p0) }
 0x273   :  { %v904_v1 = vld [vmem:[%s9149_s9 + $0x8] sm:$0xff] }
 0x274   :  { %v5229_v36 = vcombine.high %v904_v1, %v908_v32  ;;  %v5228_v37 = vcombine.low %v904_v1, %v908_v32  ;;  %v7339_v15 = vpack.c.bf16 %v898_v30, %v898_v30  ;;  %v5277_v1 = vcombine.high %v952_v23, %v956_v24  ;;  %v959_v30 = vld [vmem:[%s9149_s9 + $0x1c0] sm:$0xff]  ;;  %v960_v32 = vld [vmem:[%s9149_s9 + $0x1c8] sm:$0xff] }
 0x275   :  { %1726 = vmatpush1.bf16.msra.mxu0 %v5274_v34  ;;  %v5284_v48 = vcombine.low %v960_v32, %v964_v33 }
 0x276   :  { %1754 = vmatprep.subr.bf16.mxu1 %v5229_v36  ;;  %1745 = vmatprep.mubr.bf16.mxu0 %v7339_v15  ;;  %v5283_v36 = vcombine.high %v959_v30, %v963_v31 }
 0x277   :  { %1755 = vmatpush1.bf16.msra.mxu1 %v5228_v37  ;;  %1786 = vmatprep.mubr.bf16.mxu1 %v7339_v15  ;;  %v5285_v37 = vcombine.high %v960_v32, %v964_v33  ;;  %v1015_v33 = vld [vmem:[%s9149_s9 + $0x380] sm:$0xff] }
 0x278   :  { %1756 = vmatprep.subr.bf16.mxu1 %v5237_v47  ;;  %v5282_v47 = vcombine.low %v959_v30, %v963_v31  ;;  %1727 = vmatprep.subr.bf16.mxu0 %v5283_v36  ;;  %v1016_v36 = vld [vmem:[%s9149_s9 + $0x388] sm:$0xff] }
 0x27a   :  { %1728 = vmatpush1.bf16.msra.mxu0 %v5282_v47 }
 0x27b   :  { %1757 = vmatpush1.bf16.msra.mxu1 %v5236_v55  ;;  %v979_v55 = vld [vmem:[%s9149_s9 + $0x260] sm:$0xff]  ;;  %1729 = vmatprep.subr.bf16.mxu0 %v5291_v49  ;;  %v1028_v49 = vld [vmem:[%s9149_s9 + $0x3e8] sm:$0xff] }
 0x27c   :  { %1758 = vmatprep.subr.bf16.mxu1 %v5245_v57  ;;  %v980_v57 = vld [vmem:[%s9149_s9 + $0x268] sm:$0xff]  ;;  %v5299_v60 = vcombine.high %v975_v53, %v979_v55  ;;  %v5298_v3 = vcombine.low %v975_v53, %v979_v55  ;;  %v905_v55 = vld [vmem:[%s9149_s9 + $0x10] sm:$0xff] }
 0x27d   :  { %v5301_v61 = vcombine.high %v976_v56, %v980_v57  ;;  %v5300_v4 = vcombine.low %v976_v56, %v980_v57  ;;  %v909_v56 = vld [vmem:[%s9149_s9 + $0x30] sm:$0xff] }
 0x27e   :  { %1730 = vmatpush1.bf16.msra.mxu0 %v5290_v58  ;;  %v5347_v58 = vcombine.high %v1023_v25, %v1027_v44 }
 0x27f   :  { %1759 = vmatpush1.bf16.msra.mxu1 %v5244_v63  ;;  %v987_v63 = vld [vmem:[%s9149_s9 + $0x2a0] sm:$0xff]  ;;  %1731 = vmatprep.subr.bf16.mxu0 %v5299_v60  ;;  %v910_v60 = vld [vmem:[%s9149_s9 + $0x38] sm:$0xff] }
 0x280   :  { %1760 = vmatprep.subr.bf16.mxu1 %v5253_v2  ;;  %v988_v2 = vld [vmem:[%s9149_s9 + $0x2a8] sm:$0xff]  ;;  %v5307_v5 = vcombine.high %v983_v62, %v987_v63  ;;  %v5306_v12 = vcombine.low %v983_v62, %v987_v63  ;;  %v894_v62 = vrot.slane %v9173_v27, %v6646_v40  ;;  %v5346_v63 = vcombine.low %v1023_v25, %v1027_v44  ;;  %v918_v27 = vld [vmem:[%s9149_s9 + $0x78] sm:$0xff] }
 0x281   :  { %v5309_v7 = vcombine.high %v984_v0, %v988_v2  ;;  %v5308_v13 = vcombine.low %v984_v0, %v988_v2  ;;  %v913_v0 = vld [vmem:[%s9149_s9 + $0x50] sm:$0xff]  ;;  %v946_v25 = vld [vmem:[%s9149_s9 + $0x158] sm:$0xff] }
 0x282   :  { %1732 = vmatpush1.bf16.msra.mxu0 %v5298_v3  ;;  %v917_v2 = vld [vmem:[%s9149_s9 + $0x70] sm:$0xff]  ;;  %v950_v44 = vld [vmem:[%s9149_s9 + $0x178] sm:$0xff] }
 0x283   :  { %1761 = vmatpush1.bf16.msra.mxu1 %v5252_v9  ;;  %v995_v9 = vld [vmem:[%s9149_s9 + $0x2e0] sm:$0xff]  ;;  %1733 = vmatprep.subr.bf16.mxu0 %v5307_v5  ;;  %v914_v5 = vld [vmem:[%s9149_s9 + $0x58] sm:$0xff] }
 0x284   :  { %1762 = vmatprep.subr.bf16.mxu1 %v5261_v11  ;;  %v996_v11 = vld [vmem:[%s9149_s9 + $0x2e8] sm:$0xff]  ;;  %v5315_v14 = vcombine.high %v991_v8, %v995_v9  ;;  %v5314_v21 = vcombine.low %v991_v8, %v995_v9  ;;  %v7525_v8 = vpack.c.bf16 %v894_v62, %v894_v62  ;;  %v5230_v9 = vcombine.low %v905_v55, %v909_v56 }
 0x285   :  { %v5317_v16 = vcombine.high %v992_v10, %v996_v11  ;;  %v5316_v22 = vcombine.low %v992_v10, %v996_v11  ;;  %v921_v10 = vld [vmem:[%s9149_s9 + $0x90] sm:$0xff] }
 0x286   :  { %1734 = vmatpush1.bf16.msra.mxu0 %v5306_v12  ;;  %v925_v11 = vld [vmem:[%s9149_s9 + $0xb0] sm:$0xff] }
 0x287   :  { %1763 = vmatpush1.bf16.msra.mxu1 %v5260_v18  ;;  %v1003_v18 = vld [vmem:[%s9149_s9 + $0x320] sm:$0xff]  ;;  %1735 = vmatprep.subr.bf16.mxu0 %v5315_v14  ;;  %v922_v14 = vld [vmem:[%s9149_s9 + $0x98] sm:$0xff] }
 0x288   :  { %1764 = vmatprep.subr.bf16.mxu1 %v5269_v20  ;;  %v1004_v20 = vld [vmem:[%s9149_s9 + $0x328] sm:$0xff]  ;;  %v5323_v23 = vcombine.high %v999_v17, %v1003_v18  ;;  %v5322_v30 = vcombine.low %v999_v17, %v1003_v18  ;;  %v5241_v17 = vcombine.high %v914_v5, %v918_v27  ;;  %v5238_v18 = vcombine.low %v913_v0, %v917_v2 }
 0x289   :  { %v5325_v24 = vcombine.high %v1000_v19, %v1004_v20  ;;  %v5324_v31 = vcombine.low %v1000_v19, %v1004_v20  ;;  %v929_v19 = vld [vmem:[%s9149_s9 + $0xd0] sm:$0xff] }
 0x28a   :  { %1736 = vmatpush1.bf16.msra.mxu0 %v5314_v21  ;;  %v933_v20 = vld [vmem:[%s9149_s9 + $0xf0] sm:$0xff]  ;;  %v5240_v21 = vcombine.low %v914_v5, %v918_v27 }
 0x28b   :  { %1765 = vmatpush1.bf16.msra.mxu1 %v5268_v28  ;;  %v1011_v28 = vld [vmem:[%s9149_s9 + $0x360] sm:$0xff]  ;;  %1737 = vmatprep.subr.bf16.mxu0 %v5323_v23  ;;  %v930_v23 = vld [vmem:[%s9149_s9 + $0xd8] sm:$0xff] }
 0x28c   :  { %1766 = vmatprep.subr.bf16.mxu1 %v5277_v1  ;;  %v1012_v1 = vld [vmem:[%s9149_s9 + $0x368] sm:$0xff]  ;;  %v5331_v32 = vcombine.high %v1007_v26, %v1011_v28  ;;  %v5330_v41 = vcombine.low %v1007_v26, %v1011_v28  ;;  %v5246_v28 = vcombine.low %v921_v10, %v925_v11 }
 0x28d   :  { %v5333_v34 = vcombine.high %v1008_v29, %v1012_v1  ;;  %v5332_v46 = vcombine.low %v1008_v29, %v1012_v1  ;;  %v937_v29 = vld [vmem:[%s9149_s9 + $0x110] sm:$0xff] }
 0x28e   :  { %1738 = vmatpush1.bf16.msra.mxu0 %v5322_v30  ;;  %v941_v1 = vld [vmem:[%s9149_s9 + $0x130] sm:$0xff] }
 0x28f   :  { %1767 = vmatpush1.bf16.msra.mxu1 %v5276_v35  ;;  %v1019_v35 = vld [vmem:[%s9149_s9 + $0x3a0] sm:$0xff]  ;;  %1739 = vmatprep.subr.bf16.mxu0 %v5331_v32  ;;  %v938_v32 = vld [vmem:[%s9149_s9 + $0x118] sm:$0xff] }
 0x290   :  { %1768 = vmatprep.subr.bf16.mxu1 %v5285_v37  ;;  %v1020_v37 = vld [vmem:[%s9149_s9 + $0x3a8] sm:$0xff]  ;;  %v5339_v47 = vcombine.high %v1015_v33, %v1019_v35  ;;  %v5338_v53 = vcombine.low %v1015_v33, %v1019_v35  ;;  %v945_v35 = vld [vmem:[%s9149_s9 + $0x150] sm:$0xff] }
 0x291   :  { %v5340_v57 = vcombine.low %v1016_v36, %v1020_v37 }
 0x292   :  { %1740 = vmatpush1.bf16.msra.mxu0 %v5330_v41  ;;  %v5263_v41 = vcombine.high %v937_v29, %v941_v1 }
 0x293   :  { %1769 = vmatpush1.bf16.msra.mxu1 %v5284_v48  ;;  %v1024_v48 = vld [vmem:[%s9149_s9 + $0x3c8] sm:$0xff]  ;;  %1741 = vmatprep.subr.bf16.mxu0 %v5339_v47  ;;  %v5262_v47 = vcombine.low %v937_v29, %v941_v1  ;;  %v986_v29 = vld [vmem:[%s9149_s9 + $0x298] sm:$0xff] }
 0x294   :  { %1770 = vmatprep.subr.bf16.mxu1 %v5293_v50  ;;  %v5341_v50 = vcombine.high %v1016_v36, %v1020_v37  ;;  %v5348_v3 = vcombine.low %v1024_v48, %v1028_v49  ;;  %v949_v36 = vld [vmem:[%s9149_s9 + $0x170] sm:$0xff]  ;;  %v990_v1 = vld [vmem:[%s9149_s9 + $0x2b8] sm:$0xff] }
 0x296   :  { %1742 = vmatpush1.bf16.msra.mxu0 %v5338_v53  ;;  %v5271_v53 = vcombine.high %v945_v35, %v949_v36 }
 0x297   :  { %1771 = vmatpush1.bf16.msra.mxu1 %v5292_v59  ;;  %v906_v59 = vld [vmem:[%s9149_s9 + $0x18] sm:$0xff]  ;;  %1743 = vmatprep.subr.bf16.mxu0 %v5347_v58  ;;  %v5270_v58 = vcombine.low %v945_v35, %v949_v36 }
 0x298   :  { %1772 = vmatprep.subr.bf16.mxu1 %v5301_v61  ;;  %v5349_v61 = vcombine.high %v1024_v48, %v1028_v49  ;;  %v5232_v12 = vcombine.low %v906_v59, %v910_v60  ;;  %v953_v48 = vld [vmem:[%s9149_s9 + $0x190] sm:$0xff]  ;;  %v994_v35 = vld [vmem:[%s9149_s9 + $0x2d8] sm:$0xff] }
 0x299   :  { %v957_v49 = vld [vmem:[%s9149_s9 + $0x1b0] sm:$0xff]  ;;  %v998_v36 = vld [vmem:[%s9149_s9 + $0x2f8] sm:$0xff] }
 0x29a   :  { %1744 = vmatpush1.bf16.msra.mxu0 %v5346_v63  ;;  %v5279_v62 = vcombine.high %v953_v48, %v957_v49  ;;  %v962_v63 = vld [vmem:[%s9149_s9 + $0x1d8] sm:$0xff] }
 0x29b   :  { %1773 = vmatpush1.bf16.msra.mxu1 %v5300_v4  ;;  %v5231_v4 = vcombine.high %v905_v55, %v909_v56  ;;  %v954_v55 = vld [vmem:[%s9149_s9 + $0x198] sm:$0xff] }
 0x29c   :  { %1774 = vmatprep.subr.bf16.mxu1 %v5309_v7  ;;  %v5233_v7 = vcombine.high %v906_v59, %v910_v60  ;;  %v958_v56 = vld [vmem:[%s9149_s9 + $0x1b8] sm:$0xff]  ;;  %v961_v59 = vld [vmem:[%s9149_s9 + $0x1d0] sm:$0xff] }
 0x29d   :  { %1795 = vmatprep.subr.bf16.mxu0 %v5231_v4  ;;  %1746 = vmatmul.mubr.bf16.vlgmr.msra.gmra.mrb[0].mxu0 %v7525_v8  ;;  %v965_v60 = vld [vmem:[%s9149_s9 + $0x1f0] sm:$0xff]  ;;  %v5280_v4 = vcombine.low %v954_v55, %v958_v56 }
 0x29e   :  { %1796 = vmatpush1.bf16.msra.mxu0 %v5230_v9  ;;  %1827 = vmatprep.mubr.bf16.mxu0 %v7339_v15  ;;  %v5287_v5 = vcombine.high %v961_v59, %v965_v60  ;;  %v973_v9 = vld [vmem:[%s9149_s9 + $0x230] sm:$0xff] }
 0x29f   :  { %1775 = vmatpush1.bf16.msra.mxu1 %v5308_v13  ;;  %v5239_v13 = vcombine.high %v913_v0, %v917_v2  ;;  %v966_v0 = vld [vmem:[%s9149_s9 + $0x1f8] sm:$0xff]  ;;  %v5281_v2 = vcombine.high %v954_v55, %v958_v56 }
 0x2a0   :  { %1776 = vmatprep.subr.bf16.mxu1 %v5317_v16  ;;  %v926_v16 = vld [vmem:[%s9149_s9 + $0xb8] sm:$0xff]  ;;  %v5289_v27 = vcombine.high %v962_v63, %v966_v0 }
 0x2a1   :  { %1797 = vmatprep.subr.bf16.mxu0 %v5239_v13  ;;  %v5249_v26 = vcombine.high %v922_v14, %v926_v16  ;;  %v5248_v30 = vcombine.low %v922_v14, %v926_v16  ;;  %v5288_v13 = vcombine.low %v962_v63, %v966_v0 }
 0x2a2   :  { %1798 = vmatpush1.bf16.msra.mxu0 %v5238_v18  ;;  %v981_v18 = vld [vmem:[%s9149_s9 + $0x270] sm:$0xff] }
 0x2a3   :  { %1777 = vmatpush1.bf16.msra.mxu1 %v5316_v22  ;;  %v5247_v22 = vcombine.high %v921_v10, %v925_v11  ;;  %v970_v10 = vld [vmem:[%s9149_s9 + $0x218] sm:$0xff] }
 0x2a4   :  { %1778 = vmatprep.subr.bf16.mxu1 %v5325_v24  ;;  %v934_v24 = vld [vmem:[%s9149_s9 + $0xf8] sm:$0xff] }
 0x2a5   :  { %1799 = vmatprep.subr.bf16.mxu0 %v5247_v22  ;;  %v5257_v33 = vcombine.high %v930_v23, %v934_v24  ;;  %v5256_v37 = vcombine.low %v930_v23, %v934_v24  ;;  %v974_v11 = vld [vmem:[%s9149_s9 + $0x238] sm:$0xff] }
 0x2a6   :  { %1800 = vmatpush1.bf16.msra.mxu0 %v5246_v28  ;;  %v5297_v16 = vcombine.high %v970_v10, %v974_v11  ;;  %v5296_v22 = vcombine.low %v970_v10, %v974_v11  ;;  %v989_v28 = vld [vmem:[%s9149_s9 + $0x2b0] sm:$0xff] }
 0x2a7   :  { %1779 = vmatpush1.bf16.msra.mxu1 %v5324_v31  ;;  %v5255_v31 = vcombine.high %v929_v19, %v933_v20  ;;  %v1025_v11 = vld [vmem:[%s9149_s9 + $0x3d0] sm:$0xff] }
 0x2a8   :  { %1780 = vmatprep.subr.bf16.mxu1 %v5333_v34  ;;  %v5254_v34 = vcombine.low %v929_v19, %v933_v20  ;;  %v978_v19 = vld [vmem:[%s9149_s9 + $0x258] sm:$0xff] }
 0x2a9   :  { %1801 = vmatprep.subr.bf16.mxu0 %v5255_v31  ;;  %v982_v20 = vld [vmem:[%s9149_s9 + $0x278] sm:$0xff] }
 0x2aa   :  { %1802 = vmatpush1.bf16.msra.mxu0 %v5254_v34  ;;  %v5305_v24 = vcombine.high %v978_v19, %v982_v20  ;;  %v5304_v31 = vcombine.low %v978_v19, %v982_v20  ;;  %v997_v34 = vld [vmem:[%s9149_s9 + $0x2f0] sm:$0xff] }
 0x2ab   :  { %1781 = vmatpush1.bf16.msra.mxu1 %v5332_v46  ;;  %1803 = vmatprep.subr.bf16.mxu0 %v5263_v41  ;;  %v5312_v41 = vcombine.low %v986_v29, %v990_v1 }
 0x2ac   :  { %1782 = vmatprep.subr.bf16.mxu1 %v5341_v50 }
 0x2ae   :  { %1804 = vmatpush1.bf16.msra.mxu0 %v5262_v47  ;;  %v1005_v47 = vld [vmem:[%s9149_s9 + $0x330] sm:$0xff] }
 0x2af   :  { %1783 = vmatpush1.bf16.msra.mxu1 %v5340_v57  ;;  %v5273_v57 = vcombine.high %v946_v25, %v950_v44  ;;  %1805 = vmatprep.subr.bf16.mxu0 %v5271_v53  ;;  %v5320_v53 = vcombine.low %v994_v35, %v998_v36 }
 0x2b0   :  { %1784 = vmatprep.subr.bf16.mxu1 %v5349_v61  ;;  %v5272_v61 = vcombine.low %v946_v25, %v950_v44  ;;  %v5321_v44 = vcombine.high %v994_v35, %v998_v36  ;;  %v6152_v35 = vld [vmem:[%s9151_s11 + $0x74] ss:$8 sps:$4 sm:$0xff]   ;;  %v6150_v36 = vld [vmem:[%s9151_s11 + $0x70] ss:$8 sps:$4 sm:$0xff]  }
 0x2b2   :  { %1806 = vmatpush1.bf16.msra.mxu0 %v5270_v58  ;;  %v1013_v58 = vld [vmem:[%s9149_s9 + $0x370] sm:$0xff] }
 0x2b3   :  { %1785 = vmatpush1.bf16.msra.mxu1 %v5348_v3  ;;  %v5278_v3 = vcombine.low %v953_v48, %v957_v49  ;;  %1807 = vmatprep.subr.bf16.mxu0 %v5279_v62  ;;  %v1002_v48 = vld [vmem:[%s9149_s9 + $0x318] sm:$0xff] }
 0x2b4   :  { %1836 = vmatprep.subr.bf16.mxu1 %v5233_v7  ;;  %v969_v7 = vld [vmem:[%s9149_s9 + $0x210] sm:$0xff]  ;;  %v1006_v49 = vld [vmem:[%s9149_s9 + $0x338] sm:$0xff] }
 0x2b5   :  { %v5295_v14 = vcombine.high %v969_v7, %v973_v9  ;;  %v5329_v56 = vcombine.high %v1002_v48, %v1006_v49  ;;  %v5328_v62 = vcombine.low %v1002_v48, %v1006_v49  ;;  %v6164_v48 = vld [vmem:[%s9151_s11 + $0xb4] ss:$8 sps:$4 sm:$0xff]   ;;  %v6162_v49 = vld [vmem:[%s9151_s11 + $0xb0] ss:$8 sps:$4 sm:$0xff]  }
 0x2b6   :  { %1787 = vmatmul.mubr.bf16.vlgmr.msra.gmra.mrb[0].mxu1 %v7525_v8  ;;  %1808 = vmatpush1.bf16.msra.mxu0 %v5278_v3  ;;  %v1021_v3 = vld [vmem:[%s9149_s9 + $0x3b0] sm:$0xff] }
 0x2b7   :  { %1837 = vmatpush1.bf16.msra.mxu1 %v5232_v12  ;;  %1868 = vmatprep.mubr.bf16.mxu1 %v7339_v15  ;;  %v942_v15 = vld [vmem:[%s9149_s9 + $0x138] sm:$0xff]  ;;  %v5286_v12 = vcombine.low %v961_v59, %v965_v60 }
 0x2b8   :  { %1838 = vmatprep.subr.bf16.mxu1 %v5241_v17  ;;  %v5265_v46 = vcombine.high %v938_v32, %v942_v15  ;;  %v5264_v50 = vcombine.low %v938_v32, %v942_v15  ;;  %1809 = vmatprep.subr.bf16.mxu0 %v5287_v5  ;;  %v977_v17 = vld [vmem:[%s9149_s9 + $0x250] sm:$0xff]  ;;  %v5313_v15 = vcombine.high %v986_v29, %v990_v1  ;;  %v1010_v59 = vld [vmem:[%s9149_s9 + $0x358] sm:$0xff]  ;;  %v6135_v29 = vld [vmem:[%s9151_s11 + $0x20] ss:$8 sps:$4 sm:$0xff]  }
 0x2b9   :  { %v5303_v23 = vcombine.high %v977_v17, %v981_v18  ;;  %v1014_v60 = vld [vmem:[%s9149_s9 + $0x378] sm:$0xff] }
 0x2ba   :  { %1810 = vmatpush1.bf16.msra.mxu0 %v5286_v12  ;;  %v5337_v0 = vcombine.high %v1010_v59, %v1014_v60  ;;  %v1022_v5 = vld [vmem:[%s9149_s9 + $0x3b8] sm:$0xff]  ;;  %v1029_v12 = vld [vmem:[%s9149_s9 + $0x3f0] sm:$0xff] }
 0x2bb   :  { %1839 = vmatpush1.bf16.msra.mxu1 %v5240_v21  ;;  %v5294_v21 = vcombine.low %v969_v7, %v973_v9  ;;  %1811 = vmatprep.subr.bf16.mxu0 %v5295_v14  ;;  %v5336_v7 = vcombine.low %v1010_v59, %v1014_v60  ;;  %v1030_v14 = vld [vmem:[%s9149_s9 + $0x3f8] sm:$0xff]  ;;  %v5350_v20 = vcombine.low %v1025_v11, %v1029_v12 }
 0x2bc   :  { %1840 = vmatprep.subr.bf16.mxu1 %v5249_v26  ;;  %v985_v26 = vld [vmem:[%s9149_s9 + $0x290] sm:$0xff] }
 0x2bd   :  { %v5311_v32 = vcombine.high %v985_v26, %v989_v28  ;;  %v6138_v1 = vld [vmem:[%s9151_s11 + $0x30] ss:$8 sps:$4 sm:$0xff]   ;;  %v6176_v59 = vld [vmem:[%s9151_s11 + $0xf4] ss:$8 sps:$4 sm:$0xff]  }
 0x2be   :  { %1812 = vmatpush1.bf16.msra.mxu0 %v5294_v21  ;;  %v6174_v60 = vld [vmem:[%s9151_s11 + $0xf0] ss:$8 sps:$4 sm:$0xff]  }
 0x2bf   :  { %1841 = vmatpush1.bf16.msra.mxu1 %v5248_v30  ;;  %v5302_v30 = vcombine.low %v977_v17, %v981_v18  ;;  %1813 = vmatprep.subr.bf16.mxu0 %v5303_v23  ;;  %v5351_v18 = vcombine.high %v1025_v11, %v1029_v12  ;;  %v6129_v23 = vld [vmem:[%s9151_s11] ss:$8 sps:$4 sm:$0xff]  }
 0x2c0   :  { %1842 = vmatprep.subr.bf16.mxu1 %v5257_v33  ;;  %v993_v33 = vld [vmem:[%s9149_s9 + $0x2d0] sm:$0xff] }
 0x2c1   :  { %v5319_v25 = vcombine.high %v993_v33, %v997_v34 }
 0x2c2   :  { %1814 = vmatpush1.bf16.msra.mxu0 %v5302_v30  ;;  %v6143_v30 = vld [vmem:[%s9151_s11 + $0x44] ss:$8 sps:$4 sm:$0xff]  }
 0x2c3   :  { %1843 = vmatpush1.bf16.msra.mxu1 %v5256_v37  ;;  %v5310_v37 = vcombine.low %v985_v26, %v989_v28  ;;  %1815 = vmatprep.subr.bf16.mxu0 %v5311_v32  ;;  %v6132_v26 = vld [vmem:[%s9151_s11 + $0x10] ss:$8 sps:$4 sm:$0xff]   ;;  %v6137_v28 = vld [vmem:[%s9151_s11 + $0x24] ss:$8 sps:$4 sm:$0xff]   ;;  %v6146_v32 = vld [vmem:[%s9151_s11 + $0x54] ss:$8 sps:$4 sm:$0xff]  }
 0x2c4   :  { %1844 = vmatprep.subr.bf16.mxu1 %v5265_v46  ;;  %v1001_v46 = vld [vmem:[%s9149_s9 + $0x310] sm:$0xff] }
 0x2c5   :  { %v5327_v55 = vcombine.high %v1001_v46, %v1005_v47 }
 0x2c6   :  { %1816 = vmatpush1.bf16.msra.mxu0 %v5310_v37  ;;  %v6155_v37 = vld [vmem:[%s9151_s11 + $0x84] ss:$8 sps:$4 sm:$0xff]  }
 0x2c7   :  { %1845 = vmatpush1.bf16.msra.mxu1 %v5264_v50  ;;  %v5318_v50 = vcombine.low %v993_v33, %v997_v34  ;;  %1817 = vmatprep.subr.bf16.mxu0 %v5319_v25  ;;  %v6149_v33 = vld [vmem:[%s9151_s11 + $0x64] ss:$8 sps:$4 sm:$0xff]   ;;  %v6147_v34 = vld [vmem:[%s9151_s11 + $0x60] ss:$8 sps:$4 sm:$0xff]   ;;  %v6158_v25 = vld [vmem:[%s9151_s11 + $0x94] ss:$8 sps:$4 sm:$0xff]  }
 0x2c8   :  { %1846 = vmatprep.subr.bf16.mxu1 %v5273_v57  ;;  %v1009_v57 = vld [vmem:[%s9149_s9 + $0x350] sm:$0xff] }
 0x2c9   :  { %v5335_v63 = vcombine.high %v1009_v57, %v1013_v58 }
 0x2ca   :  { %1818 = vmatpush1.bf16.msra.mxu0 %v5318_v50  ;;  %v6167_v50 = vld [vmem:[%s9151_s11 + $0xc4] ss:$8 sps:$4 sm:$0xff]  }
 0x2cb   :  { %1847 = vmatpush1.bf16.msra.mxu1 %v5272_v61  ;;  %v5326_v61 = vcombine.low %v1001_v46, %v1005_v47  ;;  %1819 = vmatprep.subr.bf16.mxu0 %v5327_v55  ;;  %v6161_v46 = vld [vmem:[%s9151_s11 + $0xa4] ss:$8 sps:$4 sm:$0xff]   ;;  %v6159_v47 = vld [vmem:[%s9151_s11 + $0xa0] ss:$8 sps:$4 sm:$0xff]   ;;  %v6170_v55 = vld [vmem:[%s9151_s11 + $0xd4] ss:$8 sps:$4 sm:$0xff]  }
 0x2cc   :  { %1848 = vmatprep.subr.bf16.mxu1 %v5281_v2  ;;  %v1017_v2 = vld [vmem:[%s9149_s9 + $0x390] sm:$0xff] }
 0x2cd   :  { %v5343_v9 = vcombine.high %v1017_v2, %v1021_v3 }
 0x2ce   :  { %1820 = vmatpush1.bf16.msra.mxu0 %v5326_v61  ;;  %v6179_v61 = vld [vmem:[%s9151_s11 + $0x104] ss:$8 sps:$4 sm:$0xff]  }
 0x2cf   :  { %1849 = vmatpush1.bf16.msra.mxu1 %v5280_v4  ;;  %v1018_v4 = vld [vmem:[%s9149_s9 + $0x398] sm:$0xff]  ;;  %1821 = vmatprep.subr.bf16.mxu0 %v5335_v63 }
 0x2d0   :  { %1850 = vmatprep.subr.bf16.mxu1 %v5289_v27  ;;  %v5334_v27 = vcombine.low %v1009_v57, %v1013_v58  ;;  %v5345_v10 = vcombine.high %v1018_v4, %v1022_v5  ;;  %v5344_v17 = vcombine.low %v1018_v4, %v1022_v5  ;;  %v6173_v57 = vld [vmem:[%s9151_s11 + $0xe4] ss:$8 sps:$4 sm:$0xff]   ;;  %v6171_v58 = vld [vmem:[%s9151_s11 + $0xe0] ss:$8 sps:$4 sm:$0xff]  }
 0x2d2   :  { %1822 = vmatpush1.bf16.msra.mxu0 %v5334_v27 }
 0x2d3   :  { %1851 = vmatpush1.bf16.msra.mxu1 %v5288_v13  ;;  %v1026_v13 = vld [vmem:[%s9149_s9 + $0x3d8] sm:$0xff]  ;;  %1823 = vmatprep.subr.bf16.mxu0 %v5343_v9 }
 0x2d4   :  { %1852 = vmatprep.subr.bf16.mxu1 %v5297_v16  ;;  %v5342_v16 = vcombine.low %v1017_v2, %v1021_v3  ;;  %v5353_v19 = vcombine.high %v1026_v13, %v1030_v14  ;;  %v5352_v21 = vcombine.low %v1026_v13, %v1030_v14 }
 0x2d6   :  { %1824 = vmatpush1.bf16.msra.mxu0 %v5342_v16 }
 0x2d7   :  { %1853 = vmatpush1.bf16.msra.mxu1 %v5296_v22  ;;  %1825 = vmatprep.subr.bf16.mxu0 %v5351_v18  ;;  %v6131_v22 = vld [vmem:[%s9151_s11 + $0x4] ss:$8 sps:$4 sm:$0xff]  }
 0x2d8   :  { %1854 = vmatprep.subr.bf16.mxu1 %v5305_v24  ;;  %v6134_v24 = vld [vmem:[%s9151_s11 + $0x14] ss:$8 sps:$4 sm:$0xff]  }
 0x2da   :  { %1826 = vmatpush1.bf16.msra.mxu0 %v5350_v20 }
 0x2db   :  { %1855 = vmatpush1.bf16.msra.mxu1 %v5304_v31  ;;  %2804 = vmatprep.subr.bf16.mxu0 %v6131_v22  ;;  %v6141_v31 = vld [vmem:[%s9151_s11 + $0x40] ss:$8 sps:$4 sm:$0xff]  }
 0x2dc   :  { %1856 = vmatprep.subr.bf16.mxu1 %v5313_v15  ;;  %v6144_v15 = vld [vmem:[%s9151_s11 + $0x50] ss:$8 sps:$4 sm:$0xff]  }
 0x2dd   :  { %1828 = vmatmul.mubr.bf16.vlgmr.msra.gmra.mrb[4].mxu0 %v7525_v8 }
 0x2de   :  { %2805 = vmatpush1.bf16.msra.mxu0 %v6129_v23 }
 0x2df   :  { %1857 = vmatpush1.bf16.msra.mxu1 %v5312_v41  ;;  %2806 = vmatprep.subr.bf16.mxu0 %v6134_v24  ;;  %v6153_v41 = vld [vmem:[%s9151_s11 + $0x80] ss:$8 sps:$4 sm:$0xff]  }
 0x2e0   :  { %1858 = vmatprep.subr.bf16.mxu1 %v5321_v44  ;;  %v6156_v44 = vld [vmem:[%s9151_s11 + $0x90] ss:$8 sps:$4 sm:$0xff]  }
 0x2e2   :  { %2807 = vmatpush1.bf16.msra.mxu0 %v6132_v26 }
 0x2e3   :  { %1859 = vmatpush1.bf16.msra.mxu1 %v5320_v53  ;;  %2808 = vmatprep.subr.bf16.mxu0 %v6137_v28  ;;  %v6165_v53 = vld [vmem:[%s9151_s11 + $0xc0] ss:$8 sps:$4 sm:$0xff]  }
 0x2e4   :  { %1860 = vmatprep.subr.bf16.mxu1 %v5329_v56  ;;  %v6168_v56 = vld [vmem:[%s9151_s11 + $0xd0] ss:$8 sps:$4 sm:$0xff]  }
 0x2e6   :  { %2809 = vmatpush1.bf16.msra.mxu0 %v6135_v29 }
 0x2e7   :  { %1861 = vmatpush1.bf16.msra.mxu1 %v5328_v62  ;;  %v7803_v62 = vld [vmem:[%s9150_s10] sm:$0xff] }
 0x2e8   :  { %1862 = vmatprep.subr.bf16.mxu1 %v5337_v0  ;;  %v1676_v63 = vrot.slane %v7803_v62, %v6646_v40  ;;  %v1684_v0 = vrot.slane %v7803_v62, %v6655_v43  ;;  %v1680_v2 = vrot.slane %v7803_v62, %v6652_v42  ;;  %v1688_v3 = vrot.slane %v7803_v62, %v6659_v45 }
 0x2eb   :  { %1863 = vmatpush1.bf16.msra.mxu1 %v5336_v7 }
 0x2ec   :  { %1864 = vmatprep.subr.bf16.mxu1 %v5345_v10 }
 0x2ef   :  { %1865 = vmatpush1.bf16.msra.mxu1 %v5344_v17 }
 0x2f0   :  { %1866 = vmatprep.subr.bf16.mxu1 %v5353_v19 }
 0x2f3   :  { %1867 = vmatpush1.bf16.msra.mxu1 %v5352_v21 }
 0x2f6   :  { %1869 = vmatmul.mubr.bf16.vlgmr.msra.gmra.mrb[4].mxu1 %v7525_v8  ;;  %v6140_v8 = vld [vmem:[%s9151_s11 + $0x34] ss:$8 sps:$4 sm:$0xff]  }
 0x2f7   :  { %2810 = vmatprep.subr.bf16.mxu0 %v6140_v8 }
 0x2f8   :  { %2811 = vmatpush1.bf16.msra.mxu0 %v6138_v1 }
 0x2f9   :  { %2812 = vmatprep.subr.bf16.mxu0 %v6143_v30  ;;  %v6451_v30 = vmov 1983009808  }
 0x2fc   :  { %2813 = vmatpush1.bf16.msra.mxu0 %v6141_v31  ;;  %v1939_v31 = vunpack.c.l.s4 %v6451_v30 }
 0x2fd   :  { %2814 = vmatprep.subr.bf16.mxu0 %v6146_v32 }
 0x2fe   :  { %v1940_v32 = vunpack.c.0.s8 %v1939_v31 }
 0x300   :  { %2815 = vmatpush1.bf16.msra.mxu0 %v6144_v15 }
 0x301   :  { %2816 = vmatprep.subr.bf16.mxu0 %v6149_v33 }
 0x304   :  { %2817 = vmatpush1.bf16.msra.mxu0 %v6147_v34  ;;  %v7814_v34 = vsub.s32 %v1940_v32, %v6643_v39 }
 0x305   :  { %2818 = vmatprep.subr.bf16.mxu0 %v6152_v35 }
 0x308   :  { %2819 = vmatpush1.bf16.msra.mxu0 %v6150_v36 }
 0x309   :  { %2820 = vmatprep.subr.bf16.mxu0 %v6155_v37 }
 0x30c   :  { %2821 = vmatpush1.bf16.msra.mxu0 %v6153_v41  ;;  %v7819_v41 = vld [vmem:[%s9145_s5] sm:$0xff] }
 0x30d   :  { %2822 = vmatprep.subr.bf16.mxu0 %v6158_v25 }
 0x310   :  { %2823 = vmatpush1.bf16.msra.mxu0 %v6156_v44 }
 0x311   :  { %2824 = vmatprep.subr.bf16.mxu0 %v6161_v46  ;;  %v1926_v46 = vunpack.c.l.bf16 %v7819_v41 }
 0x314   :  { %2825 = vmatpush1.bf16.msra.mxu0 %v6159_v47 }
 0x315   :  { %2826 = vmatprep.subr.bf16.mxu0 %v6164_v48 }
 0x318   :  { %2827 = vmatpush1.bf16.msra.mxu0 %v6162_v49  ;;  %v7825_v49 = vsub.s32 6, %v6643_v39 }
 0x319   :  { %2828 = vmatprep.subr.bf16.mxu0 %v6167_v50 }
 0x31c   :  { %2829 = vmatpush1.bf16.msra.mxu0 %v6165_v53 }
 0x31d   :  { %2830 = vmatprep.subr.bf16.mxu0 %v6170_v55 }
 0x320   :  { %2831 = vmatpush1.bf16.msra.mxu0 %v6168_v56 }
 0x321   :  { %2832 = vmatprep.subr.bf16.mxu0 %v6173_v57 }
 0x324   :  { %2833 = vmatpush1.bf16.msra.mxu0 %v6171_v58  ;;  %v6177_v58 = vld [vmem:[%s9151_s11 + $0x100] ss:$8 sps:$4 sm:$0xff]  }
 0x325   :  { %2834 = vmatprep.subr.bf16.mxu0 %v6176_v59 }
 0x328   :  { %2835 = vmatpush1.bf16.msra.mxu0 %v6174_v60  ;;  %v6182_v60 = vld [vmem:[%s9151_s11 + $0x114] ss:$8 sps:$4 sm:$0xff]  }
 0x329   :  { %2845 = vmatprep.subr.bf16.mxu0 %v6179_v61 }
 0x370   :  { %v1747_v4 = vpop.f32.mrb[0].mxu0 }
 0x371   :  { %v1748_v5 = vadd.f32 %v1747_v4, %v1676_v63  ;;  %v1749_v7 = vpop.f32.mrb[1].mxu0  ;;  %v6180_v63 = vld [vmem:[%s9151_s11 + $0x110] ss:$8 sps:$4 sm:$0xff]  }
 0x372   :  { %v1750_v10 = vadd.f32 %v1749_v7, %v1680_v2  ;;  %v1751_v12 = vpop.f32.mrb[2].mxu0  ;;  %v6183_v2 = vld [vmem:[%s9151_s11 + $0x120] ss:$8 sps:$4 sm:$0xff]   ;;  %v6186_v4 = vld [vmem:[%s9151_s11 + $0x130] ss:$8 sps:$4 sm:$0xff]  }
 0x373   :  { %v5354_v13 = vmul.f32 -1.442695, %v1748_v5  ;;  %v1752_v17 = vpop.f32.mrb[3].mxu0  ;;  %v6191_v5 = vld [vmem:[%s9151_s11 + $0x144] ss:$8 sps:$4 sm:$0xff]   ;;  %v1700_v12 = vrot.slane %v7803_v62, %v7825_v49 }
 0x374   :  { %v5355_v19 = vmul.f32 -1.442695, %v1750_v10  ;;  %v6194_v7 = vld [vmem:[%s9151_s11 + $0x154] ss:$8 sps:$4 sm:$0xff]   ;;  %v1692_v10 = vrot.slane %v7803_v62, %v6665_v52 }
 0x375   :  { %6321 = vpow2.f32 %v5354_v13  ;;  %v1696_v13 = vrot.slane %v7803_v62, %v6668_v54 }
 0x37f   :  { %v6322_v22 = vpop.eup %6321 }
 0x380   :  { %v1901_v24 = vadd.f32 1.0, %v6322_v22 }
 0x389   :  { %v1788_v27 = vpop.f32.mrb[0].mxu1 }
 0x38a   :  { %v1789_v9 = vadd.f32 %v1788_v27, %v1684_v0  ;;  %v1790_v11 = vpop.f32.mrb[1].mxu1  ;;  %v6185_v0 = vld [vmem:[%s9151_s11 + $0x124] ss:$8 sps:$4 sm:$0xff]   ;;  %v6189_v27 = vld [vmem:[%s9151_s11 + $0x140] ss:$8 sps:$4 sm:$0xff]  }
 0x38b   :  { %v1791_v14 = vadd.f32 %v1790_v11, %v1688_v3  ;;  %v1792_v16 = vpop.f32.mrb[2].mxu1  ;;  %v6188_v3 = vld [vmem:[%s9151_s11 + $0x134] ss:$8 sps:$4 sm:$0xff]   ;;  %v6192_v11 = vld [vmem:[%s9151_s11 + $0x150] ss:$8 sps:$4 sm:$0xff]  }
 0x38c   :  { %v5356_v18 = vmul.f32 -1.442695, %v1789_v9  ;;  %v1793_v20 = vpop.f32.mrb[3].mxu1  ;;  %v1703_v9 = vsub.s32 7, %v6643_v39 }
 0x38d   :  { %v5357_v21 = vmul.f32 -1.442695, %v1791_v14  ;;  %v6197_v14 = vld [vmem:[%s9151_s11 + $0x164] ss:$8 sps:$4 sm:$0xff]  }
 0x38e   :  { %6323 = vpow2.f32 %v5356_v18  ;;  %v1704_v16 = vrot.slane %v7803_v62, %v1703_v9 }
 0x38f   :  { %6325 = vpow2.f32 %v5355_v19 }
 0x390   :  { %6327 = vpow2.f32 %v5357_v21  ;;  %v6195_v21 = vld [vmem:[%s9151_s11 + $0x160] ss:$8 sps:$4 sm:$0xff]  }
 0x391   :  { %6329 = vrcp.f32 %v1901_v24 }
 0x398   :  { %v6324_v23 = vpop.eup %6323 }
 0x399   :  { %v6326_v26 = vpop.eup %6325  ;;  %v1903_v28 = vadd.f32 1.0, %v6324_v23 }
 0x39a   :  { %v6328_v29 = vpop.eup %6327  ;;  %v1902_v8 = vadd.f32 1.0, %v6326_v26 }
 0x39b   :  { %6331 = vrcp.f32 %v1903_v28  ;;  %v1904_v1 = vadd.f32 1.0, %v6328_v29  ;;  %v6330_v15 = vpop.eup %6329  ;;  %v6200_v28 = vld [vmem:[%s9151_s11 + $0x174] ss:$8 sps:$4 sm:$0xff]  }
 0x39c   :  { %6333 = vrcp.f32 %v1902_v8 }
 0x39d   :  { %6335 = vrcp.f32 %v1904_v1 }
 0x3a5   :  { %v6332_v33 = vpop.eup %6331 }
 0x3a6   :  { %v6334_v35 = vpop.eup %6333 }
 0x3a7   :  { %v6336_v36 = vpop.eup %6335  ;;  %v1936_v37 = vcombine.low %v6330_v15, %v6334_v35  ;;  %v6203_v35 = vld [vmem:[%s9151_s11 + $0x184] ss:$8 sps:$4 sm:$0xff]  }
 0x3a8   :  { %v1937_v25 = vcombine.low %v6332_v33, %v6336_v36  ;;  %v6198_v33 = vld [vmem:[%s9151_s11 + $0x170] ss:$8 sps:$4 sm:$0xff]   ;;  %v6201_v36 = vld [vmem:[%s9151_s11 + $0x180] ss:$8 sps:$4 sm:$0xff]  }
 0x3a9   :  { %v1944_v44 = vrot.slane %v1936_v37, %v7814_v34  ;;  %v6206_v37 = vld [vmem:[%s9151_s11 + $0x194] ss:$8 sps:$4 sm:$0xff]  }
 0x3aa   :  { %v1951_v47 = vrot.slane %v1937_v25, %v7814_v34  ;;  %v6204_v25 = vld [vmem:[%s9151_s11 + $0x190] ss:$8 sps:$4 sm:$0xff]  }
 0x3ac   :  { %v1952_v48 = vcombine.low %v1944_v44, %v1951_v47 }
 0x3ae   :  { %v7827_v50 = vmul.f32 %v1952_v48, %v1926_v46  ;;  %v6209_v46 = vld [vmem:[%s9151_s11 + $0x1a4] ss:$8 sps:$4 sm:$0xff]  }
 0x3b0   :  { %v1983_v53 = vrot.slane %v7827_v50, %v6655_v43  ;;  %v1979_v55 = vrot.slane %v7827_v50, %v6646_v40  ;;  %v1991_v56 = vrot.slane %v7827_v50, %v7825_v49  ;;  %v1829_v17 = vpop.f32.mrb[4].mxu0 }
 0x3b1   :  { %v1830_v18 = vadd.f32 %v1829_v17, %v1692_v10  ;;  %v1831_v20 = vpop.f32.mrb[5].mxu0  ;;  %v6221_v10 = vld [vmem:[%s9151_s11 + $0x1e4] ss:$8 sps:$4 sm:$0xff]  }
 0x3b2   :  { %v2017_v57 = vpack.c.bf16 %v1983_v53, %v1983_v53  ;;  %v2016_v59 = vpack.c.bf16 %v1979_v55, %v1979_v55  ;;  %v2019_v61 = vpack.c.bf16 %v1991_v56, %v1991_v56  ;;  %v1832_v23 = vadd.f32 %v1831_v20, %v1696_v13  ;;  %v1833_v26 = vpop.f32.mrb[6].mxu0  ;;  %v6222_v20 = vld [vmem:[%s9151_s11 + $0x1f0] ss:$8 sps:$4 sm:$0xff]  }
 0x3b3   :  { %v5358_v29 = vmul.f32 -1.442695, %v1830_v18  ;;  %v1834_v1 = vpop.f32.mrb[7].mxu0  ;;  %v6224_v18 = vld [vmem:[%s9151_s11 + $0x1f4] ss:$8 sps:$4 sm:$0xff]  }
 0x3b4   :  { %2836 = vmatprep.mubr.bf16.mxu0 %v2017_v57  ;;  %v5359_v31 = vmul.f32 -1.442695, %v1832_v23  ;;  %v6207_v57 = vld [vmem:[%s9151_s11 + $0x1a0] ss:$8 sps:$4 sm:$0xff]  }
 0x3b5   :  { %2837 = vmatmul.mubr.bf16.vlgmr.msra.gmra.mrb[8].mxu0 %v2016_v59  ;;  %6337 = vpow2.f32 %v5358_v29  ;;  %v6212_v59 = vld [vmem:[%s9151_s11 + $0x1b4] ss:$8 sps:$4 sm:$0xff]   ;;  %v6225_v23 = vld [vmem:[%s9151_s11 + $0x200] ss:$8 sps:$4 sm:$0xff]  }
 0x3b6   :  { %2846 = vmatpush1.bf16.msra.mxu0 %v6177_v58  ;;  %2877 = vmatprep.mubr.bf16.mxu0 %v2019_v61  ;;  %v6210_v61 = vld [vmem:[%s9151_s11 + $0x1b0] ss:$8 sps:$4 sm:$0xff]   ;;  %v2990_v29 = vld [vmem:[%s9153_s13 + $0x20] sm:$0xff] }
 0x3b7   :  { %2847 = vmatprep.subr.bf16.mxu0 %v6182_v60 }
 0x3ba   :  { %2848 = vmatpush1.bf16.msra.mxu0 %v6180_v63  ;;  %v6215_v63 = vld [vmem:[%s9151_s11 + $0x1c4] ss:$8 sps:$4 sm:$0xff]  }
 0x3bb   :  { %2849 = vmatprep.subr.bf16.mxu0 %v6185_v0  ;;  %v6213_v0 = vld [vmem:[%s9151_s11 + $0x1c0] ss:$8 sps:$4 sm:$0xff]  }
 0x3be   :  { %2850 = vmatpush1.bf16.msra.mxu0 %v6183_v2  ;;  %v6218_v2 = vld [vmem:[%s9151_s11 + $0x1d4] ss:$8 sps:$4 sm:$0xff]  }
 0x3bf   :  { %2851 = vmatprep.subr.bf16.mxu0 %v6188_v3  ;;  %v6338_v44 = vpop.eup %6337 }
 0x3c0   :  { %v1905_v48 = vadd.f32 1.0, %v6338_v44 }
 0x3c2   :  { %2852 = vmatpush1.bf16.msra.mxu0 %v6186_v4 }
 0x3c3   :  { %2853 = vmatprep.subr.bf16.mxu0 %v6191_v5 }
 0x3c6   :  { %2854 = vmatpush1.bf16.msra.mxu0 %v6189_v27  ;;  %v6216_v27 = vld [vmem:[%s9151_s11 + $0x1d0] ss:$8 sps:$4 sm:$0xff]  }
 0x3c7   :  { %2855 = vmatprep.subr.bf16.mxu0 %v6194_v7 }
 0x3c9   :  { %v1870_v19 = vpop.f32.mrb[4].mxu1 }
 0x3ca   :  { %2856 = vmatpush1.bf16.msra.mxu0 %v6192_v11  ;;  %v1871_v22 = vadd.f32 %v1870_v19, %v1700_v12  ;;  %v1872_v24 = vpop.f32.mrb[5].mxu1 }
 0x3cb   :  { %2857 = vmatprep.subr.bf16.mxu0 %v6197_v14  ;;  %v1873_v62 = vadd.f32 %v1872_v24, %v1704_v16  ;;  %v1874_v8 = vpop.f32.mrb[6].mxu1  ;;  %v6219_v14 = vld [vmem:[%s9151_s11 + $0x1e0] ss:$8 sps:$4 sm:$0xff]   ;;  %v1927_v16 = vunpack.c.h.bf16 %v7819_v41 }
 0x3cc   :  { %v5360_v30 = vmul.f32 -1.442695, %v1871_v22  ;;  %v1875_v32 = vpop.f32.mrb[7].mxu1  ;;  %v1987_v22 = vrot.slane %v7827_v50, %v6665_v52  ;;  %v2986_v50 = vld [vmem:[%s9153_s13] sm:$0xff] }
 0x3cd   :  { %v5361_v15 = vmul.f32 -1.442695, %v1873_v62  ;;  %v6228_v62 = vld [vmem:[%s9151_s11 + $0x210] ss:$8 sps:$4 sm:$0xff]   ;;  %v5490_v8 = vcombine.low %v2986_v50, %v2990_v29  ;;  %v5491_v1 = vcombine.high %v2986_v50, %v2990_v29  ;;  %v6233_v32 = vld [vmem:[%s9151_s11 + $0x224] ss:$8 sps:$4 sm:$0xff]  }
 0x3ce   :  { %2858 = vmatpush1.bf16.msra.mxu0 %v6195_v21  ;;  %6339 = vpow2.f32 %v5360_v30  ;;  %v2018_v26 = vpack.c.bf16 %v1987_v22, %v1987_v22  ;;  %v2994_v30 = vld [vmem:[%s9153_s13 + $0x40] sm:$0xff]  ;;  %v6252_v29 = vld [vmem:[%s9151_s11 + $0x290] ss:$8 sps:$4 sm:$0xff]  }
 0x3cf   :  { %2859 = vmatprep.subr.bf16.mxu0 %v6200_v28  ;;  %6341 = vpow2.f32 %v5359_v31  ;;  %v6230_v28 = vld [vmem:[%s9151_s11 + $0x214] ss:$8 sps:$4 sm:$0xff]   ;;  %v2998_v31 = vld [vmem:[%s9153_s13 + $0x60] sm:$0xff]  ;;  %4564 = vmatprep.subr.bf16.mxu1 %v5491_v1 }
 0x3d0   :  { %6343 = vpow2.f32 %v5361_v15  ;;  %v5499_v15 = vcombine.high %v2994_v30, %v2998_v31  ;;  %4565 = vmatpush1.bf16.msra.mxu1 %v5490_v8  ;;  %v3062_v8 = vld [vmem:[%s9153_s13 + $0x260] sm:$0xff] }
 0x3d1   :  { %6345 = vrcp.f32 %v1905_v48  ;;  %v3010_v48 = vld [vmem:[%s9153_s13 + $0xc0] sm:$0xff] }
 0x3d2   :  { %2860 = vmatpush1.bf16.msra.mxu0 %v6198_v33  ;;  %v5498_v33 = vcombine.low %v2994_v30, %v2998_v31  ;;  %4566 = vmatprep.subr.bf16.mxu1 %v5499_v15  ;;  %v6257_v1 = vld [vmem:[%s9151_s11 + $0x2a4] ss:$8 sps:$4 sm:$0xff]  }
 0x3d3   :  { %2861 = vmatprep.subr.bf16.mxu0 %v6203_v35  ;;  %v6231_v35 = vld [vmem:[%s9151_s11 + $0x220] ss:$8 sps:$4 sm:$0xff]  }
 0x3d4   :  { %4567 = vmatpush1.bf16.msra.mxu1 %v5498_v33  ;;  %v3066_v15 = vld [vmem:[%s9153_s13 + $0x280] sm:$0xff] }
 0x3d5   :  { %v3070_v33 = vld [vmem:[%s9153_s13 + $0x2a0] sm:$0xff] }
 0x3d6   :  { %2862 = vmatpush1.bf16.msra.mxu0 %v6201_v36  ;;  %v3002_v36 = vld [vmem:[%s9153_s13 + $0x80] sm:$0xff] }
 0x3d7   :  { %2863 = vmatprep.subr.bf16.mxu0 %v6206_v37  ;;  %v3006_v37 = vld [vmem:[%s9153_s13 + $0xa0] sm:$0xff] }
 0x3d8   :  { %v6340_v47 = vpop.eup %6339  ;;  %v5507_v44 = vcombine.high %v3002_v36, %v3006_v37 }
 0x3d9   :  { %v6342_v53 = vpop.eup %6341  ;;  %v1907_v55 = vadd.f32 1.0, %v6340_v47  ;;  %v6234_v47 = vld [vmem:[%s9151_s11 + $0x230] ss:$8 sps:$4 sm:$0xff]  }
 0x3da   :  { %v6344_v56 = vpop.eup %6343  ;;  %2864 = vmatpush1.bf16.msra.mxu0 %v6204_v25  ;;  %v1906_v58 = vadd.f32 1.0, %v6342_v53  ;;  %v6236_v25 = vld [vmem:[%s9151_s11 + $0x234] ss:$8 sps:$4 sm:$0xff]   ;;  %4568 = vmatprep.subr.bf16.mxu1 %v5507_v44  ;;  %v3014_v53 = vld [vmem:[%s9153_s13 + $0xe0] sm:$0xff] }
 0x3db   :  { %2865 = vmatprep.subr.bf16.mxu0 %v6209_v46  ;;  %6347 = vrcp.f32 %v1907_v55  ;;  %v1908_v60 = vadd.f32 1.0, %v6344_v56  ;;  %v6346_v3 = vpop.eup %6345  ;;  %v5506_v46 = vcombine.low %v3002_v36, %v3006_v37  ;;  %v6239_v55 = vld [vmem:[%s9151_s11 + $0x244] ss:$8 sps:$4 sm:$0xff]   ;;  %v5515_v56 = vcombine.high %v3010_v48, %v3014_v53 }
 0x3dc   :  { %6349 = vrcp.f32 %v1906_v58  ;;  %v6237_v58 = vld [vmem:[%s9151_s11 + $0x240] ss:$8 sps:$4 sm:$0xff]   ;;  %v5571_v36 = vcombine.high %v3066_v15, %v3070_v33  ;;  %v5570_v37 = vcombine.low %v3066_v15, %v3070_v33  ;;  %v6308_v33 = vld [vmem:[%s9151_s11 + $0x3b4] ss:$8 sps:$4 sm:$0xff]  }
 0x3dd   :  { %6351 = vrcp.f32 %v1908_v60  ;;  %4569 = vmatpush1.bf16.msra.mxu1 %v5506_v46  ;;  %v3022_v60 = vld [vmem:[%s9153_s13 + $0x120] sm:$0xff] }
 0x3de   :  { %2866 = vmatpush1.bf16.msra.mxu0 %v6207_v57  ;;  %v5514_v57 = vcombine.low %v3010_v48, %v3014_v53  ;;  %4570 = vmatprep.subr.bf16.mxu1 %v5515_v56  ;;  %v3074_v44 = vld [vmem:[%s9153_s13 + $0x2c0] sm:$0xff] }
 0x3df   :  { %2867 = vmatprep.subr.bf16.mxu0 %v6212_v59  ;;  %v3018_v59 = vld [vmem:[%s9153_s13 + $0x100] sm:$0xff] }
 0x3e0   :  { %v3078_v46 = vld [vmem:[%s9153_s13 + $0x2e0] sm:$0xff] }
 0x3e1   :  { %4571 = vmatpush1.bf16.msra.mxu1 %v5514_v57  ;;  %v5579_v48 = vcombine.high %v3074_v44, %v3078_v46  ;;  %v5578_v53 = vcombine.low %v3074_v44, %v3078_v46  ;;  %v3082_v56 = vld [vmem:[%s9153_s13 + $0x300] sm:$0xff]  ;;  %v6312_v44 = vld [vmem:[%s9151_s11 + $0x3d0] ss:$8 sps:$4 sm:$0xff]  }
 0x3e2   :  { %2868 = vmatpush1.bf16.msra.mxu0 %v6210_v61  ;;  %v6242_v61 = vld [vmem:[%s9151_s11 + $0x254] ss:$8 sps:$4 sm:$0xff]   ;;  %v3086_v57 = vld [vmem:[%s9153_s13 + $0x320] sm:$0xff] }
 0x3e3   :  { %2869 = vmatprep.subr.bf16.mxu0 %v6215_v63  ;;  %v5523_v63 = vcombine.high %v3018_v59, %v3022_v60  ;;  %v6303_v15 = vld [vmem:[%s9151_s11 + $0x3a0] ss:$8 sps:$4 sm:$0xff]   ;;  %v6317_v46 = vld [vmem:[%s9151_s11 + $0x3e4] ss:$8 sps:$4 sm:$0xff]  }
 0x3e5   :  { %v6348_v4 = vpop.eup %6347  ;;  %4572 = vmatprep.subr.bf16.mxu1 %v5523_v63  ;;  %v3090_v63 = vld [vmem:[%s9153_s13 + $0x340] sm:$0xff] }
 0x3e6   :  { %v6350_v5 = vpop.eup %6349  ;;  %2870 = vmatpush1.bf16.msra.mxu0 %v6213_v0  ;;  %v5522_v0 = vcombine.low %v3018_v59, %v3022_v60  ;;  %v5587_v59 = vcombine.high %v3082_v56, %v3086_v57  ;;  %v5586_v60 = vcombine.low %v3082_v56, %v3086_v57  ;;  %v6318_v56 = vld [vmem:[%s9151_s11 + $0x3f0] ss:$8 sps:$4 sm:$0xff]  }
 0x3e7   :  { %v6352_v7 = vpop.eup %6351  ;;  %2871 = vmatprep.subr.bf16.mxu0 %v6218_v2  ;;  %v1953_v11 = vcombine.low %v6346_v3, %v6350_v5  ;;  %v6240_v2 = vld [vmem:[%s9151_s11 + $0x250] ss:$8 sps:$4 sm:$0xff]   ;;  %v3026_v3 = vld [vmem:[%s9153_s13 + $0x140] sm:$0xff] }
 0x3e8   :  { %v1954_v12 = vcombine.low %v6348_v4, %v6352_v7  ;;  %v3030_v4 = vld [vmem:[%s9153_s13 + $0x160] sm:$0xff]  ;;  %4573 = vmatpush1.bf16.msra.mxu1 %v5522_v0 }
 0x3e9   :  { %v1961_v13 = vrot.slane %v1953_v11, %v7814_v34  ;;  %v6245_v5 = vld [vmem:[%s9151_s11 + $0x264] ss:$8 sps:$4 sm:$0xff]   ;;  %v5530_v7 = vcombine.low %v3026_v3, %v3030_v4 }
 0x3ea   :  { %2872 = vmatpush1.bf16.msra.mxu0 %v6216_v27  ;;  %v1968_v17 = vrot.slane %v1954_v12, %v7814_v34  ;;  %v6227_v34 = vld [vmem:[%s9151_s11 + $0x204] ss:$8 sps:$4 sm:$0xff]   ;;  %v5531_v27 = vcombine.high %v3026_v3, %v3030_v4 }
 0x3eb   :  { %2873 = vmatprep.subr.bf16.mxu0 %v6221_v10  ;;  %v6243_v10 = vld [vmem:[%s9151_s11 + $0x260] ss:$8 sps:$4 sm:$0xff]  }
 0x3ec   :  { %v1969_v19 = vcombine.low %v1961_v13, %v1968_v17  ;;  %4574 = vmatprep.subr.bf16.mxu1 %v5531_v27  ;;  %v3034_v11 = vld [vmem:[%s9153_s13 + $0x180] sm:$0xff]  ;;  %v6248_v13 = vld [vmem:[%s9151_s11 + $0x274] ss:$8 sps:$4 sm:$0xff]   ;;  %v6246_v17 = vld [vmem:[%s9151_s11 + $0x270] ss:$8 sps:$4 sm:$0xff]  }
 0x3ed   :  { %v3038_v12 = vld [vmem:[%s9153_s13 + $0x1a0] sm:$0xff]  ;;  %4575 = vmatpush1.bf16.msra.mxu1 %v5530_v7  ;;  %v6272_v27 = vld [vmem:[%s9151_s11 + $0x2f4] ss:$8 sps:$4 sm:$0xff]  }
 0x3ee   :  { %2874 = vmatpush1.bf16.msra.mxu0 %v6219_v14  ;;  %v7941_v21 = vmul.f32 %v1969_v19, %v1927_v16  ;;  %v5539_v14 = vcombine.high %v3034_v11, %v3038_v12  ;;  %v5538_v16 = vcombine.low %v3034_v11, %v3038_v12  ;;  %v3046_v19 = vld [vmem:[%s9153_s13 + $0x1e0] sm:$0xff] }
 0x3ef   :  { %2875 = vmatprep.subr.bf16.mxu0 %v6224_v18  ;;  %v3042_v18 = vld [vmem:[%s9153_s13 + $0x1c0] sm:$0xff] }
 0x3f0   :  { %v1999_v41 = vrot.slane %v7941_v21, %v6655_v43  ;;  %4576 = vmatprep.subr.bf16.mxu1 %v5539_v14  ;;  %v5547_v22 = vcombine.high %v3042_v18, %v3046_v19  ;;  %v3094_v0 = vld [vmem:[%s9153_s13 + $0x360] sm:$0xff]  ;;  %v1995_v7 = vrot.slane %v7941_v21, %v6646_v40  ;;  %v2007_v12 = vrot.slane %v7941_v21, %v7825_v49 }
 0x3f1   :  { %4577 = vmatpush1.bf16.msra.mxu1 %v5538_v16  ;;  %v5595_v3 = vcombine.high %v3090_v63, %v3094_v0  ;;  %v5594_v4 = vcombine.low %v3090_v63, %v3094_v0  ;;  %v6275_v11 = vld [vmem:[%s9151_s11 + $0x304] ss:$8 sps:$4 sm:$0xff]   ;;  %v6273_v14 = vld [vmem:[%s9151_s11 + $0x300] ss:$8 sps:$4 sm:$0xff]   ;;  %v6278_v16 = vld [vmem:[%s9151_s11 + $0x314] ss:$8 sps:$4 sm:$0xff]   ;;  %v2003_v57 = vrot.slane %v7941_v21, %v6665_v52 }
 0x3f2   :  { %2876 = vmatpush1.bf16.msra.mxu0 %v6222_v20  ;;  %v2021_v24 = vpack.c.bf16 %v1999_v41, %v1999_v41  ;;  %v6251_v20 = vld [vmem:[%s9151_s11 + $0x284] ss:$8 sps:$4 sm:$0xff]   ;;  %v6249_v41 = vld [vmem:[%s9151_s11 + $0x280] ss:$8 sps:$4 sm:$0xff]   ;;  %4578 = vmatprep.subr.bf16.mxu1 %v5547_v22  ;;  %v6284_v22 = vld [vmem:[%s9151_s11 + $0x334] ss:$8 sps:$4 sm:$0xff]  }
 0x3f3   :  { %2886 = vmatprep.subr.bf16.mxu0 %v6227_v34  ;;  %v5546_v34 = vcombine.low %v3042_v18, %v3046_v19  ;;  %v6276_v18 = vld [vmem:[%s9151_s11 + $0x310] ss:$8 sps:$4 sm:$0xff]   ;;  %v6281_v19 = vld [vmem:[%s9151_s11 + $0x324] ss:$8 sps:$4 sm:$0xff]   ;;  %v2022_v63 = vpack.c.bf16 %v2003_v57, %v2003_v57 }
 0x3f4   :  { %v3008_v21 = vld [vmem:[%s9153_s13 + $0xb0] sm:$0xff] }
 0x3f5   :  { %2878 = vmatmul.mubr.bf16.vlgmr.msra.gmra.mrb[8].mxu0 %v2018_v26  ;;  %v6254_v26 = vld [vmem:[%s9151_s11 + $0x294] ss:$8 sps:$4 sm:$0xff]   ;;  %4579 = vmatpush1.bf16.msra.mxu1 %v5546_v34  ;;  %v6282_v34 = vld [vmem:[%s9151_s11 + $0x330] ss:$8 sps:$4 sm:$0xff]  }
 0x3f6   :  { %2887 = vmatpush1.bf16.msra.mxu0 %v6225_v23  ;;  %2918 = vmatprep.mubr.bf16.mxu0 %v2021_v24  ;;  %v3050_v23 = vld [vmem:[%s9153_s13 + $0x200] sm:$0xff]  ;;  %v3096_v57 = vld [vmem:[%s9153_s13 + $0x370] sm:$0xff] }
 0x3f7   :  { %2888 = vmatprep.subr.bf16.mxu0 %v6230_v28  ;;  %v3054_v24 = vld [vmem:[%s9153_s13 + $0x220] sm:$0xff] }
 0x3f8   :  { %v5555_v28 = vcombine.high %v3050_v23, %v3054_v24  ;;  %v5554_v50 = vcombine.low %v3050_v23, %v3054_v24  ;;  %v6285_v23 = vld [vmem:[%s9151_s11 + $0x340] ss:$8 sps:$4 sm:$0xff]   ;;  %v6290_v24 = vld [vmem:[%s9151_s11 + $0x354] ss:$8 sps:$4 sm:$0xff]  }
 0x3fa   :  { %2889 = vmatpush1.bf16.msra.mxu0 %v6228_v62  ;;  %4580 = vmatprep.subr.bf16.mxu1 %v5555_v28  ;;  %v3058_v62 = vld [vmem:[%s9153_s13 + $0x240] sm:$0xff] }
 0x3fb   :  { %2890 = vmatprep.subr.bf16.mxu0 %v6233_v32  ;;  %v5563_v30 = vcombine.high %v3058_v62, %v3062_v8  ;;  %4581 = vmatpush1.bf16.msra.mxu1 %v5554_v50  ;;  %v5562_v31 = vcombine.low %v3058_v62, %v3062_v8  ;;  %v6255_v32 = vld [vmem:[%s9151_s11 + $0x2a0] ss:$8 sps:$4 sm:$0xff]   ;;  %v6293_v28 = vld [vmem:[%s9151_s11 + $0x364] ss:$8 sps:$4 sm:$0xff]   ;;  %v6294_v62 = vld [vmem:[%s9151_s11 + $0x370] ss:$8 sps:$4 sm:$0xff]  }
 0x3fc   :  { %v6291_v50 = vld [vmem:[%s9151_s11 + $0x360] ss:$8 sps:$4 sm:$0xff]   ;;  %v6299_v8 = vld [vmem:[%s9151_s11 + $0x384] ss:$8 sps:$4 sm:$0xff]  }
 0x3fd   :  { %4582 = vmatprep.subr.bf16.mxu1 %v5563_v30  ;;  %v6302_v30 = vld [vmem:[%s9151_s11 + $0x394] ss:$8 sps:$4 sm:$0xff]  }
 0x3fe   :  { %2891 = vmatpush1.bf16.msra.mxu0 %v6231_v35  ;;  %v6260_v35 = vld [vmem:[%s9151_s11 + $0x2b4] ss:$8 sps:$4 sm:$0xff]  }
 0x3ff   :  { %2892 = vmatprep.subr.bf16.mxu0 %v6236_v25  ;;  %4583 = vmatpush1.bf16.msra.mxu1 %v5562_v31  ;;  %v6258_v25 = vld [vmem:[%s9151_s11 + $0x2b0] ss:$8 sps:$4 sm:$0xff]  }
 0x400   :  { %4584 = vmatprep.subr.bf16.mxu1 %v5571_v36  ;;  %v6300_v31 = vld [vmem:[%s9151_s11 + $0x390] ss:$8 sps:$4 sm:$0xff]   ;;  %v6311_v36 = vld [vmem:[%s9151_s11 + $0x3c4] ss:$8 sps:$4 sm:$0xff]  }
 0x402   :  { %2893 = vmatpush1.bf16.msra.mxu0 %v6234_v47  ;;  %v6263_v47 = vld [vmem:[%s9151_s11 + $0x2c4] ss:$8 sps:$4 sm:$0xff]  }
 0x403   :  { %2894 = vmatprep.subr.bf16.mxu0 %v6239_v55  ;;  %4585 = vmatpush1.bf16.msra.mxu1 %v5570_v37  ;;  %v6261_v55 = vld [vmem:[%s9151_s11 + $0x2c0] ss:$8 sps:$4 sm:$0xff]  }
 0x404   :  { %4586 = vmatprep.subr.bf16.mxu1 %v5579_v48  ;;  %v6309_v37 = vld [vmem:[%s9151_s11 + $0x3c0] ss:$8 sps:$4 sm:$0xff]   ;;  %v6320_v48 = vld [vmem:[%s9151_s11 + $0x3f4] ss:$8 sps:$4 sm:$0xff]  }
 0x406   :  { %2895 = vmatpush1.bf16.msra.mxu0 %v6237_v58  ;;  %v6266_v58 = vld [vmem:[%s9151_s11 + $0x2d4] ss:$8 sps:$4 sm:$0xff]  }
 0x407   :  { %2896 = vmatprep.subr.bf16.mxu0 %v6242_v61  ;;  %4587 = vmatpush1.bf16.msra.mxu1 %v5578_v53  ;;  %v6264_v61 = vld [vmem:[%s9151_s11 + $0x2d0] ss:$8 sps:$4 sm:$0xff]  }
 0x408   :  { %4588 = vmatprep.subr.bf16.mxu1 %v5587_v59  ;;  %v2988_v53 = vld [vmem:[%s9153_s13 + $0x10] sm:$0xff] }
 0x409   :  { %v2996_v59 = vld [vmem:[%s9153_s13 + $0x50] sm:$0xff] }
 0x40a   :  { %2897 = vmatpush1.bf16.msra.mxu0 %v6240_v2  ;;  %v6269_v2 = vld [vmem:[%s9151_s11 + $0x2e4] ss:$8 sps:$4 sm:$0xff]  }
 0x40b   :  { %2898 = vmatprep.subr.bf16.mxu0 %v6245_v5  ;;  %4589 = vmatpush1.bf16.msra.mxu1 %v5586_v60  ;;  %v6267_v5 = vld [vmem:[%s9151_s11 + $0x2e0] ss:$8 sps:$4 sm:$0xff]   ;;  %v3000_v60 = vld [vmem:[%s9153_s13 + $0x70] sm:$0xff] }
 0x40c   :  { %4590 = vmatprep.subr.bf16.mxu1 %v5595_v3  ;;  %v5503_v0 = vcombine.high %v2996_v59, %v3000_v60  ;;  %v5502_v3 = vcombine.low %v2996_v59, %v3000_v60 }
 0x40e   :  { %2899 = vmatpush1.bf16.msra.mxu0 %v6243_v10  ;;  %v6270_v10 = vld [vmem:[%s9151_s11 + $0x2f0] ss:$8 sps:$4 sm:$0xff]  }
 0x40f   :  { %2900 = vmatprep.subr.bf16.mxu0 %v6248_v13  ;;  %4591 = vmatpush1.bf16.msra.mxu1 %v5594_v4  ;;  %v2020_v13 = vpack.c.bf16 %v1995_v7, %v1995_v7 }
 0x412   :  { %2901 = vmatpush1.bf16.msra.mxu0 %v6246_v17  ;;  %v2023_v17 = vpack.c.bf16 %v2007_v12, %v2007_v12  ;;  %v3024_v12 = vld [vmem:[%s9153_s13 + $0x130] sm:$0xff] }
 0x413   :  { %2902 = vmatprep.subr.bf16.mxu0 %v6251_v20  ;;  %v6279_v20 = vld [vmem:[%s9151_s11 + $0x320] ss:$8 sps:$4 sm:$0xff]  }
 0x416   :  { %2903 = vmatpush1.bf16.msra.mxu0 %v6249_v41  ;;  %v6287_v41 = vld [vmem:[%s9151_s11 + $0x344] ss:$8 sps:$4 sm:$0xff]  }
 0x417   :  { %2904 = vmatprep.subr.bf16.mxu0 %v6254_v26  ;;  %v6288_v26 = vld [vmem:[%s9151_s11 + $0x350] ss:$8 sps:$4 sm:$0xff]  }
 0x41a   :  { %2905 = vmatpush1.bf16.msra.mxu0 %v6252_v29  ;;  %v6296_v29 = vld [vmem:[%s9151_s11 + $0x374] ss:$8 sps:$4 sm:$0xff]  }
 0x41b   :  { %2906 = vmatprep.subr.bf16.mxu0 %v6257_v1  ;;  %v6297_v1 = vld [vmem:[%s9151_s11 + $0x380] ss:$8 sps:$4 sm:$0xff]  }
 0x41e   :  { %2907 = vmatpush1.bf16.msra.mxu0 %v6255_v32  ;;  %v6305_v32 = vld [vmem:[%s9151_s11 + $0x3a4] ss:$8 sps:$4 sm:$0xff]  }
 0x41f   :  { %2908 = vmatprep.subr.bf16.mxu0 %v6260_v35  ;;  %v6306_v35 = vld [vmem:[%s9151_s11 + $0x3b0] ss:$8 sps:$4 sm:$0xff]  }
 0x422   :  { %2909 = vmatpush1.bf16.msra.mxu0 %v6258_v25  ;;  %v6314_v25 = vld [vmem:[%s9151_s11 + $0x3d4] ss:$8 sps:$4 sm:$0xff]  }
 0x423   :  { %2910 = vmatprep.subr.bf16.mxu0 %v6263_v47  ;;  %v6315_v47 = vld [vmem:[%s9151_s11 + $0x3e0] ss:$8 sps:$4 sm:$0xff]  }
 0x426   :  { %2911 = vmatpush1.bf16.msra.mxu0 %v6261_v55  ;;  %v2992_v55 = vld [vmem:[%s9153_s13 + $0x30] sm:$0xff] }
 0x427   :  { %2912 = vmatprep.subr.bf16.mxu0 %v6266_v58  ;;  %v5495_v58 = vcombine.high %v2988_v53, %v2992_v55 }
 0x42a   :  { %2913 = vmatpush1.bf16.msra.mxu0 %v6264_v61  ;;  %v5494_v61 = vcombine.low %v2988_v53, %v2992_v55 }
 0x42b   :  { %2914 = vmatprep.subr.bf16.mxu0 %v6269_v2  ;;  %v3004_v2 = vld [vmem:[%s9153_s13 + $0x90] sm:$0xff] }
 0x42c   :  { %v5511_v4 = vcombine.high %v3004_v2, %v3008_v21  ;;  %v5510_v7 = vcombine.low %v3004_v2, %v3008_v21  ;;  %v3104_v21 = vld [vmem:[%s9153_s13 + $0x3b0] sm:$0xff] }
 0x42e   :  { %2915 = vmatpush1.bf16.msra.mxu0 %v6267_v5  ;;  %v3012_v5 = vld [vmem:[%s9153_s13 + $0xd0] sm:$0xff] }
 0x42f   :  { %2916 = vmatprep.subr.bf16.mxu0 %v6272_v27  ;;  %v3016_v27 = vld [vmem:[%s9153_s13 + $0xf0] sm:$0xff] }
 0x432   :  { %2917 = vmatpush1.bf16.msra.mxu0 %v6270_v10  ;;  %v5519_v10 = vcombine.high %v3012_v5, %v3016_v27 }
 0x433   :  { %2927 = vmatprep.subr.bf16.mxu0 %v6275_v11  ;;  %v3020_v11 = vld [vmem:[%s9153_s13 + $0x110] sm:$0xff] }
 0x435   :  { %2919 = vmatmul.mubr.bf16.vlgmr.msra.gmra.mrb[8].mxu0 %v2020_v13  ;;  %v5518_v13 = vcombine.low %v3012_v5, %v3016_v27  ;;  %v3106_v27 = vld [vmem:[%s9153_s13 + $0x3c0] sm:$0xff] }
 0x436   :  { %2928 = vmatpush1.bf16.msra.mxu0 %v6273_v14  ;;  %2959 = vmatprep.mubr.bf16.mxu0 %v2023_v17  ;;  %v5527_v14 = vcombine.high %v3020_v11, %v3024_v12  ;;  %v3032_v17 = vld [vmem:[%s9153_s13 + $0x170] sm:$0xff] }
 0x437   :  { %2929 = vmatprep.subr.bf16.mxu0 %v6278_v16  ;;  %v3028_v16 = vld [vmem:[%s9153_s13 + $0x150] sm:$0xff] }
 0x43a   :  { %2930 = vmatpush1.bf16.msra.mxu0 %v6276_v18  ;;  %v5526_v18 = vcombine.low %v3020_v11, %v3024_v12  ;;  %v3112_v12 = vld [vmem:[%s9153_s13 + $0x3f0] sm:$0xff] }
 0x43b   :  { %2931 = vmatprep.subr.bf16.mxu0 %v6281_v19  ;;  %v5535_v19 = vcombine.high %v3028_v16, %v3032_v17 }
 0x43e   :  { %2932 = vmatpush1.bf16.msra.mxu0 %v6279_v20  ;;  %v3036_v20 = vld [vmem:[%s9153_s13 + $0x190] sm:$0xff] }
 0x43f   :  { %2933 = vmatprep.subr.bf16.mxu0 %v6284_v22  ;;  %v3040_v22 = vld [vmem:[%s9153_s13 + $0x1b0] sm:$0xff] }
 0x442   :  { %2934 = vmatpush1.bf16.msra.mxu0 %v6282_v34  ;;  %v5534_v34 = vcombine.low %v3028_v16, %v3032_v17  ;;  %v3114_v17 = vld [vmem:[%s9153_s13 + $0x400] sm:$0xff] }
 0x443   :  { %2935 = vmatprep.subr.bf16.mxu0 %v6287_v41  ;;  %v5543_v41 = vcombine.high %v3036_v20, %v3040_v22 }
 0x446   :  { %2936 = vmatpush1.bf16.msra.mxu0 %v6285_v23  ;;  %v3044_v23 = vld [vmem:[%s9153_s13 + $0x1d0] sm:$0xff] }
 0x447   :  { %2937 = vmatprep.subr.bf16.mxu0 %v6290_v24  ;;  %v3048_v24 = vld [vmem:[%s9153_s13 + $0x1f0] sm:$0xff] }
 0x44a   :  { %2938 = vmatpush1.bf16.msra.mxu0 %v6288_v26  ;;  %v5542_v26 = vcombine.low %v3036_v20, %v3040_v22  ;;  %v3120_v22 = vld [vmem:[%s9153_s13 + $0x430] sm:$0xff] }
 0x44b   :  { %2939 = vmatprep.subr.bf16.mxu0 %v6293_v28  ;;  %v5551_v28 = vcombine.high %v3044_v23, %v3048_v24 }
 0x44e   :  { %2940 = vmatpush1.bf16.msra.mxu0 %v6291_v50  ;;  %v3052_v50 = vld [vmem:[%s9153_s13 + $0x210] sm:$0xff] }
 0x44f   :  { %2941 = vmatprep.subr.bf16.mxu0 %v6296_v29  ;;  %v3056_v29 = vld [vmem:[%s9153_s13 + $0x230] sm:$0xff] }
 0x452   :  { %2942 = vmatpush1.bf16.msra.mxu0 %v6294_v62  ;;  %v5550_v62 = vcombine.low %v3044_v23, %v3048_v24  ;;  %v2152_v24 = vld [vmem:[%s9152_s12] sm:$0x3]  ;;  %s6455_s12 = smov [#allocation5]  }
 0x453   :  { %2943 = vmatprep.subr.bf16.mxu0 %v6299_v8  ;;  %v5559_v8 = vcombine.high %v3052_v50, %v3056_v29  ;;  %s5193_s28 = sshll.u32 %s6455_s12, 4  ;;  %s5194_s28 = int_to_ptr.vmem [resolvable:$true] %s5193_s28 }
 0x456   :  { %2944 = vmatpush1.bf16.msra.mxu0 %v6297_v1  ;;  %v3060_v1 = vld [vmem:[%s9153_s13 + $0x250] sm:$0xff] }
 0x457   :  { %2945 = vmatprep.subr.bf16.mxu0 %v6302_v30  ;;  %v3064_v30 = vld [vmem:[%s9153_s13 + $0x270] sm:$0xff] }
 0x45a   :  { %2946 = vmatpush1.bf16.msra.mxu0 %v6300_v31  ;;  %v5558_v31 = vcombine.low %v3052_v50, %v3056_v29 }
 0x45b   :  { %2947 = vmatprep.subr.bf16.mxu0 %v6305_v32  ;;  %v5567_v32 = vcombine.high %v3060_v1, %v3064_v30 }
 0x45e   :  { %2948 = vmatpush1.bf16.msra.mxu0 %v6303_v15  ;;  %v3068_v15 = vld [vmem:[%s9153_s13 + $0x290] sm:$0xff] }
 0x45f   :  { %2949 = vmatprep.subr.bf16.mxu0 %v6308_v33  ;;  %v3072_v33 = vld [vmem:[%s9153_s13 + $0x2b0] sm:$0xff] }
 0x462   :  { %2950 = vmatpush1.bf16.msra.mxu0 %v6306_v35  ;;  %v5566_v35 = vcombine.low %v3060_v1, %v3064_v30 }
 0x463   :  { %2951 = vmatprep.subr.bf16.mxu0 %v6311_v36  ;;  %v5575_v36 = vcombine.high %v3068_v15, %v3072_v33 }
 0x466   :  { %2952 = vmatpush1.bf16.msra.mxu0 %v6309_v37  ;;  %v3076_v37 = vld [vmem:[%s9153_s13 + $0x2d0] sm:$0xff] }
 0x467   :  { %2953 = vmatprep.subr.bf16.mxu0 %v6314_v25  ;;  %v3080_v25 = vld [vmem:[%s9153_s13 + $0x2f0] sm:$0xff] }
 0x468   :  { %v5582_v53 = vcombine.low %v3076_v37, %v3080_v25 }
 0x46a   :  { %2954 = vmatpush1.bf16.msra.mxu0 %v6312_v44  ;;  %v5574_v44 = vcombine.low %v3068_v15, %v3072_v33  ;;  %v3122_v15 = vld [vmem:[%s9153_s13 + $0x440] sm:$0xff] }
 0x46b   :  { %2955 = vmatprep.subr.bf16.mxu0 %v6317_v46  ;;  %v5583_v46 = vcombine.high %v3076_v37, %v3080_v25  ;;  %v3128_v37 = vld [vmem:[%s9153_s13 + $0x470] sm:$0xff] }
 0x46e   :  { %2956 = vmatpush1.bf16.msra.mxu0 %v6315_v47  ;;  %v3084_v47 = vld [vmem:[%s9153_s13 + $0x310] sm:$0xff] }
 0x46f   :  { %2957 = vmatprep.subr.bf16.mxu0 %v6320_v48  ;;  %v3088_v48 = vld [vmem:[%s9153_s13 + $0x330] sm:$0xff] }
 0x470   :  { %v5591_v55 = vcombine.high %v3084_v47, %v3088_v48 }
 0x472   :  { %2958 = vmatpush1.bf16.msra.mxu0 %v6318_v56  ;;  %v3092_v56 = vld [vmem:[%s9153_s13 + $0x350] sm:$0xff] }
 0x473   :  { %4728 = vmatprep.subr.bf16.mxu0 %v5495_v58  ;;  %v5590_v58 = vcombine.low %v3084_v47, %v3088_v48  ;;  %v5599_v59 = vcombine.high %v3092_v56, %v3096_v57  ;;  %v5598_v60 = vcombine.low %v3092_v56, %v3096_v57  ;;  %v3132_v56 = vld [vmem:[%s9153_s13 + $0x490] sm:$0xff] }
 0x474   :  { %v3136_v57 = vld [vmem:[%s9153_s13 + $0x4b0] sm:$0xff] }
 0x475   :  { %2960 = vmatmul.mubr.bf16.vlgmr.msra.gmra.mrb[8].mxu0 %v2022_v63  ;;  %v3102_v63 = vld [vmem:[%s9153_s13 + $0x3a0] sm:$0xff] }
 0x476   :  { %4729 = vmatpush1.bf16.msra.mxu0 %v5494_v61  ;;  %v3098_v61 = vld [vmem:[%s9153_s13 + $0x380] sm:$0xff] }
 0x477   :  { %4730 = vmatprep.subr.bf16.mxu0 %v5503_v0  ;;  %v3100_v0 = vld [vmem:[%s9153_s13 + $0x390] sm:$0xff]  ;;  %v5603_v2 = vcombine.high %v3098_v61, %v3102_v63 }
 0x478   :  { %v5607_v5 = vcombine.high %v3100_v0, %v3104_v21 }
 0x479   :  { %4592 = vmatprep.subr.bf16.mxu1 %v5603_v2  ;;  %v3142_v2 = vld [vmem:[%s9153_s13 + $0x4e0] sm:$0xff] }
 0x47a   :  { %4731 = vmatpush1.bf16.msra.mxu0 %v5502_v3  ;;  %v5602_v3 = vcombine.low %v3098_v61, %v3102_v63  ;;  %v5639_v63 = vcombine.high %v3132_v56, %v3136_v57 }
 0x47b   :  { %4732 = vmatprep.subr.bf16.mxu0 %v5511_v4  ;;  %v5606_v4 = vcombine.low %v3100_v0, %v3104_v21  ;;  %v3138_v0 = vld [vmem:[%s9153_s13 + $0x4c0] sm:$0xff]  ;;  %v3140_v21 = vld [vmem:[%s9153_s13 + $0x4d0] sm:$0xff] }
 0x47c   :  { %4593 = vmatpush1.bf16.msra.mxu1 %v5602_v3  ;;  %v3144_v3 = vld [vmem:[%s9153_s13 + $0x4f0] sm:$0xff] }
 0x47e   :  { %4733 = vmatpush1.bf16.msra.mxu0 %v5510_v7  ;;  %v3110_v7 = vld [vmem:[%s9153_s13 + $0x3e0] sm:$0xff] }
 0x47f   :  { %4734 = vmatprep.subr.bf16.mxu0 %v5519_v10  ;;  %v3108_v10 = vld [vmem:[%s9153_s13 + $0x3d0] sm:$0xff]  ;;  %v5611_v11 = vcombine.high %v3106_v27, %v3110_v7 }
 0x480   :  { %v5615_v16 = vcombine.high %v3108_v10, %v3112_v12 }
 0x481   :  { %4594 = vmatprep.subr.bf16.mxu1 %v5611_v11  ;;  %v3150_v11 = vld [vmem:[%s9153_s13 + $0x520] sm:$0xff] }
 0x482   :  { %4735 = vmatpush1.bf16.msra.mxu0 %v5518_v13  ;;  %v5610_v13 = vcombine.low %v3106_v27, %v3110_v7  ;;  %v5643_v27 = vcombine.high %v3138_v0, %v3142_v2  ;;  %v5647_v7 = vcombine.high %v3140_v21, %v3144_v3 }
 0x483   :  { %4736 = vmatprep.subr.bf16.mxu0 %v5527_v14  ;;  %v5614_v14 = vcombine.low %v3108_v10, %v3112_v12  ;;  %v3146_v10 = vld [vmem:[%s9153_s13 + $0x500] sm:$0xff]  ;;  %v3148_v12 = vld [vmem:[%s9153_s13 + $0x510] sm:$0xff] }
 0x484   :  { %4595 = vmatpush1.bf16.msra.mxu1 %v5610_v13  ;;  %v3152_v13 = vld [vmem:[%s9153_s13 + $0x530] sm:$0xff] }
 0x486   :  { %4737 = vmatpush1.bf16.msra.mxu0 %v5526_v18  ;;  %v3118_v18 = vld [vmem:[%s9153_s13 + $0x420] sm:$0xff] }
 0x487   :  { %4738 = vmatprep.subr.bf16.mxu0 %v5535_v19  ;;  %v3116_v19 = vld [vmem:[%s9153_s13 + $0x410] sm:$0xff]  ;;  %v5619_v20 = vcombine.high %v3114_v17, %v3118_v18 }
 0x488   :  { %v5623_v23 = vcombine.high %v3116_v19, %v3120_v22 }
 0x489   :  { %4605 = vmatprep.subr.bf16.mxu1 %v5619_v20  ;;  %v3158_v20 = vld [vmem:[%s9153_s13 + $0x560] sm:$0xff] }
 0x48a   :  { %4739 = vmatpush1.bf16.msra.mxu0 %v5534_v34  ;;  %v5618_v34 = vcombine.low %v3114_v17, %v3118_v18  ;;  %v5651_v17 = vcombine.high %v3146_v10, %v3150_v11  ;;  %v5655_v18 = vcombine.high %v3148_v12, %v3152_v13 }
 0x48b   :  { %4740 = vmatprep.subr.bf16.mxu0 %v5543_v41  ;;  %v5622_v41 = vcombine.low %v3116_v19, %v3120_v22  ;;  %v3154_v19 = vld [vmem:[%s9153_s13 + $0x540] sm:$0xff]  ;;  %v3156_v22 = vld [vmem:[%s9153_s13 + $0x550] sm:$0xff] }
 0x48e   :  { %4741 = vmatpush1.bf16.msra.mxu0 %v5542_v26  ;;  %v2797_v26 = vrot.slane %v2152_v24, %v6646_v40 }
 0x48f   :  { %4742 = vmatprep.subr.bf16.mxu0 %v5551_v28  ;;  %v2801_v28 = vrot.slane %v2152_v24, %v6652_v42  ;;  %v5659_v24 = vcombine.high %v3154_v19, %v3158_v20 }
 0x492   :  { %4743 = vmatpush1.bf16.msra.mxu0 %v5550_v62 }
 0x493   :  { %4744 = vmatprep.subr.bf16.mxu0 %v5559_v8  ;;  %v8357_v8 = vld [vmem:[%s9146_s6] sm:$0x3] }
 0x494   :  { %v2979_v25 = vrot.slane %v8357_v8, %v6652_v42 }
 0x496   :  { %4745 = vmatpush1.bf16.msra.mxu0 %v5558_v31 }
 0x497   :  { %4746 = vmatprep.subr.bf16.mxu0 %v5567_v32 }
 0x49a   :  { %4747 = vmatpush1.bf16.msra.mxu0 %v5566_v35  ;;  %v3126_v35 = vld [vmem:[%s9153_s13 + $0x460] sm:$0xff] }
 0x49b   :  { %4748 = vmatprep.subr.bf16.mxu0 %v5575_v36  ;;  %v3124_v36 = vld [vmem:[%s9153_s13 + $0x450] sm:$0xff]  ;;  %v5627_v47 = vcombine.high %v3122_v15, %v3126_v35 }
 0x49c   :  { %v5631_v48 = vcombine.high %v3124_v36, %v3128_v37 }
 0x49e   :  { %4749 = vmatpush1.bf16.msra.mxu0 %v5574_v44 }
 0x49f   :  { %4750 = vmatprep.subr.bf16.mxu0 %v5583_v46 }
 0x4a2   :  { %4751 = vmatpush1.bf16.msra.mxu0 %v5582_v53  ;;  %v3130_v53 = vld [vmem:[%s9153_s13 + $0x480] sm:$0xff] }
 0x4a3   :  { %4752 = vmatprep.subr.bf16.mxu0 %v5591_v55  ;;  %v3134_v55 = vld [vmem:[%s9153_s13 + $0x4a0] sm:$0xff] }
 0x4a4   :  { %v5635_v61 = vcombine.high %v3130_v53, %v3134_v55 }
 0x4a6   :  { %4753 = vmatpush1.bf16.msra.mxu0 %v5590_v58  ;;  %v8391_v58 = vpack.c.bf16 %v2979_v25, %v2979_v25 }
 0x4a7   :  { %4754 = vmatprep.subr.bf16.mxu0 %v5599_v59  ;;  %v5626_v59 = vcombine.low %v3122_v15, %v3126_v35  ;;  %v3170_v15 = vld [vmem:[%s9153_s13 + $0x5c0] sm:$0xff]  ;;  %v3172_v35 = vld [vmem:[%s9153_s13 + $0x5d0] sm:$0xff] }
 0x4aa   :  { %4755 = vmatpush1.bf16.msra.mxu0 %v5598_v60  ;;  %v5630_v60 = vcombine.low %v3124_v36, %v3128_v37  ;;  %v3176_v36 = vld [vmem:[%s9153_s13 + $0x5f0] sm:$0xff] }
 0x4ab   :  { %4756 = vmatprep.subr.bf16.mxu0 %v5607_v5  ;;  %v5638_v5 = vcombine.low %v3132_v56, %v3136_v57  ;;  %v3180_v56 = vld [vmem:[%s9153_s13 + $0x610] sm:$0xff] }
 0x4ac   :  { %v3184_v57 = vld [vmem:[%s9153_s13 + $0x630] sm:$0xff] }
 0x4ae   :  { %4757 = vmatpush1.bf16.msra.mxu0 %v5606_v4  ;;  %v5634_v4 = vcombine.low %v3130_v53, %v3134_v55  ;;  %v3178_v53 = vld [vmem:[%s9153_s13 + $0x600] sm:$0xff] }
 0x4af   :  { %4758 = vmatprep.subr.bf16.mxu0 %v5615_v16  ;;  %v5646_v16 = vcombine.low %v3140_v21, %v3144_v3  ;;  %v3182_v55 = vld [vmem:[%s9153_s13 + $0x620] sm:$0xff]  ;;  %v3188_v21 = vld [vmem:[%s9153_s13 + $0x650] sm:$0xff] }
 0x4b0   :  { %v3192_v3 = vld [vmem:[%s9153_s13 + $0x670] sm:$0xff] }
 0x4b2   :  { %4759 = vmatpush1.bf16.msra.mxu0 %v5614_v14  ;;  %v5642_v14 = vcombine.low %v3138_v0, %v3142_v2  ;;  %v3186_v0 = vld [vmem:[%s9153_s13 + $0x640] sm:$0xff] }
 0x4b3   :  { %4769 = vmatprep.subr.bf16.mxu0 %v5623_v23  ;;  %v5654_v23 = vcombine.low %v3148_v12, %v3152_v13  ;;  %v3190_v2 = vld [vmem:[%s9153_s13 + $0x660] sm:$0xff]  ;;  %v3196_v12 = vld [vmem:[%s9153_s13 + $0x690] sm:$0xff] }
 0x4b4   :  { %v3200_v13 = vld [vmem:[%s9153_s13 + $0x6b0] sm:$0xff] }
 0x548   :  { %v2961_v50 = vpop.f32.mrb[8].mxu0 }
 0x549   :  { %v6058_v29 = vadd.f32 %v2961_v50, %v2797_v26  ;;  %v2963_v62 = vpop.f32.mrb[9].mxu0  ;;  %v3166_v50 = vld [vmem:[%s9153_s13 + $0x5a0] sm:$0xff] }
 0x54a   :  { %v6059_v1 = vadd.f32 %v2963_v62, %v2801_v28  ;;  %v2965_v30 = vpop.f32.mrb[10].mxu0  ;;  %v3162_v28 = vld [vmem:[%s9153_s13 + $0x580] sm:$0xff]  ;;  %v3168_v62 = vld [vmem:[%s9153_s13 + $0x5b0] sm:$0xff] }
 0x54b   :  { %v2968_v31 = vmax.f32 %v6058_v29, 0.0  ;;  %v2966_v32 = vpop.f32.mrb[11].mxu0  ;;  %v3164_v29 = vld [vmem:[%s9153_s13 + $0x590] sm:$0xff]  ;;  %v5666_v37 = vcombine.low %v3162_v28, %v3166_v50 }
 0x54c   :  { %v2969_v33 = vmax.f32 %v6059_v1, 0.0  ;;  %v5658_v1 = vcombine.low %v3154_v19, %v3158_v20  ;;  %v5671_v32 = vcombine.high %v3164_v29, %v3168_v62  ;;  %v5670_v25 = vcombine.low %v3164_v29, %v3168_v62  ;;  %v3202_v19 = vld [vmem:[%s9153_s13 + $0x6c0] sm:$0xff]  ;;  %v3212_v29 = vld [vmem:[%s9153_s13 + $0x710] sm:$0xff] }
 0x54d   :  { %v8375_v46 = vpack.c.bf16 %v2968_v31, %v2968_v31  ;;  %v5667_v31 = vcombine.high %v3162_v28, %v3166_v50  ;;  %v3206_v20 = vld [vmem:[%s9153_s13 + $0x6e0] sm:$0xff]  ;;  %v3216_v62 = vld [vmem:[%s9153_s13 + $0x730] sm:$0xff] }
 0x54e   :  { %v8373_v44 = vpack.c.bf16 %v2969_v33, %v2969_v33  ;;  %v3174_v33 = vld [vmem:[%s9153_s13 + $0x5e0] sm:$0xff] }
 0x54f   :  { %v3210_v28 = vld [vmem:[%s9153_s13 + $0x700] sm:$0xff] }
 0x550   :  { %4596 = vmatprep.mubr.bf16.mxu1 %v8373_v44  ;;  %4760 = vmatprep.mubr.bf16.mxu0 %v8373_v44  ;;  %v3214_v50 = vld [vmem:[%s9153_s13 + $0x720] sm:$0xff] }
 0x551   :  { %4597 = vmatmul.mubr.bf16.vlgmr.msra.gmra.mrb[8].mxu1 %v8375_v46  ;;  %4761 = vmatmul.mubr.bf16.vlgmr.msra.gmra.mrb[12].mxu0 %v8375_v46 }
 0x552   :  { %4606 = vmatpush1.bf16.msra.mxu1 %v5618_v34  ;;  %4770 = vmatpush1.bf16.msra.mxu0 %v5622_v41  ;;  %v3160_v34 = vld [vmem:[%s9153_s13 + $0x570] sm:$0xff]  ;;  %v5650_v41 = vcombine.low %v3146_v10, %v3150_v11  ;;  %v3194_v10 = vld [vmem:[%s9153_s13 + $0x680] sm:$0xff] }
 0x553   :  { %4607 = vmatprep.subr.bf16.mxu1 %v5627_v47  ;;  %4771 = vmatprep.subr.bf16.mxu0 %v5631_v48  ;;  %v5663_v26 = vcombine.high %v3156_v22, %v3160_v34  ;;  %v5662_v30 = vcombine.low %v3156_v22, %v3160_v34  ;;  %v5675_v47 = vcombine.high %v3170_v15, %v3174_v33  ;;  %v3198_v11 = vld [vmem:[%s9153_s13 + $0x6a0] sm:$0xff]  ;;  %v3204_v22 = vld [vmem:[%s9153_s13 + $0x6d0] sm:$0xff] }
 0x554   :  { %4637 = vmatprep.mubr.bf16.mxu1 %v8391_v58  ;;  %4801 = vmatprep.mubr.bf16.mxu0 %v8391_v58  ;;  %v5679_v48 = vcombine.high %v3172_v35, %v3176_v36  ;;  %v3208_v34 = vld [vmem:[%s9153_s13 + $0x6f0] sm:$0xff] }
 0x556   :  { %4608 = vmatpush1.bf16.msra.mxu1 %v5626_v59  ;;  %4772 = vmatpush1.bf16.msra.mxu0 %v5630_v60  ;;  %v5674_v59 = vcombine.low %v3170_v15, %v3174_v33  ;;  %v5678_v60 = vcombine.low %v3172_v35, %v3176_v36  ;;  %v3218_v15 = vld [vmem:[%s9153_s13 + $0x740] sm:$0xff]  ;;  %v3220_v35 = vld [vmem:[%s9153_s13 + $0x750] sm:$0xff] }
 0x557   :  { %4609 = vmatprep.subr.bf16.mxu1 %v5635_v61  ;;  %4773 = vmatprep.subr.bf16.mxu0 %v5639_v63  ;;  %v5683_v61 = vcombine.high %v3178_v53, %v3182_v55  ;;  %v5687_v63 = vcombine.high %v3180_v56, %v3184_v57  ;;  %v3222_v33 = vld [vmem:[%s9153_s13 + $0x760] sm:$0xff]  ;;  %v3224_v36 = vld [vmem:[%s9153_s13 + $0x770] sm:$0xff] }
 0x55a   :  { %4610 = vmatpush1.bf16.msra.mxu1 %v5634_v4  ;;  %4774 = vmatpush1.bf16.msra.mxu0 %v5638_v5  ;;  %v5682_v4 = vcombine.low %v3178_v53, %v3182_v55  ;;  %v5686_v5 = vcombine.low %v3180_v56, %v3184_v57  ;;  %v3226_v53 = vld [vmem:[%s9153_s13 + $0x780] sm:$0xff]  ;;  %v3228_v56 = vld [vmem:[%s9153_s13 + $0x790] sm:$0xff] }
 0x55b   :  { %4611 = vmatprep.subr.bf16.mxu1 %v5643_v27  ;;  %4775 = vmatprep.subr.bf16.mxu0 %v5647_v7  ;;  %v5691_v27 = vcombine.high %v3186_v0, %v3190_v2  ;;  %v5695_v7 = vcombine.high %v3188_v21, %v3192_v3  ;;  %v3230_v55 = vld [vmem:[%s9153_s13 + $0x7a0] sm:$0xff]  ;;  %v3232_v57 = vld [vmem:[%s9153_s13 + $0x7b0] sm:$0xff] }
 0x55e   :  { %4612 = vmatpush1.bf16.msra.mxu1 %v5642_v14  ;;  %4776 = vmatpush1.bf16.msra.mxu0 %v5646_v16  ;;  %v5690_v14 = vcombine.low %v3186_v0, %v3190_v2  ;;  %v5694_v16 = vcombine.low %v3188_v21, %v3192_v3  ;;  %v3234_v0 = vld [vmem:[%s9153_s13 + $0x7c0] sm:$0xff]  ;;  %v3236_v21 = vld [vmem:[%s9153_s13 + $0x7d0] sm:$0xff] }
 0x55f   :  { %4613 = vmatprep.subr.bf16.mxu1 %v5651_v17  ;;  %4777 = vmatprep.subr.bf16.mxu0 %v5655_v18  ;;  %v5699_v17 = vcombine.high %v3194_v10, %v3198_v11  ;;  %v5703_v18 = vcombine.high %v3196_v12, %v3200_v13  ;;  %v3238_v2 = vld [vmem:[%s9153_s13 + $0x7e0] sm:$0xff]  ;;  %v3240_v3 = vld [vmem:[%s9153_s13 + $0x7f0] sm:$0xff] }
 0x562   :  { %4614 = vmatpush1.bf16.msra.mxu1 %v5650_v41  ;;  %4778 = vmatpush1.bf16.msra.mxu0 %v5654_v23  ;;  %v5698_v41 = vcombine.low %v3194_v10, %v3198_v11  ;;  %v5702_v23 = vcombine.low %v3196_v12, %v3200_v13  ;;  %v2987_v10 = vld [vmem:[%s9153_s13 + $0x8] sm:$0xff]  ;;  %v2975_v12 = vrot.slane %v8357_v8, %v6646_v40 }
 0x563   :  { %4615 = vmatprep.subr.bf16.mxu1 %v5659_v24  ;;  %4779 = vmatprep.subr.bf16.mxu0 %v5663_v26  ;;  %v5707_v24 = vcombine.high %v3202_v19, %v3206_v20  ;;  %v5711_v26 = vcombine.high %v3204_v22, %v3208_v34  ;;  %v2991_v11 = vld [vmem:[%s9153_s13 + $0x28] sm:$0xff]  ;;  %v5738_v13 = vcombine.low %v3234_v0, %v3238_v2 }
 0x564   :  { %v5492_v8 = vcombine.low %v2987_v10, %v2991_v11 }
 0x566   :  { %4616 = vmatpush1.bf16.msra.mxu1 %v5658_v1  ;;  %4780 = vmatpush1.bf16.msra.mxu0 %v5662_v30  ;;  %v5706_v1 = vcombine.low %v3202_v19, %v3206_v20  ;;  %v5710_v30 = vcombine.low %v3204_v22, %v3208_v34  ;;  %v8567_v19 = vpack.c.bf16 %v2975_v12, %v2975_v12  ;;  %v3003_v22 = vld [vmem:[%s9153_s13 + $0x88] sm:$0xff] }
 0x567   :  { %4617 = vmatprep.subr.bf16.mxu1 %v5667_v31  ;;  %4781 = vmatprep.subr.bf16.mxu0 %v5671_v32  ;;  %v5715_v31 = vcombine.high %v3210_v28, %v3214_v50  ;;  %v5719_v32 = vcombine.high %v3212_v29, %v3216_v62  ;;  %v3007_v34 = vld [vmem:[%s9153_s13 + $0xa8] sm:$0xff] }
 0x568   :  { %v3083_v12 = vld [vmem:[%s9153_s13 + $0x308] sm:$0xff] }
 0x56a   :  { %4618 = vmatpush1.bf16.msra.mxu1 %v5666_v37  ;;  %4782 = vmatpush1.bf16.msra.mxu0 %v5670_v25  ;;  %v5714_v37 = vcombine.low %v3210_v28, %v3214_v50  ;;  %v5718_v25 = vcombine.low %v3212_v29, %v3216_v62  ;;  %v5508_v28 = vcombine.low %v3003_v22, %v3007_v34  ;;  %v3019_v29 = vld [vmem:[%s9153_s13 + $0x108] sm:$0xff] }
 0x56b   :  { %4619 = vmatprep.subr.bf16.mxu1 %v5675_v47  ;;  %4783 = vmatprep.subr.bf16.mxu0 %v5679_v48  ;;  %v5723_v47 = vcombine.high %v3218_v15, %v3222_v33  ;;  %v5727_v48 = vcombine.high %v3220_v35, %v3224_v36  ;;  %v3023_v62 = vld [vmem:[%s9153_s13 + $0x128] sm:$0xff] }
 0x56e   :  { %4620 = vmatpush1.bf16.msra.mxu1 %v5674_v59  ;;  %4784 = vmatpush1.bf16.msra.mxu0 %v5678_v60  ;;  %v5722_v59 = vcombine.low %v3218_v15, %v3222_v33  ;;  %v5726_v60 = vcombine.low %v3220_v35, %v3224_v36  ;;  %v5524_v15 = vcombine.low %v3019_v29, %v3023_v62  ;;  %v3035_v35 = vld [vmem:[%s9153_s13 + $0x188] sm:$0xff] }
 0x56f   :  { %4621 = vmatprep.subr.bf16.mxu1 %v5683_v61  ;;  %4785 = vmatprep.subr.bf16.mxu0 %v5687_v63  ;;  %v5731_v61 = vcombine.high %v3226_v53, %v3230_v55  ;;  %v5735_v63 = vcombine.high %v3228_v56, %v3232_v57  ;;  %v3039_v36 = vld [vmem:[%s9153_s13 + $0x1a8] sm:$0xff] }
 0x572   :  { %4622 = vmatpush1.bf16.msra.mxu1 %v5682_v4  ;;  %4786 = vmatpush1.bf16.msra.mxu0 %v5686_v5  ;;  %v5730_v4 = vcombine.low %v3226_v53, %v3230_v55  ;;  %v5734_v5 = vcombine.low %v3228_v56, %v3232_v57  ;;  %v5540_v53 = vcombine.low %v3035_v35, %v3039_v36  ;;  %v3051_v56 = vld [vmem:[%s9153_s13 + $0x208] sm:$0xff] }
 0x573   :  { %4623 = vmatprep.subr.bf16.mxu1 %v5691_v27  ;;  %4787 = vmatprep.subr.bf16.mxu0 %v5695_v7  ;;  %v5739_v27 = vcombine.high %v3234_v0, %v3238_v2  ;;  %v5743_v7 = vcombine.high %v3236_v21, %v3240_v3  ;;  %v3055_v57 = vld [vmem:[%s9153_s13 + $0x228] sm:$0xff] }
 0x574   :  { %v5556_v0 = vcombine.low %v3051_v56, %v3055_v57 }
 0x576   :  { %4624 = vmatpush1.bf16.msra.mxu1 %v5690_v14  ;;  %4788 = vmatpush1.bf16.msra.mxu0 %v5694_v16  ;;  %v5742_v14 = vcombine.low %v3236_v21, %v3240_v3  ;;  %v5493_v16 = vcombine.high %v2987_v10, %v2991_v11  ;;  %v3067_v21 = vld [vmem:[%s9153_s13 + $0x288] sm:$0xff] }
 0x577   :  { %4625 = vmatprep.subr.bf16.mxu1 %v5699_v17  ;;  %4789 = vmatprep.subr.bf16.mxu0 %v5703_v18  ;;  %v2995_v17 = vld [vmem:[%s9153_s13 + $0x48] sm:$0xff] }
 0x578   :  { %v2999_v18 = vld [vmem:[%s9153_s13 + $0x68] sm:$0xff] }
 0x579   :  { %v5501_v20 = vcombine.high %v2995_v17, %v2999_v18  ;;  %v3071_v3 = vld [vmem:[%s9153_s13 + $0x2a8] sm:$0xff] }
 0x57a   :  { %4626 = vmatpush1.bf16.msra.mxu1 %v5698_v41  ;;  %4790 = vmatpush1.bf16.msra.mxu0 %v5702_v23  ;;  %v5500_v41 = vcombine.low %v2995_v17, %v2999_v18  ;;  %v5509_v23 = vcombine.high %v3003_v22, %v3007_v34  ;;  %v5572_v10 = vcombine.low %v3067_v21, %v3071_v3  ;;  %v3091_v17 = vld [vmem:[%s9153_s13 + $0x348] sm:$0xff] }
 0x57b   :  { %4627 = vmatprep.subr.bf16.mxu1 %v5707_v24  ;;  %4791 = vmatprep.subr.bf16.mxu0 %v5711_v26  ;;  %v3011_v24 = vld [vmem:[%s9153_s13 + $0xc8] sm:$0xff] }
 0x57c   :  { %v3015_v26 = vld [vmem:[%s9153_s13 + $0xe8] sm:$0xff] }
 0x57d   :  { %v5517_v50 = vcombine.high %v3011_v24, %v3015_v26  ;;  %v3095_v18 = vld [vmem:[%s9153_s13 + $0x368] sm:$0xff] }
 0x57e   :  { %4628 = vmatpush1.bf16.msra.mxu1 %v5706_v1  ;;  %4792 = vmatpush1.bf16.msra.mxu0 %v5710_v30  ;;  %v5516_v1 = vcombine.low %v3011_v24, %v3015_v26  ;;  %v5525_v30 = vcombine.high %v3019_v29, %v3023_v62  ;;  %v3099_v22 = vld [vmem:[%s9153_s13 + $0x388] sm:$0xff] }
 0x57f   :  { %4629 = vmatprep.subr.bf16.mxu1 %v5715_v31  ;;  %4793 = vmatprep.subr.bf16.mxu0 %v5719_v32  ;;  %v3027_v31 = vld [vmem:[%s9153_s13 + $0x148] sm:$0xff] }
 0x580   :  { %v3031_v32 = vld [vmem:[%s9153_s13 + $0x168] sm:$0xff] }
 0x581   :  { %v5533_v33 = vcombine.high %v3027_v31, %v3031_v32  ;;  %v3103_v34 = vld [vmem:[%s9153_s13 + $0x3a8] sm:$0xff] }
 0x582   :  { %4630 = vmatpush1.bf16.msra.mxu1 %v5714_v37  ;;  %4794 = vmatpush1.bf16.msra.mxu0 %v5718_v25  ;;  %v5532_v37 = vcombine.low %v3027_v31, %v3031_v32  ;;  %v5541_v25 = vcombine.high %v3035_v35, %v3039_v36  ;;  %v3107_v24 = vld [vmem:[%s9153_s13 + $0x3c8] sm:$0xff] }
 0x583   :  { %4631 = vmatprep.subr.bf16.mxu1 %v5723_v47  ;;  %4795 = vmatprep.subr.bf16.mxu0 %v5727_v48  ;;  %v3043_v47 = vld [vmem:[%s9153_s13 + $0x1c8] sm:$0xff] }
 0x584   :  { %v3047_v48 = vld [vmem:[%s9153_s13 + $0x1e8] sm:$0xff] }
 0x585   :  { %v5549_v55 = vcombine.high %v3043_v47, %v3047_v48  ;;  %v3111_v26 = vld [vmem:[%s9153_s13 + $0x3e8] sm:$0xff] }
 0x586   :  { %4632 = vmatpush1.bf16.msra.mxu1 %v5722_v59  ;;  %4796 = vmatpush1.bf16.msra.mxu0 %v5726_v60  ;;  %v5548_v59 = vcombine.low %v3043_v47, %v3047_v48  ;;  %v5557_v60 = vcombine.high %v3051_v56, %v3055_v57  ;;  %v3115_v29 = vld [vmem:[%s9153_s13 + $0x408] sm:$0xff] }
 0x587   :  { %4633 = vmatprep.subr.bf16.mxu1 %v5731_v61  ;;  %4797 = vmatprep.subr.bf16.mxu0 %v5735_v63  ;;  %v3059_v61 = vld [vmem:[%s9153_s13 + $0x248] sm:$0xff] }
 0x588   :  { %v3063_v63 = vld [vmem:[%s9153_s13 + $0x268] sm:$0xff] }
 0x589   :  { %v5565_v2 = vcombine.high %v3059_v61, %v3063_v63  ;;  %v3119_v62 = vld [vmem:[%s9153_s13 + $0x428] sm:$0xff] }
 0x58a   :  { %4634 = vmatpush1.bf16.msra.mxu1 %v5730_v4  ;;  %4798 = vmatpush1.bf16.msra.mxu0 %v5734_v5  ;;  %v5564_v4 = vcombine.low %v3059_v61, %v3063_v63  ;;  %v5573_v5 = vcombine.high %v3067_v21, %v3071_v3  ;;  %v3123_v31 = vld [vmem:[%s9153_s13 + $0x448] sm:$0xff] }
 0x58b   :  { %4635 = vmatprep.subr.bf16.mxu1 %v5739_v27  ;;  %4799 = vmatprep.subr.bf16.mxu0 %v5743_v7  ;;  %v3075_v27 = vld [vmem:[%s9153_s13 + $0x2c8] sm:$0xff] }
 0x58c   :  { %v3079_v7 = vld [vmem:[%s9153_s13 + $0x2e8] sm:$0xff] }
 0x58d   :  { %v5581_v11 = vcombine.high %v3075_v27, %v3079_v7  ;;  %v3127_v32 = vld [vmem:[%s9153_s13 + $0x468] sm:$0xff] }
 0x58e   :  { %4636 = vmatpush1.bf16.msra.mxu1 %v5738_v13  ;;  %4800 = vmatpush1.bf16.msra.mxu0 %v5742_v14  ;;  %v3087_v13 = vld [vmem:[%s9153_s13 + $0x328] sm:$0xff]  ;;  %v5580_v14 = vcombine.low %v3075_v27, %v3079_v7 }
 0x58f   :  { %4646 = vmatprep.subr.bf16.mxu1 %v5493_v16  ;;  %v5589_v16 = vcombine.high %v3083_v12, %v3087_v13  ;;  %v3131_v35 = vld [vmem:[%s9153_s13 + $0x488] sm:$0xff] }
 0x590   :  { %v3135_v36 = vld [vmem:[%s9153_s13 + $0x4a8] sm:$0xff] }
 0x591   :  { %4638 = vmatmul.mubr.bf16.vlgmr.msra.gmra.mrb[8].mxu1 %v8567_v19  ;;  %4802 = vmatmul.mubr.bf16.vlgmr.msra.gmra.mrb[12].mxu0 %v8567_v19  ;;  %v3139_v47 = vld [vmem:[%s9153_s13 + $0x4c8] sm:$0xff] }
 0x592   :  { %4647 = vmatpush1.bf16.msra.mxu1 %v5492_v8  ;;  %4678 = vmatprep.mubr.bf16.mxu1 %v8373_v44  ;;  %v5588_v8 = vcombine.low %v3083_v12, %v3087_v13  ;;  %v3143_v48 = vld [vmem:[%s9153_s13 + $0x4e8] sm:$0xff] }
 0x593   :  { %4648 = vmatprep.subr.bf16.mxu1 %v5501_v20  ;;  %v5597_v20 = vcombine.high %v3091_v17, %v3095_v18  ;;  %v3147_v56 = vld [vmem:[%s9153_s13 + $0x508] sm:$0xff]  ;;  %5801 = vmatprep.mubr.msk.f32.mxu0 %vm6453_vm1, %v6449_v6 }
 0x594   :  { %v3151_v57 = vld [vmem:[%s9153_s13 + $0x528] sm:$0xff] }
 0x595   :  { %v3155_v61 = vld [vmem:[%s9153_s13 + $0x548] sm:$0xff] }
 0x596   :  { %4649 = vmatpush1.bf16.msra.mxu1 %v5500_v41  ;;  %v5596_v41 = vcombine.low %v3091_v17, %v3095_v18  ;;  %v3159_v63 = vld [vmem:[%s9153_s13 + $0x568] sm:$0xff] }
 0x597   :  { %4650 = vmatprep.subr.bf16.mxu1 %v5509_v23  ;;  %v5605_v23 = vcombine.high %v3099_v22, %v3103_v34  ;;  %v3163_v21 = vld [vmem:[%s9153_s13 + $0x588] sm:$0xff] }
 0x598   :  { %v3167_v3 = vld [vmem:[%s9153_s13 + $0x5a8] sm:$0xff] }
 0x599   :  { %v3171_v27 = vld [vmem:[%s9153_s13 + $0x5c8] sm:$0xff] }
 0x59a   :  { %4651 = vmatpush1.bf16.msra.mxu1 %v5508_v28  ;;  %v5604_v28 = vcombine.low %v3099_v22, %v3103_v34  ;;  %v3175_v7 = vld [vmem:[%s9153_s13 + $0x5e8] sm:$0xff] }
 0x59b   :  { %4652 = vmatprep.subr.bf16.mxu1 %v5517_v50  ;;  %v5613_v50 = vcombine.high %v3107_v24, %v3111_v26  ;;  %v3179_v12 = vld [vmem:[%s9153_s13 + $0x608] sm:$0xff] }
 0x59c   :  { %v3183_v13 = vld [vmem:[%s9153_s13 + $0x628] sm:$0xff] }
 0x59d   :  { %v3187_v17 = vld [vmem:[%s9153_s13 + $0x648] sm:$0xff] }
 0x59e   :  { %4653 = vmatpush1.bf16.msra.mxu1 %v5516_v1  ;;  %v5612_v1 = vcombine.low %v3107_v24, %v3111_v26  ;;  %v3191_v18 = vld [vmem:[%s9153_s13 + $0x668] sm:$0xff] }
 0x59f   :  { %4654 = vmatprep.subr.bf16.mxu1 %v5525_v30  ;;  %v5621_v30 = vcombine.high %v3115_v29, %v3119_v62  ;;  %v3195_v22 = vld [vmem:[%s9153_s13 + $0x688] sm:$0xff] }
 0x5a0   :  { %v3199_v34 = vld [vmem:[%s9153_s13 + $0x6a8] sm:$0xff] }
 0x5a1   :  { %v3203_v24 = vld [vmem:[%s9153_s13 + $0x6c8] sm:$0xff] }
 0x5a2   :  { %4655 = vmatpush1.bf16.msra.mxu1 %v5524_v15  ;;  %v5620_v15 = vcombine.low %v3115_v29, %v3119_v62  ;;  %v3207_v26 = vld [vmem:[%s9153_s13 + $0x6e8] sm:$0xff] }
 0x5a3   :  { %4656 = vmatprep.subr.bf16.mxu1 %v5533_v33  ;;  %v5629_v33 = vcombine.high %v3123_v31, %v3127_v32  ;;  %v3211_v29 = vld [vmem:[%s9153_s13 + $0x708] sm:$0xff] }
 0x5a4   :  { %v3215_v62 = vld [vmem:[%s9153_s13 + $0x728] sm:$0xff] }
 0x5a6   :  { %4657 = vmatpush1.bf16.msra.mxu1 %v5532_v37  ;;  %v5628_v37 = vcombine.low %v3123_v31, %v3127_v32  ;;  %v3219_v31 = vld [vmem:[%s9153_s13 + $0x748] sm:$0xff] }
 0x5a7   :  { %4658 = vmatprep.subr.bf16.mxu1 %v5541_v25  ;;  %v5637_v25 = vcombine.high %v3131_v35, %v3135_v36  ;;  %v3223_v32 = vld [vmem:[%s9153_s13 + $0x768] sm:$0xff] }
 0x5aa   :  { %4659 = vmatpush1.bf16.msra.mxu1 %v5540_v53  ;;  %v5636_v53 = vcombine.low %v3131_v35, %v3135_v36  ;;  %v3227_v35 = vld [vmem:[%s9153_s13 + $0x788] sm:$0xff] }
 0x5ab   :  { %4660 = vmatprep.subr.bf16.mxu1 %v5549_v55  ;;  %v5645_v55 = vcombine.high %v3139_v47, %v3143_v48  ;;  %v3231_v36 = vld [vmem:[%s9153_s13 + $0x7a8] sm:$0xff] }
 0x5ae   :  { %4661 = vmatpush1.bf16.msra.mxu1 %v5548_v59  ;;  %v5644_v59 = vcombine.low %v3139_v47, %v3143_v48  ;;  %v3235_v47 = vld [vmem:[%s9153_s13 + $0x7c8] sm:$0xff] }
 0x5af   :  { %4662 = vmatprep.subr.bf16.mxu1 %v5557_v60  ;;  %v5653_v60 = vcombine.high %v3147_v56, %v3151_v57  ;;  %v3239_v48 = vld [vmem:[%s9153_s13 + $0x7e8] sm:$0xff] }
 0x5b2   :  { %4663 = vmatpush1.bf16.msra.mxu1 %v5556_v0  ;;  %v5652_v0 = vcombine.low %v3147_v56, %v3151_v57  ;;  %v2989_v56 = vld [vmem:[%s9153_s13 + $0x18] sm:$0xff] }
 0x5b3   :  { %4664 = vmatprep.subr.bf16.mxu1 %v5565_v2  ;;  %v5661_v2 = vcombine.high %v3155_v61, %v3159_v63  ;;  %v2993_v57 = vld [vmem:[%s9153_s13 + $0x38] sm:$0xff] }
 0x5b6   :  { %4665 = vmatpush1.bf16.msra.mxu1 %v5564_v4  ;;  %v5660_v4 = vcombine.low %v3155_v61, %v3159_v63  ;;  %v2997_v61 = vld [vmem:[%s9153_s13 + $0x58] sm:$0xff] }
 0x5b7   :  { %4666 = vmatprep.subr.bf16.mxu1 %v5573_v5  ;;  %v5669_v5 = vcombine.high %v3163_v21, %v3167_v3  ;;  %v3001_v63 = vld [vmem:[%s9153_s13 + $0x78] sm:$0xff] }
 0x5ba   :  { %4667 = vmatpush1.bf16.msra.mxu1 %v5572_v10  ;;  %v5668_v10 = vcombine.low %v3163_v21, %v3167_v3  ;;  %v3005_v21 = vld [vmem:[%s9153_s13 + $0x98] sm:$0xff] }
 0x5bb   :  { %4668 = vmatprep.subr.bf16.mxu1 %v5581_v11  ;;  %v5677_v11 = vcombine.high %v3171_v27, %v3175_v7  ;;  %v3009_v3 = vld [vmem:[%s9153_s13 + $0xb8] sm:$0xff] }
 0x5be   :  { %4669 = vmatpush1.bf16.msra.mxu1 %v5580_v14  ;;  %v5676_v14 = vcombine.low %v3171_v27, %v3175_v7  ;;  %v3013_v27 = vld [vmem:[%s9153_s13 + $0xd8] sm:$0xff] }
 0x5bf   :  { %4670 = vmatprep.subr.bf16.mxu1 %v5589_v16  ;;  %v5685_v16 = vcombine.high %v3179_v12, %v3183_v13  ;;  %v3017_v7 = vld [vmem:[%s9153_s13 + $0xf8] sm:$0xff] }
 0x5c2   :  { %4671 = vmatpush1.bf16.msra.mxu1 %v5588_v8  ;;  %v5684_v8 = vcombine.low %v3179_v12, %v3183_v13  ;;  %v3021_v12 = vld [vmem:[%s9153_s13 + $0x118] sm:$0xff]  ;;  %v5520_v13 = vcombine.low %v3013_v27, %v3017_v7 }
 0x5c3   :  { %4672 = vmatprep.subr.bf16.mxu1 %v5597_v20  ;;  %v5693_v20 = vcombine.high %v3187_v17, %v3191_v18 }
 0x5c6   :  { %4673 = vmatpush1.bf16.msra.mxu1 %v5596_v41  ;;  %v5692_v41 = vcombine.low %v3187_v17, %v3191_v18  ;;  %v3033_v17 = vld [vmem:[%s9153_s13 + $0x178] sm:$0xff] }
 0x5c7   :  { %4674 = vmatprep.subr.bf16.mxu1 %v5605_v23  ;;  %v5701_v23 = vcombine.high %v3195_v22, %v3199_v34 }
 0x5ca   :  { %4675 = vmatpush1.bf16.msra.mxu1 %v5604_v28  ;;  %v5700_v28 = vcombine.low %v3195_v22, %v3199_v34  ;;  %v3041_v22 = vld [vmem:[%s9153_s13 + $0x1b8] sm:$0xff] }
 0x5cb   :  { %4676 = vmatprep.subr.bf16.mxu1 %v5613_v50  ;;  %v5709_v50 = vcombine.high %v3203_v24, %v3207_v26 }
 0x5ce   :  { %4677 = vmatpush1.bf16.msra.mxu1 %v5612_v1  ;;  %v5708_v1 = vcombine.low %v3203_v24, %v3207_v26  ;;  %v3049_v24 = vld [vmem:[%s9153_s13 + $0x1f8] sm:$0xff] }
 0x5cf   :  { %4687 = vmatprep.subr.bf16.mxu1 %v5621_v30  ;;  %v5717_v30 = vcombine.high %v3211_v29, %v3215_v62 }
 0x5d1   :  { %4679 = vmatmul.mubr.bf16.vlgmr.msra.gmra.mrb[12].mxu1 %v8375_v46 }
 0x5d2   :  { %4688 = vmatpush1.bf16.msra.mxu1 %v5620_v15  ;;  %4719 = vmatprep.mubr.bf16.mxu1 %v8391_v58  ;;  %v5716_v15 = vcombine.low %v3211_v29, %v3215_v62  ;;  %v3057_v29 = vld [vmem:[%s9153_s13 + $0x238] sm:$0xff] }
 0x5d3   :  { %4689 = vmatprep.subr.bf16.mxu1 %v5629_v33  ;;  %v5725_v33 = vcombine.high %v3219_v31, %v3223_v32 }
 0x5d6   :  { %4690 = vmatpush1.bf16.msra.mxu1 %v5628_v37  ;;  %v5724_v37 = vcombine.low %v3219_v31, %v3223_v32  ;;  %v3065_v31 = vld [vmem:[%s9153_s13 + $0x278] sm:$0xff] }
 0x5d7   :  { %4691 = vmatprep.subr.bf16.mxu1 %v5637_v25  ;;  %v5733_v25 = vcombine.high %v3227_v35, %v3231_v36 }
 0x5da   :  { %4692 = vmatpush1.bf16.msra.mxu1 %v5636_v53  ;;  %v5732_v53 = vcombine.low %v3227_v35, %v3231_v36  ;;  %v3073_v35 = vld [vmem:[%s9153_s13 + $0x2b8] sm:$0xff] }
 0x5db   :  { %4693 = vmatprep.subr.bf16.mxu1 %v5645_v55  ;;  %v5741_v55 = vcombine.high %v3235_v47, %v3239_v48 }
 0x5de   :  { %4694 = vmatpush1.bf16.msra.mxu1 %v5644_v59  ;;  %v5740_v59 = vcombine.low %v3235_v47, %v3239_v48  ;;  %v3081_v47 = vld [vmem:[%s9153_s13 + $0x2f8] sm:$0xff] }
 0x5df   :  { %4695 = vmatprep.subr.bf16.mxu1 %v5653_v60  ;;  %v5497_v60 = vcombine.high %v2989_v56, %v2993_v57 }
 0x5e2   :  { %4696 = vmatpush1.bf16.msra.mxu1 %v5652_v0  ;;  %v5496_v0 = vcombine.low %v2989_v56, %v2993_v57  ;;  %v3089_v56 = vld [vmem:[%s9153_s13 + $0x338] sm:$0xff] }
 0x5e3   :  { %4697 = vmatprep.subr.bf16.mxu1 %v5661_v2  ;;  %v5505_v2 = vcombine.high %v2997_v61, %v3001_v63 }
 0x5e6   :  { %4698 = vmatpush1.bf16.msra.mxu1 %v5660_v4  ;;  %v5504_v4 = vcombine.low %v2997_v61, %v3001_v63  ;;  %v3097_v61 = vld [vmem:[%s9153_s13 + $0x378] sm:$0xff] }
 0x5e7   :  { %4699 = vmatprep.subr.bf16.mxu1 %v5669_v5  ;;  %v5513_v5 = vcombine.high %v3005_v21, %v3009_v3 }
 0x5ea   :  { %4700 = vmatpush1.bf16.msra.mxu1 %v5668_v10  ;;  %v5512_v10 = vcombine.low %v3005_v21, %v3009_v3  ;;  %v3105_v21 = vld [vmem:[%s9153_s13 + $0x3b8] sm:$0xff] }
 0x5eb   :  { %4701 = vmatprep.subr.bf16.mxu1 %v5677_v11  ;;  %v5521_v11 = vcombine.high %v3013_v27, %v3017_v7  ;;  %v3113_v27 = vld [vmem:[%s9153_s13 + $0x3f8] sm:$0xff] }
 0x5ee   :  { %4702 = vmatpush1.bf16.msra.mxu1 %v5676_v14 }
 0x5ef   :  { %4703 = vmatprep.subr.bf16.mxu1 %v5685_v16  ;;  %v3029_v16 = vld [vmem:[%s9153_s13 + $0x158] sm:$0xff] }
 0x5f0   :  { %v5536_v34 = vcombine.low %v3029_v16, %v3033_v17 }
 0x5f2   :  { %4704 = vmatpush1.bf16.msra.mxu1 %v5684_v8  ;;  %v5537_v8 = vcombine.high %v3029_v16, %v3033_v17  ;;  %v3129_v16 = vld [vmem:[%s9153_s13 + $0x478] sm:$0xff] }
 0x5f3   :  { %4705 = vmatprep.subr.bf16.mxu1 %v5693_v20  ;;  %v3037_v20 = vld [vmem:[%s9153_s13 + $0x198] sm:$0xff] }
 0x5f4   :  { %v5544_v26 = vcombine.low %v3037_v20, %v3041_v22 }
 0x5f6   :  { %4706 = vmatpush1.bf16.msra.mxu1 %v5692_v41  ;;  %v5545_v41 = vcombine.high %v3037_v20, %v3041_v22  ;;  %v3137_v20 = vld [vmem:[%s9153_s13 + $0x4b8] sm:$0xff] }
 0x5f7   :  { %4707 = vmatprep.subr.bf16.mxu1 %v5701_v23  ;;  %v3045_v23 = vld [vmem:[%s9153_s13 + $0x1d8] sm:$0xff] }
 0x5f8   :  { %v5552_v62 = vcombine.low %v3045_v23, %v3049_v24 }
 0x5fa   :  { %4708 = vmatpush1.bf16.msra.mxu1 %v5700_v28  ;;  %v5553_v28 = vcombine.high %v3045_v23, %v3049_v24  ;;  %v3145_v23 = vld [vmem:[%s9153_s13 + $0x4f8] sm:$0xff] }
 0x5fb   :  { %4709 = vmatprep.subr.bf16.mxu1 %v5709_v50  ;;  %v3053_v50 = vld [vmem:[%s9153_s13 + $0x218] sm:$0xff] }
 0x5fc   :  { %v5560_v32 = vcombine.low %v3053_v50, %v3057_v29 }
 0x5fe   :  { %4710 = vmatpush1.bf16.msra.mxu1 %v5708_v1  ;;  %v5561_v1 = vcombine.high %v3053_v50, %v3057_v29  ;;  %v3157_v29 = vld [vmem:[%s9153_s13 + $0x558] sm:$0xff] }
 0x5ff   :  { %4711 = vmatprep.subr.bf16.mxu1 %v5717_v30  ;;  %v3061_v30 = vld [vmem:[%s9153_s13 + $0x258] sm:$0xff] }
 0x600   :  { %v5568_v36 = vcombine.low %v3061_v30, %v3065_v31 }
 0x602   :  { %4712 = vmatpush1.bf16.msra.mxu1 %v5716_v15  ;;  %v5569_v15 = vcombine.high %v3061_v30, %v3065_v31  ;;  %v8893_v30 = vld [vmem:[%s9154_s14] sm:$0xff] }
 0x603   :  { %4713 = vmatprep.subr.bf16.mxu1 %v5725_v33  ;;  %v3069_v33 = vld [vmem:[%s9153_s13 + $0x298] sm:$0xff]  ;;  %v4555_v6 = vrot.slane %v8893_v30, %v1703_v9 }
 0x604   :  { %v5576_v48 = vcombine.low %v3069_v33, %v3073_v35 }
 0x606   :  { %4714 = vmatpush1.bf16.msra.mxu1 %v5724_v37  ;;  %v5577_v37 = vcombine.high %v3069_v33, %v3073_v35  ;;  %v4527_v33 = vrot.slane %v8893_v30, %v6646_v40  ;;  %v4531_v35 = vrot.slane %v8893_v30, %v6652_v42 }
 0x607   :  { %4715 = vmatprep.subr.bf16.mxu1 %v5733_v25  ;;  %v3077_v25 = vld [vmem:[%s9153_s13 + $0x2d8] sm:$0xff] }
 0x608   :  { %v5584_v57 = vcombine.low %v3077_v25, %v3081_v47 }
 0x60a   :  { %4716 = vmatpush1.bf16.msra.mxu1 %v5732_v53  ;;  %v5585_v53 = vcombine.high %v3077_v25, %v3081_v47 }
 0x60b   :  { %4717 = vmatprep.subr.bf16.mxu1 %v5741_v55  ;;  %v3085_v55 = vld [vmem:[%s9153_s13 + $0x318] sm:$0xff] }
 0x60c   :  { %v5592_v63 = vcombine.low %v3085_v55, %v3089_v56 }
 0x60e   :  { %4718 = vmatpush1.bf16.msra.mxu1 %v5740_v59  ;;  %v5593_v59 = vcombine.high %v3085_v55, %v3089_v56 }
 0x60f   :  { %4810 = vmatprep.subr.bf16.mxu1 %v5497_v60  ;;  %v3093_v60 = vld [vmem:[%s9153_s13 + $0x358] sm:$0xff] }
 0x610   :  { %v5600_v3 = vcombine.low %v3093_v60, %v3097_v61 }
 0x611   :  { %4720 = vmatmul.mubr.bf16.vlgmr.msra.gmra.mrb[12].mxu1 %v8567_v19 }
 0x612   :  { %4811 = vmatpush1.bf16.msra.mxu1 %v5496_v0  ;;  %4842 = vmatprep.mubr.bf16.mxu1 %v8373_v44  ;;  %v3025_v44 = vld [vmem:[%s9153_s13 + $0x138] sm:$0xff]  ;;  %v5601_v0 = vcombine.high %v3093_v60, %v3097_v61 }
 0x613   :  { %4812 = vmatprep.subr.bf16.mxu1 %v5505_v2  ;;  %v5529_v14 = vcombine.high %v3021_v12, %v3025_v44  ;;  %v5528_v18 = vcombine.low %v3021_v12, %v3025_v44  ;;  %v3101_v2 = vld [vmem:[%s9153_s13 + $0x398] sm:$0xff] }
 0x614   :  { %v5608_v7 = vcombine.low %v3101_v2, %v3105_v21  ;;  %v3121_v12 = vld [vmem:[%s9153_s13 + $0x438] sm:$0xff] }
 0x616   :  { %4813 = vmatpush1.bf16.msra.mxu1 %v5504_v4  ;;  %v5609_v4 = vcombine.high %v3101_v2, %v3105_v21 }
 0x617   :  { %4814 = vmatprep.subr.bf16.mxu1 %v5513_v5  ;;  %v3109_v5 = vld [vmem:[%s9153_s13 + $0x3d8] sm:$0xff] }
 0x618   :  { %v5616_v44 = vcombine.low %v3109_v5, %v3113_v27 }
 0x61a   :  { %4815 = vmatpush1.bf16.msra.mxu1 %v5512_v10  ;;  %v5617_v10 = vcombine.high %v3109_v5, %v3113_v27  ;;  %v3181_v5 = vld [vmem:[%s9153_s13 + $0x618] sm:$0xff] }
 0x61b   :  { %4816 = vmatprep.subr.bf16.mxu1 %v5521_v11  ;;  %v3117_v11 = vld [vmem:[%s9153_s13 + $0x418] sm:$0xff] }
 0x61c   :  { %v5624_v17 = vcombine.low %v3117_v11, %v3121_v12  ;;  %v3185_v27 = vld [vmem:[%s9153_s13 + $0x638] sm:$0xff] }
 0x61e   :  { %4817 = vmatpush1.bf16.msra.mxu1 %v5520_v13  ;;  %v5625_v13 = vcombine.high %v3117_v11, %v3121_v12  ;;  %v4543_v11 = vrot.slane %v8893_v30, %v6665_v52  ;;  %v3189_v12 = vld [vmem:[%s9153_s13 + $0x658] sm:$0xff] }
 0x61f   :  { %4818 = vmatprep.subr.bf16.mxu1 %v5529_v14  ;;  %v3125_v14 = vld [vmem:[%s9153_s13 + $0x458] sm:$0xff] }
 0x620   :  { %v5632_v22 = vcombine.low %v3125_v14, %v3129_v16  ;;  %v3197_v52 = vld [vmem:[%s9153_s13 + $0x698] sm:$0xff] }
 0x622   :  { %4819 = vmatpush1.bf16.msra.mxu1 %v5528_v18  ;;  %v5633_v18 = vcombine.high %v3125_v14, %v3129_v16  ;;  %v5688_v14 = vcombine.low %v3181_v5, %v3185_v27 }
 0x623   :  { %4820 = vmatprep.subr.bf16.mxu1 %v5537_v8  ;;  %v3133_v8 = vld [vmem:[%s9153_s13 + $0x498] sm:$0xff] }
 0x624   :  { %v5640_v24 = vcombine.low %v3133_v8, %v3137_v20 }
 0x626   :  { %4821 = vmatpush1.bf16.msra.mxu1 %v5536_v34  ;;  %v5641_v34 = vcombine.high %v3133_v8, %v3137_v20 }
 0x627   :  { %4822 = vmatprep.subr.bf16.mxu1 %v5545_v41  ;;  %v3141_v41 = vld [vmem:[%s9153_s13 + $0x4d8] sm:$0xff] }
 0x62a   :  { %4823 = vmatpush1.bf16.msra.mxu1 %v5544_v26  ;;  %v5649_v26 = vcombine.high %v3141_v41, %v3145_v23 }
 0x62b   :  { %4824 = vmatprep.subr.bf16.mxu1 %v5553_v28  ;;  %v5648_v28 = vcombine.low %v3141_v41, %v3145_v23  ;;  %v3205_v23 = vld [vmem:[%s9153_s13 + $0x6d8] sm:$0xff] }
 0x62e   :  { %4825 = vmatpush1.bf16.msra.mxu1 %v5552_v62  ;;  %v3161_v62 = vld [vmem:[%s9153_s13 + $0x578] sm:$0xff] }
 0x62f   :  { %4826 = vmatprep.subr.bf16.mxu1 %v5561_v1  ;;  %v5665_v31 = vcombine.high %v3157_v29, %v3161_v62 }
 0x632   :  { %4827 = vmatpush1.bf16.msra.mxu1 %v5560_v32  ;;  %v3165_v32 = vld [vmem:[%s9153_s13 + $0x598] sm:$0xff] }
 0x633   :  { %4828 = vmatprep.subr.bf16.mxu1 %v5569_v15  ;;  %v3169_v15 = vld [vmem:[%s9153_s13 + $0x5b8] sm:$0xff] }
 0x636   :  { %4829 = vmatpush1.bf16.msra.mxu1 %v5568_v36  ;;  %v5664_v36 = vcombine.low %v3157_v29, %v3161_v62 }
 0x637   :  { %4830 = vmatprep.subr.bf16.mxu1 %v5577_v37  ;;  %v5673_v37 = vcombine.high %v3165_v32, %v3169_v15 }
 0x63a   :  { %4831 = vmatpush1.bf16.msra.mxu1 %v5576_v48  ;;  %v3173_v48 = vld [vmem:[%s9153_s13 + $0x5d8] sm:$0xff] }
 0x63b   :  { %4832 = vmatprep.subr.bf16.mxu1 %v5585_v53  ;;  %v3177_v53 = vld [vmem:[%s9153_s13 + $0x5f8] sm:$0xff] }
 0x63e   :  { %4833 = vmatpush1.bf16.msra.mxu1 %v5584_v57 }
 0x63f   :  { %4834 = vmatprep.subr.bf16.mxu1 %v5593_v59 }
 0x642   :  { %4835 = vmatpush1.bf16.msra.mxu1 %v5592_v63  ;;  %v5672_v63 = vcombine.low %v3165_v32, %v3169_v15 }
 0x643   :  { %4836 = vmatprep.subr.bf16.mxu1 %v5601_v0 }
 0x646   :  { %4837 = vmatpush1.bf16.msra.mxu1 %v5600_v3  ;;  %v5681_v3 = vcombine.high %v3173_v48, %v3177_v53 }
 0x647   :  { %4838 = vmatprep.subr.bf16.mxu1 %v5609_v4 }
 0x64a   :  { %4839 = vmatpush1.bf16.msra.mxu1 %v5608_v7  ;;  %v5680_v7 = vcombine.low %v3173_v48, %v3177_v53 }
 0x64b   :  { %4840 = vmatprep.subr.bf16.mxu1 %v5617_v10  ;;  %v5689_v10 = vcombine.high %v3181_v5, %v3185_v27  ;;  %v4994_v5 = vld [vmem:[%s9155_s15] sm:$0xff] }
 0x64e   :  { %4841 = vmatpush1.bf16.msra.mxu1 %v5616_v44  ;;  %v3193_v44 = vld [vmem:[%s9153_s13 + $0x678] sm:$0xff] }
 0x64f   :  { %4851 = vmatprep.subr.bf16.mxu1 %v5625_v13  ;;  %v4547_v13 = vrot.slane %v8893_v30, %v6668_v54  ;;  %v5697_v16 = vcombine.high %v3189_v12, %v3193_v44  ;;  %v5696_v20 = vcombine.low %v3189_v12, %v3193_v44  ;;  %v5012_v12 = vld [vmem:[%s9155_s15 + $0x90] sm:$0xff]  ;;  %v5013_v44 = vld [vmem:[%s9155_s15 + $0x98] sm:$0xff] }
 0x651   :  { %4843 = vmatmul.mubr.bf16.vlgmr.msra.gmra.mrb[16].mxu1 %v8375_v46  ;;  %v3149_v46 = vld [vmem:[%s9153_s13 + $0x518] sm:$0xff] }
 0x652   :  { %4852 = vmatpush1.bf16.msra.mxu1 %v5624_v17  ;;  %4883 = vmatprep.mubr.bf16.mxu1 %v8391_v58  ;;  %v3153_v58 = vld [vmem:[%s9153_s13 + $0x538] sm:$0xff] }
 0x653   :  { %4853 = vmatprep.subr.bf16.mxu1 %v5633_v18  ;;  %v5657_v50 = vcombine.high %v3149_v46, %v3153_v58  ;;  %v5656_v1 = vcombine.low %v3149_v46, %v3153_v58  ;;  %v3201_v18 = vld [vmem:[%s9153_s13 + $0x6b8] sm:$0xff] }
 0x654   :  { %v5704_v46 = vcombine.low %v3197_v52, %v3201_v18 }
 0x656   :  { %4854 = vmatpush1.bf16.msra.mxu1 %v5632_v22 }
 0x657   :  { %4855 = vmatprep.subr.bf16.mxu1 %v5641_v34  ;;  %v5705_v34 = vcombine.high %v3197_v52, %v3201_v18  ;;  %v4997_v52 = vld [vmem:[%s9155_s15 + $0x18] sm:$0xff] }
 0x65a   :  { %4856 = vmatpush1.bf16.msra.mxu1 %v5640_v24  ;;  %v3209_v24 = vld [vmem:[%s9153_s13 + $0x6f8] sm:$0xff] }
 0x65b   :  { %4857 = vmatprep.subr.bf16.mxu1 %v5649_v26  ;;  %v5713_v58 = vcombine.high %v3205_v23, %v3209_v24  ;;  %v5712_v29 = vcombine.low %v3205_v23, %v3209_v24  ;;  %v5016_v24 = vld [vmem:[%s9155_s15 + $0xb0] sm:$0xff] }
 0x65e   :  { %4858 = vmatpush1.bf16.msra.mxu1 %v5648_v28  ;;  %v3213_v28 = vld [vmem:[%s9153_s13 + $0x718] sm:$0xff] }
 0x65f   :  { %4859 = vmatprep.subr.bf16.mxu1 %v5657_v50  ;;  %v3217_v50 = vld [vmem:[%s9153_s13 + $0x738] sm:$0xff] }
 0x660   :  { %v5721_v62 = vcombine.high %v3213_v28, %v3217_v50  ;;  %v5720_v15 = vcombine.low %v3213_v28, %v3217_v50  ;;  %v5001_v28 = vld [vmem:[%s9155_s15 + $0x38] sm:$0xff] }
 0x662   :  { %4860 = vmatpush1.bf16.msra.mxu1 %v5656_v1  ;;  %v3221_v1 = vld [vmem:[%s9153_s13 + $0x758] sm:$0xff] }
 0x663   :  { %4861 = vmatprep.subr.bf16.mxu1 %v5665_v31  ;;  %v3225_v31 = vld [vmem:[%s9153_s13 + $0x778] sm:$0xff] }
 0x664   :  { %v4639_v25 = vpop.f32.mrb[8].mxu1  ;;  %v4803_v47 = vpop.f32.mrb[12].mxu0 }
 0x665   :  { %v6060_v55 = vadd.f32 %v4639_v25, %v4527_v33  ;;  %v4641_v56 = vpop.f32.mrb[9].mxu1  ;;  %v4805_v57 = vpop.f32.mrb[13].mxu0  ;;  %v6064_v17 = vadd.f32 %v4803_v47, %v4543_v11  ;;  %v3233_v25 = vld [vmem:[%s9153_s13 + $0x7b8] sm:$0xff] }
 0x666   :  { %v6061_v59 = vadd.f32 %v4641_v56, %v4531_v35  ;;  %v4643_v60 = vpop.f32.mrb[10].mxu1  ;;  %v4807_v61 = vpop.f32.mrb[14].mxu0  ;;  %4862 = vmatpush1.bf16.msra.mxu1 %v5664_v36  ;;  %v6065_v8 = vadd.f32 %v4805_v57, %v4547_v13  ;;  %v5729_v35 = vcombine.high %v3221_v1, %v3225_v31  ;;  %v3237_v57 = vld [vmem:[%s9153_s13 + $0x7d8] sm:$0xff] }
 0x667   :  { %v5746_v0 = vmul.f32 -1.442695, %v6060_v55  ;;  %v4644_v2 = vpop.f32.mrb[11].mxu1  ;;  %v4808_v21 = vpop.f32.mrb[15].mxu0  ;;  %4863 = vmatprep.subr.bf16.mxu1 %v5673_v37  ;;  %v3229_v37 = vld [vmem:[%s9153_s13 + $0x798] sm:$0xff]  ;;  %v5728_v55 = vcombine.low %v3221_v1, %v3225_v31 }
 0x668   :  { %v5747_v4 = vmul.f32 -1.442695, %v6061_v59  ;;  %v5737_v56 = vcombine.high %v3229_v37, %v3233_v25  ;;  %v3241_v59 = vld [vmem:[%s9153_s13 + $0x7f8] sm:$0xff]  ;;  %v5736_v60 = vcombine.low %v3229_v37, %v3233_v25  ;;  %v4539_v2 = vrot.slane %v8893_v30, %v6659_v45  ;;  %v5010_v21 = vld [vmem:[%s9155_s15 + $0x80] sm:$0xff]  ;;  %v5020_v25 = vld [vmem:[%s9155_s15 + $0xd0] sm:$0xff] }
 0x669   :  { %6353 = vpow2.f32 %v5746_v0  ;;  %v5745_v61 = vcombine.high %v3237_v57, %v3241_v59  ;;  %v4535_v0 = vrot.slane %v8893_v30, %v6655_v43  ;;  %v4995_v43 = vld [vmem:[%s9155_s15 + $0x8] sm:$0xff] }
 0x66a   :  { %6355 = vpow2.f32 %v5747_v4  ;;  %4864 = vmatpush1.bf16.msra.mxu1 %v5672_v63  ;;  %v5744_v63 = vcombine.low %v3237_v57, %v3241_v59  ;;  %v6028_v27 = vpack.c.bf16 %v4995_v43, %v4994_v5  ;;  %v5005_v57 = vld [vmem:[%s9155_s15 + $0x58] sm:$0xff]  ;;  %v5022_v59 = vld [vmem:[%s9155_s15 + $0xe0] sm:$0xff]  ;;  %v5024_v5 = vld [vmem:[%s9155_s15 + $0xf0] sm:$0xff] }
 0x66b   :  { %4865 = vmatprep.subr.bf16.mxu1 %v5681_v3  ;;  %6357 = vtanh.f32 %v6064_v17  ;;  %v5011_v3 = vld [vmem:[%s9155_s15 + $0x88] sm:$0xff]  ;;  %v4996_v17 = vld [vmem:[%s9155_s15 + $0x10] sm:$0xff]  ;;  %v4930_v43 = vld [vmem:[%s9147_s7] sm:$0x3] }
 0x66c   :  { %6359 = vtanh.f32 %v6065_v8  ;;  %v6026_v4 = vpack.c.bf16 %v5011_v3, %v5010_v21  ;;  %v6032_v8 = vpack.c.bf16 %v4997_v52, %v4996_v17  ;;  %v5027_v3 = vld [vmem:[%s9156_s16] sm:$0xff] }
 0x66e   :  { %4866 = vmatpush1.bf16.msra.mxu1 %v5680_v7 }
 0x66f   :  { %4867 = vmatprep.subr.bf16.mxu1 %v5689_v10 }
 0x672   :  { %4868 = vmatpush1.bf16.msra.mxu1 %v5688_v14 }
 0x673   :  { %v6354_v22 = vpop.eup %6353  ;;  %4869 = vmatprep.subr.bf16.mxu1 %v5697_v16  ;;  %v6030_v16 = vpack.c.bf16 %v5013_v44, %v5012_v12  ;;  %v5029_v12 = vld [vmem:[%s9156_s16 + $0x10] sm:$0xff]  ;;  %v5030_v44 = vld [vmem:[%s9156_s16 + $0x18] sm:$0xff] }
 0x674   :  { %v6356_v54 = vpop.eup %6355  ;;  %v4898_v41 = vadd.f32 1.0, %v6354_v22  ;;  %v5015_v22 = vld [vmem:[%s9155_s15 + $0xa8] sm:$0xff] }
 0x675   :  { %v4899_v26 = vadd.f32 1.0, %v6356_v54  ;;  %v6358_v32 = vpop.eup %6357  ;;  %v4998_v54 = vld [vmem:[%s9155_s15 + $0x20] sm:$0xff] }
 0x676   :  { %6361 = vrcp.f32 %v4898_v41  ;;  %4870 = vmatpush1.bf16.msra.mxu1 %v5696_v20  ;;  %v6360_v33 = vpop.eup %6359  ;;  %v5014_v20 = vld [vmem:[%s9155_s15 + $0xa0] sm:$0xff]  ;;  %v4999_v41 = vld [vmem:[%s9155_s15 + $0x28] sm:$0xff] }
 0x677   :  { %6363 = vrcp.f32 %v4899_v26  ;;  %4871 = vmatprep.subr.bf16.mxu1 %v5705_v34  ;;  %v6034_v34 = vpack.c.bf16 %v5015_v22, %v5014_v20  ;;  %v6036_v23 = vpack.c.bf16 %v4999_v41, %v4998_v54  ;;  %v5017_v26 = vld [vmem:[%s9155_s15 + $0xb8] sm:$0xff] }
 0x67a   :  { %4872 = vmatpush1.bf16.msra.mxu1 %v5704_v46  ;;  %v6038_v46 = vpack.c.bf16 %v5017_v26, %v5016_v24 }
 0x67b   :  { %4873 = vmatprep.subr.bf16.mxu1 %v5713_v58  ;;  %v5000_v58 = vld [vmem:[%s9155_s15 + $0x30] sm:$0xff] }
 0x67c   :  { %v6040_v50 = vpack.c.bf16 %v5001_v28, %v5000_v58 }
 0x67e   :  { %4874 = vmatpush1.bf16.msra.mxu1 %v5712_v29  ;;  %v5018_v29 = vld [vmem:[%s9155_s15 + $0xc0] sm:$0xff] }
 0x67f   :  { %4875 = vmatprep.subr.bf16.mxu1 %v5721_v62  ;;  %v5019_v62 = vld [vmem:[%s9155_s15 + $0xc8] sm:$0xff] }
 0x680   :  { %v6362_v36 = vpop.eup %6361  ;;  %v6042_v31 = vpack.c.bf16 %v5019_v62, %v5018_v29 }
 0x681   :  { %v6364_v47 = vpop.eup %6363  ;;  %v8957_v48 = vmul.f32 %v6362_v36, %v6358_v32  ;;  %v5002_v32 = vld [vmem:[%s9155_s15 + $0x40] sm:$0xff] }
 0x682   :  { %v8959_v53 = vmul.f32 %v6364_v47, %v6360_v33  ;;  %4876 = vmatpush1.bf16.msra.mxu1 %v5720_v15  ;;  %v5003_v15 = vld [vmem:[%s9155_s15 + $0x48] sm:$0xff]  ;;  %v5021_v47 = vld [vmem:[%s9155_s15 + $0xd8] sm:$0xff] }
 0x683   :  { %4877 = vmatprep.subr.bf16.mxu1 %v5729_v35  ;;  %v6044_v36 = vpack.c.bf16 %v5003_v15, %v5002_v32 }
 0x686   :  { %4878 = vmatpush1.bf16.msra.mxu1 %v5728_v55  ;;  %v6046_v55 = vpack.c.bf16 %v5021_v47, %v5020_v25 }
 0x687   :  { %4879 = vmatprep.subr.bf16.mxu1 %v5737_v56  ;;  %v5004_v56 = vld [vmem:[%s9155_s15 + $0x50] sm:$0xff] }
 0x68a   :  { %4880 = vmatpush1.bf16.msra.mxu1 %v5736_v60  ;;  %v6048_v60 = vpack.c.bf16 %v5005_v57, %v5004_v56 }
 0x68b   :  { %4881 = vmatprep.subr.bf16.mxu1 %v5745_v61  ;;  %v5023_v61 = vld [vmem:[%s9155_s15 + $0xe8] sm:$0xff] }
 0x68c   :  { %v6050_v21 = vpack.c.bf16 %v5023_v61, %v5022_v59 }
 0x68e   :  { %4882 = vmatpush1.bf16.msra.mxu1 %v5744_v63  ;;  %v5006_v63 = vld [vmem:[%s9155_s15 + $0x60] sm:$0xff] }
 0x68f   :  { %6027 = vmatprep.subr.bf16.mxu1 %v6026_v4  ;;  %v5028_v4 = vld [vmem:[%s9156_s16 + $0x8] sm:$0xff] }
 0x691   :  { %4884 = vmatmul.mubr.bf16.vlgmr.msra.gmra.mrb[16].mxu1 %v8567_v19 }
 0x692   :  { %6029 = vmatpush3.bf16.msra.mxu1 %v6028_v27  ;;  %v6021_v27 = vpack.c.bf16 %v5028_v4, %v5027_v3 }
 0x693   :  { %6031 = vmatprep.subr.bf16.mxu1 %v6030_v16  ;;  %v4939_v16 = vrot.slane %v4930_v43, %v6652_v42 }
 0x696   :  { %6033 = vmatpush3.bf16.msra.mxu1 %v6032_v8 }
 0x697   :  { %6035 = vmatprep.subr.bf16.mxu1 %v6034_v34 }
 0x69a   :  { %6037 = vmatpush3.bf16.msra.mxu1 %v6036_v23 }
 0x69b   :  { %6039 = vmatprep.subr.bf16.mxu1 %v6038_v46 }
 0x69e   :  { %6041 = vmatpush3.bf16.msra.mxu1 %v6040_v50 }
 0x69f   :  { %6043 = vmatprep.subr.bf16.mxu1 %v6042_v31 }
 0x6a2   :  { %6045 = vmatpush3.bf16.msra.mxu1 %v6044_v36 }
 0x6a3   :  { %6047 = vmatprep.subr.bf16.mxu1 %v6046_v55 }
 0x6a6   :  { %6049 = vmatpush3.bf16.msra.mxu1 %v6048_v60 }
 0x6a7   :  { %6051 = vmatprep.subr.bf16.mxu1 %v6050_v21 }
 0x6e4   :  { %v4721_v19 = vpop.f32.mrb[12].mxu1 }
 0x6e5   :  { %v6062_v45 = vadd.f32 %v4721_v19, %v4535_v0  ;;  %v4723_v7 = vpop.f32.mrb[13].mxu1  ;;  %v5007_v0 = vld [vmem:[%s9155_s15 + $0x68] sm:$0xff] }
 0x6e6   :  { %v6063_v10 = vadd.f32 %v4723_v7, %v4539_v2  ;;  %v4725_v11 = vpop.f32.mrb[14].mxu1  ;;  %v6452_v2 = vmov 0.0|0.0   ;;  %v6052_v19 = vpack.c.bf16 %v5007_v0, %v5006_v63  ;;  %v5008_v7 = vld [vmem:[%s9155_s15 + $0x70] sm:$0xff] }
 0x6e7   :  { %v5748_v13 = vmul.f32 -1.442695, %v6062_v45  ;;  %v4726_v14 = vpop.f32.mrb[15].mxu1  ;;  %6020 = vmatprep.subr.bf16.mxu0 %v6452_v2  ;;  %v5025_v45 = vld [vmem:[%s9155_s15 + $0xf8] sm:$0xff] }
 0x6e8   :  { %v5749_v18 = vmul.f32 -1.442695, %v6063_v10  ;;  %v6054_v10 = vpack.c.bf16 %v5025_v45, %v5024_v5  ;;  %v5009_v11 = vld [vmem:[%s9155_s15 + $0x78] sm:$0xff]  ;;  %6022 = vmatpush3.bf16.msra.mxu0 %v6021_v27  ;;  %v4935_v14 = vrot.slane %v4930_v43, %v6646_v40  ;;  %6053 = vmatpush3.bf16.msra.mxu1 %v6052_v19  ;;  %v5026_v40 = vld [vmem:[%s9148_s8] sm:$0x1]  ;;  %s6454_s8 = smov [#allocation3]  }
 0x6e9   :  { %6365 = vpow2.f32 %v5748_v13  ;;  %v6024_v13 = vpack.c.bf16 %v5030_v44, %v5029_v12  ;;  %6023 = vmatprep.subr.bf16.mxu0 %v6452_v2  ;;  %v6056_v17 = vpack.c.bf16 %v5009_v11, %v5008_v7  ;;  %s5183_s11 = sshll.u32 %s6454_s8, 4  ;;  %s5184_s11 = int_to_ptr.vmem [resolvable:$true] %s5183_s11 }
 0x6ea   :  { %6367 = vpow2.f32 %v5749_v18  ;;  %6055 = vmatprep.subr.bf16.mxu1 %v6054_v10  ;;  %s6385_s30 = scalar_lea.vmem %s5184_s11, 32  ;;  %p6390_p2 = scmp.lt.s32.totalorder %s5184_s11, %s5184_s11 }
 0x6eb   :  { %p6386_p1 = scmp.ne.s32.totalorder %s5184_s11, %s6385_s30  ;;  %p6391_p3 = scmp.lt.s32.totalorder %s6385_s30, %s6385_s30 }
 0x6ec   :  { %6025 = vmatpush3.bf16.msra.mxu0 %v6024_v13  ;;  %6057 = vmatpush3.bf16.msra.mxu1 %v6056_v17 }
 0x6ed   :  { %p6392_p4 = por %p6391_p3, %p6390_p2 }
 0x6ef   :  { %5802 = vmatmul.mubr.msk.f32.vlgmr.msra.gmra.mrb[16].mxu0 %vm121_vm0, %v5026_v40  ;;  %p6393_p5 = pnand %p6392_p4, %p6386_p1 }
 0x6f3   :  { %v6366_v1 = vpop.eup %6365 }
 0x6f4   :  { %v6368_v33 = vpop.eup %6367  ;;  %v4910_v35 = vadd.f32 1.0, %v6366_v1 }
 0x6f5   :  { %v4911_v37 = vadd.f32 1.0, %v6368_v33 }
 0x6f6   :  { %6369 = vrcp.f32 %v4910_v35 }
 0x6f7   :  { %6371 = vrcp.f32 %v4911_v37 }
 0x700   :  { %v6370_v52 = vpop.eup %6369 }
 0x701   :  { %v6372_v18 = vpop.eup %6371  ;;  %v4942_v8 = vmul.f32 %v6370_v52, %v4935_v14 }
 0x702   :  { %v4943_v20 = vmul.f32 %v6372_v18, %v4939_v16 }
 0x703   :  { %v4946_v22 = vadd.f32 %v8957_v48, %v4942_v8 }
 0x704   :  { %v4947_v34 = vadd.f32 %v8959_v53, %v4943_v20  ;;  %v4551_v53 = vrot.slane %v8893_v30, %v7825_v49 }
 0x706   :  { %v4977_v42 = vcombine.low %v4946_v22, %v4947_v34 }
 0x708   :  { %v4984_v54 = vrot.slane %v4977_v42, %v7282_v51 }
 0x70a   :  { %v4991_v48 = vrot.slane %v4984_v54, %v7282_v51 }
 0x70c   :  { %4993 = vst.msk [vmem:[#allocation5] sm:$0x3] %vm9094_vm2, %v4991_v48 }
 0x764   :  { %v4885_v23 = vpop.f32.mrb[16].mxu1 }
 0x765   :  { %v6066_v24 = vadd.f32 %v4885_v23, %v4551_v53  ;;  %v4887_v26 = vpop.f32.mrb[17].mxu1 }
 0x766   :  { %v6067_v46 = vadd.f32 %v4887_v26, %v4555_v6  ;;  %v4889_v38 = vpop.f32.mrb[18].mxu1 }
 0x767   :  { %v5750_v58 = vmul.f32 -1.442695, %v6066_v24  ;;  %v4890_v28 = vpop.f32.mrb[19].mxu1 }
 0x768   :  { %v5751_v50 = vmul.f32 -1.442695, %v6067_v46 }
 0x769   :  { %6373 = vpow2.f32 %v5750_v58 }
 0x76a   :  { %6375 = vpow2.f32 %v5751_v50 }
 0x76b   :  { %6377 = vtanh.f32 %v4946_v22 }
 0x76c   :  { %6379 = vtanh.f32 %v4947_v34 }
 0x773   :  { %v6374_v29 = vpop.eup %6373 }
 0x774   :  { %v6376_v62 = vpop.eup %6375  ;;  %v4924_v1 = vadd.f32 1.0, %v6374_v29 }
 0x775   :  { %v4925_v31 = vadd.f32 1.0, %v6376_v62  ;;  %v6378_v39 = vpop.eup %6377 }
 0x776   :  { %6381 = vrcp.f32 %v4924_v1  ;;  %v6380_v49 = vpop.eup %6379 }
 0x777   :  { %6383 = vrcp.f32 %v4925_v31 }
 0x780   :  { %v6382_v9 = vpop.eup %6381 }
 0x781   :  { %v6384_v30 = vpop.eup %6383  ;;  %v4950_v32 = vmul.f32 %v6382_v9, %v6378_v39 }
 0x782   :  { %v4951_v15 = vmul.f32 %v6384_v30, %v6380_v49 }
 0x784   :  { %5168 = vmatprep.mubr.f32.mxu1 %v4951_v15  ;;  %v4954_v33 = vcombine.low %v4950_v32, %v4951_v15 }
 0x785   :  { %5169 = vmatmul.mubr.f32.vlgmr.msra.gmra.mrb[20].mxu1 %v4950_v32 }
 0x786   :  { %v4961_v35 = vrot.slane %v4954_v33, %v7282_v51 }
 0x788   :  { %v4968_v36 = vrot.slane %v4961_v35, %v7282_v51 }
 0x78a   :  { %4974 = vst.msk [vmem:[#allocation3] sm:$0x3] %vm9094_vm2, %v4968_v36 }
 0x7c2   :  { %v5100_v37 = vpop.f32.mrb[16].mxu0 }
 0x7c3   :  { %v5803_v25 = vpop.f32.mrb[17].mxu0 }
 0x7c4   :  { %6396 = shalt.err (!%p6393_p5)
}
 0x7c5   :  { %s6397_s23 = scalar_lea.hbm %s9158_s18, 32 }
 0x7c6   :  { %p6398_p6 = scmp.ne.s32.totalorder %s9158_s18, %s6397_s23  ;;  %p6401_p7 = scmp.lt.u32.totalorder %s6397_s23, %s9158_s18 }
 0x7c8   :  { %p6403_p8 = pnand %p6401_p7, %p6398_p6 }
 0x7ca   :  { %6406 = shalt.err (!%p6403_p8)
}
 0x7cb   :  { %5186 = dma.vmem_to_hbm [thread:$0]  %s5184_s11, 32, %s9158_s18, [#allocation4]  }
 0x7cc   :  { %s6407_s24 = scalar_lea.vmem %s5194_s28, 32  ;;  %p6412_p10 = scmp.lt.s32.totalorder %s5194_s28, %s5194_s28 }
 0x7cd   :  { %p6408_p9 = scmp.ne.s32.totalorder %s5194_s28, %s6407_s24  ;;  %p6413_p11 = scmp.lt.s32.totalorder %s6407_s24, %s6407_s24 }
 0x7cf   :  { %p6414_p12 = por %p6413_p11, %p6412_p10 }
 0x7d1   :  { %p6415_p13 = pnand %p6414_p12, %p6408_p9 }
 0x7d3   :  { %6418 = shalt.err (!%p6415_p13)
}
 0x7d4   :  { %s6419_s25 = scalar_lea.hbm %s9159_s19, 32 }
 0x7d5   :  { %p6420_p0 = scmp.ne.s32.totalorder %s9159_s19, %s6419_s25  ;;  %p6423_p1 = scmp.lt.u32.totalorder %s6419_s25, %s9159_s19 }
 0x7d7   :  { %p6425_p2 = pnand %p6423_p1, %p6420_p0 }
 0x7d9   :  { %6428 = shalt.err (!%p6425_p2)
}
 0x7da   :  { %5196 = dma.vmem_to_hbm [thread:$0]  %s5194_s28, 32, %s9159_s19, [#allocation6]   ;;  %v5174_v56 = vld [vmem:[%s9157_s17] sm:$0x1] }
 0x858   :  { %v5790_v51 = vpop.f32.mrb[20].mxu1 }
 0x859   :  { %v5791_v47 = vpop.f32.mrb[21].mxu1 }
 0x85a   :  { %v5792_v55 = vadd.f32 %v5791_v47, %v5790_v51 }
 0x85c   :  { %v5171_v57 = vadd.f32 %v5792_v55, %v5100_v37 }
 0x85e   :  { %v5175_v59 = vadd.f32 %v5174_v56, %v5171_v57 }
 0x860   :  { %5176 = vst [vmem:[%s9160_s20] sm:$0x1] %v5175_v59 }
 0x861   :  { %6437 = dma.done.wait [#allocation4], 32  }
 0x862   :  { %6438 = vsyncadd [#allocation4], 4294967264 }
 0x863   :  { %6439 = dma.done.wait [#allocation6], 32  }
 0x864   :  { %6440 = vsyncadd [#allocation6], 4294967264 }
 0x865   :  { %5207 = vsyncpa [#allocation4], 1 }
 0x866   :  { %5208 = vsyncpa [#allocation6], 1 }

</bundles_post_ra>
